<compile_context>
chip_gen: v5e
topology: v5e:2x2
jax: 0.10.0
libtpu: 0.0.40
codegen_flags: <defaults>
</compile_context>

<pallas_src>
import math
import jax
import jax.numpy as jnp
from jax.experimental import pallas as pl
from jax.experimental.pallas import tpu as pltpu

# ---- model hyper-parameters (small, consistent with the module) ----
WINDOW_SIZE = 8
KSIZE = WINDOW_SIZE - 1            # 7 : conv kernel size
PAD = (KSIZE - 1) // 2             # 3
IN_DIM = 6
POSE_DIM = 9
CONTACT_DIM = 2
POSE_IN = POSE_DIM + CONTACT_DIM   # 11 : pose embedding input width
IN_CAT = 2 * POSE_IN + IN_DIM      # 28 : fused (block-diagonal) embedding input
EMB_DIM = 32
HID_DIM = 64
LAT_DIM = 16
NUM_HEAD = 4
NUM_LAYER = 2
HEAD_DIM = EMB_DIM // NUM_HEAD     # 8
PE_LEN = 29                        # PositionalEncoding len -> stream length
L = PE_LEN                         # per-stream / decoder sequence length
SEQ = 3 * L                        # 87 transformer tokens per batch element
S_PAD = SEQ + 1                    # 88 (multiple of 8; one masked pad token)
BATCH = 2
OUT_DIM = POSE_DIM + CONTACT_DIM   # 11 : fused f(9) + c(2) decoder output
LDEC = 32                          # decoder rows padded 29 -> 32 (sublane aligned)
OUT_PAD = 128                      # lane-dense output slab width
LN_EPS = 1e-5
BN_EPS = 1e-5


def _layer_norm(x, gamma, beta):
    mu = jnp.mean(x, axis=-1, keepdims=True)
    var = jnp.mean((x - mu) ** 2, axis=-1, keepdims=True)
    return (x - mu) * jax.lax.rsqrt(var + LN_EPS) * gamma + beta


def blend_kernel(xc_ref, w_emb_ref, emb_add_ref,
                 w_qkv_ref, b_qkv_ref, w_o_ref,
                 w_ff1_ref, b_ff1_ref, w_ff2_ref, lp_ref,
                 w_dec1_ref, dec_aff_ref, w_dec2_ref, b_dec2_ref,
                 out_ref):
    f32 = jnp.float32

    # --- fused stream embeddings + bias + positional encoding (one matmul) ---
    xc = xc_ref[0]                                               # (S_PAD, IN_CAT)
    h = jnp.dot(xc, w_emb_ref[...], preferred_element_type=f32)
    h = h + emb_add_ref[...]                                     # (S_PAD, E)

    # additive key mask: token S_PAD-1 is padding
    key_pos = jax.lax.broadcasted_iota(jnp.int32, (1, 1, S_PAD), 2)
    key_mask = jnp.where(key_pos >= SEQ, jnp.float32(-1e9), jnp.float32(0.0))

    scale = 1.0 / math.sqrt(HEAD_DIM)
    for layer in range(NUM_LAYER):
        lp = lp_ref[layer]                                       # (6, E) packed rows
        b_o, ln1_g, ln1_b = lp[0:1, :], lp[1:2, :], lp[2:3, :]
        ln2_g, ln2_b, b_ff2 = lp[3:4, :], lp[4:5, :], lp[5:6, :]

        # fused Q/K/V projection: one (S_PAD, E) @ (E, 3E) matmul
        qkv = jnp.dot(h, w_qkv_ref[layer], preferred_element_type=f32)
        qkv = qkv + b_qkv_ref[layer]                             # (S_PAD, 3E)

        # ONE 2-D transpose of the whole QKV slab; heads fall out as aligned
        # 8-sublane blocks (no per-head lane slices, no per-head K transpose).
        qkv_t = qkv.T.reshape(3 * NUM_HEAD, HEAD_DIM, S_PAD)     # (12, d, S)
        q_h = jnp.transpose(qkv_t[:NUM_HEAD], (0, 2, 1))         # (H, S, d)
        kt_h = qkv_t[NUM_HEAD:2 * NUM_HEAD]                      # (H, d, S) = K^T heads
        v_h = jnp.transpose(qkv_t[2 * NUM_HEAD:], (0, 2, 1))     # (H, S, d)

        # heads batched: one dot_general for QK^T and one for P.V per layer
        s = jnp.einsum('hld,hdm->hlm', q_h, kt_h,
                       preferred_element_type=f32) * scale + key_mask
        s = s - jnp.max(s, axis=-1, keepdims=True)
        p = jnp.exp(s)
        p = p * pl.reciprocal(jnp.sum(p, axis=-1, keepdims=True), approx=True)
        o_h = jnp.einsum('hlm,hmd->hld', p, v_h,
                         preferred_element_type=f32)             # (H, S, d)

        # output projection: per-head 8-sublane weight blocks accumulated on
        # the MXU (no lane-concat of head outputs).
        w_o_l = w_o_ref[layer]                                   # (E, E)
        attn = jnp.dot(o_h[0], w_o_l[0:HEAD_DIM, :], preferred_element_type=f32)
        for hd in range(1, NUM_HEAD):
            attn = attn + jnp.dot(o_h[hd],
                                  w_o_l[hd * HEAD_DIM:(hd + 1) * HEAD_DIM, :],
                                  preferred_element_type=f32)
        attn = attn + b_o

        h = _layer_norm(h + attn, ln1_g, ln1_b)

        # feed-forward (ReLU)
        ff = jnp.dot(h, w_ff1_ref[layer],
                     preferred_element_type=f32) + b_ff1_ref[layer]
        ff = jnp.maximum(ff, 0.0)
        ff = jnp.dot(ff, w_ff2_ref[layer], preferred_element_type=f32) + b_ff2

        h = _layer_norm(h + ff, ln2_g, ln2_b)

    # --- fused f/c decoders: Conv1d(K=7,pad=3) -> eval-BN affine -> tanh -> 1x1 ---
    # conv via 7 accumulating matmuls on a 32-row zero-padded, sublane-aligned slab
    row = jax.lax.broadcasted_iota(jnp.int32, (LDEC, 1), 0)
    xp = jnp.where(row < L, h[:LDEC, :], jnp.float32(0.0))       # rows 29..31 zero
    acc = jnp.dot(xp, w_dec1_ref[PAD], preferred_element_type=f32)
    for k in range(KSIZE):
        if k == PAD:
            continue
        shifted = pltpu.roll(xp, (PAD - k) % LDEC, axis=0)       # wraps hit zero rows
        acc = acc + jnp.dot(shifted, w_dec1_ref[k], preferred_element_type=f32)
    aff = dec_aff_ref[...]                                       # (2, 2*LAT)
    y = jnp.tanh(acc * aff[0:1, :] + aff[1:2, :])                # conv bias + eval-BN folded
    out = jnp.dot(y, w_dec2_ref[...],
                  preferred_element_type=f32) + b_dec2_ref[...]  # (LDEC, OUT_PAD)
    lane = jax.lax.broadcasted_iota(jnp.int32, (1, OUT_PAD), 1)
    out = jnp.where((lane >= POSE_DIM) & (lane < OUT_DIM),
                    jax.nn.sigmoid(out), out)                    # sigmoid on c lanes
    out_ref[0] = out                                             # lane-dense store


def _positional_encoding():
    position = jnp.arange(PE_LEN, dtype=jnp.float32)[:, None]
    div_term = jnp.exp(jnp.arange(0, EMB_DIM, 2, dtype=jnp.float32)
                       * (-math.log(10000.0) / EMB_DIM))
    pe = jnp.zeros((PE_LEN, EMB_DIM), jnp.float32)
    pe = pe.at[:, 0::2].set(jnp.sin(position * div_term))
    pe = pe.at[:, 1::2].set(jnp.cos(position * div_term))
    return pe


def init_params(key):
    """PyTorch-shaped parameters, kaiming-normal-ish init, deterministic."""
    keys = iter(jax.random.split(key, 40))

    def kaiming(shape, fan_in):
        return (jax.random.normal(next(keys), shape, jnp.float32)
                * math.sqrt(2.0 / fan_in))

    def bias(shape):
        return jax.random.normal(next(keys), shape, jnp.float32) * 0.01

    NL, E, H, K, LAT, P2 = NUM_LAYER, EMB_DIM, HID_DIM, KSIZE, LAT_DIM, POSE_IN
    return dict(
        emb_in_w=kaiming((E, IN_DIM), IN_DIM), emb_in_b=bias((E,)),
        emb_p0_w=kaiming((E, P2), P2), emb_p0_b=bias((E,)),
        emb_p1_w=kaiming((E, P2), P2), emb_p1_b=bias((E,)),
        in_proj_w=kaiming((NL, 3 * E, E), E), in_proj_b=bias((NL, 3 * E)),
        out_proj_w=kaiming((NL, E, E), E), out_proj_b=bias((NL, E)),
        lin1_w=kaiming((NL, H, E), E), lin1_b=bias((NL, H)),
        lin2_w=kaiming((NL, E, H), H), lin2_b=bias((NL, E)),
        ln1_g=jnp.ones((NL, E), jnp.float32), ln1_b=jnp.zeros((NL, E), jnp.float32),
        ln2_g=jnp.ones((NL, E), jnp.float32), ln2_b=jnp.zeros((NL, E), jnp.float32),
        f_c1_w=kaiming((LAT, E, K), E * K), f_c1_b=bias((LAT,)),
        f_bn_g=jnp.ones((LAT,), jnp.float32), f_bn_b=jnp.zeros((LAT,), jnp.float32),
        f_c2_w=kaiming((POSE_DIM, LAT, 1), LAT), f_c2_b=bias((POSE_DIM,)),
        c_c1_w=kaiming((LAT, E, K), E * K), c_c1_b=bias((LAT,)),
        c_bn_g=jnp.ones((LAT,), jnp.float32), c_bn_b=jnp.zeros((LAT,), jnp.float32),
        c_c2_w=kaiming((2, LAT, 1), LAT), c_c2_b=bias((2,)),
    )


def pack_params(p):
    """One-time parameter packing / pre-transposition (hoisted out of the hot path)."""
    f32 = jnp.float32
    pe = _positional_encoding()

    w_emb = jnp.concatenate([p['emb_p0_w'].T, p['emb_p1_w'].T, p['emb_in_w'].T],
                            axis=0)                              # (28, E)
    emb_add = jnp.concatenate(
        [pe + p['emb_p0_b'][None, :],
         pe + p['emb_p1_b'][None, :],
         pe + p['emb_in_b'][None, :],
         jnp.zeros((S_PAD - SEQ, EMB_DIM), f32)], axis=0)        # (S_PAD, E)

    w_qkv = jnp.transpose(p['in_proj_w'], (0, 2, 1))             # (NL, E, 3E)
    b_qkv = p['in_proj_b'][:, None, :]                           # (NL, 1, 3E)
    w_o = jnp.transpose(p['out_proj_w'], (0, 2, 1))              # (NL, E, E)
    w_ff1 = jnp.transpose(p['lin1_w'], (0, 2, 1))                # (NL, E, H)
    b_ff1 = p['lin1_b'][:, None, :]                              # (NL, 1, H)
    w_ff2 = jnp.transpose(p['lin2_w'], (0, 2, 1))                # (NL, H, E)
    lp = jnp.stack([p['out_proj_b'], p['ln1_g'], p['ln1_b'],
                    p['ln2_g'], p['ln2_b'], p['lin2_b']], axis=1)  # (NL, 6, E)

    # fused decoders: f head -> latent lanes 0..15 / output lanes 0..8,
    #                 c head -> latent lanes 16..31 / output lanes 9..10
    w_dec1 = jnp.concatenate([jnp.transpose(p['f_c1_w'], (2, 1, 0)),
                              jnp.transpose(p['c_c1_w'], (2, 1, 0))],
                             axis=-1)                            # (K, E, 2*LAT)
    scale_f = p['f_bn_g'] / jnp.sqrt(1.0 + BN_EPS)               # eval BN: mean=0, var=1
    scale_c = p['c_bn_g'] / jnp.sqrt(1.0 + BN_EPS)
    dec_aff = jnp.stack(
        [jnp.concatenate([scale_f, scale_c]),
         jnp.concatenate([p['f_bn_b'] + scale_f * p['f_c1_b'],
                          p['c_bn_b'] + scale_c * p['c_c1_b']])])  # (2, 2*LAT)
    w_dec2 = jnp.zeros((2 * LAT_DIM, OUT_PAD), f32)
    w_dec2 = w_dec2.at[:LAT_DIM, :POSE_DIM].set(p['f_c2_w'][:, :, 0].T)
    w_dec2 = w_dec2.at[LAT_DIM:, POSE_DIM:OUT_DIM].set(p['c_c2_w'][:, :, 0].T)
    b_dec2 = jnp.zeros((1, OUT_PAD), f32)
    b_dec2 = b_dec2.at[0, :OUT_DIM].set(
        jnp.concatenate([p['f_c2_b'], p['c_c2_b']]))             # (1, OUT_PAD)

    return (w_emb, emb_add, w_qkv, b_qkv, w_o, w_ff1, b_ff1, w_ff2, lp,
            w_dec1, dec_aff, w_dec2, b_dec2)


def blend_forward(packed, inp, pose0, pose1, contact0, contact1):
    """BlendModel.forward -> (f, c). All heavy math runs in one Pallas kernel."""
    f32 = jnp.float32

    # ---- glue: torch.cat / rearrange equivalents (pure data movement) ----
    p0c = jnp.concatenate([pose0, contact0], axis=-1)            # (B, L, 11)
    p1c = jnp.concatenate([pose1, contact1], axis=-1)            # (B, L, 11)
    z11 = jnp.zeros((BATCH, L, POSE_IN), f32)
    z6 = jnp.zeros((BATCH, L, IN_DIM), f32)
    blk0 = jnp.concatenate([p0c, z11, z6], axis=-1)              # pose0 tokens
    blk1 = jnp.concatenate([z11, p1c, z6], axis=-1)              # pose1 tokens
    blk2 = jnp.concatenate([z11, z11, inp], axis=-1)             # input tokens
    padrow = jnp.zeros((BATCH, S_PAD - SEQ, IN_CAT), f32)        # masked pad token
    xc = jnp.concatenate([blk0, blk1, blk2, padrow], axis=1)     # (B, S_PAD, IN_CAT)

    vmem = pl.BlockSpec(memory_space=pltpu.MemorySpace.VMEM)
    args = (xc,) + tuple(packed)
    out = pl.pallas_call(
        blend_kernel,
        out_shape=jax.ShapeDtypeStruct((BATCH, LDEC, OUT_PAD), jnp.float32),
        grid=(BATCH,),
        in_specs=[pl.BlockSpec((1, S_PAD, IN_CAT), lambda b: (b, 0, 0))]
                 + [vmem] * len(packed),
        out_specs=pl.BlockSpec((1, LDEC, OUT_PAD), lambda b: (b, 0, 0)),
        compiler_params=pltpu.CompilerParams(
            dimension_semantics=("parallel",)),
    )(*args)

    return out[:, :L, :POSE_DIM], out[:, :L, POSE_DIM:OUT_DIM]


def blend_forward_ref(params, inp, pose0, pose1, contact0, contact1):
    """Pure-JAX reference (eval-mode BlendModel forward), for verification."""
    p = params
    pe = _positional_encoding()

    def emb(x, w, b):
        return x @ w.T + b[None, None, :] + pe[None]

    x_p0 = emb(jnp.concatenate([pose0, contact0], -1), p['emb_p0_w'], p['emb_p0_b'])
    x_p1 = emb(jnp.concatenate([pose1, contact1], -1), p['emb_p1_w'], p['emb_p1_b'])
    x_i = emb(inp, p['emb_in_w'], p['emb_in_b'])
    h = jnp.concatenate([x_p0, x_p1, x_i], axis=1)               # (B, 87, E)

    def layer_norm(x, g, b):
        mu = x.mean(-1, keepdims=True)
        var = ((x - mu) ** 2).mean(-1, keepdims=True)
        return (x - mu) / jnp.sqrt(var + LN_EPS) * g + b

    for l in range(NUM_LAYER):
        qkv = h @ p['in_proj_w'][l].T + p['in_proj_b'][l]
        q, k, v = jnp.split(qkv, 3, axis=-1)
        B_, S_, _ = q.shape

        def heads(t):
            return t.reshape(B_, S_, NUM_HEAD, HEAD_DIM).transpose(0, 2, 1, 3)

        qh, kh, vh = heads(q), heads(k), heads(v)
        sc = jnp.einsum('bhsd,bhtd->bhst', qh, kh) / math.sqrt(HEAD_DIM)
        pr = jax.nn.softmax(sc, axis=-1)
        ao = jnp.einsum('bhst,bhtd->bhsd', pr, vh).transpose(0, 2, 1, 3)
        ao = ao.reshape(B_, S_, EMB_DIM) @ p['out_proj_w'][l].T + p['out_proj_b'][l]
        h = layer_norm(h + ao, p['ln1_g'][l], p['ln1_b'][l])
        ff = jnp.maximum(h @ p['lin1_w'][l].T + p['lin1_b'][l], 0.0)
        ff = ff @ p['lin2_w'][l].T + p['lin2_b'][l]
        h = layer_norm(h + ff, p['ln2_g'][l], p['ln2_b'][l])

    hd = h[:, :L, :]
    hp = jnp.pad(hd, ((0, 0), (PAD, PAD), (0, 0)))

    def run_decoder(c1w, c1b, bng, bnb, c2w, c2b):
        y = jnp.zeros((BATCH, L, c1w.shape[0])) + c1b[None, None, :]
        for k in range(KSIZE):
            y = y + jnp.einsum('ble,oe->blo', hp[:, k:k + L, :], c1w[:, :, k])
        y = y / jnp.sqrt(1.0 + BN_EPS) * bng + bnb               # eval BN (mean=0, var=1)
        y = jnp.tanh(y)
        return jnp.einsum('blo,po->blp', y, c2w[:, :, 0]) + c2b

    f = run_decoder(p['f_c1_w'], p['f_c1_b'], p['f_bn_g'], p['f_bn_b'],
                    p['f_c2_w'], p['f_c2_b'])
    c = jax.nn.sigmoid(run_decoder(p['c_c1_w'], p['c_c1_b'], p['c_bn_g'],
                                   p['c_bn_b'], p['c_c2_w'], p['c_c2_b']))
    return f, c


if __name__ == "__main__":
    key = jax.random.PRNGKey(0)
    k_in, k_p0, k_p1, k_c0, k_c1, k_par = jax.random.split(key, 6)
    inp = jax.random.normal(k_in, (BATCH, L, IN_DIM), jnp.float32)
    pose0 = jax.random.normal(k_p0, (BATCH, L, POSE_DIM), jnp.float32)
    pose1 = jax.random.normal(k_p1, (BATCH, L, POSE_DIM), jnp.float32)
    contact0 = jax.random.uniform(k_c0, (BATCH, L, CONTACT_DIM), jnp.float32)
    contact1 = jax.random.uniform(k_c1, (BATCH, L, CONTACT_DIM), jnp.float32)
    params = init_params(k_par)

    packed = pack_params(params)                                 # one-time packing
    f, c = jax.jit(blend_forward)(packed, inp, pose0, pose1, contact0, contact1)
    jax.block_until_ready((f, c))

    f_ref, c_ref = jax.jit(blend_forward_ref)(params, inp, pose0, pose1,
                                              contact0, contact1)
    err = max(float(jnp.max(jnp.abs(f - f_ref))),
              float(jnp.max(jnp.abs(c - c_ref))))

    assert f.shape == (BATCH, L, POSE_DIM)
    assert c.shape == (BATCH, L, CONTACT_DIM)
    assert bool(jnp.all(jnp.isfinite(f))) and bool(jnp.all(jnp.isfinite(c)))
    assert bool(jnp.all(c >= 0.0)) and bool(jnp.all(c <= 1.0))
    assert err < 5e-2, f"mismatch vs pure-JAX reference: {err}"
    print("KERNEL_OK")
</pallas_src>

<mosaic_0001>
module attributes {stable_mosaic.version = 11 : i64} {
  func.func @blend_kernel(%arg0: i32, %arg1: memref<1x88x28xf32, #tpu.memory_space<vmem>>, %arg2: memref<28x32xf32, #tpu.memory_space<vmem>>, %arg3: memref<88x32xf32, #tpu.memory_space<vmem>>, %arg4: memref<2x32x96xf32, #tpu.memory_space<vmem>>, %arg5: memref<2x1x96xf32, #tpu.memory_space<vmem>>, %arg6: memref<2x32x32xf32, #tpu.memory_space<vmem>>, %arg7: memref<2x32x64xf32, #tpu.memory_space<vmem>>, %arg8: memref<2x1x64xf32, #tpu.memory_space<vmem>>, %arg9: memref<2x64x32xf32, #tpu.memory_space<vmem>>, %arg10: memref<2x6x32xf32, #tpu.memory_space<vmem>>, %arg11: memref<7x32x32xf32, #tpu.memory_space<vmem>>, %arg12: memref<2x32xf32, #tpu.memory_space<vmem>>, %arg13: memref<32x128xf32, #tpu.memory_space<vmem>>, %arg14: memref<1x128xf32, #tpu.memory_space<vmem>>, %arg15: memref<1x32x128xf32, #tpu.memory_space<vmem>>) attributes {dimension_semantics = [#tpu.dimension_semantics<parallel>], iteration_bounds = array<i64: 2>, scalar_prefetch = 0 : i64, scratch_operands = 0 : i64, tpu.core_type = #tpu.core_type<tc>, window_params = [{transform_indices = @transform_0, window_bounds = array<i64: 1, 88, 28>}, {pipeline_mode = #tpu.pipeline_mode<synchronous>, transform_indices = @transform_1, window_bounds = array<i64: 28, 32>}, {pipeline_mode = #tpu.pipeline_mode<synchronous>, transform_indices = @transform_2, window_bounds = array<i64: 88, 32>}, {pipeline_mode = #tpu.pipeline_mode<synchronous>, transform_indices = @transform_3, window_bounds = array<i64: 2, 32, 96>}, {pipeline_mode = #tpu.pipeline_mode<synchronous>, transform_indices = @transform_4, window_bounds = array<i64: 2, 1, 96>}, {pipeline_mode = #tpu.pipeline_mode<synchronous>, transform_indices = @transform_5, window_bounds = array<i64: 2, 32, 32>}, {pipeline_mode = #tpu.pipeline_mode<synchronous>, transform_indices = @transform_6, window_bounds = array<i64: 2, 32, 64>}, {pipeline_mode = #tpu.pipeline_mode<synchronous>, transform_indices = @transform_7, window_bounds = array<i64: 2, 1, 64>}, {pipeline_mode = #tpu.pipeline_mode<synchronous>, transform_indices = @transform_8, window_bounds = array<i64: 2, 64, 32>}, {pipeline_mode = #tpu.pipeline_mode<synchronous>, transform_indices = @transform_9, window_bounds = array<i64: 2, 6, 32>}, {pipeline_mode = #tpu.pipeline_mode<synchronous>, transform_indices = @transform_10, window_bounds = array<i64: 7, 32, 32>}, {pipeline_mode = #tpu.pipeline_mode<synchronous>, transform_indices = @transform_11, window_bounds = array<i64: 2, 32>}, {pipeline_mode = #tpu.pipeline_mode<synchronous>, transform_indices = @transform_12, window_bounds = array<i64: 32, 128>}, {pipeline_mode = #tpu.pipeline_mode<synchronous>, transform_indices = @transform_13, window_bounds = array<i64: 1, 128>}, {transform_indices = @transform_14, window_bounds = array<i64: 1, 32, 128>}]} {
    %c0 = arith.constant 0 : index
    %c0_0 = arith.constant 0 : index
    %c0_1 = arith.constant 0 : index
    %0 = vector.load %arg1[%c0, %c0_0, %c0_1] : memref<1x88x28xf32, #tpu.memory_space<vmem>>, vector<1x88x28xf32>
    %1 = vector.shape_cast %0 : vector<1x88x28xf32> to vector<88x28xf32>
    %c0_2 = arith.constant 0 : index
    %c0_3 = arith.constant 0 : index
    %2 = vector.load %arg2[%c0_2, %c0_3] : memref<28x32xf32, #tpu.memory_space<vmem>>, vector<28x32xf32>
    %cst = arith.constant dense<0.000000e+00> : vector<88x32xf32>
    %3 = tpu.matmul %1, %2, %cst {dimension_numbers = #tpu.dot_dimension_numbers<[1], [0], [0], [1], [0, 0, 1, 1], [], []>} : vector<88x28xf32>, vector<28x32xf32>, vector<88x32xf32> -> vector<88x32xf32>
    %c0_4 = arith.constant 0 : index
    %c0_5 = arith.constant 0 : index
    %4 = vector.load %arg3[%c0_4, %c0_5] : memref<88x32xf32, #tpu.memory_space<vmem>>, vector<88x32xf32>
    %5 = arith.addf %3, %4 : vector<88x32xf32>
    %6 = tpu.iota {dimensions = array<i32: 2>} : vector<1x1x88xi32>
    %c87_i32 = arith.constant 87 : i32
    %7 = vector.broadcast %c87_i32 : i32 to vector<1x1x88xi32>
    %8 = arith.cmpi sge, %6, %7 : vector<1x1x88xi32>
    %cst_6 = arith.constant -1.000000e+09 : f32
    %cst_7 = arith.constant 0.000000e+00 : f32
    %9 = vector.broadcast %cst_6 : f32 to vector<1x1x88xf32>
    %10 = vector.broadcast %cst_7 : f32 to vector<1x1x88xf32>
    %11 = arith.select %8, %9, %10 : vector<1x1x88xi1>, vector<1x1x88xf32>
    %c0_8 = arith.constant 0 : index
    %c0_9 = arith.constant 0 : index
    %c0_10 = arith.constant 0 : index
    %12 = vector.load %arg10[%c0_8, %c0_9, %c0_10] : memref<2x6x32xf32, #tpu.memory_space<vmem>>, vector<1x6x32xf32>
    %13 = vector.shape_cast %12 : vector<1x6x32xf32> to vector<6x32xf32>
    %14 = vector.extract_strided_slice %13 {offsets = [0, 0], sizes = [1, 32], strides = [1, 1]} : vector<6x32xf32> to vector<1x32xf32>
    %15 = vector.extract_strided_slice %13 {offsets = [1, 0], sizes = [1, 32], strides = [1, 1]} : vector<6x32xf32> to vector<1x32xf32>
    %16 = vector.extract_strided_slice %13 {offsets = [2, 0], sizes = [1, 32], strides = [1, 1]} : vector<6x32xf32> to vector<1x32xf32>
    %17 = vector.extract_strided_slice %13 {offsets = [3, 0], sizes = [1, 32], strides = [1, 1]} : vector<6x32xf32> to vector<1x32xf32>
    %18 = vector.extract_strided_slice %13 {offsets = [4, 0], sizes = [1, 32], strides = [1, 1]} : vector<6x32xf32> to vector<1x32xf32>
    %19 = vector.extract_strided_slice %13 {offsets = [5, 0], sizes = [1, 32], strides = [1, 1]} : vector<6x32xf32> to vector<1x32xf32>
    %c0_11 = arith.constant 0 : index
    %c0_12 = arith.constant 0 : index
    %c0_13 = arith.constant 0 : index
    %20 = vector.load %arg4[%c0_11, %c0_12, %c0_13] : memref<2x32x96xf32, #tpu.memory_space<vmem>>, vector<1x32x96xf32>
    %21 = vector.shape_cast %20 : vector<1x32x96xf32> to vector<32x96xf32>
    %cst_14 = arith.constant dense<0.000000e+00> : vector<88x96xf32>
    %22 = tpu.matmul %5, %21, %cst_14 {dimension_numbers = #tpu.dot_dimension_numbers<[1], [0], [0], [1], [0, 0, 1, 1], [], []>} : vector<88x32xf32>, vector<32x96xf32>, vector<88x96xf32> -> vector<88x96xf32>
    %c0_15 = arith.constant 0 : index
    %c0_16 = arith.constant 0 : index
    %c0_17 = arith.constant 0 : index
    %23 = vector.load %arg5[%c0_15, %c0_16, %c0_17] : memref<2x1x96xf32, #tpu.memory_space<vmem>>, vector<1x1x96xf32>
    %24 = vector.shape_cast %23 : vector<1x1x96xf32> to vector<1x96xf32>
    %25 = vector.broadcast %24 : vector<1x96xf32> to vector<88x96xf32>
    %26 = arith.addf %22, %25 : vector<88x96xf32>
    %27 = tpu.transpose %26, [1, 0] : vector<88x96xf32> -> vector<96x88xf32>
    %28 = vector.shape_cast %27 : vector<96x88xf32> to vector<12x8x88xf32>
    %29 = vector.extract_strided_slice %28 {offsets = [0, 0, 0], sizes = [4, 8, 88], strides = [1, 1, 1]} : vector<12x8x88xf32> to vector<4x8x88xf32>
    %30 = tpu.transpose %29, [0, 2, 1] : vector<4x8x88xf32> -> vector<4x88x8xf32>
    %31 = vector.extract_strided_slice %28 {offsets = [4, 0, 0], sizes = [4, 8, 88], strides = [1, 1, 1]} : vector<12x8x88xf32> to vector<4x8x88xf32>
    %32 = vector.extract_strided_slice %28 {offsets = [8, 0, 0], sizes = [4, 8, 88], strides = [1, 1, 1]} : vector<12x8x88xf32> to vector<4x8x88xf32>
    %33 = tpu.transpose %32, [0, 2, 1] : vector<4x8x88xf32> -> vector<4x88x8xf32>
    "tpu.trace_start"() <{level = 10 : i32, message = "hld,hdm->hlm"}> : () -> ()
    %cst_18 = arith.constant dense<0.000000e+00> : vector<4x88x88xf32>
    %34 = tpu.matmul %30, %31, %cst_18 {dimension_numbers = #tpu.dot_dimension_numbers<[2], [1], [1], [2], [0, 0, 0, 1, 1, 2], [0], [0]>} : vector<4x88x8xf32>, vector<4x8x88xf32>, vector<4x88x88xf32> -> vector<4x88x88xf32>
    "tpu.trace_stop"() : () -> ()
    %cst_19 = arith.constant 0.353553385 : f32
    %35 = vector.broadcast %cst_19 : f32 to vector<4x88x88xf32>
    %36 = arith.mulf %34, %35 : vector<4x88x88xf32>
    %37 = vector.broadcast %11 : vector<1x1x88xf32> to vector<4x88x88xf32>
    %38 = arith.addf %36, %37 : vector<4x88x88xf32>
    %cst_20 = arith.constant dense<0xFF800000> : vector<4x88xf32>
    %39 = vector.multi_reduction <maximumf>, %38, %cst_20 [2] : vector<4x88x88xf32> to vector<4x88xf32>
    %40 = vector.shape_cast %39 : vector<4x88xf32> to vector<4x88x1xf32>
    %41 = vector.broadcast %40 : vector<4x88x1xf32> to vector<4x88x88xf32>
    %42 = arith.subf %38, %41 : vector<4x88x88xf32>
    %43 = math.exp %42 : vector<4x88x88xf32>
    %cst_21 = arith.constant dense<0.000000e+00> : vector<4x88xf32>
    %44 = vector.multi_reduction <add>, %43, %cst_21 [2] : vector<4x88x88xf32> to vector<4x88xf32>
    %45 = vector.shape_cast %44 : vector<4x88xf32> to vector<4x88x1xf32>
    %46 = tpu.reciprocal %45 {approx = true} : vector<4x88x1xf32> -> vector<4x88x1xf32>
    %47 = vector.broadcast %46 : vector<4x88x1xf32> to vector<4x88x88xf32>
    %48 = arith.mulf %43, %47 : vector<4x88x88xf32>
    "tpu.trace_start"() <{level = 10 : i32, message = "hlm,hmd->hld"}> : () -> ()
    %cst_22 = arith.constant dense<0.000000e+00> : vector<4x88x8xf32>
    %49 = tpu.matmul %48, %33, %cst_22 {dimension_numbers = #tpu.dot_dimension_numbers<[2], [1], [1], [2], [0, 0, 0, 1, 1, 2], [0], [0]>} : vector<4x88x88xf32>, vector<4x88x8xf32>, vector<4x88x8xf32> -> vector<4x88x8xf32>
    "tpu.trace_stop"() : () -> ()
    %c0_23 = arith.constant 0 : index
    %c0_24 = arith.constant 0 : index
    %c0_25 = arith.constant 0 : index
    %50 = vector.load %arg6[%c0_23, %c0_24, %c0_25] : memref<2x32x32xf32, #tpu.memory_space<vmem>>, vector<1x32x32xf32>
    %51 = vector.shape_cast %50 : vector<1x32x32xf32> to vector<32x32xf32>
    %52 = vector.extract_strided_slice %49 {offsets = [0, 0, 0], sizes = [1, 88, 8], strides = [1, 1, 1]} : vector<4x88x8xf32> to vector<1x88x8xf32>
    %53 = vector.shape_cast %52 : vector<1x88x8xf32> to vector<88x8xf32>
    %54 = vector.extract_strided_slice %51 {offsets = [0, 0], sizes = [8, 32], strides = [1, 1]} : vector<32x32xf32> to vector<8x32xf32>
    %cst_26 = arith.constant dense<0.000000e+00> : vector<88x32xf32>
    %55 = tpu.matmul %53, %54, %cst_26 {dimension_numbers = #tpu.dot_dimension_numbers<[1], [0], [0], [1], [0, 0, 1, 1], [], []>} : vector<88x8xf32>, vector<8x32xf32>, vector<88x32xf32> -> vector<88x32xf32>
    %56 = vector.extract_strided_slice %49 {offsets = [1, 0, 0], sizes = [1, 88, 8], strides = [1, 1, 1]} : vector<4x88x8xf32> to vector<1x88x8xf32>
    %57 = vector.shape_cast %56 : vector<1x88x8xf32> to vector<88x8xf32>
    %58 = vector.extract_strided_slice %51 {offsets = [8, 0], sizes = [8, 32], strides = [1, 1]} : vector<32x32xf32> to vector<8x32xf32>
    %cst_27 = arith.constant dense<0.000000e+00> : vector<88x32xf32>
    %59 = tpu.matmul %57, %58, %cst_27 {dimension_numbers = #tpu.dot_dimension_numbers<[1], [0], [0], [1], [0, 0, 1, 1], [], []>} : vector<88x8xf32>, vector<8x32xf32>, vector<88x32xf32> -> vector<88x32xf32>
    %60 = arith.addf %55, %59 : vector<88x32xf32>
    %61 = vector.extract_strided_slice %49 {offsets = [2, 0, 0], sizes = [1, 88, 8], strides = [1, 1, 1]} : vector<4x88x8xf32> to vector<1x88x8xf32>
    %62 = vector.shape_cast %61 : vector<1x88x8xf32> to vector<88x8xf32>
    %63 = vector.extract_strided_slice %51 {offsets = [16, 0], sizes = [8, 32], strides = [1, 1]} : vector<32x32xf32> to vector<8x32xf32>
    %cst_28 = arith.constant dense<0.000000e+00> : vector<88x32xf32>
    %64 = tpu.matmul %62, %63, %cst_28 {dimension_numbers = #tpu.dot_dimension_numbers<[1], [0], [0], [1], [0, 0, 1, 1], [], []>} : vector<88x8xf32>, vector<8x32xf32>, vector<88x32xf32> -> vector<88x32xf32>
    %65 = arith.addf %60, %64 : vector<88x32xf32>
    %66 = vector.extract_strided_slice %49 {offsets = [3, 0, 0], sizes = [1, 88, 8], strides = [1, 1, 1]} : vector<4x88x8xf32> to vector<1x88x8xf32>
    %67 = vector.shape_cast %66 : vector<1x88x8xf32> to vector<88x8xf32>
    %68 = vector.extract_strided_slice %51 {offsets = [24, 0], sizes = [8, 32], strides = [1, 1]} : vector<32x32xf32> to vector<8x32xf32>
    %cst_29 = arith.constant dense<0.000000e+00> : vector<88x32xf32>
    %69 = tpu.matmul %67, %68, %cst_29 {dimension_numbers = #tpu.dot_dimension_numbers<[1], [0], [0], [1], [0, 0, 1, 1], [], []>} : vector<88x8xf32>, vector<8x32xf32>, vector<88x32xf32> -> vector<88x32xf32>
    %70 = arith.addf %65, %69 : vector<88x32xf32>
    %71 = vector.broadcast %14 : vector<1x32xf32> to vector<88x32xf32>
    %72 = arith.addf %70, %71 : vector<88x32xf32>
    %73 = arith.addf %5, %72 : vector<88x32xf32>
    %cst_30 = arith.constant dense<0.000000e+00> : vector<88xf32>
    %74 = vector.multi_reduction <add>, %73, %cst_30 [1] : vector<88x32xf32> to vector<88xf32>
    %75 = vector.shape_cast %74 : vector<88xf32> to vector<88x1xf32>
    %cst_31 = arith.constant 3.200000e+01 : f32
    %76 = vector.broadcast %cst_31 : f32 to vector<88x1xf32>
    %77 = arith.divf %75, %76 : vector<88x1xf32>
    %78 = vector.broadcast %77 : vector<88x1xf32> to vector<88x32xf32>
    %79 = arith.subf %73, %78 : vector<88x32xf32>
    %80 = arith.mulf %79, %79 : vector<88x32xf32>
    %cst_32 = arith.constant dense<0.000000e+00> : vector<88xf32>
    %81 = vector.multi_reduction <add>, %80, %cst_32 [1] : vector<88x32xf32> to vector<88xf32>
    %82 = vector.shape_cast %81 : vector<88xf32> to vector<88x1xf32>
    %cst_33 = arith.constant 3.200000e+01 : f32
    %83 = vector.broadcast %cst_33 : f32 to vector<88x1xf32>
    %84 = arith.divf %82, %83 : vector<88x1xf32>
    %85 = vector.broadcast %77 : vector<88x1xf32> to vector<88x32xf32>
    %86 = arith.subf %73, %85 : vector<88x32xf32>
    %cst_34 = arith.constant 9.99999974E-6 : f32
    %87 = vector.broadcast %cst_34 : f32 to vector<88x1xf32>
    %88 = arith.addf %84, %87 : vector<88x1xf32>
    %89 = math.rsqrt %88 : vector<88x1xf32>
    %90 = vector.broadcast %89 : vector<88x1xf32> to vector<88x32xf32>
    %91 = arith.mulf %86, %90 : vector<88x32xf32>
    %92 = vector.broadcast %15 : vector<1x32xf32> to vector<88x32xf32>
    %93 = arith.mulf %91, %92 : vector<88x32xf32>
    %94 = vector.broadcast %16 : vector<1x32xf32> to vector<88x32xf32>
    %95 = arith.addf %93, %94 : vector<88x32xf32>
    %c0_35 = arith.constant 0 : index
    %c0_36 = arith.constant 0 : index
    %c0_37 = arith.constant 0 : index
    %96 = vector.load %arg7[%c0_35, %c0_36, %c0_37] : memref<2x32x64xf32, #tpu.memory_space<vmem>>, vector<1x32x64xf32>
    %97 = vector.shape_cast %96 : vector<1x32x64xf32> to vector<32x64xf32>
    %cst_38 = arith.constant dense<0.000000e+00> : vector<88x64xf32>
    %98 = tpu.matmul %95, %97, %cst_38 {dimension_numbers = #tpu.dot_dimension_numbers<[1], [0], [0], [1], [0, 0, 1, 1], [], []>} : vector<88x32xf32>, vector<32x64xf32>, vector<88x64xf32> -> vector<88x64xf32>
    %c0_39 = arith.constant 0 : index
    %c0_40 = arith.constant 0 : index
    %c0_41 = arith.constant 0 : index
    %99 = vector.load %arg8[%c0_39, %c0_40, %c0_41] : memref<2x1x64xf32, #tpu.memory_space<vmem>>, vector<1x1x64xf32>
    %100 = vector.shape_cast %99 : vector<1x1x64xf32> to vector<1x64xf32>
    %101 = vector.broadcast %100 : vector<1x64xf32> to vector<88x64xf32>
    %102 = arith.addf %98, %101 : vector<88x64xf32>
    %cst_42 = arith.constant 0.000000e+00 : f32
    %103 = vector.broadcast %cst_42 : f32 to vector<88x64xf32>
    %104 = arith.maximumf %102, %103 : vector<88x64xf32>
    %c0_43 = arith.constant 0 : index
    %c0_44 = arith.constant 0 : index
    %c0_45 = arith.constant 0 : index
    %105 = vector.load %arg9[%c0_43, %c0_44, %c0_45] : memref<2x64x32xf32, #tpu.memory_space<vmem>>, vector<1x64x32xf32>
    %106 = vector.shape_cast %105 : vector<1x64x32xf32> to vector<64x32xf32>
    %cst_46 = arith.constant dense<0.000000e+00> : vector<88x32xf32>
    %107 = tpu.matmul %104, %106, %cst_46 {dimension_numbers = #tpu.dot_dimension_numbers<[1], [0], [0], [1], [0, 0, 1, 1], [], []>} : vector<88x64xf32>, vector<64x32xf32>, vector<88x32xf32> -> vector<88x32xf32>
    %108 = vector.broadcast %19 : vector<1x32xf32> to vector<88x32xf32>
    %109 = arith.addf %107, %108 : vector<88x32xf32>
    %110 = arith.addf %95, %109 : vector<88x32xf32>
    %cst_47 = arith.constant dense<0.000000e+00> : vector<88xf32>
    %111 = vector.multi_reduction <add>, %110, %cst_47 [1] : vector<88x32xf32> to vector<88xf32>
    %112 = vector.shape_cast %111 : vector<88xf32> to vector<88x1xf32>
    %cst_48 = arith.constant 3.200000e+01 : f32
    %113 = vector.broadcast %cst_48 : f32 to vector<88x1xf32>
    %114 = arith.divf %112, %113 : vector<88x1xf32>
    %115 = vector.broadcast %114 : vector<88x1xf32> to vector<88x32xf32>
    %116 = arith.subf %110, %115 : vector<88x32xf32>
    %117 = arith.mulf %116, %116 : vector<88x32xf32>
    %cst_49 = arith.constant dense<0.000000e+00> : vector<88xf32>
    %118 = vector.multi_reduction <add>, %117, %cst_49 [1] : vector<88x32xf32> to vector<88xf32>
    %119 = vector.shape_cast %118 : vector<88xf32> to vector<88x1xf32>
    %cst_50 = arith.constant 3.200000e+01 : f32
    %120 = vector.broadcast %cst_50 : f32 to vector<88x1xf32>
    %121 = arith.divf %119, %120 : vector<88x1xf32>
    %122 = vector.broadcast %114 : vector<88x1xf32> to vector<88x32xf32>
    %123 = arith.subf %110, %122 : vector<88x32xf32>
    %cst_51 = arith.constant 9.99999974E-6 : f32
    %124 = vector.broadcast %cst_51 : f32 to vector<88x1xf32>
    %125 = arith.addf %121, %124 : vector<88x1xf32>
    %126 = math.rsqrt %125 : vector<88x1xf32>
    %127 = vector.broadcast %126 : vector<88x1xf32> to vector<88x32xf32>
    %128 = arith.mulf %123, %127 : vector<88x32xf32>
    %129 = vector.broadcast %17 : vector<1x32xf32> to vector<88x32xf32>
    %130 = arith.mulf %128, %129 : vector<88x32xf32>
    %131 = vector.broadcast %18 : vector<1x32xf32> to vector<88x32xf32>
    %132 = arith.addf %130, %131 : vector<88x32xf32>
    %c1 = arith.constant 1 : index
    %c0_52 = arith.constant 0 : index
    %c0_53 = arith.constant 0 : index
    %133 = vector.load %arg10[%c1, %c0_52, %c0_53] : memref<2x6x32xf32, #tpu.memory_space<vmem>>, vector<1x6x32xf32>
    %134 = vector.shape_cast %133 : vector<1x6x32xf32> to vector<6x32xf32>
    %135 = vector.extract_strided_slice %134 {offsets = [0, 0], sizes = [1, 32], strides = [1, 1]} : vector<6x32xf32> to vector<1x32xf32>
    %136 = vector.extract_strided_slice %134 {offsets = [1, 0], sizes = [1, 32], strides = [1, 1]} : vector<6x32xf32> to vector<1x32xf32>
    %137 = vector.extract_strided_slice %134 {offsets = [2, 0], sizes = [1, 32], strides = [1, 1]} : vector<6x32xf32> to vector<1x32xf32>
    %138 = vector.extract_strided_slice %134 {offsets = [3, 0], sizes = [1, 32], strides = [1, 1]} : vector<6x32xf32> to vector<1x32xf32>
    %139 = vector.extract_strided_slice %134 {offsets = [4, 0], sizes = [1, 32], strides = [1, 1]} : vector<6x32xf32> to vector<1x32xf32>
    %140 = vector.extract_strided_slice %134 {offsets = [5, 0], sizes = [1, 32], strides = [1, 1]} : vector<6x32xf32> to vector<1x32xf32>
    %c1_54 = arith.constant 1 : index
    %c0_55 = arith.constant 0 : index
    %c0_56 = arith.constant 0 : index
    %141 = vector.load %arg4[%c1_54, %c0_55, %c0_56] : memref<2x32x96xf32, #tpu.memory_space<vmem>>, vector<1x32x96xf32>
    %142 = vector.shape_cast %141 : vector<1x32x96xf32> to vector<32x96xf32>
    %cst_57 = arith.constant dense<0.000000e+00> : vector<88x96xf32>
    %143 = tpu.matmul %132, %142, %cst_57 {dimension_numbers = #tpu.dot_dimension_numbers<[1], [0], [0], [1], [0, 0, 1, 1], [], []>} : vector<88x32xf32>, vector<32x96xf32>, vector<88x96xf32> -> vector<88x96xf32>
    %c1_58 = arith.constant 1 : index
    %c0_59 = arith.constant 0 : index
    %c0_60 = arith.constant 0 : index
    %144 = vector.load %arg5[%c1_58, %c0_59, %c0_60] : memref<2x1x96xf32, #tpu.memory_space<vmem>>, vector<1x1x96xf32>
    %145 = vector.shape_cast %144 : vector<1x1x96xf32> to vector<1x96xf32>
    %146 = vector.broadcast %145 : vector<1x96xf32> to vector<88x96xf32>
    %147 = arith.addf %143, %146 : vector<88x96xf32>
    %148 = tpu.transpose %147, [1, 0] : vector<88x96xf32> -> vector<96x88xf32>
    %149 = vector.shape_cast %148 : vector<96x88xf32> to vector<12x8x88xf32>
    %150 = vector.extract_strided_slice %149 {offsets = [0, 0, 0], sizes = [4, 8, 88], strides = [1, 1, 1]} : vector<12x8x88xf32> to vector<4x8x88xf32>
    %151 = tpu.transpose %150, [0, 2, 1] : vector<4x8x88xf32> -> vector<4x88x8xf32>
    %152 = vector.extract_strided_slice %149 {offsets = [4, 0, 0], sizes = [4, 8, 88], strides = [1, 1, 1]} : vector<12x8x88xf32> to vector<4x8x88xf32>
    %153 = vector.extract_strided_slice %149 {offsets = [8, 0, 0], sizes = [4, 8, 88], strides = [1, 1, 1]} : vector<12x8x88xf32> to vector<4x8x88xf32>
    %154 = tpu.transpose %153, [0, 2, 1] : vector<4x8x88xf32> -> vector<4x88x8xf32>
    "tpu.trace_start"() <{level = 10 : i32, message = "hld,hdm->hlm"}> : () -> ()
    %cst_61 = arith.constant dense<0.000000e+00> : vector<4x88x88xf32>
    %155 = tpu.matmul %151, %152, %cst_61 {dimension_numbers = #tpu.dot_dimension_numbers<[2], [1], [1], [2], [0, 0, 0, 1, 1, 2], [0], [0]>} : vector<4x88x8xf32>, vector<4x8x88xf32>, vector<4x88x88xf32> -> vector<4x88x88xf32>
    "tpu.trace_stop"() : () -> ()
    %cst_62 = arith.constant 0.353553385 : f32
    %156 = vector.broadcast %cst_62 : f32 to vector<4x88x88xf32>
    %157 = arith.mulf %155, %156 : vector<4x88x88xf32>
    %158 = vector.broadcast %11 : vector<1x1x88xf32> to vector<4x88x88xf32>
    %159 = arith.addf %157, %158 : vector<4x88x88xf32>
    %cst_63 = arith.constant dense<0xFF800000> : vector<4x88xf32>
    %160 = vector.multi_reduction <maximumf>, %159, %cst_63 [2] : vector<4x88x88xf32> to vector<4x88xf32>
    %161 = vector.shape_cast %160 : vector<4x88xf32> to vector<4x88x1xf32>
    %162 = vector.broadcast %161 : vector<4x88x1xf32> to vector<4x88x88xf32>
    %163 = arith.subf %159, %162 : vector<4x88x88xf32>
    %164 = math.exp %163 : vector<4x88x88xf32>
    %cst_64 = arith.constant dense<0.000000e+00> : vector<4x88xf32>
    %165 = vector.multi_reduction <add>, %164, %cst_64 [2] : vector<4x88x88xf32> to vector<4x88xf32>
    %166 = vector.shape_cast %165 : vector<4x88xf32> to vector<4x88x1xf32>
    %167 = tpu.reciprocal %166 {approx = true} : vector<4x88x1xf32> -> vector<4x88x1xf32>
    %168 = vector.broadcast %167 : vector<4x88x1xf32> to vector<4x88x88xf32>
    %169 = arith.mulf %164, %168 : vector<4x88x88xf32>
    "tpu.trace_start"() <{level = 10 : i32, message = "hlm,hmd->hld"}> : () -> ()
    %cst_65 = arith.constant dense<0.000000e+00> : vector<4x88x8xf32>
    %170 = tpu.matmul %169, %154, %cst_65 {dimension_numbers = #tpu.dot_dimension_numbers<[2], [1], [1], [2], [0, 0, 0, 1, 1, 2], [0], [0]>} : vector<4x88x88xf32>, vector<4x88x8xf32>, vector<4x88x8xf32> -> vector<4x88x8xf32>
    "tpu.trace_stop"() : () -> ()
    %c1_66 = arith.constant 1 : index
    %c0_67 = arith.constant 0 : index
    %c0_68 = arith.constant 0 : index
    %171 = vector.load %arg6[%c1_66, %c0_67, %c0_68] : memref<2x32x32xf32, #tpu.memory_space<vmem>>, vector<1x32x32xf32>
    %172 = vector.shape_cast %171 : vector<1x32x32xf32> to vector<32x32xf32>
    %173 = vector.extract_strided_slice %170 {offsets = [0, 0, 0], sizes = [1, 88, 8], strides = [1, 1, 1]} : vector<4x88x8xf32> to vector<1x88x8xf32>
    %174 = vector.shape_cast %173 : vector<1x88x8xf32> to vector<88x8xf32>
    %175 = vector.extract_strided_slice %172 {offsets = [0, 0], sizes = [8, 32], strides = [1, 1]} : vector<32x32xf32> to vector<8x32xf32>
    %cst_69 = arith.constant dense<0.000000e+00> : vector<88x32xf32>
    %176 = tpu.matmul %174, %175, %cst_69 {dimension_numbers = #tpu.dot_dimension_numbers<[1], [0], [0], [1], [0, 0, 1, 1], [], []>} : vector<88x8xf32>, vector<8x32xf32>, vector<88x32xf32> -> vector<88x32xf32>
    %177 = vector.extract_strided_slice %170 {offsets = [1, 0, 0], sizes = [1, 88, 8], strides = [1, 1, 1]} : vector<4x88x8xf32> to vector<1x88x8xf32>
    %178 = vector.shape_cast %177 : vector<1x88x8xf32> to vector<88x8xf32>
    %179 = vector.extract_strided_slice %172 {offsets = [8, 0], sizes = [8, 32], strides = [1, 1]} : vector<32x32xf32> to vector<8x32xf32>
    %cst_70 = arith.constant dense<0.000000e+00> : vector<88x32xf32>
    %180 = tpu.matmul %178, %179, %cst_70 {dimension_numbers = #tpu.dot_dimension_numbers<[1], [0], [0], [1], [0, 0, 1, 1], [], []>} : vector<88x8xf32>, vector<8x32xf32>, vector<88x32xf32> -> vector<88x32xf32>
    %181 = arith.addf %176, %180 : vector<88x32xf32>
    %182 = vector.extract_strided_slice %170 {offsets = [2, 0, 0], sizes = [1, 88, 8], strides = [1, 1, 1]} : vector<4x88x8xf32> to vector<1x88x8xf32>
    %183 = vector.shape_cast %182 : vector<1x88x8xf32> to vector<88x8xf32>
    %184 = vector.extract_strided_slice %172 {offsets = [16, 0], sizes = [8, 32], strides = [1, 1]} : vector<32x32xf32> to vector<8x32xf32>
    %cst_71 = arith.constant dense<0.000000e+00> : vector<88x32xf32>
    %185 = tpu.matmul %183, %184, %cst_71 {dimension_numbers = #tpu.dot_dimension_numbers<[1], [0], [0], [1], [0, 0, 1, 1], [], []>} : vector<88x8xf32>, vector<8x32xf32>, vector<88x32xf32> -> vector<88x32xf32>
    %186 = arith.addf %181, %185 : vector<88x32xf32>
    %187 = vector.extract_strided_slice %170 {offsets = [3, 0, 0], sizes = [1, 88, 8], strides = [1, 1, 1]} : vector<4x88x8xf32> to vector<1x88x8xf32>
    %188 = vector.shape_cast %187 : vector<1x88x8xf32> to vector<88x8xf32>
    %189 = vector.extract_strided_slice %172 {offsets = [24, 0], sizes = [8, 32], strides = [1, 1]} : vector<32x32xf32> to vector<8x32xf32>
    %cst_72 = arith.constant dense<0.000000e+00> : vector<88x32xf32>
    %190 = tpu.matmul %188, %189, %cst_72 {dimension_numbers = #tpu.dot_dimension_numbers<[1], [0], [0], [1], [0, 0, 1, 1], [], []>} : vector<88x8xf32>, vector<8x32xf32>, vector<88x32xf32> -> vector<88x32xf32>
    %191 = arith.addf %186, %190 : vector<88x32xf32>
    %192 = vector.broadcast %135 : vector<1x32xf32> to vector<88x32xf32>
    %193 = arith.addf %191, %192 : vector<88x32xf32>
    %194 = arith.addf %132, %193 : vector<88x32xf32>
    %cst_73 = arith.constant dense<0.000000e+00> : vector<88xf32>
    %195 = vector.multi_reduction <add>, %194, %cst_73 [1] : vector<88x32xf32> to vector<88xf32>
    %196 = vector.shape_cast %195 : vector<88xf32> to vector<88x1xf32>
    %cst_74 = arith.constant 3.200000e+01 : f32
    %197 = vector.broadcast %cst_74 : f32 to vector<88x1xf32>
    %198 = arith.divf %196, %197 : vector<88x1xf32>
    %199 = vector.broadcast %198 : vector<88x1xf32> to vector<88x32xf32>
    %200 = arith.subf %194, %199 : vector<88x32xf32>
    %201 = arith.mulf %200, %200 : vector<88x32xf32>
    %cst_75 = arith.constant dense<0.000000e+00> : vector<88xf32>
    %202 = vector.multi_reduction <add>, %201, %cst_75 [1] : vector<88x32xf32> to vector<88xf32>
    %203 = vector.shape_cast %202 : vector<88xf32> to vector<88x1xf32>
    %cst_76 = arith.constant 3.200000e+01 : f32
    %204 = vector.broadcast %cst_76 : f32 to vector<88x1xf32>
    %205 = arith.divf %203, %204 : vector<88x1xf32>
    %206 = vector.broadcast %198 : vector<88x1xf32> to vector<88x32xf32>
    %207 = arith.subf %194, %206 : vector<88x32xf32>
    %cst_77 = arith.constant 9.99999974E-6 : f32
    %208 = vector.broadcast %cst_77 : f32 to vector<88x1xf32>
    %209 = arith.addf %205, %208 : vector<88x1xf32>
    %210 = math.rsqrt %209 : vector<88x1xf32>
    %211 = vector.broadcast %210 : vector<88x1xf32> to vector<88x32xf32>
    %212 = arith.mulf %207, %211 : vector<88x32xf32>
    %213 = vector.broadcast %136 : vector<1x32xf32> to vector<88x32xf32>
    %214 = arith.mulf %212, %213 : vector<88x32xf32>
    %215 = vector.broadcast %137 : vector<1x32xf32> to vector<88x32xf32>
    %216 = arith.addf %214, %215 : vector<88x32xf32>
    %c1_78 = arith.constant 1 : index
    %c0_79 = arith.constant 0 : index
    %c0_80 = arith.constant 0 : index
    %217 = vector.load %arg7[%c1_78, %c0_79, %c0_80] : memref<2x32x64xf32, #tpu.memory_space<vmem>>, vector<1x32x64xf32>
    %218 = vector.shape_cast %217 : vector<1x32x64xf32> to vector<32x64xf32>
    %cst_81 = arith.constant dense<0.000000e+00> : vector<88x64xf32>
    %219 = tpu.matmul %216, %218, %cst_81 {dimension_numbers = #tpu.dot_dimension_numbers<[1], [0], [0], [1], [0, 0, 1, 1], [], []>} : vector<88x32xf32>, vector<32x64xf32>, vector<88x64xf32> -> vector<88x64xf32>
    %c1_82 = arith.constant 1 : index
    %c0_83 = arith.constant 0 : index
    %c0_84 = arith.constant 0 : index
    %220 = vector.load %arg8[%c1_82, %c0_83, %c0_84] : memref<2x1x64xf32, #tpu.memory_space<vmem>>, vector<1x1x64xf32>
    %221 = vector.shape_cast %220 : vector<1x1x64xf32> to vector<1x64xf32>
    %222 = vector.broadcast %221 : vector<1x64xf32> to vector<88x64xf32>
    %223 = arith.addf %219, %222 : vector<88x64xf32>
    %cst_85 = arith.constant 0.000000e+00 : f32
    %224 = vector.broadcast %cst_85 : f32 to vector<88x64xf32>
    %225 = arith.maximumf %223, %224 : vector<88x64xf32>
    %c1_86 = arith.constant 1 : index
    %c0_87 = arith.constant 0 : index
    %c0_88 = arith.constant 0 : index
    %226 = vector.load %arg9[%c1_86, %c0_87, %c0_88] : memref<2x64x32xf32, #tpu.memory_space<vmem>>, vector<1x64x32xf32>
    %227 = vector.shape_cast %226 : vector<1x64x32xf32> to vector<64x32xf32>
    %cst_89 = arith.constant dense<0.000000e+00> : vector<88x32xf32>
    %228 = tpu.matmul %225, %227, %cst_89 {dimension_numbers = #tpu.dot_dimension_numbers<[1], [0], [0], [1], [0, 0, 1, 1], [], []>} : vector<88x64xf32>, vector<64x32xf32>, vector<88x32xf32> -> vector<88x32xf32>
    %229 = vector.broadcast %140 : vector<1x32xf32> to vector<88x32xf32>
    %230 = arith.addf %228, %229 : vector<88x32xf32>
    %231 = arith.addf %216, %230 : vector<88x32xf32>
    %cst_90 = arith.constant dense<0.000000e+00> : vector<88xf32>
    %232 = vector.multi_reduction <add>, %231, %cst_90 [1] : vector<88x32xf32> to vector<88xf32>
    %233 = vector.shape_cast %232 : vector<88xf32> to vector<88x1xf32>
    %cst_91 = arith.constant 3.200000e+01 : f32
    %234 = vector.broadcast %cst_91 : f32 to vector<88x1xf32>
    %235 = arith.divf %233, %234 : vector<88x1xf32>
    %236 = vector.broadcast %235 : vector<88x1xf32> to vector<88x32xf32>
    %237 = arith.subf %231, %236 : vector<88x32xf32>
    %238 = arith.mulf %237, %237 : vector<88x32xf32>
    %cst_92 = arith.constant dense<0.000000e+00> : vector<88xf32>
    %239 = vector.multi_reduction <add>, %238, %cst_92 [1] : vector<88x32xf32> to vector<88xf32>
    %240 = vector.shape_cast %239 : vector<88xf32> to vector<88x1xf32>
    %cst_93 = arith.constant 3.200000e+01 : f32
    %241 = vector.broadcast %cst_93 : f32 to vector<88x1xf32>
    %242 = arith.divf %240, %241 : vector<88x1xf32>
    %243 = vector.broadcast %235 : vector<88x1xf32> to vector<88x32xf32>
    %244 = arith.subf %231, %243 : vector<88x32xf32>
    %cst_94 = arith.constant 9.99999974E-6 : f32
    %245 = vector.broadcast %cst_94 : f32 to vector<88x1xf32>
    %246 = arith.addf %242, %245 : vector<88x1xf32>
    %247 = math.rsqrt %246 : vector<88x1xf32>
    %248 = vector.broadcast %247 : vector<88x1xf32> to vector<88x32xf32>
    %249 = arith.mulf %244, %248 : vector<88x32xf32>
    %250 = vector.broadcast %138 : vector<1x32xf32> to vector<88x32xf32>
    %251 = arith.mulf %249, %250 : vector<88x32xf32>
    %252 = vector.broadcast %139 : vector<1x32xf32> to vector<88x32xf32>
    %253 = arith.addf %251, %252 : vector<88x32xf32>
    %254 = tpu.iota {dimensions = array<i32: 0>} : vector<32x1xi32>
    %c29_i32 = arith.constant 29 : i32
    %255 = vector.broadcast %c29_i32 : i32 to vector<32x1xi32>
    %256 = arith.cmpi slt, %254, %255 : vector<32x1xi32>
    %257 = vector.extract_strided_slice %253 {offsets = [0, 0], sizes = [32, 32], strides = [1, 1]} : vector<88x32xf32> to vector<32x32xf32>
    %cst_95 = arith.constant 0.000000e+00 : f32
    %258 = vector.shape_cast %256 : vector<32x1xi1> to vector<32x1xi1>
    %259 = vector.broadcast %258 : vector<32x1xi1> to vector<32x32xi1>
    %260 = vector.broadcast %cst_95 : f32 to vector<32x32xf32>
    %261 = arith.select %259, %257, %260 : vector<32x32xi1>, vector<32x32xf32>
    %c3 = arith.constant 3 : index
    %c0_96 = arith.constant 0 : index
    %c0_97 = arith.constant 0 : index
    %262 = vector.load %arg11[%c3, %c0_96, %c0_97] : memref<7x32x32xf32, #tpu.memory_space<vmem>>, vector<1x32x32xf32>
    %263 = vector.shape_cast %262 : vector<1x32x32xf32> to vector<32x32xf32>
    %cst_98 = arith.constant dense<0.000000e+00> : vector<32x32xf32>
    %264 = tpu.matmul %261, %263, %cst_98 {dimension_numbers = #tpu.dot_dimension_numbers<[1], [0], [0], [1], [0, 0, 1, 1], [], []>} : vector<32x32xf32>, vector<32x32xf32>, vector<32x32xf32> -> vector<32x32xf32>
    %c3_i32 = arith.constant 3 : i32
    %265 = tpu.dynamic_rotate %261 by %c3_i32 dim 0 : vector<32x32xf32>, i32 -> vector<32x32xf32>
    %c0_99 = arith.constant 0 : index
    %c0_100 = arith.constant 0 : index
    %c0_101 = arith.constant 0 : index
    %266 = vector.load %arg11[%c0_99, %c0_100, %c0_101] : memref<7x32x32xf32, #tpu.memory_space<vmem>>, vector<1x32x32xf32>
    %267 = vector.shape_cast %266 : vector<1x32x32xf32> to vector<32x32xf32>
    %cst_102 = arith.constant dense<0.000000e+00> : vector<32x32xf32>
    %268 = tpu.matmul %265, %267, %cst_102 {dimension_numbers = #tpu.dot_dimension_numbers<[1], [0], [0], [1], [0, 0, 1, 1], [], []>} : vector<32x32xf32>, vector<32x32xf32>, vector<32x32xf32> -> vector<32x32xf32>
    %269 = arith.addf %264, %268 : vector<32x32xf32>
    %c2_i32 = arith.constant 2 : i32
    %270 = tpu.dynamic_rotate %261 by %c2_i32 dim 0 : vector<32x32xf32>, i32 -> vector<32x32xf32>
    %c1_103 = arith.constant 1 : index
    %c0_104 = arith.constant 0 : index
    %c0_105 = arith.constant 0 : index
    %271 = vector.load %arg11[%c1_103, %c0_104, %c0_105] : memref<7x32x32xf32, #tpu.memory_space<vmem>>, vector<1x32x32xf32>
    %272 = vector.shape_cast %271 : vector<1x32x32xf32> to vector<32x32xf32>
    %cst_106 = arith.constant dense<0.000000e+00> : vector<32x32xf32>
    %273 = tpu.matmul %270, %272, %cst_106 {dimension_numbers = #tpu.dot_dimension_numbers<[1], [0], [0], [1], [0, 0, 1, 1], [], []>} : vector<32x32xf32>, vector<32x32xf32>, vector<32x32xf32> -> vector<32x32xf32>
    %274 = arith.addf %269, %273 : vector<32x32xf32>
    %c1_i32 = arith.constant 1 : i32
    %275 = tpu.dynamic_rotate %261 by %c1_i32 dim 0 : vector<32x32xf32>, i32 -> vector<32x32xf32>
    %c2 = arith.constant 2 : index
    %c0_107 = arith.constant 0 : index
    %c0_108 = arith.constant 0 : index
    %276 = vector.load %arg11[%c2, %c0_107, %c0_108] : memref<7x32x32xf32, #tpu.memory_space<vmem>>, vector<1x32x32xf32>
    %277 = vector.shape_cast %276 : vector<1x32x32xf32> to vector<32x32xf32>
    %cst_109 = arith.constant dense<0.000000e+00> : vector<32x32xf32>
    %278 = tpu.matmul %275, %277, %cst_109 {dimension_numbers = #tpu.dot_dimension_numbers<[1], [0], [0], [1], [0, 0, 1, 1], [], []>} : vector<32x32xf32>, vector<32x32xf32>, vector<32x32xf32> -> vector<32x32xf32>
    %279 = arith.addf %274, %278 : vector<32x32xf32>
    %c31_i32 = arith.constant 31 : i32
    %280 = tpu.dynamic_rotate %261 by %c31_i32 dim 0 : vector<32x32xf32>, i32 -> vector<32x32xf32>
    %c4 = arith.constant 4 : index
    %c0_110 = arith.constant 0 : index
    %c0_111 = arith.constant 0 : index
    %281 = vector.load %arg11[%c4, %c0_110, %c0_111] : memref<7x32x32xf32, #tpu.memory_space<vmem>>, vector<1x32x32xf32>
    %282 = vector.shape_cast %281 : vector<1x32x32xf32> to vector<32x32xf32>
    %cst_112 = arith.constant dense<0.000000e+00> : vector<32x32xf32>
    %283 = tpu.matmul %280, %282, %cst_112 {dimension_numbers = #tpu.dot_dimension_numbers<[1], [0], [0], [1], [0, 0, 1, 1], [], []>} : vector<32x32xf32>, vector<32x32xf32>, vector<32x32xf32> -> vector<32x32xf32>
    %284 = arith.addf %279, %283 : vector<32x32xf32>
    %c30_i32 = arith.constant 30 : i32
    %285 = tpu.dynamic_rotate %261 by %c30_i32 dim 0 : vector<32x32xf32>, i32 -> vector<32x32xf32>
    %c5 = arith.constant 5 : index
    %c0_113 = arith.constant 0 : index
    %c0_114 = arith.constant 0 : index
    %286 = vector.load %arg11[%c5, %c0_113, %c0_114] : memref<7x32x32xf32, #tpu.memory_space<vmem>>, vector<1x32x32xf32>
    %287 = vector.shape_cast %286 : vector<1x32x32xf32> to vector<32x32xf32>
    %cst_115 = arith.constant dense<0.000000e+00> : vector<32x32xf32>
    %288 = tpu.matmul %285, %287, %cst_115 {dimension_numbers = #tpu.dot_dimension_numbers<[1], [0], [0], [1], [0, 0, 1, 1], [], []>} : vector<32x32xf32>, vector<32x32xf32>, vector<32x32xf32> -> vector<32x32xf32>
    %289 = arith.addf %284, %288 : vector<32x32xf32>
    %c29_i32_116 = arith.constant 29 : i32
    %290 = tpu.dynamic_rotate %261 by %c29_i32_116 dim 0 : vector<32x32xf32>, i32 -> vector<32x32xf32>
    %c6 = arith.constant 6 : index
    %c0_117 = arith.constant 0 : index
    %c0_118 = arith.constant 0 : index
    %291 = vector.load %arg11[%c6, %c0_117, %c0_118] : memref<7x32x32xf32, #tpu.memory_space<vmem>>, vector<1x32x32xf32>
    %292 = vector.shape_cast %291 : vector<1x32x32xf32> to vector<32x32xf32>
    %cst_119 = arith.constant dense<0.000000e+00> : vector<32x32xf32>
    %293 = tpu.matmul %290, %292, %cst_119 {dimension_numbers = #tpu.dot_dimension_numbers<[1], [0], [0], [1], [0, 0, 1, 1], [], []>} : vector<32x32xf32>, vector<32x32xf32>, vector<32x32xf32> -> vector<32x32xf32>
    %294 = arith.addf %289, %293 : vector<32x32xf32>
    %c0_120 = arith.constant 0 : index
    %c0_121 = arith.constant 0 : index
    %295 = vector.load %arg12[%c0_120, %c0_121] : memref<2x32xf32, #tpu.memory_space<vmem>>, vector<2x32xf32>
    %296 = vector.extract_strided_slice %295 {offsets = [0, 0], sizes = [1, 32], strides = [1, 1]} : vector<2x32xf32> to vector<1x32xf32>
    %297 = vector.broadcast %296 : vector<1x32xf32> to vector<32x32xf32>
    %298 = arith.mulf %294, %297 : vector<32x32xf32>
    %299 = vector.extract_strided_slice %295 {offsets = [1, 0], sizes = [1, 32], strides = [1, 1]} : vector<2x32xf32> to vector<1x32xf32>
    %300 = vector.broadcast %299 : vector<1x32xf32> to vector<32x32xf32>
    %301 = arith.addf %298, %300 : vector<32x32xf32>
    %302 = math.tanh %301 : vector<32x32xf32>
    %c0_122 = arith.constant 0 : index
    %c0_123 = arith.constant 0 : index
    %303 = vector.load %arg13[%c0_122, %c0_123] : memref<32x128xf32, #tpu.memory_space<vmem>>, vector<32x128xf32>
    %cst_124 = arith.constant dense<0.000000e+00> : vector<32x128xf32>
    %304 = tpu.matmul %302, %303, %cst_124 {dimension_numbers = #tpu.dot_dimension_numbers<[1], [0], [0], [1], [0, 0, 1, 1], [], []>} : vector<32x32xf32>, vector<32x128xf32>, vector<32x128xf32> -> vector<32x128xf32>
    %c0_125 = arith.constant 0 : index
    %c0_126 = arith.constant 0 : index
    %305 = vector.load %arg14[%c0_125, %c0_126] : memref<1x128xf32, #tpu.memory_space<vmem>>, vector<1x128xf32>
    %306 = vector.broadcast %305 : vector<1x128xf32> to vector<32x128xf32>
    %307 = arith.addf %304, %306 : vector<32x128xf32>
    %308 = tpu.iota {dimensions = array<i32: 1>} : vector<1x128xi32>
    %c9_i32 = arith.constant 9 : i32
    %309 = vector.broadcast %c9_i32 : i32 to vector<1x128xi32>
    %310 = arith.cmpi sge, %308, %309 : vector<1x128xi32>
    %c11_i32 = arith.constant 11 : i32
    %311 = vector.broadcast %c11_i32 : i32 to vector<1x128xi32>
    %312 = arith.cmpi slt, %308, %311 : vector<1x128xi32>
    %313 = arith.andi %310, %312 : vector<1x128xi1>
    %314 = arith.negf %307 : vector<32x128xf32>
    %315 = math.exp %314 : vector<32x128xf32>
    %cst_127 = arith.constant 1.000000e+00 : f32
    %316 = vector.broadcast %cst_127 : f32 to vector<32x128xf32>
    %317 = arith.addf %316, %315 : vector<32x128xf32>
    %318 = arith.divf %316, %317 : vector<32x128xf32>
    %319 = vector.shape_cast %313 : vector<1x128xi1> to vector<1x128xi1>
    %320 = vector.broadcast %319 : vector<1x128xi1> to vector<32x128xi1>
    %321 = arith.select %320, %318, %307 : vector<32x128xi1>, vector<32x128xf32>
    %c0_128 = arith.constant 0 : index
    %c0_129 = arith.constant 0 : index
    %c0_130 = arith.constant 0 : index
    %322 = vector.load %arg15[%c0_128, %c0_129, %c0_130] : memref<1x32x128xf32, #tpu.memory_space<vmem>>, vector<1x32x128xf32>
    %323 = vector.shape_cast %322 : vector<1x32x128xf32> to vector<32x128xf32>
    %324 = vector.shape_cast %321 : vector<32x128xf32> to vector<1x32x128xf32>
    tpu.vector_store %arg15[%c0_128, %c0_129, %c0_130], %324 {strides = array<i32>} : memref<1x32x128xf32, #tpu.memory_space<vmem>>, vector<1x32x128xf32>,
    return
  }
  func.func @transform_0(%arg0: i32) -> (i32, i32, i32) {
    %c0_i32 = arith.constant 0 : i32
    %c0_i32_0 = arith.constant 0 : i32
    %c0_i32_1 = arith.constant 0 : i32
    return %arg0, %c0_i32, %c0_i32_0 : i32, i32, i32
  }
  func.func @transform_1(%arg0: i32) -> (i32, i32) {
    %c0_i32 = arith.constant 0 : i32
    %c0_i32_0 = arith.constant 0 : i32
    %c0_i32_1 = arith.constant 0 : i32
    return %c0_i32, %c0_i32_0 : i32, i32
  }
  func.func @transform_2(%arg0: i32) -> (i32, i32) {
    %c0_i32 = arith.constant 0 : i32
    %c0_i32_0 = arith.constant 0 : i32
    %c0_i32_1 = arith.constant 0 : i32
    return %c0_i32, %c0_i32_0 : i32, i32
  }
  func.func @transform_3(%arg0: i32) -> (i32, i32, i32) {
    %c0_i32 = arith.constant 0 : i32
    %c0_i32_0 = arith.constant 0 : i32
    %c0_i32_1 = arith.constant 0 : i32
    %c0_i32_2 = arith.constant 0 : i32
    return %c0_i32, %c0_i32_0, %c0_i32_1 : i32, i32, i32
  }
  func.func @transform_4(%arg0: i32) -> (i32, i32, i32) {
    %c0_i32 = arith.constant 0 : i32
    %c0_i32_0 = arith.constant 0 : i32
    %c0_i32_1 = arith.constant 0 : i32
    %c0_i32_2 = arith.constant 0 : i32
    return %c0_i32, %c0_i32_0, %c0_i32_1 : i32, i32, i32
  }
  func.func @transform_5(%arg0: i32) -> (i32, i32, i32) {
    %c0_i32 = arith.constant 0 : i32
    %c0_i32_0 = arith.constant 0 : i32
    %c0_i32_1 = arith.constant 0 : i32
    %c0_i32_2 = arith.constant 0 : i32
    return %c0_i32, %c0_i32_0, %c0_i32_1 : i32, i32, i32
  }
  func.func @transform_6(%arg0: i32) -> (i32, i32, i32) {
    %c0_i32 = arith.constant 0 : i32
    %c0_i32_0 = arith.constant 0 : i32
    %c0_i32_1 = arith.constant 0 : i32
    %c0_i32_2 = arith.constant 0 : i32
    return %c0_i32, %c0_i32_0, %c0_i32_1 : i32, i32, i32
  }
  func.func @transform_7(%arg0: i32) -> (i32, i32, i32) {
    %c0_i32 = arith.constant 0 : i32
    %c0_i32_0 = arith.constant 0 : i32
    %c0_i32_1 = arith.constant 0 : i32
    %c0_i32_2 = arith.constant 0 : i32
    return %c0_i32, %c0_i32_0, %c0_i32_1 : i32, i32, i32
  }
  func.func @transform_8(%arg0: i32) -> (i32, i32, i32) {
    %c0_i32 = arith.constant 0 : i32
    %c0_i32_0 = arith.constant 0 : i32
    %c0_i32_1 = arith.constant 0 : i32
    %c0_i32_2 = arith.constant 0 : i32
    return %c0_i32, %c0_i32_0, %c0_i32_1 : i32, i32, i32
  }
  func.func @transform_9(%arg0: i32) -> (i32, i32, i32) {
    %c0_i32 = arith.constant 0 : i32
    %c0_i32_0 = arith.constant 0 : i32
    %c0_i32_1 = arith.constant 0 : i32
    %c0_i32_2 = arith.constant 0 : i32
    return %c0_i32, %c0_i32_0, %c0_i32_1 : i32, i32, i32
  }
  func.func @transform_10(%arg0: i32) -> (i32, i32, i32) {
    %c0_i32 = arith.constant 0 : i32
    %c0_i32_0 = arith.constant 0 : i32
    %c0_i32_1 = arith.constant 0 : i32
    %c0_i32_2 = arith.constant 0 : i32
    return %c0_i32, %c0_i32_0, %c0_i32_1 : i32, i32, i32
  }
  func.func @transform_11(%arg0: i32) -> (i32, i32) {
    %c0_i32 = arith.constant 0 : i32
    %c0_i32_0 = arith.constant 0 : i32
    %c0_i32_1 = arith.constant 0 : i32
    return %c0_i32, %c0_i32_0 : i32, i32
  }
  func.func @transform_12(%arg0: i32) -> (i32, i32) {
    %c0_i32 = arith.constant 0 : i32
    %c0_i32_0 = arith.constant 0 : i32
    %c0_i32_1 = arith.constant 0 : i32
    return %c0_i32, %c0_i32_0 : i32, i32
  }
  func.func @transform_13(%arg0: i32) -> (i32, i32) {
    %c0_i32 = arith.constant 0 : i32
    %c0_i32_0 = arith.constant 0 : i32
    %c0_i32_1 = arith.constant 0 : i32
    return %c0_i32, %c0_i32_0 : i32, i32
  }
  func.func @transform_14(%arg0: i32) -> (i32, i32, i32) {
    %c0_i32 = arith.constant 0 : i32
    %c0_i32_0 = arith.constant 0 : i32
    %c0_i32_1 = arith.constant 0 : i32
    return %arg0, %c0_i32, %c0_i32_0 : i32, i32, i32
  }
}

</mosaic_0001>

<bundles_post_ra>
// kernel: blend_forward.1
= control target key start
LH: loop header
LB: loop body
LE: loop exit
PB: predicated region body
PF: predicated region fallthrough
CT: control target
= control target key end

     0   :  { %s7282_s29 = smov 0   ;;  %s9972_s0 = inlined_call_operand.vmem [shape: f32[2,88,28], index: 0, kind: input, shape index: {}]   ;;  %s9973_s1 = inlined_call_operand.vmem [shape: f32[28,32], index: 1, kind: input, shape index: {}]   ;;  %s9974_s2 = inlined_call_operand.vmem [shape: f32[88,32], index: 2, kind: input, shape index: {}]   ;;  %s9975_s3 = inlined_call_operand.vmem [shape: f32[2,32,96], index: 3, kind: input, shape index: {}]   ;;  %s9976_s4 = inlined_call_operand.vmem [shape: f32[2,1,96], index: 4, kind: input, shape index: {}]   ;;  %s9977_s5 = inlined_call_operand.vmem [shape: f32[2,32,32], index: 5, kind: input, shape index: {}]   ;;  %s9978_s6 = inlined_call_operand.vmem [shape: f32[2,32,64], index: 6, kind: input, shape index: {}]   ;;  %s9979_s7 = inlined_call_operand.vmem [shape: f32[2,1,64], index: 7, kind: input, shape index: {}]   ;;  %s9980_s8 = inlined_call_operand.vmem [shape: f32[2,64,32], index: 8, kind: input, shape index: {}]   ;;  %s9981_s9 = inlined_call_operand.vmem [shape: f32[2,6,32], index: 9, kind: input, shape index: {}]   ;;  %s9982_s10 = inlined_call_operand.vmem [shape: f32[7,32,32], index: 10, kind: input, shape index: {}]   ;;  %s9983_s11 = inlined_call_operand.vmem [shape: f32[2,32], index: 11, kind: input, shape index: {}]   ;;  %s9984_s12 = inlined_call_operand.vmem [shape: f32[32,128], index: 12, kind: input, shape index: {}]   ;;  %s9985_s13 = inlined_call_operand.vmem [shape: f32[1,128], index: 13, kind: input, shape index: {}]   ;;  %s9986_s14 = inlined_call_operand.vmem [shape: f32[2,32,128], index: 14, kind: output, shape index: {}]  }
   0x1 LB: > { %s6282_s30 = sadd.s32 4294967295, %s7203_s29   ;;  %p6286_p0 = scmp.ge.s32.totalorder %s7203_s29, 1  ;;  %s7203_s29 = sphi %s7282_s29, %s24_s29  }
   0x2   : > { %p412_p1 = scmp.lt.s32.totalorder %s7203_s29, 3 }
   0x4   : > { %p413_p2 = pnand %p6286_p0, %p412_p1 }
   0x6   : > { %416 = sbr.rel (%p413_p2) target bundleno = 4886 (0x1316), region = 76 }
   0xb   : > { %v482_v0 = vld [vmem:[%s9973_s1 + $0x18] sm:$0xf]  ;;  %vm528_vm0 = vcmask 1043456   ;;  %v481_v1 = vld [vmem:[%s9973_s1 + $0x10] sm:$0xff]  ;;  %p458_p3 = scmp.lt.s32.totalorder %s6282_s30, 1  ;;  %v480_v2 = vld [vmem:[%s9973_s1 + $0x8] sm:$0xff] }
   0xc   : > { %6290 = vmatpush.msk.msra.mxu0 %vm528_vm0, %v482_v0  ;;  %v479_v3 = vld [vmem:[%s9973_s1] sm:$0xff]  ;;  %vm494_vm1 = vcmask 228352   ;;  %v590_v11 = vld [vmem:[%s9975_s3 + $0x18] sm:$0xff]  ;;  %v589_v12 = vld [vmem:[%s9975_s3 + $0x10] sm:$0xff]  ;;  %vm595_vm2 = vcmask 261120   ;;  %vm839_vm3 = vcmask 64512  }
   0xd   : > { %s10077_s30 = smov (!%p458_p3, %s6282_s30), 1  ;;  %641 = vmatpush.msra.mxu1 %v590_v11  ;;  %v588_v17 = vld [vmem:[%s9975_s3 + $0x8] sm:$0xff]  ;;  %v587_v18 = vld [vmem:[%s9975_s3] sm:$0xff]  ;;  %v485_v25 = vld [vmem:[%s9974_s2 + $0x10] sm:$0xff]  ;;  %vm1260_vm5 = vcmask 719872  }
   0xe   : > { %545 = vmatpush.msra.mxu0 %v481_v1  ;;  %s6727_s23 = smul.u32 88, %s10077_s30  ;;  %v483_v19 = vld [vmem:[%s9974_s2] sm:$0xff]  ;;  %v484_v22 = vld [vmem:[%s9974_s2 + $0x8] sm:$0xff]  ;;  %v486_v28 = vld [vmem:[%s9974_s2 + $0x18] sm:$0xff]  ;;  %s6725_s17 = sshll.u32 %s10077_s30, 5 }
   0xf   : > { %642 = vmatpush.msra.mxu1 %v589_v12  ;;  %v487_v31 = vld [vmem:[%s9974_s2 + $0x20] sm:$0xff]  ;;  %v488_v34 = vld [vmem:[%s9974_s2 + $0x28] sm:$0xff]  ;;  %v489_v37 = vld [vmem:[%s9974_s2 + $0x30] sm:$0xff]  ;;  %s9953_s20 = scalar_lea.vmem %s9986_s14, %s6725_s17 }
  0x10   : > { %546 = vmatpush.msra.mxu0 %v480_v2  ;;  %s462_s26 = scalar_lea.vmem %s9972_s0, %s6727_s23  ;;  %v490_v40 = vld [vmem:[%s9974_s2 + $0x38] sm:$0xff]  ;;  %v491_v43 = vld [vmem:[%s9974_s2 + $0x40] sm:$0xff]  ;;  %v492_v46 = vld [vmem:[%s9974_s2 + $0x48] sm:$0xff] }
  0x11   : > { %v468_v4 = vld [vmem:[%s462_s26] sm:$0xff]  ;;  %v469_v5 = vld [vmem:[%s462_s26 + $0x8] sm:$0xff]  ;;  %v470_v6 = vld [vmem:[%s462_s26 + $0x10] sm:$0xff]  ;;  %643 = vmatpush.msra.mxu1 %v588_v17 }
  0x12   : > { %547 = vmatpush.msra.mxu0 %v479_v3  ;;  %v471_v7 = vld [vmem:[%s462_s26 + $0x18] sm:$0xff]  ;;  %v472_v8 = vld [vmem:[%s462_s26 + $0x20] sm:$0xff]  ;;  %v473_v9 = vld [vmem:[%s462_s26 + $0x28] sm:$0xff] }
  0x13   : > { %6291 = vmatmul.msk.f32.vlgmr.msra.gmra.mxu0 %vm494_vm1, %v468_v4  ;;  %v474_v10 = vld [vmem:[%s462_s26 + $0x30] sm:$0xff]  ;;  %v475_v13 = vld [vmem:[%s462_s26 + $0x38] sm:$0xff]  ;;  %v476_v14 = vld [vmem:[%s462_s26 + $0x40] sm:$0xff]  ;;  %644 = vmatpush.msra.mxu1 %v587_v18 }
  0x14   : > { %v477_v15 = vld [vmem:[%s462_s26 + $0x48] sm:$0xff]  ;;  %v478_v16 = vld [vmem:[%s462_s26 + $0x50] sm:$0xff]  ;;  %v6738_v52 = vld [vmem:[%s9976_s4] ss:$0 sm:$0xff] }
  0x15   : > { %v493_v49 = vld [vmem:[%s9974_s2 + $0x50] sm:$0xff] }
  0x1b   : > { %6292 = vmatmul.msk.f32.gmra.mxu0 %vm494_vm1, %v469_v5 }
  0x23   : > { %6293 = vmatmul.msk.f32.gmra.mxu0 %vm494_vm1, %v470_v6 }
  0x2b   : > { %6294 = vmatmul.msk.f32.gmra.mxu0 %vm494_vm1, %v471_v7 }
  0x33   : > { %6295 = vmatmul.msk.f32.gmra.mxu0 %vm494_vm1, %v472_v8 }
  0x3b   : > { %6296 = vmatmul.msk.f32.gmra.mxu0 %vm494_vm1, %v473_v9 }
  0x43   : > { %6297 = vmatmul.msk.f32.gmra.mxu0 %vm494_vm1, %v474_v10 }
  0x4b   : > { %6298 = vmatmul.msk.f32.gmra.mxu0 %vm494_vm1, %v475_v13 }
  0x53   : > { %6299 = vmatmul.msk.f32.gmra.mxu0 %vm494_vm1, %v476_v14 }
  0x5b   : > { %6300 = vmatmul.msk.f32.gmra.mxu0 %vm494_vm1, %v477_v15 }
  0x63   : > { %6301 = vmatmul.msk.f32.gmra.mxu0 %vm494_vm1, %v478_v16 }
  0x90   : > { %v549_v20 = vpop.f32.mrf.mxu0 }
  0x91   : > { %v7334_v21 = vadd.f32 %v549_v20, %v483_v19 }
  0x93   : > { %10017 = vst [vmem:[#allocation2_spill] sm:$0xff] %v7334_v21  ;;  %6302 = vmatmul.msk.f32.vlgmr.msra.gmra.mxu1 %vm595_vm2, %v7334_v21 }
  0x98   : > { %v552_v23 = vpop.f32.mrf.mxu0 }
  0x99   : > { %v7341_v24 = vadd.f32 %v552_v23, %v484_v22 }
  0x9b   : > { %10018 = vst [vmem:[#allocation3_spill] sm:$0xff] %v7341_v24  ;;  %6303 = vmatmul.msk.f32.gmra.mxu1 %vm595_vm2, %v7341_v24 }
  0xa0   : > { %v555_v26 = vpop.f32.mrf.mxu0 }
  0xa1   : > { %v7348_v27 = vadd.f32 %v555_v26, %v485_v25 }
  0xa3   : > { %10019 = vst [vmem:[#allocation4_spill] sm:$0xff] %v7348_v27  ;;  %6304 = vmatmul.msk.f32.gmra.mxu1 %vm595_vm2, %v7348_v27 }
  0xa8   : > { %v558_v29 = vpop.f32.mrf.mxu0 }
  0xa9   : > { %v7355_v30 = vadd.f32 %v558_v29, %v486_v28 }
  0xab   : > { %10020 = vst [vmem:[#allocation5_spill] sm:$0xff] %v7355_v30  ;;  %6305 = vmatmul.msk.f32.gmra.mxu1 %vm595_vm2, %v7355_v30 }
  0xb0   : > { %v561_v32 = vpop.f32.mrf.mxu0 }
  0xb1   : > { %v7362_v33 = vadd.f32 %v561_v32, %v487_v31 }
  0xb3   : > { %10021 = vst [vmem:[#allocation6_spill] sm:$0xff] %v7362_v33  ;;  %6306 = vmatmul.msk.f32.gmra.mxu1 %vm595_vm2, %v7362_v33 }
  0xb8   : > { %v564_v35 = vpop.f32.mrf.mxu0 }
  0xb9   : > { %v7369_v36 = vadd.f32 %v564_v35, %v488_v34 }
  0xbb   : > { %10022 = vst [vmem:[#allocation7_spill] sm:$0xff] %v7369_v36  ;;  %6307 = vmatmul.msk.f32.gmra.mxu1 %vm595_vm2, %v7369_v36 }
  0xc0   : > { %v567_v38 = vpop.f32.mrf.mxu0 }
  0xc1   : > { %v7376_v39 = vadd.f32 %v567_v38, %v489_v37 }
  0xc3   : > { %10023 = vst [vmem:[#allocation8_spill] sm:$0xff] %v7376_v39  ;;  %6308 = vmatmul.msk.f32.gmra.mxu1 %vm595_vm2, %v7376_v39 }
  0xc8   : > { %v570_v41 = vpop.f32.mrf.mxu0 }
  0xc9   : > { %v7383_v42 = vadd.f32 %v570_v41, %v490_v40 }
  0xcb   : > { %10024 = vst [vmem:[#allocation9_spill] sm:$0xff] %v7383_v42  ;;  %6309 = vmatmul.msk.f32.gmra.mxu1 %vm595_vm2, %v7383_v42 }
  0xd0   : > { %v573_v44 = vpop.f32.mrf.mxu0 }
  0xd1   : > { %v7390_v45 = vadd.f32 %v573_v44, %v491_v43 }
  0xd3   : > { %10025 = vst [vmem:[#allocation10_spill] sm:$0xff] %v7390_v45  ;;  %6310 = vmatmul.msk.f32.gmra.mxu1 %vm595_vm2, %v7390_v45 }
  0xd8   : > { %v576_v47 = vpop.f32.mrf.mxu0 }
  0xd9   : > { %v7397_v48 = vadd.f32 %v576_v47, %v492_v46 }
  0xdb   : > { %10026 = vst [vmem:[#allocation11_spill] sm:$0xff] %v7397_v48  ;;  %6311 = vmatmul.msk.f32.gmra.mxu1 %vm595_vm2, %v7397_v48 }
  0xe0   : > { %v579_v50 = vpop.f32.mrf.mxu0 }
  0xe1   : > { %v7404_v51 = vadd.f32 %v579_v50, %v493_v49 }
  0xe3   : > { %10027 = vst [vmem:[#allocation12_spill] sm:$0xff] %v7404_v51  ;;  %6312 = vmatmul.msk.f32.gmra.mxu1 %vm595_vm2, %v7404_v51 }
 0x110   : > { %v646_v53 = vpop.f32.mrf.mxu1 }
 0x111   : > { %v647_v54 = vadd.f32 %v6738_v52, %v646_v53 }
 0x113   : > { %679 = vxpose.xlu0.b32.start [1/11] (short) (narrow) %v647_v54, 96  ;;  %v9987_v54 = vlaneseq }
 0x118   : > { %v649_v55 = vpop.f32.mrf.mxu1 }
 0x119   : > { %v650_v56 = vadd.f32 %v6738_v52, %v649_v55  ;;  %v7435_v55 = vand.u32 127, %v9987_v54 }
 0x11b   : > { %680 = vxpose.xlu0.b32.cont [2/11] (short) (narrow) %v650_v56, 96  ;;  %10028 = vst [vmem:[#allocation13_spill] sm:$0xff] %v7435_v55  ;;  %vm584_vm4 = vcmp.ge.s32.totalorder %v7435_v55, 87 }
 0x120   : > { %v652_v57 = vpop.f32.mrf.mxu1 }
 0x121   : > { %v653_v58 = vadd.f32 %v6738_v52, %v652_v57 }
 0x123   : > { %681 = vxpose.xlu0.b32.cont [3/11] (short) (narrow) %v653_v58, 96 }
 0x128   : > { %v655_v59 = vpop.f32.mrf.mxu1 }
 0x129   : > { %v656_v60 = vadd.f32 %v6738_v52, %v655_v59  ;;  %v7205_v59 = vmov 0.0  }
 0x12b   : > { %682 = vxpose.xlu0.b32.cont [4/11] (short) (narrow) %v656_v60, 96  ;;  %v7440_v60 = vsel %vm584_vm4, -1e+09, %v7205_v59 }
 0x130   : > { %v658_v61 = vpop.f32.mrf.mxu1 }
 0x131   : > { %v659_v62 = vadd.f32 %v6738_v52, %v658_v61 }
 0x133   : > { %683 = vxpose.xlu0.b32.cont [5/11] (short) (narrow) %v659_v62, 96 }
 0x138   : > { %v661_v63 = vpop.f32.mrf.mxu1 }
 0x139   : > { %v662_v0 = vadd.f32 %v6738_v52, %v661_v63 }
 0x13b   : > { %684 = vxpose.xlu0.b32.cont [6/11] (short) (narrow) %v662_v0, 96 }
 0x140   : > { %v664_v1 = vpop.f32.mrf.mxu1 }
 0x141   : > { %v665_v2 = vadd.f32 %v6738_v52, %v664_v1 }
 0x143   : > { %685 = vxpose.xlu0.b32.cont [7/11] (short) (narrow) %v665_v2, 96 }
 0x148   : > { %v667_v3 = vpop.f32.mrf.mxu1 }
 0x149   : > { %v668_v4 = vadd.f32 %v6738_v52, %v667_v3 }
 0x14b   : > { %686 = vxpose.xlu0.b32.cont [8/11] (short) (narrow) %v668_v4, 96 }
 0x150   : > { %v670_v5 = vpop.f32.mrf.mxu1 }
 0x151   : > { %v671_v6 = vadd.f32 %v6738_v52, %v670_v5 }
 0x153   : > { %687 = vxpose.xlu0.b32.cont [9/11] (short) (narrow) %v671_v6, 96 }
 0x158   : > { %v673_v7 = vpop.f32.mrf.mxu1 }
 0x159   : > { %v674_v8 = vadd.f32 %v6738_v52, %v673_v7 }
 0x15b   : > { %688 = vxpose.xlu0.b32.cont [10/11] (short) (narrow) %v674_v8, 96 }
 0x160   : > { %v676_v9 = vpop.f32.mrf.mxu1 }
 0x161   : > { %v677_v10 = vadd.f32 %v6738_v52, %v676_v9 }
 0x163   : > { %689 = vxpose.xlu0.b32.end [11/11] (short) (narrow) %v677_v10, 96 }
 0x1b7   : > { %v695_v11 = vpop.trf.xlu0 }
 0x1b8   : > { %711 = vxpose.xlu1.b32.start.end [1/1] (short) (narrow) %v695_v11, 88 }
 0x1bf   : > { %v696_v12 = vpop.trf.xlu0 }
 0x1c7   : > { %v697_v13 = vpop.trf.xlu0 }
 0x1c8   : > { %775 = vxpose.xlu2.b32.start.end [1/1] (short) (narrow) %v697_v13, 88 }
 0x1cf   : > { %v698_v14 = vpop.trf.xlu0 }
 0x1d7   : > { %v699_v15 = vpop.trf.xlu0 }
 0x1d8   : > { %888 = vmatpush.msra.mxu2 %v699_v15  ;;  %6726 = vmatpush.msra.mxu3 %v699_v15 }
 0x1df   : > { %v700_v16 = vpop.trf.xlu0 }
 0x1e0   : > { %971 = vmatpush.msrb.mxu3 %v700_v16 }
 0x1e7   : > { %v701_v17 = vpop.trf.xlu0 }
 0x1e8   : > { %1054 = vmatpush.msrb.mxu2 %v701_v17 }
 0x1ef   : > { %v702_v35 = vpop.trf.xlu0 }
 0x210   : > { %743 = vxpose.xlu1.b32.start.end [1/1] (short) (narrow) %v696_v12, 88 }
 0x220   : > { %807 = vxpose.xlu2.b32.start.end [1/1] (short) (narrow) %v698_v14, 88 }
 0x25c   : > { %v727_v18 = vpop.trf.xlu1 }
 0x25d   : > { %6313 = vmatmul.msk.f32.vlgmr.msra.gmra.mxu2 %vm839_vm3, %v727_v18 }
 0x261   : > { %v791_v28 = vpop.trf.xlu2 }
 0x264   : > { %v728_v19 = vpop.trf.xlu1 }
 0x265   : > { %6314 = vmatmul.msk.f32.gmra.mxu2 %vm839_vm3, %v728_v19 }
 0x269   : > { %v792_v31 = vpop.trf.xlu2 }
 0x26c   : > { %v729_v20 = vpop.trf.xlu1 }
 0x26d   : > { %6315 = vmatmul.msk.f32.gmra.mxu2 %vm839_vm3, %v729_v20 }
 0x271   : > { %v793_v34 = vpop.trf.xlu2 }
 0x274   : > { %v730_v22 = vpop.trf.xlu1 }
 0x275   : > { %6316 = vmatmul.msk.f32.gmra.mxu2 %vm839_vm3, %v730_v22 }
 0x279   : > { %v794_v40 = vpop.trf.xlu2 }
 0x27c   : > { %v731_v23 = vpop.trf.xlu1 }
 0x27d   : > { %6317 = vmatmul.msk.f32.gmra.mxu2 %vm839_vm3, %v731_v23 }
 0x281   : > { %v795_v43 = vpop.trf.xlu2 }
 0x284   : > { %v732_v25 = vpop.trf.xlu1 }
 0x285   : > { %6318 = vmatmul.msk.f32.gmra.mxu2 %vm839_vm3, %v732_v25 }
 0x289   : > { %v796_v46 = vpop.trf.xlu2 }
 0x28c   : > { %v733_v26 = vpop.trf.xlu1 }
 0x28d   : > { %6319 = vmatmul.msk.f32.gmra.mxu2 %vm839_vm3, %v733_v26 }
 0x291   : > { %v797_v49 = vpop.trf.xlu2 }
 0x294   : > { %v734_v29 = vpop.trf.xlu1 }
 0x295   : > { %6320 = vmatmul.msk.f32.gmra.mxu2 %vm839_vm3, %v734_v29 }
 0x299   : > { %v798_v52 = vpop.trf.xlu2 }
 0x29c   : > { %v735_v32 = vpop.trf.xlu1 }
 0x29d   : > { %6321 = vmatmul.msk.f32.gmra.mxu2 %vm839_vm3, %v735_v32 }
 0x2a1   : > { %v799_v57 = vpop.trf.xlu2 }
 0x2a4   : > { %v736_v37 = vpop.trf.xlu1 }
 0x2a5   : > { %6322 = vmatmul.msk.f32.vlgmr.msra.gmra.mxu3 %vm839_vm3, %v736_v37  ;;  %6335 = vmatmul.msk.f32.vlgmr.msrb.gmra.mxu2 %vm839_vm3, %v791_v28 }
 0x2a6   : > { %1137 = vmatpush.msra.mxu3 %v702_v35 }
 0x2a9   : > { %v800_v1 = vpop.trf.xlu2 }
 0x2ac   : > { %v737_v38 = vpop.trf.xlu1 }
 0x2ad   : > { %6323 = vmatmul.msk.f32.gmra.mxu3 %vm839_vm3, %v737_v38  ;;  %6336 = vmatmul.msk.f32.gmra.mxu2 %vm839_vm3, %v792_v31 }
 0x2b1   : > { %v801_v7 = vpop.trf.xlu2 }
 0x2b4   : > { %v759_v41 = vpop.trf.xlu1 }
 0x2b5   : > { %6324 = vmatmul.msk.f32.vlgmr.msrb.gmra.mxu3 %vm839_vm3, %v759_v41  ;;  %6337 = vmatmul.msk.f32.gmra.mxu2 %vm839_vm3, %v793_v34 }
 0x2b9   : > { %v823_v15 = vpop.trf.xlu2 }
 0x2bc   : > { %v760_v44 = vpop.trf.xlu1 }
 0x2bd   : > { %6325 = vmatmul.msk.f32.gmra.mxu3 %vm839_vm3, %v760_v44  ;;  %6338 = vmatmul.msk.f32.gmra.mxu2 %vm839_vm3, %v794_v40 }
 0x2c1   : > { %v824_v23 = vpop.trf.xlu2 }
 0x2c4   : > { %v761_v47 = vpop.trf.xlu1 }
 0x2c5   : > { %6326 = vmatmul.msk.f32.gmra.mxu3 %vm839_vm3, %v761_v47  ;;  %6339 = vmatmul.msk.f32.gmra.mxu2 %vm839_vm3, %v795_v43 }
 0x2c9   : > { %v825_v34 = vpop.trf.xlu2 }
 0x2cc   : > { %v762_v50 = vpop.trf.xlu1 }
 0x2cd   : > { %6327 = vmatmul.msk.f32.gmra.mxu3 %vm839_vm3, %v762_v50  ;;  %6340 = vmatmul.msk.f32.gmra.mxu2 %vm839_vm3, %v796_v46  ;;  %v703_v46 = vpop.trf.xlu0 }
 0x2ce   : > { %6357 = vmatpush.xpose.msk.msrb.mxu0 %vm1260_vm5, %v703_v46 }
 0x2d1   : > { %v826_v41 = vpop.trf.xlu2 }
 0x2d4   : > { %v763_v53 = vpop.trf.xlu1 }
 0x2d5   : > { %6328 = vmatmul.msk.f32.gmra.mxu3 %vm839_vm3, %v763_v53  ;;  %6341 = vmatmul.msk.f32.gmra.mxu2 %vm839_vm3, %v797_v49 }
 0x2d9   : > { %v827_v53 = vpop.trf.xlu2 }
 0x2dc   : > { %v764_v56 = vpop.trf.xlu1 }
 0x2dd   : > { %6329 = vmatmul.msk.f32.gmra.mxu3 %vm839_vm3, %v764_v56  ;;  %6342 = vmatmul.msk.f32.gmra.mxu2 %vm839_vm3, %v798_v52  ;;  %v704_v56 = vpop.trf.xlu0 }
 0x2de   : > { %6369 = vmatpush.xpose.msk.msrb.mxu1 %vm1260_vm5, %v704_v56 }
 0x2e0   : > { %v890_v58 = vpop.f32.mrf.mxu2 }
 0x2e1   : > { %v1172_v61 = vmul.f32 0.35355338, %v890_v58 }
 0x2e3   : > { %v7443_v62 = vadd.f32 %v1172_v61, %v7440_v60 }
 0x2e4   : > { %v765_v63 = vpop.trf.xlu1 }
 0x2e5   : > { %6330 = vmatmul.msk.f32.gmra.mxu3 %vm839_vm3, %v765_v63  ;;  %v1261_v0 = vsel %vm1260_vm5, %v7443_v62, -inf  ;;  %6343 = vmatmul.msk.f32.gmra.mxu2 %vm839_vm3, %v799_v57 }
 0x2e6   : > { %1262 = vmax.xlane.f32.xlu0 %v1261_v0 }
 0x2e8   : > { %v893_v2 = vpop.f32.mrf.mxu2 }
 0x2e9   : > { %v1173_v3 = vmul.f32 0.35355338, %v893_v2 }
 0x2eb   : > { %v7450_v4 = vadd.f32 %v1173_v3, %v7440_v60 }
 0x2ec   : > { %v766_v5 = vpop.trf.xlu1 }
 0x2ed   : > { %6331 = vmatmul.msk.f32.gmra.mxu3 %vm839_vm3, %v766_v5  ;;  %v1264_v6 = vsel %vm1260_vm5, %v7450_v4, -inf  ;;  %6344 = vmatmul.msk.f32.gmra.mxu2 %vm839_vm3, %v800_v1  ;;  %v705_v1 = vpop.trf.xlu0  ;;  %v828_v5 = vpop.trf.xlu2 }
 0x2ee   : > { %1265 = vmax.xlane.f32.xlu0 %v1264_v6  ;;  %6381 = vmatpush.xpose.msk.msra.mxu2 %vm1260_vm5, %v705_v1 }
 0x2f0   : > { %v896_v8 = vpop.f32.mrf.mxu2 }
 0x2f1   : > { %v1174_v9 = vmul.f32 0.35355338, %v896_v8 }
 0x2f3   : > { %v7457_v10 = vadd.f32 %v1174_v9, %v7440_v60 }
 0x2f4   : > { %v767_v11 = vpop.trf.xlu1 }
 0x2f5   : > { %6332 = vmatmul.msk.f32.gmra.mxu3 %vm839_vm3, %v767_v11  ;;  %v1267_v12 = vsel %vm1260_vm5, %v7457_v10, -inf  ;;  %6345 = vmatmul.msk.f32.gmra.mxu2 %vm839_vm3, %v801_v7 }
 0x2f6   : > { %1268 = vmax.xlane.f32.xlu1 %v1267_v12  ;;  %v706_v12 = vpop.trf.xlu0 }
 0x2f7   : > { %6393 = vmatpush.xpose.msk.msrb.mxu3 %vm1260_vm5, %v706_v12 }
 0x2f8   : > { %v899_v13 = vpop.f32.mrf.mxu2 }
 0x2f9   : > { %v1175_v14 = vmul.f32 0.35355338, %v899_v13 }
 0x2fb   : > { %v7464_v16 = vadd.f32 %v1175_v14, %v7440_v60  ;;  %v829_v14 = vpop.trf.xlu2 }
 0x2fc   : > { %v768_v17 = vpop.trf.xlu1 }
 0x2fd   : > { %6333 = vmatmul.msk.f32.gmra.mxu3 %vm839_vm3, %v768_v17  ;;  %v1270_v18 = vsel %vm1260_vm5, %v7464_v16, -inf }
 0x2fe   : > { %1271 = vmax.xlane.f32.xlu1 %v1270_v18 }
 0x300   : > { %v902_v19 = vpop.f32.mrf.mxu2 }
 0x301   : > { %v1176_v20 = vmul.f32 0.35355338, %v902_v19 }
 0x303   : > { %v7470_v22 = vadd.f32 %v1176_v20, %v7440_v60 }
 0x304   : > { %v769_v25 = vpop.trf.xlu1 }
 0x305   : > { %6334 = vmatmul.msk.f32.gmra.mxu3 %vm839_vm3, %v769_v25  ;;  %v1273_v26 = vsel %vm1260_vm5, %v7470_v22, -inf }
 0x306   : > { %1274 = vmax.xlane.f32.xlu0 %v1273_v26  ;;  %v830_v26 = vpop.trf.xlu2 }
 0x308   : > { %v905_v28 = vpop.f32.mrf.mxu2 }
 0x309   : > { %v1177_v29 = vmul.f32 0.35355338, %v905_v28 }
 0x30b   : > { %v7476_v31 = vadd.f32 %v1177_v29, %v7440_v60 }
 0x30d   : > { %6346 = vmatmul.msk.f32.vlgmr.msra.gmra.mxu3 %vm839_vm3, %v823_v15  ;;  %v1276_v32 = vsel %vm1260_vm5, %v7476_v31, -inf }
 0x30e   : > { %1277 = vmax.xlane.f32.xlu2 %v1276_v32 }
 0x310   : > { %v908_v35 = vpop.f32.mrf.mxu2 }
 0x311   : > { %v1178_v37 = vmul.f32 0.35355338, %v908_v35 }
 0x313   : > { %v7482_v38 = vadd.f32 %v1178_v37, %v7440_v60  ;;  %v831_v37 = vpop.trf.xlu2 }
 0x315   : > { %6347 = vmatmul.msk.f32.gmra.mxu3 %vm839_vm3, %v824_v23  ;;  %v1279_v40 = vsel %vm1260_vm5, %v7482_v38, -inf }
 0x316   : > { %1280 = vmax.xlane.f32.xlu2 %v1279_v40 }
 0x318   : > { %v911_v43 = vpop.f32.mrf.mxu2 }
 0x319   : > { %v1179_v44 = vmul.f32 0.35355338, %v911_v43 }
 0x31b   : > { %v7489_v47 = vadd.f32 %v1179_v44, %v7440_v60 }
 0x31d   : > { %6348 = vmatmul.msk.f32.gmra.mxu3 %vm839_vm3, %v825_v34  ;;  %v1282_v49 = vsel %vm1260_vm5, %v7489_v47, -inf }
 0x31e   : > { %1283 = vmax.xlane.f32.xlu0 %v1282_v49 }
 0x320   : > { %v914_v50 = vpop.f32.mrf.mxu2 }
 0x321   : > { %v1180_v52 = vmul.f32 0.35355338, %v914_v50  ;;  %v832_v50 = vpop.trf.xlu2 }
 0x323   : > { %v7496_v57 = vadd.f32 %v1180_v52, %v7440_v60 }
 0x325   : > { %6349 = vmatmul.msk.f32.gmra.mxu3 %vm839_vm3, %v826_v41  ;;  %v1285_v58 = vsel %vm1260_vm5, %v7496_v57, -inf }
 0x326   : > { %1286 = vmax.xlane.f32.xlu1 %v1285_v58 }
 0x328   : > { %v917_v59 = vpop.f32.mrf.mxu3  ;;  %v1056_v61 = vpop.f32.mrf.mxu2 }
 0x329   : > { %v1181_v63 = vmul.f32 0.35355338, %v917_v59  ;;  %v1194_v0 = vmul.f32 0.35355338, %v1056_v61 }
 0x32b   : > { %v7503_v2 = vadd.f32 %v1181_v63, %v7440_v60  ;;  %v7506_v3 = vadd.f32 %v1194_v0, %v7440_v60 }
 0x32d   : > { %6350 = vmatmul.msk.f32.gmra.mxu3 %vm839_vm3, %v827_v53  ;;  %v1288_v6 = vsel %vm1260_vm5, %v7503_v2, -inf  ;;  %v1327_v7 = vsel %vm1260_vm5, %v7506_v3, -inf }
 0x32e   : > { %1289 = vmax.xlane.f32.xlu2 %v1288_v6  ;;  %1328 = vmax.xlane.f32.xlu0 %v1327_v7 }
 0x330   : > { %v7513_v8 = vpop.f32.mrf.mxu3  ;;  %v1059_v9 = vpop.f32.mrf.mxu2 }
 0x331   : > { %v1195_v11 = vmul.f32 0.35355338, %v1059_v9  ;;  %v833_v9 = vpop.trf.xlu2 }
 0x333   : > { %v7517_v13 = vadd.f32 %v1195_v11, %v7440_v60 }
 0x335   : > { %6351 = vmatmul.msk.f32.gmra.mxu3 %vm839_vm3, %v828_v5  ;;  %v1330_v15 = vsel %vm1260_vm5, %v7517_v13, -inf }
 0x336   : > { %1331 = vmax.xlane.f32.xlu2 %v1330_v15 }
 0x338   : > { %v973_v17 = vpop.f32.mrf.mxu3  ;;  %v1062_v18 = vpop.f32.mrf.mxu2 }
 0x339   : > { %v1183_v19 = vmul.f32 0.35355338, %v973_v17  ;;  %v1196_v20 = vmul.f32 0.35355338, %v1062_v18 }
 0x33b   : > { %v7523_v23 = vadd.f32 %v1183_v19, %v7440_v60  ;;  %v7529_v28 = vadd.f32 %v1196_v20, %v7440_v60 }
 0x33d   : > { %v1294_v25 = vsel %vm1260_vm5, %v7523_v23, -inf  ;;  %6352 = vmatmul.msk.f32.gmra.mxu3 %vm839_vm3, %v829_v14  ;;  %v1333_v34 = vsel %vm1260_vm5, %v7529_v28, -inf }
 0x33e   : > { %1295 = vmax.xlane.f32.xlu0 %v1294_v25 }
 0x340   : > { %v976_v29 = vpop.f32.mrf.mxu3  ;;  %v1065_v32 = vpop.f32.mrf.mxu2 }
 0x341   : > { %v1184_v35 = vmul.f32 0.35355338, %v976_v29  ;;  %v1197_v44 = vmul.f32 0.35355338, %v1065_v32 }
 0x343   : > { %v7535_v43 = vadd.f32 %v1184_v35, %v7440_v60  ;;  %v7541_v49 = vadd.f32 %v1197_v44, %v7440_v60 }
 0x345   : > { %6353 = vmatmul.msk.f32.gmra.mxu3 %vm839_vm3, %v830_v26  ;;  %v1297_v46 = vsel %vm1260_vm5, %v7535_v43, -inf  ;;  %v1336_v58 = vsel %vm1260_vm5, %v7541_v49, -inf }
 0x346   : > { %1334 = vmax.xlane.f32.xlu0 %v1333_v34 }
 0x348   : > { %v979_v40 = vpop.f32.mrf.mxu3  ;;  %v1068_v41 = vpop.f32.mrf.mxu2 }
 0x349   : > { %v1185_v61 = vmul.f32 0.35355338, %v979_v40  ;;  %v1198_v14 = vmul.f32 0.35355338, %v1068_v41 }
 0x34b   : > { %v7552_v7 = vadd.f32 %v1185_v61, %v7440_v60  ;;  %v7564_v29 = vadd.f32 %v1198_v14, %v7440_v60 }
 0x34d   : > { %6354 = vmatmul.msk.f32.gmra.mxu3 %vm839_vm3, %v831_v37  ;;  %v1300_v17 = vsel %vm1260_vm5, %v7552_v7, -inf  ;;  %v1339_v37 = vsel %vm1260_vm5, %v7564_v29, -inf }
 0x34e   : > { %1298 = vmax.xlane.f32.xlu0 %v1297_v46 }
 0x350   : > { %v982_v52 = vpop.f32.mrf.mxu3  ;;  %v1071_v53 = vpop.f32.mrf.mxu2 }
 0x351   : > { %v1199_v56 = vmul.f32 0.35355338, %v1071_v53  ;;  %v1186_v34 = vmul.f32 0.35355338, %v982_v52 }
 0x353   : > { %v7546_v59 = vadd.f32 %v1199_v56, %v7440_v60  ;;  %v7575_v44 = vadd.f32 %v1186_v34, %v7440_v60 }
 0x355   : > { %v1342_v63 = vsel %vm1260_vm5, %v7546_v59, -inf  ;;  %6355 = vmatmul.msk.f32.gmra.mxu3 %vm839_vm3, %v832_v50  ;;  %v1303_v52 = vsel %vm1260_vm5, %v7575_v44, -inf }
 0x356   : > { %1337 = vmax.xlane.f32.xlu0 %v1336_v58  ;;  %1343 = vmax.xlane.f32.xlu1 %v1342_v63 }
 0x358   : > { %v985_v0 = vpop.f32.mrf.mxu3  ;;  %v1074_v1 = vpop.f32.mrf.mxu2 }
 0x359   : > { %v1187_v5 = vmul.f32 0.35355338, %v985_v0  ;;  %v1263_v6 = vpop.xlane.xlu0 %1262  ;;  %v1200_v53 = vmul.f32 0.35355338, %v1074_v1 }
 0x35a   : > { %v1393_v12 = vsub.f32 %v7443_v62, %v1263_v6 }
 0x35b   : > { %v7555_v11 = vadd.f32 %v1187_v5, %v7440_v60  ;;  %v7588_v6 = vadd.f32 %v1200_v53, %v7440_v60 }
 0x35c   : > { %v1437_v18 = vmul.f32 1.442695, %v1393_v12 }
 0x35d   : > { %v1306_v15 = vsel %vm1260_vm5, %v7555_v11, -inf  ;;  %6356 = vmatmul.msk.f32.gmra.mxu3 %vm839_vm3, %v833_v9 }
 0x35e   : > { %1307 = vmax.xlane.f32.xlu2 %v1306_v15  ;;  %1301 = vmax.xlane.f32.xlu0 %v1300_v17  ;;  %6743 = vpow2.f32 %v1437_v18 }
 0x360   : > { %v988_v19 = vpop.f32.mrf.mxu3  ;;  %v1077_v20 = vpop.f32.mrf.mxu2 }
 0x361   : > { %v1188_v25 = vmul.f32 0.35355338, %v988_v19  ;;  %v1266_v26 = vpop.xlane.xlu0 %1265  ;;  %v1201_v18 = vmul.f32 0.35355338, %v1077_v20  ;;  %v1345_v19 = vsel %vm1260_vm5, %v7588_v6, -inf }
 0x362   : > { %v1394_v62 = vsub.f32 %v7450_v4, %v1266_v26 }
 0x363   : > { %v7568_v32 = vadd.f32 %v1188_v25, %v7440_v60  ;;  %v7610_v20 = vadd.f32 %v1201_v18, %v7440_v60 }
 0x364   : > { %v1439_v35 = vmul.f32 1.442695, %v1394_v62  ;;  %v7577_v46 = vpop.eup %6743 }
 0x365   : > { %v1309_v40 = vsel %vm1260_vm5, %v7568_v32, -inf  ;;  %v1525_v58 = vsel %vm1260_vm5, %v7577_v46, 0.0 }
 0x366   : > { %6745 = vpow2.f32 %v1439_v35  ;;  %1340 = vmax.xlane.f32.xlu0 %v1339_v37  ;;  %1310 = vmax.xlane.f32.xlu1 %v1309_v40 }
 0x368   : > { %v991_v41 = vpop.f32.mrf.mxu3  ;;  %v1080_v4 = vpop.f32.mrf.mxu2 }
 0x369   : > { %v1189_v56 = vmul.f32 0.35355338, %v991_v41  ;;  %v1269_v0 = vpop.xlane.xlu1 %1268  ;;  %v1202_v12 = vmul.f32 0.35355338, %v1080_v4  ;;  %v1348_v41 = vsel %vm1260_vm5, %v7610_v20, -inf }
 0x36a   : > { %v1395_v15 = vsub.f32 %v7457_v10, %v1269_v0 }
 0x36b   : > { %v7591_v9 = vadd.f32 %v1189_v56, %v7440_v60  ;;  %v7604_v62 = vadd.f32 %v1202_v12, %v7440_v60 }
 0x36c   : > { %v7579_v50 = vpop.eup %6745  ;;  %v1441_v34 = vmul.f32 1.442695, %v1395_v15 }
 0x36d   : > { %v1528_v61 = vsel %vm1260_vm5, %v7579_v50, 0.0  ;;  %v1312_v25 = vsel %vm1260_vm5, %v7591_v9, -inf  ;;  %v1351_v37 = vsel %vm1260_vm5, %v7604_v62, -inf }
 0x36e   : > { %1304 = vmax.xlane.f32.xlu0 %v1303_v52  ;;  %1526 = vadd.xlane.f32.xlu1 %v1525_v58  ;;  %6747 = vpow2.f32 %v1441_v34 }
 0x36f   : > { %1529 = vadd.xlane.f32.xlu2 %v1528_v61 }
 0x370   : > { %v994_v63 = vpop.f32.mrf.mxu3  ;;  %v1083_v1 = vpop.f32.mrf.mxu2 }
 0x371   : > { %v1190_v5 = vmul.f32 0.35355338, %v994_v63  ;;  %v1203_v17 = vmul.f32 0.35355338, %v1083_v1 }
 0x373   : > { %v7594_v14 = vadd.f32 %v1190_v5, %v7440_v60  ;;  %v7607_v10 = vadd.f32 %v1203_v17, %v7440_v60  ;;  %v1272_v5 = vpop.xlane.xlu1 %1271 }
 0x374   : > { %v7618_v53 = vpop.eup %6747  ;;  %v1396_v15 = vsub.f32 %v7464_v16, %v1272_v5 }
 0x375   : > { %v1315_v26 = vsel %vm1260_vm5, %v7594_v14, -inf  ;;  %v1354_v40 = vsel %vm1260_vm5, %v7607_v10, -inf  ;;  %v1531_v61 = vsel %vm1260_vm5, %v7618_v53, 0.0 }
 0x376   : > { %1346 = vmax.xlane.f32.xlu0 %v1345_v19  ;;  %1313 = vmax.xlane.f32.xlu1 %v1312_v25  ;;  %v1443_v25 = vmul.f32 1.442695, %v1396_v15 }
 0x377   : > { %1316 = vmax.xlane.f32.xlu2 %v1315_v26 }
 0x378   : > { %v997_v35 = vpop.f32.mrf.mxu3  ;;  %v1086_v12 = vpop.f32.mrf.mxu2  ;;  %6749 = vpow2.f32 %v1443_v25 }
 0x379   : > { %v1191_v58 = vmul.f32 0.35355338, %v997_v35  ;;  %v1204_v17 = vmul.f32 0.35355338, %v1086_v12  ;;  %v7637_v34 = vpop.xlane.xlu0 %1274 }
 0x37b   : > { %v7630_v1 = vadd.f32 %v1191_v58, %v7440_v60 }
 0x37d   : > { %v1318_v18 = vsel %vm1260_vm5, %v7630_v1, -inf }
 0x37e   : > { %1349 = vmax.xlane.f32.xlu0 %v1348_v41  ;;  %1352 = vmax.xlane.f32.xlu1 %v1351_v37  ;;  %v7640_v37 = vadd.f32 %v1204_v17, %v7440_v60 }
 0x37f   : > { %1355 = vmax.xlane.f32.xlu2 %v1354_v40 }
 0x380   : > { %v1000_v4 = vpop.f32.mrf.mxu3  ;;  %v1357_v16 = vsel %vm1260_vm5, %v7640_v37, -inf }
 0x381   : > { %v1192_v52 = vmul.f32 0.35355338, %v1000_v4  ;;  %v7635_v19 = vpop.xlane.xlu2 %1277 }
 0x383   : > { %v7621_v56 = vadd.f32 %v1192_v52, %v7440_v60 }
 0x385   : > { %10029 = vst [vmem:[#allocation14_spill] sm:$0xff] %v7621_v56  ;;  %v1321_v63 = vsel %vm1260_vm5, %v7621_v56, -inf }
 0x386   : > { %1532 = vadd.xlane.f32.xlu0 %v1531_v61  ;;  %1322 = vmax.xlane.f32.xlu1 %v1321_v63  ;;  %v7653_v63 = vpop.eup %6749 }
 0x387   : > { %v1534_v15 = vsel %vm1260_vm5, %v7653_v63, 0.0 }
 0x388   : > { %v7627_v0 = vpop.f32.mrf.mxu3 }
 0x389   : > { %v7649_v52 = vpop.xlane.xlu2 %1280 }
 0x38e   : > { %1319 = vmax.xlane.f32.xlu0 %v1318_v18 }
 0x390   : > { %v1139_v26 = vpop.f32.mrf.mxu3 }
 0x391   : > { %v1205_v35 = vmul.f32 0.35355338, %v1139_v26  ;;  %v7651_v58 = vpop.xlane.xlu0 %1283 }
 0x393   : > { %v7643_v40 = vadd.f32 %v1205_v35, %v7440_v60 }
 0x395   : > { %v1360_v41 = vsel %vm1260_vm5, %v7643_v40, -inf }
 0x396   : > { %1358 = vmax.xlane.f32.xlu0 %v1357_v16  ;;  %1361 = vmax.xlane.f32.xlu1 %v1360_v41 }
 0x398   : > { %v1142_v4 = vpop.f32.mrf.mxu3 }
 0x399   : > { %v1206_v61 = vmul.f32 0.35355338, %v1142_v4 }
 0x39b   : > { %v7656_v5 = vadd.f32 %v1206_v61, %v7440_v60 }
 0x39d   : > { %v1363_v12 = vsel %vm1260_vm5, %v7656_v5, -inf }
 0x39e   : > { %1364 = vmax.xlane.f32.xlu0 %v1363_v12  ;;  %1535 = vadd.xlane.f32.xlu1 %v1534_v15 }
 0x3a0   : > { %v1145_v17 = vpop.f32.mrf.mxu3 }
 0x3a1   : > { %v1207_v18 = vmul.f32 0.35355338, %v1145_v17  ;;  %v7662_v25 = vpop.xlane.xlu2 %1289  ;;  %v1329_v26 = vpop.xlane.xlu0 %1328 }
 0x3a2   : > { %v1415_v35 = vsub.f32 %v7506_v3, %v1329_v26 }
 0x3a3   : > { %v7666_v16 = vadd.f32 %v1207_v18, %v7440_v60 }
 0x3a4   : > { %v1481_v41 = vmul.f32 1.442695, %v1415_v35 }
 0x3a5   : > { %v1366_v4 = vsel %vm1260_vm5, %v7666_v16, -inf }
 0x3a6   : > { %1367 = vmax.xlane.f32.xlu0 %v1366_v4  ;;  %6751 = vpow2.f32 %v1481_v41 }
 0x3a8   : > { %v1148_v61 = vpop.f32.mrf.mxu3 }
 0x3a9   : > { %v1208_v54 = vmul.f32 0.35355338, %v1148_v61  ;;  %v1332_v12 = vpop.xlane.xlu2 %1331 }
 0x3aa   : > { %v1416_v55 = vsub.f32 %v7517_v13, %v1332_v12 }
 0x3ab   : > { %v7671_v15 = vadd.f32 %v1208_v54, %v7440_v60 }
 0x3ac   : > { %v7673_v17 = vpop.eup %6751  ;;  %v1483_v35 = vmul.f32 1.442695, %v1416_v55 }
 0x3ad   : > { %v1369_v3 = vsel %vm1260_vm5, %v7671_v15, -inf  ;;  %v1591_v18 = vsel %vm1260_vm5, %v7673_v17, 0.0 }
 0x3ae   : > { %1370 = vmax.xlane.f32.xlu1 %v1369_v3  ;;  %1592 = vadd.xlane.f32.xlu2 %v1591_v18  ;;  %6753 = vpow2.f32 %v1483_v35 }
 0x3b0   : > { %v1151_v26 = vpop.f32.mrf.mxu3 }
 0x3b1   : > { %v1209_v41 = vmul.f32 0.35355338, %v1151_v26  ;;  %v1296_v4 = vpop.xlane.xlu0 %1295 }
 0x3b2   : > { %v1404_v61 = vsub.f32 %v7523_v23, %v1296_v4 }
 0x3b3   : > { %v7682_v54 = vadd.f32 %v1209_v41, %v7440_v60 }
 0x3b4   : > { %v1459_v51 = vmul.f32 1.442695, %v1404_v61  ;;  %v7687_v55 = vpop.eup %6753 }
 0x3b5   : > { %v1372_v13 = vsel %vm1260_vm5, %v7682_v54, -inf  ;;  %v1594_v4 = vsel %vm1260_vm5, %v7687_v55, 0.0 }
 0x3b6   : > { %6755 = vpow2.f32 %v1459_v51  ;;  %1373 = vmax.xlane.f32.xlu2 %v1372_v13 }
 0x3b8   : > { %v1154_v12 = vpop.f32.mrf.mxu3 }
 0x3b9   : > { %v1210_v3 = vmul.f32 0.35355338, %v1154_v12  ;;  %v1335_v48 = vpop.xlane.xlu0 %1334 }
 0x3ba   : > { %v1417_v18 = vsub.f32 %v7529_v28, %v1335_v48 }
 0x3bb   : > { %v7690_v26 = vadd.f32 %v1210_v3, %v7440_v60 }
 0x3bc   : > { %v7692_v23 = vpop.eup %6755  ;;  %v1485_v41 = vmul.f32 1.442695, %v1417_v18 }
 0x3bd   : > { %v1375_v35 = vsel %vm1260_vm5, %v7690_v26, -inf  ;;  %v1558_v51 = vsel %vm1260_vm5, %v7692_v23, 0.0 }
 0x3be   : > { %6757 = vpow2.f32 %v1485_v41  ;;  %1376 = vmax.xlane.f32.xlu1 %v1375_v35  ;;  %1559 = vadd.xlane.f32.xlu0 %v1558_v51  ;;  %v7708_v35 = vpop.xlane.xlu1 %1286 }
 0x3bf   : > { %1595 = vadd.xlane.f32.xlu2 %v1594_v4 }
 0x3c0   : > { %v1157_v48 = vpop.f32.mrf.mxu3 }
 0x3c1   : > { %v1299_v28 = vpop.xlane.xlu0 %1298  ;;  %v1211_v13 = vmul.f32 0.35355338, %v1157_v48 }
 0x3c2   : > { %v1405_v61 = vsub.f32 %v7535_v43, %v1299_v28 }
 0x3c3   : > { %v7706_v41 = vadd.f32 %v1211_v13, %v7440_v60 }
 0x3c4   : > { %v7701_v12 = vpop.eup %6757  ;;  %v1461_v3 = vmul.f32 1.442695, %v1405_v61 }
 0x3c5   : > { %v1597_v18 = vsel %vm1260_vm5, %v7701_v12, 0.0  ;;  %v1378_v43 = vsel %vm1260_vm5, %v7706_v41, -inf }
 0x3c6   : > { %6759 = vpow2.f32 %v1461_v3  ;;  %1598 = vadd.xlane.f32.xlu0 %v1597_v18 }
 0x3c8   : > { %v1160_v51 = vpop.f32.mrf.mxu3 }
 0x3c9   : > { %v1338_v4 = vpop.xlane.xlu0 %1337  ;;  %v1212_v48 = vmul.f32 0.35355338, %v1160_v51  ;;  %v7720_v18 = vpop.xlane.xlu1 %1343 }
 0x3ca   : > { %v1418_v45 = vsub.f32 %v7541_v49, %v1338_v4 }
 0x3cb   : > { %v7718_v13 = vadd.f32 %v1212_v48, %v7440_v60 }
 0x3cc   : > { %v7713_v28 = vpop.eup %6759  ;;  %v1487_v61 = vmul.f32 1.442695, %v1418_v45 }
 0x3cd   : > { %v1561_v3 = vsel %vm1260_vm5, %v7713_v28, 0.0  ;;  %v1381_v51 = vsel %vm1260_vm5, %v7718_v13, -inf }
 0x3ce   : > { %1379 = vmax.xlane.f32.xlu0 %v1378_v43  ;;  %1562 = vadd.xlane.f32.xlu1 %v1561_v3  ;;  %6761 = vpow2.f32 %v1487_v61 }
 0x3d0   : > { %v1163_v49 = vpop.f32.mrf.mxu3 }
 0x3d1   : > { %v1302_v42 = vpop.xlane.xlu0 %1301  ;;  %v1213_v45 = vmul.f32 0.35355338, %v1163_v49 }
 0x3d2   : > { %v1406_v4 = vsub.f32 %v7552_v7, %v1302_v42 }
 0x3d3   : > { %v7730_v48 = vadd.f32 %v1213_v45, %v7440_v60 }
 0x3d4   : > { %v1463_v39 = vmul.f32 1.442695, %v1406_v4  ;;  %v7725_v36 = vpop.eup %6761 }
 0x3d5   : > { %v1600_v43 = vsel %vm1260_vm5, %v7725_v36, 0.0  ;;  %v1384_v49 = vsel %vm1260_vm5, %v7730_v48, -inf }
 0x3d6   : > { %1382 = vmax.xlane.f32.xlu0 %v1381_v51  ;;  %6763 = vpow2.f32 %v1463_v39  ;;  %1601 = vadd.xlane.f32.xlu1 %v1600_v43  ;;  %v7739_v51 = vpop.xlane.xlu2 %1307 }
 0x3d8   : > { %v1166_v43 = vpop.f32.mrf.mxu3 }
 0x3d9   : > { %v7732_v61 = vpop.xlane.xlu1 %1310  ;;  %v1341_v3 = vpop.xlane.xlu0 %1340 }
 0x3da   : > { %v1419_v42 = vsub.f32 %v7564_v29, %v1341_v3 }
 0x3dc   : > { %v1489_v7 = vmul.f32 1.442695, %v1419_v42  ;;  %v7737_v4 = vpop.eup %6763  ;;  %v1214_v42 = vmul.f32 0.35355338, %v1166_v43 }
 0x3dd   : > { %v1564_v39 = vsel %vm1260_vm5, %v7737_v4, 0.0 }
 0x3de   : > { %6765 = vpow2.f32 %v1489_v7  ;;  %1385 = vmax.xlane.f32.xlu1 %v1384_v49  ;;  %1565 = vadd.xlane.f32.xlu2 %v1564_v39  ;;  %v7749_v7 = vadd.f32 %v1214_v42, %v7440_v60 }
 0x3e0   : > { %v1169_v49 = vpop.f32.mrf.mxu3 }
 0x3e1   : > { %v1527_v45 = vpop.xlane.xlu1 %1526  ;;  %v1305_v33 = vpop.xlane.xlu0 %1304 }
 0x3e2   : > { %6767 = vrcp.f32 %v1527_v45  ;;  %v1407_v29 = vsub.f32 %v7575_v44, %v1305_v33  ;;  %v1530_v27 = vpop.xlane.xlu2 %1529  ;;  %v1215_v44 = vmul.f32 0.35355338, %v1169_v49  ;;  %v1387_v45 = vsel %vm1260_vm5, %v7749_v7, -inf }
 0x3e3   : > { %v1193_v49 = vmul.f32 0.35355338, %v7627_v0 }
 0x3e4   : > { %v1465_v3 = vmul.f32 1.442695, %v1407_v29  ;;  %v7744_v30 = vpop.eup %6765 }
 0x3e5   : > { %v1603_v24 = vsel %vm1260_vm5, %v7744_v30, 0.0 }
 0x3e6   : > { %6769 = vpow2.f32 %v1465_v3  ;;  %1604 = vadd.xlane.f32.xlu2 %v1603_v24  ;;  %v7764_v3 = vadd.f32 %v1215_v44, %v7440_v60 }
 0x3e7   : > { %6771 = vrcp.f32 %v1530_v27 }
 0x3e8   : > { %v6768_v21 = vpop.eup %6767  ;;  %10031 = vst [vmem:[#allocation16_spill] sm:$0xff] %v7764_v3  ;;  %v1390_v42 = vsel %vm1260_vm5, %v7764_v3, -inf }
 0x3e9   : > { %v7751_v39 = vpop.xlane.xlu0 %1346  ;;  %v1701_v33 = vmul.f32 %v6768_v21, %v7577_v46  ;;  %v7759_v29 = vpop.xlane.xlu1 %1313 }
 0x3eb   : > { %6358 = vmatmul.msk.f32.vlgmr.msrb.gmra.mxu0 %vm1260_vm5, %v1701_v33 }
 0x3ec   : > { %v7755_v43 = vpop.eup %6769 }
 0x3ed   : > { %10030 = vst [vmem:[#allocation15_spill] sm:$0xff] %v7755_v43  ;;  %v1567_v24 = vsel %vm1260_vm5, %v7755_v43, 0.0  ;;  %v6772_v27 = vpop.eup %6771 }
 0x3ee   : > { %1568 = vadd.xlane.f32.xlu0 %v1567_v24  ;;  %1388 = vmax.xlane.f32.xlu2 %v1387_v45  ;;  %v1702_v46 = vmul.f32 %v6772_v27, %v7579_v50  ;;  %v7776_v45 = vadd.f32 %v1193_v49, %v7440_v60 }
 0x3f0   : > { %10032 = vst [vmem:[#allocation17_spill] sm:$0xff] %v7776_v45  ;;  %v1324_v44 = vsel %vm1260_vm5, %v7776_v45, -inf }
 0x3f1   : > { %v7766_v21 = vpop.xlane.xlu0 %1349  ;;  %v7773_v33 = vpop.xlane.xlu1 %1352 }
 0x3f3   : > { %6359 = vmatmul.msk.f32.gmra.mxu0 %vm1260_vm5, %v1702_v46 }
 0x3f6   : > { %1391 = vmax.xlane.f32.xlu0 %v1390_v42 }
 0x3f9   : > { %v1533_v43 = vpop.xlane.xlu0 %1532  ;;  %v7780_v24 = vpop.xlane.xlu1 %1322 }
 0x3fa   : > { %6773 = vrcp.f32 %v1533_v43  ;;  %10033 = vst [vmem:[#allocation18_spill] sm:$0xff] %v7780_v24  ;;  %v7789_v43 = vpop.xlane.xlu2 %1316  ;;  %v1397_v24 = vsub.f32 %v7470_v22, %v7637_v34 }
 0x3fe   : > { %1325 = vmax.xlane.f32.xlu0 %v1324_v44 }
 0x400   : > { %v6774_v50 = vpop.eup %6773 }
 0x401   : > { %v7782_v27 = vpop.xlane.xlu0 %1319  ;;  %v1703_v46 = vmul.f32 %v6774_v50, %v7618_v53  ;;  %v1420_v50 = vsub.f32 %v7546_v59, %v7720_v18 }
 0x402   : > { %v7805_v34 = vpop.xlane.xlu2 %1355 }
 0x403   : > { %6360 = vmatmul.msk.f32.gmra.mxu0 %vm1260_vm5, %v1703_v46 }
 0x409   : > { %v1362_v0 = vpop.xlane.xlu1 %1361  ;;  %v7786_v42 = vpop.xlane.xlu0 %1358 }
 0x40a   : > { %v1426_v49 = vsub.f32 %v7643_v40, %v1362_v0  ;;  %v1182_v40 = vmul.f32 0.35355338, %v7513_v8  ;;  %v1445_v0 = vmul.f32 1.442695, %v1397_v24 }
 0x40c   : > { %v1503_v3 = vmul.f32 1.442695, %v1426_v49  ;;  %v1491_v49 = vmul.f32 1.442695, %v1420_v50  ;;  %v7803_v22 = vadd.f32 %v1182_v40, %v7440_v60 }
 0x40e   : > { %6775 = vpow2.f32 %v1503_v3  ;;  %v1291_v24 = vsel %vm1260_vm5, %v7803_v22, -inf }
 0x411   : > { %v1536_v45 = vpop.xlane.xlu1 %1535  ;;  %v1365_v44 = vpop.xlane.xlu0 %1364 }
 0x412   : > { %6777 = vrcp.f32 %v1536_v45  ;;  %v1427_v56 = vsub.f32 %v7656_v5, %v1365_v44 }
 0x414   : > { %v7794_v53 = vpop.eup %6775  ;;  %v1505_v46 = vmul.f32 1.442695, %v1427_v56  ;;  %v1409_v56 = vsub.f32 %v7568_v32, %v7732_v61 }
 0x415   : > { %v1624_v3 = vsel %vm1260_vm5, %v7794_v53, 0.0 }
 0x416   : > { %6779 = vpow2.f32 %v1505_v46  ;;  %1625 = vadd.xlane.f32.xlu1 %v1624_v3 }
 0x417   : > { %6781 = vpow2.f32 %v1445_v0 }
 0x418   : > { %v6778_v45 = vpop.eup %6777  ;;  %6783 = vpow2.f32 %v1491_v49 }
 0x419   : > { %v1368_v5 = vpop.xlane.xlu0 %1367  ;;  %v1704_v44 = vmul.f32 %v6778_v45, %v7653_v63  ;;  %v1408_v63 = vsub.f32 %v7555_v11, %v7739_v51  ;;  %v1398_v11 = vsub.f32 %v7476_v31, %v7635_v19  ;;  %v1421_v45 = vsub.f32 %v7588_v6, %v7751_v39 }
 0x41a   : > { %v1428_v59 = vsub.f32 %v7666_v16, %v1368_v5  ;;  %v1469_v16 = vmul.f32 1.442695, %v1409_v56 }
 0x41b   : > { %6361 = vmatmul.msk.f32.gmra.mxu0 %vm1260_vm5, %v1704_v44  ;;  %v1467_v40 = vmul.f32 1.442695, %v1408_v63  ;;  %v1447_v31 = vmul.f32 1.442695, %v1398_v11  ;;  %v1493_v19 = vmul.f32 1.442695, %v1421_v45 }
 0x41c   : > { %v7809_v8 = vpop.eup %6779  ;;  %v1507_v18 = vmul.f32 1.442695, %v1428_v59 }
 0x41d   : > { %v1627_v50 = vsel %vm1260_vm5, %v7809_v8, 0.0  ;;  %v7819_v46 = vpop.eup %6781 }
 0x41e   : > { %6785 = vpow2.f32 %v1507_v18  ;;  %1292 = vmax.xlane.f32.xlu1 %v1291_v24  ;;  %1628 = vadd.xlane.f32.xlu2 %v1627_v50  ;;  %v7821_v0 = vpop.eup %6783  ;;  %v1537_v5 = vsel %vm1260_vm5, %v7819_v46, 0.0  ;;  %v1410_v50 = vsub.f32 %v7591_v9, %v7759_v29 }
 0x41f   : > { %v1606_v44 = vsel %vm1260_vm5, %v7821_v0, 0.0 }
 0x420   : > { %v1471_v9 = vmul.f32 1.442695, %v1410_v50 }
 0x421   : > { %v1371_v3 = vpop.xlane.xlu1 %1370  ;;  %v1593_v61 = vpop.xlane.xlu2 %1592 }
 0x422   : > { %v1429_v32 = vsub.f32 %v7671_v15, %v1371_v3  ;;  %6787 = vrcp.f32 %v1593_v61 }
 0x423   : > { %6789 = vpow2.f32 %v1469_v16  ;;  %v1422_v16 = vsub.f32 %v7610_v20, %v7766_v21 }
 0x424   : > { %v7826_v51 = vpop.eup %6785  ;;  %v1509_v49 = vmul.f32 1.442695, %v1429_v32  ;;  %6791 = vpow2.f32 %v1467_v40 }
 0x425   : > { %v1630_v15 = vsel %vm1260_vm5, %v7826_v51, 0.0  ;;  %v1495_v32 = vmul.f32 1.442695, %v1422_v16 }
 0x426   : > { %6793 = vpow2.f32 %v1509_v49  ;;  %1538 = vadd.xlane.f32.xlu1 %v1537_v5  ;;  %1607 = vadd.xlane.f32.xlu2 %v1606_v44  ;;  %v1399_v49 = vsub.f32 %v7482_v38, %v7649_v52 }
 0x427   : > { %1631 = vadd.xlane.f32.xlu0 %v1630_v15  ;;  %6795 = vpow2.f32 %v1447_v31  ;;  %v1411_v15 = vsub.f32 %v7594_v14, %v7789_v43 }
 0x428   : > { %v6788_v59 = vpop.eup %6787  ;;  %6797 = vpow2.f32 %v1493_v19  ;;  %v1449_v52 = vmul.f32 1.442695, %v1399_v49 }
 0x429   : > { %v7836_v56 = vpop.eup %6789  ;;  %v1723_v6 = vmul.f32 %v6788_v59, %v7673_v17  ;;  %v1374_v39 = vpop.xlane.xlu2 %1373 }
 0x42a   : > { %v7839_v18 = vpop.eup %6791  ;;  %v1430_v63 = vsub.f32 %v7682_v54, %v1374_v39  ;;  %v1573_v3 = vsel %vm1260_vm5, %v7836_v56, 0.0 }
 0x42b   : > { %6382 = vmatmul.msk.f32.vlgmr.msra.gmra.mxu2 %vm1260_vm5, %v1723_v6  ;;  %v1570_v54 = vsel %vm1260_vm5, %v7839_v18, 0.0  ;;  %v1473_v6 = vmul.f32 1.442695, %v1411_v15 }
 0x42c   : > { %v7842_v24 = vpop.eup %6793  ;;  %v1511_v40 = vmul.f32 1.442695, %v1430_v63 }
 0x42d   : > { %v1633_v17 = vsel %vm1260_vm5, %v7842_v24, 0.0  ;;  %v7855_v29 = vpop.eup %6795 }
 0x42e   : > { %1634 = vadd.xlane.f32.xlu1 %v1633_v17  ;;  %1574 = vadd.xlane.f32.xlu2 %v1573_v3  ;;  %6799 = vpow2.f32 %v1511_v40  ;;  %v7857_v21 = vpop.eup %6797  ;;  %v1540_v19 = vsel %vm1260_vm5, %v7855_v29, 0.0  ;;  %v1423_v40 = vsub.f32 %v7604_v62, %v7773_v33 }
 0x42f   : > { %1571 = vadd.xlane.f32.xlu0 %v1570_v54  ;;  %v1609_v31 = vsel %vm1260_vm5, %v7857_v21, 0.0 }
 0x430   : > { %v1497_v54 = vmul.f32 1.442695, %v1423_v40 }
 0x431   : > { %v1377_v61 = vpop.xlane.xlu1 %1376  ;;  %v1560_v20 = vpop.xlane.xlu0 %1559 }
 0x432   : > { %v1431_v11 = vsub.f32 %v7690_v26, %v1377_v61  ;;  %v1596_v45 = vpop.xlane.xlu2 %1595  ;;  %6801 = vrcp.f32 %v1560_v20 }
 0x433   : > { %6803 = vrcp.f32 %v1596_v45 }
 0x434   : > { %6805 = vpow2.f32 %v1471_v9  ;;  %v1513_v5 = vmul.f32 1.442695, %v1431_v11  ;;  %v7862_v44 = vpop.eup %6799  ;;  %v1400_v11 = vsub.f32 %v7489_v47, %v7651_v58  ;;  %v1401_v47 = vsub.f32 %v7496_v57, %v7708_v35 }
 0x435   : > { %6807 = vpow2.f32 %v1495_v32  ;;  %v1636_v26 = vsel %vm1260_vm5, %v7862_v44, 0.0 }
 0x436   : > { %6809 = vpow2.f32 %v1513_v5  ;;  %1610 = vadd.xlane.f32.xlu1 %v1609_v31  ;;  %1637 = vadd.xlane.f32.xlu2 %v1636_v26 }
 0x437   : > { %1541 = vadd.xlane.f32.xlu0 %v1540_v19 }
 0x438   : > { %v6802_v38 = vpop.eup %6801 }
 0x439   : > { %v6804_v59 = vpop.eup %6803  ;;  %v1599_v39 = vpop.xlane.xlu0 %1598  ;;  %v1712_v14 = vmul.f32 %v6802_v38, %v7692_v23 }
 0x43a   : > { %v7873_v43 = vpop.eup %6805  ;;  %6811 = vrcp.f32 %v1599_v39  ;;  %v1724_v63 = vmul.f32 %v6804_v59, %v7687_v55 }
 0x43b   : > { %v7876_v50 = vpop.eup %6807  ;;  %6370 = vmatmul.msk.f32.vlgmr.msrb.gmra.mxu1 %vm1260_vm5, %v1712_v14  ;;  %6813 = vpow2.f32 %v1449_v52  ;;  %v1576_v23 = vsel %vm1260_vm5, %v7873_v43, 0.0  ;;  %v1424_v52 = vsub.f32 %v7607_v10, %v7805_v34 }
 0x43c   : > { %v7879_v16 = vpop.eup %6809  ;;  %6383 = vmatmul.msk.f32.gmra.mxu2 %vm1260_vm5, %v1724_v63  ;;  %6815 = vpow2.f32 %v1473_v6  ;;  %v1612_v55 = vsel %vm1260_vm5, %v7876_v50, 0.0  ;;  %v1453_v6 = vmul.f32 1.442695, %v1401_v47  ;;  %v10035_v47 = vld [vmem:[#allocation14_spill] sm:$0xff] }
 0x43d   : > { %v1639_v17 = vsel %vm1260_vm5, %v7879_v16, 0.0  ;;  %v1499_v35 = vmul.f32 1.442695, %v1424_v52 }
 0x43e   : > { %1577 = vadd.xlane.f32.xlu1 %v1576_v23  ;;  %1640 = vadd.xlane.f32.xlu2 %v1639_v17  ;;  %v1425_v23 = vsub.f32 %v7640_v37, %v7786_v42  ;;  %v1412_v17 = vsub.f32 %v7630_v1, %v7782_v27 }
 0x43f   : > { %1613 = vadd.xlane.f32.xlu0 %v1612_v55 }
 0x440   : > { %v6812_v3 = vpop.eup %6811  ;;  %v1475_v37 = vmul.f32 1.442695, %v1412_v17 }
 0x441   : > { %v1563_v9 = vpop.xlane.xlu1 %1562  ;;  %v1380_v32 = vpop.xlane.xlu0 %1379  ;;  %v1725_v61 = vmul.f32 %v6812_v3, %v7701_v12 }
 0x442   : > { %v7891_v20 = vpop.eup %6813  ;;  %6817 = vrcp.f32 %v1563_v9  ;;  %v1432_v62 = vsub.f32 %v7706_v41, %v1380_v32  ;;  %v1451_v41 = vmul.f32 1.442695, %v1400_v11 }
 0x443   : > { %v7894_v33 = vpop.eup %6815  ;;  %6819 = vpow2.f32 %v1497_v54  ;;  %v1543_v49 = vsel %vm1260_vm5, %v7891_v20, 0.0  ;;  %v1501_v54 = vmul.f32 1.442695, %v1425_v23 }
 0x444   : > { %v1515_v45 = vmul.f32 1.442695, %v1432_v62  ;;  %6384 = vmatmul.msk.f32.gmra.mxu2 %vm1260_vm5, %v1725_v61  ;;  %v1579_v12 = vsel %vm1260_vm5, %v7894_v33, 0.0  ;;  %v1402_v61 = vsub.f32 %v7503_v2, %v7662_v25 }
 0x446   : > { %6821 = vpow2.f32 %v1515_v45  ;;  %1544 = vadd.xlane.f32.xlu2 %v1543_v49  ;;  %v1455_v49 = vmul.f32 1.442695, %v1402_v61 }
 0x447   : > { %1580 = vadd.xlane.f32.xlu0 %v1579_v12 }
 0x448   : > { %v6818_v5 = vpop.eup %6817 }
 0x449   : > { %v1383_v15 = vpop.xlane.xlu0 %1382  ;;  %v1713_v31 = vmul.f32 %v6818_v5, %v7713_v28  ;;  %v1602_v58 = vpop.xlane.xlu1 %1601 }
 0x44a   : > { %v1433_v26 = vsub.f32 %v7718_v13, %v1383_v15  ;;  %v7907_v19 = vpop.eup %6819  ;;  %6823 = vrcp.f32 %v1602_v58 }
 0x44b   : > { %6371 = vmatmul.msk.f32.gmra.mxu1 %vm1260_vm5, %v1713_v31  ;;  %6825 = vpow2.f32 %v1451_v41  ;;  %v1615_v57 = vsel %vm1260_vm5, %v7907_v19, 0.0  ;;  %v10034_v31 = vld [vmem:[#allocation18_spill] sm:$0xff] }
 0x44c   : > { %v7910_v38 = vpop.eup %6821  ;;  %v1517_v59 = vmul.f32 1.442695, %v1433_v26  ;;  %v1413_v58 = vsub.f32 %v10035_v47, %v10034_v31 }
 0x44d   : > { %v1642_v28 = vsel %vm1260_vm5, %v7910_v38, 0.0 }
 0x44e   : > { %6827 = vpow2.f32 %v1517_v59  ;;  %1643 = vadd.xlane.f32.xlu1 %v1642_v28  ;;  %1616 = vadd.xlane.f32.xlu2 %v1615_v57  ;;  %v1477_v28 = vmul.f32 1.442695, %v1413_v58 }
 0x44f   : > { %6829 = vpow2.f32 %v1453_v6 }
 0x450   : > { %v6824_v13 = vpop.eup %6823 }
 0x451   : > { %v7918_v39 = vpop.eup %6825  ;;  %v1386_v14 = vpop.xlane.xlu1 %1385  ;;  %v1726_v10 = vmul.f32 %v6824_v13, %v7725_v36 }
 0x452   : > { %v1566_v63 = vpop.xlane.xlu2 %1565  ;;  %v1434_v34 = vsub.f32 %v7730_v48, %v1386_v14  ;;  %v1546_v3 = vsel %vm1260_vm5, %v7918_v39, 0.0 }
 0x453   : > { %6831 = vrcp.f32 %v1566_v63  ;;  %6385 = vmatmul.msk.f32.gmra.mxu2 %vm1260_vm5, %v1726_v10 }
 0x454   : > { %v7922_v40 = vpop.eup %6827  ;;  %6833 = vpow2.f32 %v1499_v35  ;;  %v1519_v55 = vmul.f32 1.442695, %v1434_v34  ;;  %v10037_v35 = vld [vmem:[#allocation16_spill] sm:$0xff] }
 0x455   : > { %v1645_v36 = vsel %vm1260_vm5, %v7922_v40, 0.0  ;;  %v7933_v48 = vpop.eup %6829 }
 0x456   : > { %1547 = vadd.xlane.f32.xlu1 %v1546_v3  ;;  %1646 = vadd.xlane.f32.xlu0 %v1645_v36  ;;  %6835 = vpow2.f32 %v1519_v55  ;;  %v1549_v11 = vsel %vm1260_vm5, %v7933_v48, 0.0  ;;  %v10038_v55 = vld [vmem:[#allocation17_spill] sm:$0xff] }
 0x459   : > { %v6832_v9 = vpop.eup %6831 }
 0x45a   : > { %v7935_v42 = vpop.eup %6833  ;;  %v1605_v32 = vpop.xlane.xlu2 %1604  ;;  %v1714_v1 = vmul.f32 %v6832_v9, %v7737_v4 }
 0x45b   : > { %6837 = vrcp.f32 %v1605_v32  ;;  %v1618_v62 = vsel %vm1260_vm5, %v7935_v42, 0.0 }
 0x45c   : > { %6839 = vpow2.f32 %v1501_v54  ;;  %6372 = vmatmul.msk.f32.gmra.mxu1 %vm1260_vm5, %v1714_v1  ;;  %v7939_v27 = vpop.eup %6835 }
 0x45d   : > { %6841 = vpow2.f32 %v1475_v37  ;;  %v1648_v45 = vsel %vm1260_vm5, %v7939_v27, 0.0 }
 0x45e   : > { %1619 = vadd.xlane.f32.xlu1 %v1618_v62  ;;  %1550 = vadd.xlane.f32.xlu0 %v1549_v11 }
 0x45f   : > { %1649 = vadd.xlane.f32.xlu2 %v1648_v45 }
 0x461   : > { %v6838_v4 = vpop.eup %6837  ;;  %v1569_v12 = vpop.xlane.xlu0 %1568 }
 0x462   : > { %v7949_v5 = vpop.eup %6839  ;;  %v1389_v41 = vpop.xlane.xlu2 %1388  ;;  %6843 = vrcp.f32 %v1569_v12  ;;  %v1727_v2 = vmul.f32 %v6838_v4, %v7744_v30 }
 0x463   : > { %v7952_v25 = vpop.eup %6841  ;;  %v1435_v15 = vsub.f32 %v7749_v7, %v1389_v41  ;;  %6845 = vpow2.f32 %v1455_v49  ;;  %v1621_v52 = vsel %vm1260_vm5, %v7949_v5, 0.0  ;;  %v10036_v7 = vld [vmem:[#allocation15_spill] sm:$0xff] }
 0x464   : > { %6386 = vmatmul.msk.f32.gmra.mxu2 %vm1260_vm5, %v1727_v2  ;;  %v1582_v59 = vsel %vm1260_vm5, %v7952_v25, 0.0 }
 0x465   : > { %v1521_v26 = vmul.f32 1.442695, %v1435_v15 }
 0x466   : > { %1622 = vadd.xlane.f32.xlu0 %v1621_v52 }
 0x467   : > { %6847 = vpow2.f32 %v1521_v26  ;;  %1583 = vadd.xlane.f32.xlu2 %v1582_v59 }
 0x468   : > { %v6844_v30 = vpop.eup %6843  ;;  %6849 = vpow2.f32 %v1477_v28 }
 0x469   : > { %v1392_v6 = vpop.xlane.xlu0 %1391  ;;  %v1715_v57 = vmul.f32 %v6844_v30, %v10036_v7  ;;  %v7964_v14 = vpop.eup %6845 }
 0x46a   : > { %v1436_v13 = vsub.f32 %v10037_v35, %v1392_v6  ;;  %v1552_v34 = vsel %vm1260_vm5, %v7964_v14, 0.0  ;;  %v2091_v35 = vld [vmem:[%s9977_s5 + $0x10] sm:$0xff] }
 0x46b   : > { %6373 = vmatmul.msk.f32.gmra.mxu1 %vm1260_vm5, %v1715_v57  ;;  %2307 = vmatpush.msrb.mxu2 %v2091_v35 }
 0x46c   : > { %v1523_v63 = vmul.f32 1.442695, %v1436_v13 }
 0x46d   : > { %v7967_v10 = vpop.eup %6847 }
 0x46e   : > { %6851 = vpow2.f32 %v1523_v63  ;;  %v1651_v23 = vsel %vm1260_vm5, %v7967_v10, 0.0  ;;  %v7974_v36 = vpop.eup %6849 }
 0x46f   : > { %1553 = vadd.xlane.f32.xlu2 %v1552_v34  ;;  %1652 = vadd.xlane.f32.xlu1 %v1651_v23  ;;  %v1585_v32 = vsel %vm1260_vm5, %v7974_v36, 0.0 }
 0x471   : > { %v1326_v17 = vpop.xlane.xlu0 %1325 }
 0x472   : > { %v1414_v3 = vsub.f32 %v10038_v55, %v1326_v17  ;;  %v2090_v55 = vld [vmem:[%s9977_s5 + $0x8] sm:$0xff] }
 0x473   : > { %2141 = vmatpush.msra.mxu0 %v2090_v55 }
 0x474   : > { %v7976_v54 = vpop.eup %6851  ;;  %v1479_v9 = vmul.f32 1.442695, %v1414_v3  ;;  %v2089_v3 = vld [vmem:[%s9977_s5] sm:$0xff] }
 0x475   : > { %v1654_v37 = vsel %vm1260_vm5, %v7976_v54, 0.0  ;;  %2224 = vmatpush.msra.mxu1 %v2089_v3 }
 0x476   : > { %6853 = vpow2.f32 %v1479_v9  ;;  %1655 = vadd.xlane.f32.xlu0 %v1654_v37 }
 0x477   : > { %1586 = vadd.xlane.f32.xlu1 %v1585_v32 }
 0x47c   : > { %v7982_v1 = vpop.eup %6853 }
 0x47d   : > { %v1588_v61 = vsel %vm1260_vm5, %v7982_v1, 0.0 }
 0x47f   : > { %1589 = vadd.xlane.f32.xlu1 %v1588_v61 }
 0x489   : > { %v1626_v62 = vpop.xlane.xlu1 %1625 }
 0x48a   : > { %6855 = vrcp.f32 %v1626_v62 }
 0x490   : > { %v6856_v11 = vpop.eup %6855 }
 0x491   : > { %v1734_v45 = vmul.f32 %v6856_v11, %v7794_v53  ;;  %v1293_v4 = vpop.xlane.xlu1 %1292  ;;  %v1629_v49 = vpop.xlane.xlu2 %1628 }
 0x492   : > { %v1403_v12 = vsub.f32 %v7803_v22, %v1293_v4  ;;  %6857 = vrcp.f32 %v1629_v49 }
 0x493   : > { %6394 = vmatmul.msk.f32.vlgmr.msrb.gmra.mxu3 %vm1260_vm5, %v1734_v45 }
 0x494   : > { %v1457_v41 = vmul.f32 1.442695, %v1403_v12 }
 0x496   : > { %6859 = vpow2.f32 %v1457_v41 }
 0x498   : > { %v6858_v2 = vpop.eup %6857 }
 0x499   : > { %v1539_v15 = vpop.xlane.xlu1 %1538  ;;  %v1608_v31 = vpop.xlane.xlu2 %1607  ;;  %v1735_v47 = vmul.f32 %v6858_v2, %v7809_v8 }
 0x49a   : > { %6861 = vrcp.f32 %v1539_v15  ;;  %v1632_v58 = vpop.xlane.xlu0 %1631 }
 0x49b   : > { %6863 = vrcp.f32 %v1608_v31  ;;  %6395 = vmatmul.msk.f32.gmra.mxu3 %vm1260_vm5, %v1735_v47 }
 0x49c   : > { %v7991_v53 = vpop.eup %6859  ;;  %6865 = vrcp.f32 %v1632_v58 }
 0x49d   : > { %v1555_v22 = vsel %vm1260_vm5, %v7991_v53, 0.0 }
 0x49e   : > { %1556 = vadd.xlane.f32.xlu2 %v1555_v22 }
 0x4a0   : > { %v6862_v26 = vpop.eup %6861 }
 0x4a1   : > { %v6864_v52 = vpop.eup %6863  ;;  %v1635_v59 = vpop.xlane.xlu1 %1634  ;;  %v1705_v28 = vmul.f32 %v6862_v26, %v7819_v46  ;;  %v2092_v46 = vld [vmem:[%s9977_s5 + $0x18] sm:$0xff] }
 0x4a2   : > { %v1575_v30 = vpop.xlane.xlu2 %1574  ;;  %v6866_v6 = vpop.eup %6865  ;;  %6867 = vrcp.f32 %v1635_v59  ;;  %v1728_v7 = vmul.f32 %v6864_v52, %v7821_v0  ;;  %2401 = vmatpush.msra.mxu3 %v2092_v46 }
 0x4a3   : > { %v1572_v8 = vpop.xlane.xlu0 %1571  ;;  %6362 = vmatmul.msk.f32.gmra.mxu0 %vm1260_vm5, %v1705_v28  ;;  %v1736_v57 = vmul.f32 %v6866_v6, %v7826_v51 }
 0x4a4   : > { %6869 = vrcp.f32 %v1572_v8  ;;  %6387 = vmatmul.msk.f32.gmra.mxu2 %vm1260_vm5, %v1728_v7 }
 0x4a5   : > { %6396 = vmatmul.msk.f32.gmra.mxu3 %vm1260_vm5, %v1736_v57  ;;  %6871 = vrcp.f32 %v1575_v30 }
 0x4a8   : > { %v6868_v13 = vpop.eup %6867 }
 0x4a9   : > { %v1611_v0 = vpop.xlane.xlu1 %1610  ;;  %v1737_v63 = vmul.f32 %v6868_v13, %v7842_v24 }
 0x4aa   : > { %v6870_v51 = vpop.eup %6869  ;;  %6873 = vrcp.f32 %v1611_v0  ;;  %v1638_v34 = vpop.xlane.xlu2 %1637 }
 0x4ab   : > { %v1542_v23 = vpop.xlane.xlu0 %1541  ;;  %6875 = vrcp.f32 %v1638_v34  ;;  %v1716_v17 = vmul.f32 %v6870_v51, %v7839_v18  ;;  %v6872_v24 = vpop.eup %6871 }
 0x4ac   : > { %6877 = vrcp.f32 %v1542_v23  ;;  %v1717_v49 = vmul.f32 %v6872_v24, %v7836_v56 }
 0x4ad   : > { %6374 = vmatmul.msk.f32.gmra.mxu1 %vm1260_vm5, %v1716_v17  ;;  %6397 = vmatmul.msk.f32.gmra.mxu3 %vm1260_vm5, %v1737_v63 }
 0x4b0   : > { %v6874_v9 = vpop.eup %6873 }
 0x4b1   : > { %v6876_v37 = vpop.eup %6875  ;;  %v1578_v32 = vpop.xlane.xlu1 %1577  ;;  %v1729_v18 = vmul.f32 %v6874_v9, %v7857_v21 }
 0x4b2   : > { %v6878_v61 = vpop.eup %6877  ;;  %6879 = vrcp.f32 %v1578_v32  ;;  %v1641_v62 = vpop.xlane.xlu2 %1640  ;;  %v1738_v45 = vmul.f32 %v6876_v37, %v7862_v44 }
 0x4b3   : > { %v1614_v11 = vpop.xlane.xlu0 %1613  ;;  %6881 = vrcp.f32 %v1641_v62  ;;  %v1706_v4 = vmul.f32 %v6878_v61, %v7855_v29  ;;  %6388 = vmatmul.msk.f32.gmra.mxu2 %vm1260_vm5, %v1729_v18 }
 0x4b4   : > { %6883 = vrcp.f32 %v1614_v11 }
 0x4b5   : > { %6363 = vmatmul.msk.f32.gmra.mxu0 %vm1260_vm5, %v1706_v4  ;;  %6375 = vmatmul.msk.f32.gmra.mxu1 %vm1260_vm5, %v1717_v49  ;;  %v1798_v4 = vpop.f32.mrf.mxu0 }
 0x4b6   : > { %6398 = vmatmul.msk.f32.gmra.mxu3 %vm1260_vm5, %v1738_v45 }
 0x4b8   : > { %v6880_v21 = vpop.eup %6879 }
 0x4b9   : > { %v6882_v12 = vpop.eup %6881  ;;  %v1718_v41 = vmul.f32 %v6880_v21, %v7873_v43 }
 0x4ba   : > { %v6884_v2 = vpop.eup %6883  ;;  %v1545_v44 = vpop.xlane.xlu2 %1544  ;;  %v1739_v29 = vmul.f32 %v6882_v12, %v7879_v16 }
 0x4bb   : > { %v1581_v15 = vpop.xlane.xlu0 %1580  ;;  %6885 = vrcp.f32 %v1545_v44  ;;  %v1730_v56 = vmul.f32 %v6884_v2, %v7876_v50 }
 0x4bc   : > { %6887 = vrcp.f32 %v1581_v15  ;;  %v1884_v15 = vpop.f32.mrf.mxu1 }
 0x4bd   : > { %6376 = vmatmul.msk.f32.gmra.mxu1 %vm1260_vm5, %v1718_v41  ;;  %6389 = vmatmul.msk.f32.gmra.mxu2 %vm1260_vm5, %v1730_v56  ;;  %v1801_v49 = vpop.f32.mrf.mxu0 }
 0x4be   : > { %6399 = vmatmul.msk.f32.gmra.mxu3 %vm1260_vm5, %v1739_v29 }
 0x4c1   : > { %v6886_v31 = vpop.eup %6885  ;;  %v1644_v47 = vpop.xlane.xlu1 %1643 }
 0x4c2   : > { %v6888_v58 = vpop.eup %6887  ;;  %v1617_v22 = vpop.xlane.xlu2 %1616  ;;  %6889 = vrcp.f32 %v1644_v47  ;;  %v1707_v43 = vmul.f32 %v6886_v31, %v7891_v20 }
 0x4c3   : > { %6891 = vrcp.f32 %v1617_v22  ;;  %v1719_v16 = vmul.f32 %v6888_v58, %v7894_v33 }
 0x4c4   : > { %6364 = vmatmul.msk.f32.gmra.mxu0 %vm1260_vm5, %v1707_v43 }
 0x4c5   : > { %6377 = vmatmul.msk.f32.gmra.mxu1 %vm1260_vm5, %v1719_v16  ;;  %v1804_v12 = vpop.f32.mrf.mxu0 }
 0x4c8   : > { %v6890_v50 = vpop.eup %6889  ;;  %v1887_v31 = vpop.f32.mrf.mxu1 }
 0x4c9   : > { %v6892_v26 = vpop.eup %6891  ;;  %v1548_v52 = vpop.xlane.xlu1 %1547  ;;  %v1740_v30 = vmul.f32 %v6890_v50, %v7910_v38 }
 0x4ca   : > { %v1647_v59 = vpop.xlane.xlu0 %1646  ;;  %6893 = vrcp.f32 %v1548_v52  ;;  %v1731_v28 = vmul.f32 %v6892_v26, %v7907_v19 }
 0x4cb   : > { %6895 = vrcp.f32 %v1647_v59  ;;  %6400 = vmatmul.msk.f32.gmra.mxu3 %vm1260_vm5, %v1740_v30 }
 0x4cc   : > { %6390 = vmatmul.msk.f32.gmra.mxu2 %vm1260_vm5, %v1731_v28 }
 0x4cd   : > { %v1807_v44 = vpop.f32.mrf.mxu0 }
 0x4d0   : > { %v6894_v20 = vpop.eup %6893 }
 0x4d1   : > { %v6896_v33 = vpop.eup %6895  ;;  %v1620_v6 = vpop.xlane.xlu1 %1619  ;;  %v1708_v7 = vmul.f32 %v6894_v20, %v7918_v39 }
 0x4d2   : > { %v1551_v8 = vpop.xlane.xlu0 %1550  ;;  %v1650_v57 = vpop.xlane.xlu2 %1649  ;;  %6897 = vrcp.f32 %v1620_v6  ;;  %v1741_v35 = vmul.f32 %v6896_v33, %v7922_v40 }
 0x4d3   : > { %6899 = vrcp.f32 %v1650_v57  ;;  %6365 = vmatmul.msk.f32.gmra.mxu0 %vm1260_vm5, %v1708_v7 }
 0x4d4   : > { %6901 = vrcp.f32 %v1551_v8  ;;  %6401 = vmatmul.msk.f32.gmra.mxu3 %vm1260_vm5, %v1741_v35 }
 0x4d8   : > { %v6898_v19 = vpop.eup %6897 }
 0x4d9   : > { %v6900_v38 = vpop.eup %6899  ;;  %v1732_v46 = vmul.f32 %v6898_v19, %v7935_v42 }
 0x4da   : > { %v1623_v13 = vpop.xlane.xlu0 %1622  ;;  %v6902_v0 = vpop.eup %6901  ;;  %v1742_v39 = vmul.f32 %v6900_v38, %v7939_v27 }
 0x4db   : > { %v1584_v63 = vpop.xlane.xlu2 %1583  ;;  %6903 = vrcp.f32 %v1623_v13  ;;  %v1709_v51 = vmul.f32 %v6902_v0, %v7933_v48  ;;  %6391 = vmatmul.msk.f32.gmra.mxu2 %vm1260_vm5, %v1732_v46  ;;  %v1970_v48 = vpop.f32.mrf.mxu2 }
 0x4dc   : > { %6905 = vrcp.f32 %v1584_v63  ;;  %6402 = vmatmul.msk.f32.gmra.mxu3 %vm1260_vm5, %v1742_v39 }
 0x4dd   : > { %6366 = vmatmul.msk.f32.gmra.mxu0 %vm1260_vm5, %v1709_v51 }
 0x4e1   : > { %v6904_v40 = vpop.eup %6903 }
 0x4e2   : > { %v6906_v34 = vpop.eup %6905  ;;  %v1733_v23 = vmul.f32 %v6904_v40, %v7949_v5  ;;  %v1653_v42 = vpop.xlane.xlu1 %1652 }
 0x4e3   : > { %v1554_v17 = vpop.xlane.xlu2 %1553  ;;  %v1720_v55 = vmul.f32 %v6906_v34, %v7952_v25  ;;  %v1973_v32 = vpop.f32.mrf.mxu2 }
 0x4e4   : > { %6907 = vrcp.f32 %v1554_v17  ;;  %6392 = vmatmul.msk.f32.gmra.mxu2 %vm1260_vm5, %v1733_v23 }
 0x4e5   : > { %6909 = vrcp.f32 %v1653_v42  ;;  %6378 = vmatmul.msk.f32.gmra.mxu1 %vm1260_vm5, %v1720_v55 }
 0x4e9   : > { %v1656_v3 = vpop.xlane.xlu0 %1655 }
 0x4ea   : > { %v6908_v27 = vpop.eup %6907  ;;  %v1587_v9 = vpop.xlane.xlu1 %1586  ;;  %6911 = vrcp.f32 %v1656_v3 }
 0x4eb   : > { %v6910_v24 = vpop.eup %6909  ;;  %v1710_v37 = vmul.f32 %v6908_v27, %v7964_v14  ;;  %6913 = vrcp.f32 %v1587_v9  ;;  %v8112_v27 = vld [vmem:[%s9981_s9] sm:$0x3f] }
 0x4ec   : > { %v1743_v5 = vmul.f32 %v6910_v24, %v7967_v10  ;;  %6427 = vmatmul.msk.f32.vlgmr.msrb.gmra.mxu2 %vm839_vm3, %v1970_v48  ;;  %v1976_v10 = vpop.f32.mrf.mxu2 }
 0x4ed   : > { %6367 = vmatmul.msk.f32.gmra.mxu0 %vm1260_vm5, %v1710_v37 }
 0x4ee   : > { %6403 = vmatmul.msk.f32.gmra.mxu3 %vm1260_vm5, %v1743_v5  ;;  %v8115_v5 = vperm.slane %v8112_v27, 0 }
 0x4f0   : > { %v6912_v25 = vpop.eup %6911 }
 0x4f1   : > { %v6914_v18 = vpop.eup %6913  ;;  %v1744_v61 = vmul.f32 %v6912_v25, %v7976_v54 }
 0x4f2   : > { %v1590_v62 = vpop.xlane.xlu1 %1589  ;;  %v1721_v11 = vmul.f32 %v6914_v18, %v7974_v36 }
 0x4f3   : > { %6915 = vrcp.f32 %v1590_v62 }
 0x4f4   : > { %6428 = vmatmul.msk.f32.gmra.mxu2 %vm839_vm3, %v1973_v32  ;;  %6379 = vmatmul.msk.f32.gmra.mxu1 %vm1260_vm5, %v1721_v11  ;;  %v1979_v54 = vpop.f32.mrf.mxu2  ;;  %v10039_v11 = vld [vmem:[#allocation2_spill] sm:$0xff] }
 0x4f6   : > { %6404 = vmatmul.msk.f32.gmra.mxu3 %vm1260_vm5, %v1744_v61 }
 0x4f9   : > { %v6916_v14 = vpop.eup %6915 }
 0x4fa   : > { %v1722_v45 = vmul.f32 %v6916_v14, %v7982_v1 }
 0x4fc   : > { %6429 = vmatmul.msk.f32.gmra.mxu2 %vm839_vm3, %v1976_v10  ;;  %6380 = vmatmul.msk.f32.gmra.mxu1 %vm1260_vm5, %v1722_v45  ;;  %v1982_v36 = vpop.f32.mrf.mxu2 }
 0x504   : > { %6430 = vmatmul.msk.f32.gmra.mxu2 %vm839_vm3, %v1979_v54  ;;  %6416 = vmatmul.msk.f32.vlgmr.msra.gmra.mxu1 %vm839_vm3, %v1798_v4 }
 0x50c   : > { %6431 = vmatmul.msk.f32.gmra.mxu2 %vm839_vm3, %v1982_v36  ;;  %6417 = vmatmul.msk.f32.gmra.mxu1 %vm839_vm3, %v1801_v49 }
 0x511   : > { %v1557_v21 = vpop.xlane.xlu2 %1556 }
 0x512   : > { %6917 = vrcp.f32 %v1557_v21 }
 0x514   : > { %6418 = vmatmul.msk.f32.gmra.mxu1 %vm839_vm3, %v1804_v12 }
 0x516   : > { %v2056_v1 = vpop.f32.mrf.mxu3 }
 0x517   : > { %6438 = vmatmul.msk.f32.vlgmr.msra.gmra.mxu3 %vm839_vm3, %v2056_v1 }
 0x518   : > { %v6918_v41 = vpop.eup %6917 }
 0x519   : > { %v1711_v2 = vmul.f32 %v6918_v41, %v7991_v53  ;;  %v1890_v53 = vpop.f32.mrf.mxu1  ;;  %v10040_v41 = vld [vmem:[#allocation3_spill] sm:$0xff] }
 0x51b   : > { %6368 = vmatmul.msk.f32.gmra.mxu0 %vm1260_vm5, %v1711_v2 }
 0x51c   : > { %6419 = vmatmul.msk.f32.gmra.mxu1 %vm839_vm3, %v1807_v44 }
 0x51e   : > { %v2059_v29 = vpop.f32.mrf.mxu3 }
 0x51f   : > { %6439 = vmatmul.msk.f32.gmra.mxu3 %vm839_vm3, %v2059_v29 }
 0x520   : > { %v1810_v56 = vpop.f32.mrf.mxu0 }
 0x521   : > { %v1893_v16 = vpop.f32.mrf.mxu1 }
 0x523   : > { %6405 = vmatmul.msk.f32.vlgmr.msra.gmra.mxu0 %vm839_vm3, %v1884_v15 }
 0x524   : > { %6420 = vmatmul.msk.f32.gmra.mxu1 %vm839_vm3, %v1810_v56 }
 0x527   : > { %v1985_v47 = vpop.f32.mrf.mxu2 }
 0x528   : > { %v2062_v58 = vpop.f32.mrf.mxu3  ;;  %6432 = vmatmul.msk.f32.gmra.mxu2 %vm839_vm3, %v1985_v47 }
 0x529   : > { %6440 = vmatmul.msk.f32.gmra.mxu3 %vm839_vm3, %v2062_v58 }
 0x52a   : > { %v1896_v52 = vpop.f32.mrf.mxu1 }
 0x52b   : > { %6406 = vmatmul.msk.f32.gmra.mxu0 %vm839_vm3, %v1887_v31 }
 0x530   : > { %v2065_v22 = vpop.f32.mrf.mxu3 }
 0x531   : > { %6441 = vmatmul.msk.f32.gmra.mxu3 %vm839_vm3, %v2065_v22 }
 0x532   : > { %v1813_v43 = vpop.f32.mrf.mxu0  ;;  %v1899_v20 = vpop.f32.mrf.mxu1 }
 0x533   : > { %6421 = vmatmul.msk.f32.gmra.mxu1 %vm839_vm3, %v1813_v43  ;;  %6407 = vmatmul.msk.f32.gmra.mxu0 %vm839_vm3, %v1890_v53  ;;  %v10041_v43 = vld [vmem:[#allocation4_spill] sm:$0xff] }
 0x536   : > { %v1988_v50 = vpop.f32.mrf.mxu2 }
 0x537   : > { %6433 = vmatmul.msk.f32.gmra.mxu2 %vm839_vm3, %v1988_v50 }
 0x539   : > { %v2068_v26 = vpop.f32.mrf.mxu3 }
 0x53a   : > { %6442 = vmatmul.msk.f32.gmra.mxu3 %vm839_vm3, %v2068_v26  ;;  %v1902_v8 = vpop.f32.mrf.mxu1 }
 0x53b   : > { %6408 = vmatmul.msk.f32.gmra.mxu0 %vm839_vm3, %v1893_v16 }
 0x540   : > { %v1991_v59 = vpop.f32.mrf.mxu2 }
 0x541   : > { %v2071_v30 = vpop.f32.mrf.mxu3  ;;  %6434 = vmatmul.msk.f32.gmra.mxu2 %vm839_vm3, %v1991_v59  ;;  %v1816_v28 = vpop.f32.mrf.mxu0 }
 0x542   : > { %6443 = vmatmul.msk.f32.gmra.mxu3 %vm839_vm3, %v2071_v30  ;;  %6422 = vmatmul.msk.f32.gmra.mxu1 %vm839_vm3, %v1816_v28  ;;  %v1905_v35 = vpop.f32.mrf.mxu1 }
 0x543   : > { %6409 = vmatmul.msk.f32.gmra.mxu0 %vm839_vm3, %v1896_v52 }
 0x54b   : > { %6410 = vmatmul.msk.f32.gmra.mxu0 %vm839_vm3, %v1899_v20 }
 0x54e   : > { %v2074_v33 = vpop.f32.mrf.mxu3 }
 0x54f   : > { %v1994_v6 = vpop.f32.mrf.mxu2  ;;  %6444 = vmatmul.msk.f32.gmra.mxu3 %vm839_vm3, %v2074_v33  ;;  %v10042_v33 = vld [vmem:[#allocation5_spill] sm:$0xff] }
 0x550   : > { %6435 = vmatmul.msk.f32.gmra.mxu2 %vm839_vm3, %v1994_v6  ;;  %v1819_v7 = vpop.f32.mrf.mxu0 }
 0x551   : > { %6423 = vmatmul.msk.f32.gmra.mxu1 %vm839_vm3, %v1819_v7 }
 0x553   : > { %6411 = vmatmul.msk.f32.gmra.mxu0 %vm839_vm3, %v1902_v8 }
 0x557   : > { %v2077_v57 = vpop.f32.mrf.mxu3 }
 0x558   : > { %6445 = vmatmul.msk.f32.gmra.mxu3 %vm839_vm3, %v2077_v57 }
 0x55a   : > { %v1822_v19 = vpop.f32.mrf.mxu0 }
 0x55b   : > { %6424 = vmatmul.msk.f32.gmra.mxu1 %vm839_vm3, %v1822_v19  ;;  %6412 = vmatmul.msk.f32.gmra.mxu0 %vm839_vm3, %v1905_v35 }
 0x55e   : > { %v1997_v38 = vpop.f32.mrf.mxu2 }
 0x55f   : > { %v2080_v13 = vpop.f32.mrf.mxu3  ;;  %6436 = vmatmul.msk.f32.gmra.mxu2 %vm839_vm3, %v1997_v38 }
 0x560   : > { %6446 = vmatmul.msk.f32.gmra.mxu3 %vm839_vm3, %v2080_v13 }
 0x562   : > { %v1908_v46 = vpop.f32.mrf.mxu1 }
 0x563   : > { %6413 = vmatmul.msk.f32.gmra.mxu0 %vm839_vm3, %v1908_v46 }
 0x567   : > { %v2000_v0 = vpop.f32.mrf.mxu2 }
 0x568   : > { %6437 = vmatmul.msk.f32.gmra.mxu2 %vm839_vm3, %v2000_v0 }
 0x56a   : > { %v1825_v63 = vpop.f32.mrf.mxu0 }
 0x56b   : > { %6425 = vmatmul.msk.f32.gmra.mxu1 %vm839_vm3, %v1825_v63  ;;  %v10043_v63 = vld [vmem:[#allocation6_spill] sm:$0xff] }
 0x56f   : > { %v2309_v42 = vpop.f32.mrf.mxu2 }
 0x571   : > { %v2083_v39 = vpop.f32.mrf.mxu3  ;;  %v1911_v51 = vpop.f32.mrf.mxu1 }
 0x572   : > { %6447 = vmatmul.msk.f32.gmra.mxu3 %vm839_vm3, %v2083_v39  ;;  %6414 = vmatmul.msk.f32.gmra.mxu0 %vm839_vm3, %v1911_v51 }
 0x577   : > { %v2312_v9 = vpop.f32.mrf.mxu2 }
 0x579   : > { %v2086_v40 = vpop.f32.mrf.mxu3  ;;  %v1914_v34 = vpop.f32.mrf.mxu1 }
 0x57a   : > { %6448 = vmatmul.msk.f32.gmra.mxu3 %vm839_vm3, %v2086_v40  ;;  %6415 = vmatmul.msk.f32.gmra.mxu0 %vm839_vm3, %v1914_v34 }
 0x57f   : > { %v2315_v54 = vpop.f32.mrf.mxu2 }
 0x581   : > { %v2226_v23 = vpop.f32.mrf.mxu1 }
 0x587   : > { %v2318_v31 = vpop.f32.mrf.mxu2 }
 0x589   : > { %v2229_v24 = vpop.f32.mrf.mxu1 }
 0x58f   : > { %v2321_v8 = vpop.f32.mrf.mxu2 }
 0x591   : > { %v2232_v4 = vpop.f32.mrf.mxu1 }
 0x598   : > { %v1828_v17 = vpop.f32.mrf.mxu0 }
 0x599   : > { %6426 = vmatmul.msk.f32.gmra.mxu1 %vm839_vm3, %v1828_v17  ;;  %v2235_v56 = vpop.f32.mrf.mxu1 }
 0x59a   : > { %v2403_v55 = vpop.f32.mrf.mxu3 }
 0x5a0   : > { %v2143_v48 = vpop.f32.mrf.mxu0 }
 0x5a1   : > { %v2227_v3 = vadd.f32 %v2226_v23, %v2143_v48  ;;  %v2238_v30 = vpop.f32.mrf.mxu1 }
 0x5a2   : > { %v2406_v25 = vpop.f32.mrf.mxu3 }
 0x5a3   : > { %v2342_v37 = vadd.f32 %v2309_v42, %v2227_v3 }
 0x5a5   : > { %v2436_v32 = vadd.f32 %v2403_v55, %v2342_v37 }
 0x5a7   : > { %v2448_v18 = vadd.f32 %v8115_v5, %v2436_v32 }
 0x5a8   : > { %v2146_v61 = vpop.f32.mrf.mxu0 }
 0x5a9   : > { %v2230_v62 = vadd.f32 %v2229_v24, %v2146_v61  ;;  %v8119_v14 = vadd.f32 %v2448_v18, %v10039_v11  ;;  %v10044_v24 = vld [vmem:[#allocation7_spill] sm:$0xff]  ;;  %v10045_v11 = vld [vmem:[#allocation8_spill] sm:$0xff] }
 0x5ab   : > { %v2343_v10 = vadd.f32 %v2312_v9, %v2230_v62  ;;  %v2470_v45 = vsel %vm595_vm2, %v8119_v14, 0.0  ;;  %v2324_v51 = vpop.f32.mrf.mxu2 }
 0x5ac   : > { %2471 = vadd.xlane.f32.xlu0 %v2470_v45  ;;  %v2409_v49 = vpop.f32.mrf.mxu3 }
 0x5ad   : > { %v2437_v36 = vadd.f32 %v2406_v25, %v2343_v10 }
 0x5af   : > { %v2449_v21 = vadd.f32 %v8115_v5, %v2437_v36 }
 0x5b0   : > { %v2149_v12 = vpop.f32.mrf.mxu0  ;;  %v2241_v13 = vpop.f32.mrf.mxu1 }
 0x5b1   : > { %v2233_v1 = vadd.f32 %v2232_v4, %v2149_v12  ;;  %v8125_v2 = vadd.f32 %v2449_v21, %v10040_v41  ;;  %v7206_v4 = vmov 32.0  }
 0x5b2   : > { %6919 = vrcp.f32 %v7206_v4 }
 0x5b3   : > { %v2344_v44 = vadd.f32 %v2315_v54, %v2233_v1  ;;  %v2473_v15 = vsel %vm595_vm2, %v8125_v2, 0.0 }
 0x5b4   : > { %2474 = vadd.xlane.f32.xlu2 %v2473_v15  ;;  %v2412_v58 = vpop.f32.mrf.mxu3 }
 0x5b5   : > { %v2438_v29 = vadd.f32 %v2409_v49, %v2344_v44 }
 0x5b7   : > { %v2450_v47 = vadd.f32 %v8115_v5, %v2438_v29 }
 0x5b8   : > { %v2152_v53 = vpop.f32.mrf.mxu0  ;;  %v6920_v54 = vpop.eup %6919 }
 0x5b9   : > { %v2236_v22 = vadd.f32 %v2235_v56, %v2152_v53  ;;  %v8131_v16 = vadd.f32 %v2450_v47, %v10041_v43  ;;  %v2504_v36 = vmul.f32 32.0, %v6920_v54  ;;  %vm2508_vm6 = vweird.f32 %v6920_v54 }
 0x5ba   : > { %v2327_v37 = vpop.f32.mrf.mxu2 }
 0x5bb   : > { %v2345_v50 = vadd.f32 %v2318_v31, %v2236_v22  ;;  %v2476_v26 = vsel %vm595_vm2, %v8131_v16, 0.0  ;;  %v2505_v49 = vsub.f32 1.0, %v2504_v36  ;;  %v2745_v36 = vld [vmem:[%s9978_s6 + $0x10] sm:$0xff] }
 0x5bc   : > { %2477 = vadd.xlane.f32.xlu1 %v2476_v26 }
 0x5bd   : > { %v2439_v52 = vadd.f32 %v2412_v58, %v2345_v50  ;;  %v2415_v7 = vpop.f32.mrf.mxu3  ;;  %v2506_v1 = vmul.f32 %v6920_v54, %v2505_v49 }
 0x5bf   : > { %v2451_v59 = vadd.f32 %v8115_v5, %v2439_v52  ;;  %v2244_v55 = vpop.f32.mrf.mxu1  ;;  %v2507_v41 = vadd.f32 %v6920_v54, %v2506_v1 }
 0x5c0   : > { %v2155_v28 = vpop.f32.mrf.mxu0 }
 0x5c1   : > { %v2239_v20 = vadd.f32 %v2238_v30, %v2155_v28  ;;  %v8137_v6 = vadd.f32 %v2451_v59, %v10042_v33  ;;  %v8159_v56 = vsel %vm2508_vm6, %v6920_v54, %v2507_v41 }
 0x5c2   : > { %10046 = vst [vmem:[#allocation18_spill] sm:$0xff] %v8159_v56 }
 0x5c3   : > { %v2346_v57 = vadd.f32 %v2321_v8, %v2239_v20  ;;  %v2479_v35 = vsel %vm595_vm2, %v8137_v6, 0.0 }
 0x5c4   : > { %2480 = vadd.xlane.f32.xlu0 %v2479_v35  ;;  %v2330_v15 = vpop.f32.mrf.mxu2 }
 0x5c5   : > { %v2440_v19 = vadd.f32 %v2415_v7, %v2346_v57  ;;  %v2418_v23 = vpop.f32.mrf.mxu3 }
 0x5c7   : > { %v2452_v38 = vadd.f32 %v8115_v5, %v2440_v19 }
 0x5c8   : > { %v2158_v46 = vpop.f32.mrf.mxu0 }
 0x5c9   : > { %v2242_v0 = vadd.f32 %v2241_v13, %v2158_v46  ;;  %v8143_v39 = vadd.f32 %v2452_v38, %v10043_v63  ;;  %v10047_v13 = vld [vmem:[#allocation9_spill] sm:$0xff] }
 0x5cb   : > { %v2347_v40 = vadd.f32 %v2324_v51, %v2242_v0  ;;  %v2482_v34 = vsel %vm595_vm2, %v8143_v39, 0.0 }
 0x5cc   : > { %2483 = vadd.xlane.f32.xlu2 %v2482_v34 }
 0x5cd   : > { %v2441_v17 = vadd.f32 %v2418_v23, %v2347_v40 }
 0x5ce   : > { %v2247_v21 = vpop.f32.mrf.mxu1 }
 0x5cf   : > { %v2453_v42 = vadd.f32 %v8115_v5, %v2441_v17 }
 0x5d0   : > { %v2161_v48 = vpop.f32.mrf.mxu0 }
 0x5d1   : > { %v2245_v3 = vadd.f32 %v2244_v55, %v2161_v48  ;;  %v8149_v9 = vadd.f32 %v2453_v42, %v10044_v24 }
 0x5d2   : > { %v2421_v18 = vpop.f32.mrf.mxu3 }
 0x5d3   : > { %v2348_v25 = vadd.f32 %v2327_v37, %v2245_v3  ;;  %v2485_v32 = vsel %vm595_vm2, %v8149_v9, 0.0  ;;  %v2333_v52 = vpop.f32.mrf.mxu2 }
 0x5d4   : > { %2486 = vadd.xlane.f32.xlu1 %v2485_v32 }
 0x5d5   : > { %v2442_v61 = vadd.f32 %v2421_v18, %v2348_v25  ;;  %v10048_v25 = vld [vmem:[#allocation10_spill] sm:$0xff] }
 0x5d7   : > { %v2454_v62 = vadd.f32 %v8115_v5, %v2442_v61 }
 0x5d8   : > { %v2164_v12 = vpop.f32.mrf.mxu0  ;;  %v2250_v31 = vpop.f32.mrf.mxu1 }
 0x5d9   : > { %v8155_v10 = vadd.f32 %v2454_v62, %v10045_v11  ;;  %v2248_v44 = vadd.f32 %v2247_v21, %v2164_v12  ;;  %v2744_v12 = vld [vmem:[%s9978_s6 + $0x8] sm:$0xff] }
 0x5db   : > { %v2488_v45 = vsel %vm595_vm2, %v8155_v10, 0.0  ;;  %v2424_v29 = vpop.f32.mrf.mxu3  ;;  %v2349_v47 = vadd.f32 %v2330_v15, %v2248_v44  ;;  %v10049_v44 = vld [vmem:[#allocation11_spill] sm:$0xff] }
 0x5dc   : > { %2489 = vadd.xlane.f32.xlu2 %v2488_v45 }
 0x5dd   : > { %v2443_v43 = vadd.f32 %v2424_v29, %v2349_v47 }
 0x5df   : > { %v2455_v30 = vadd.f32 %v8115_v5, %v2443_v43  ;;  %v10050_v43 = vld [vmem:[#allocation12_spill] sm:$0xff] }
 0x5e0   : > { %v2167_v58 = vpop.f32.mrf.mxu0 }
 0x5e1   : > { %v2251_v50 = vadd.f32 %v2250_v31, %v2167_v58  ;;  %v8174_v46 = vadd.f32 %v2455_v30, %v10047_v13 }
 0x5e2   : > { %v2336_v0 = vpop.f32.mrf.mxu2 }
 0x5e3   : > { %v2350_v28 = vadd.f32 %v2333_v52, %v2251_v50  ;;  %v2427_v20 = vpop.f32.mrf.mxu3  ;;  %v2491_v17 = vsel %vm595_vm2, %v8174_v46, 0.0 }
 0x5e5   : > { %v2444_v19 = vadd.f32 %v2427_v20, %v2350_v28 }
 0x5e7   : > { %v2456_v51 = vadd.f32 %v8115_v5, %v2444_v19 }
 0x5e8   : > { %v2253_v33 = vpop.f32.mrf.mxu1 }
 0x5e9   : > { %v8187_v32 = vadd.f32 %v2456_v51, %v10048_v25 }
 0x5eb   : > { %v2339_v61 = vpop.f32.mrf.mxu2  ;;  %v2494_v4 = vsel %vm595_vm2, %v8187_v32, 0.0 }
 0x5ef   : > { %v2170_v7 = vpop.f32.mrf.mxu0 }
 0x5f0   : > { %v2254_v38 = vadd.f32 %v2253_v33, %v2170_v7 }
 0x5f2   : > { %v2351_v40 = vadd.f32 %v2336_v0, %v2254_v38 }
 0x5f5   : > { %v2430_v34 = vpop.f32.mrf.mxu3 }
 0x5f6   : > { %v2445_v3 = vadd.f32 %v2430_v34, %v2351_v40 }
 0x5f7   : > { %v2173_v48 = vpop.f32.mrf.mxu0 }
 0x5f8   : > { %v2457_v62 = vadd.f32 %v8115_v5, %v2445_v3 }
 0x5fa   : > { %v8209_v15 = vadd.f32 %v2457_v62, %v10049_v44 }
 0x5fc   : > { %v2497_v47 = vsel %vm595_vm2, %v8209_v15, 0.0 }
 0x5fd   : > { %v2433_v21 = vpop.f32.mrf.mxu3 }
 0x616   : > { %v2256_v42 = vpop.f32.mrf.mxu1 }
 0x617   : > { %v2257_v24 = vadd.f32 %v2256_v42, %v2173_v48 }
 0x619   : > { %v2352_v11 = vadd.f32 %v2339_v61, %v2257_v24 }
 0x61b   : > { %v2446_v1 = vadd.f32 %v2433_v21, %v2352_v11 }
 0x61d   : > { %v2458_v58 = vadd.f32 %v8115_v5, %v2446_v1 }
 0x61f   : > { %v2472_v53 = vpop.xlane.xlu0 %2471  ;;  %v8222_v50 = vadd.f32 %v2458_v58, %v10050_v43 }
 0x620   : > { %v2510_v22 = vmul.f32 %v8159_v56, %v2472_v53 }
 0x621   : > { %v2500_v30 = vsel %vm595_vm2, %v8222_v50, 0.0 }
 0x622   : > { %v8163_v26 = vsub.f32 %v8119_v14, %v2510_v22 }
 0x624   : > { %v2532_v59 = vmul.f32 %v8163_v26, %v8163_v26 }
 0x626   : > { %v2543_v8 = vsel %vm595_vm2, %v2532_v59, 0.0 }
 0x627   : > { %v2475_v57 = vpop.xlane.xlu2 %2474  ;;  %2544 = vadd.xlane.f32.xlu0 %v2543_v8 }
 0x628   : > { %v2511_v35 = vmul.f32 %v8159_v56, %v2475_v57 }
 0x62a   : > { %v8171_v14 = vsub.f32 %v8125_v2, %v2511_v35 }
 0x62c   : > { %v2533_v63 = vmul.f32 %v8171_v14, %v8171_v14 }
 0x62e   : > { %v2546_v23 = vsel %vm595_vm2, %v2533_v63, 0.0 }
 0x62f   : > { %v2478_v55 = vpop.xlane.xlu1 %2477  ;;  %2547 = vadd.xlane.f32.xlu1 %v2546_v23  ;;  %2492 = vadd.xlane.f32.xlu0 %v2491_v17 }
 0x630   : > { %v2512_v2 = vmul.f32 %v8159_v56, %v2478_v55 }
 0x632   : > { %v8184_v37 = vsub.f32 %v8131_v16, %v2512_v2  ;;  %v2746_v16 = vld [vmem:[%s9978_s6 + $0x18] sm:$0xff] }
 0x633   : > { %2796 = vmatpush.msrb.mxu0 %v2746_v16  ;;  %v8261_v16 = vperm.slane %v8112_v27, 1 }
 0x634   : > { %v2534_v18 = vmul.f32 %v8184_v37, %v8184_v37 }
 0x635   : > { %2797 = vmatpush.msrb.mxu0 %v2745_v36 }
 0x636   : > { %v2549_v45 = vsel %vm595_vm2, %v2534_v18, 0.0 }
 0x637   : > { %v2481_v54 = vpop.xlane.xlu0 %2480  ;;  %2550 = vadd.xlane.f32.xlu2 %v2549_v45  ;;  %2495 = vadd.xlane.f32.xlu1 %v2494_v4 }
 0x638   : > { %v2513_v49 = vmul.f32 %v8159_v56, %v2481_v54  ;;  %2798 = vmatpush.msrb.mxu0 %v2744_v12  ;;  %v8266_v12 = vperm.slane %v8112_v27, 2 }
 0x63a   : > { %v8206_v41 = vsub.f32 %v8137_v6, %v2513_v49 }
 0x63c   : > { %v2535_v29 = vmul.f32 %v8206_v41, %v8206_v41 }
 0x63e   : > { %v2552_v31 = vsel %vm595_vm2, %v2535_v29, 0.0 }
 0x63f   : > { %v2484_v53 = vpop.xlane.xlu2 %2483  ;;  %2553 = vadd.xlane.f32.xlu0 %v2552_v31  ;;  %2498 = vadd.xlane.f32.xlu2 %v2497_v47 }
 0x640   : > { %v2514_v6 = vmul.f32 %v8159_v56, %v2484_v53 }
 0x642   : > { %v8219_v22 = vsub.f32 %v8143_v39, %v2514_v6 }
 0x644   : > { %v2536_v52 = vmul.f32 %v8219_v22, %v8219_v22 }
 0x646   : > { %v2555_v59 = vsel %vm595_vm2, %v2536_v52, 0.0 }
 0x647   : > { %v2487_v5 = vpop.xlane.xlu1 %2486  ;;  %2556 = vadd.xlane.f32.xlu1 %v2555_v59  ;;  %2501 = vadd.xlane.f32.xlu0 %v2500_v30 }
 0x648   : > { %v2515_v28 = vmul.f32 %v8159_v56, %v2487_v5 }
 0x64a   : > { %v8231_v20 = vsub.f32 %v8149_v9, %v2515_v28  ;;  %v2743_v9 = vld [vmem:[%s9978_s6] sm:$0xff] }
 0x64b   : > { %2799 = vmatpush.msrb.mxu0 %v2743_v9 }
 0x64c   : > { %v2537_v39 = vmul.f32 %v8231_v20, %v8231_v20 }
 0x64e   : > { %v2558_v33 = vsel %vm595_vm2, %v2537_v39, 0.0 }
 0x64f   : > { %v2490_v8 = vpop.xlane.xlu2 %2489  ;;  %2559 = vadd.xlane.f32.xlu2 %v2558_v33 }
 0x650   : > { %v2516_v7 = vmul.f32 %v8159_v56, %v2490_v8 }
 0x652   : > { %v8238_v57 = vsub.f32 %v8155_v10, %v2516_v7 }
 0x654   : > { %v2538_v35 = vmul.f32 %v8238_v57, %v8238_v57 }
 0x656   : > { %v2561_v19 = vsel %vm595_vm2, %v2538_v35, 0.0 }
 0x657   : > { %2562 = vadd.xlane.f32.xlu1 %v2561_v19 }
 0x69a   : > { %v2545_v38 = vpop.xlane.xlu0 %2544 }
 0x69b   : > { %v2576_v13 = vmul.f32 %v2545_v38, %v8159_v56 }
 0x69d   : > { %v2587_v0 = vadd.f32 1e-05, %v2576_v13 }
 0x69f   : > { %6921 = vrsqrt.f32 %v2587_v0  ;;  %vm2604_vm8 = vweird.f32 %v2587_v0 }
 0x6a2   : > { %v2548_v63 = vpop.xlane.xlu1 %2547  ;;  %v2493_v51 = vpop.xlane.xlu0 %2492 }
 0x6a3   : > { %v2577_v10 = vmul.f32 %v2548_v63, %v8159_v56  ;;  %v2517_v40 = vmul.f32 %v8159_v56, %v2493_v51 }
 0x6a5   : > { %v6922_v34 = vpop.eup %6921  ;;  %v2588_v23 = vadd.f32 1e-05, %v2577_v10  ;;  %v8250_v17 = vsub.f32 %v8174_v46, %v2517_v40 }
 0x6a6   : > { %v2599_v42 = vmul.f32 %v6922_v34, %v2587_v0  ;;  %vm2605_vm7 = vweird.f32 %v6922_v34 }
 0x6a7   : > { %6923 = vrsqrt.f32 %v2588_v23  ;;  %v2539_v55 = vmul.f32 %v8250_v17, %v8250_v17  ;;  %vm2606_vm9 = vmor %vm2604_vm8, %vm2605_vm7  ;;  %vm2614_vm11 = vweird.f32 %v2588_v23 }
 0x6a8   : > { %v2600_v2 = vmul.f32 %v6922_v34, %v2599_v42 }
 0x6a9   : > { %v2564_v48 = vsel %vm595_vm2, %v2539_v55, 0.0 }
 0x6aa   : > { %v2601_v3 = vmul.f32 0.5, %v2600_v2  ;;  %v2551_v24 = vpop.xlane.xlu2 %2550  ;;  %v2496_v25 = vpop.xlane.xlu1 %2495  ;;  %2565 = vadd.xlane.f32.xlu0 %v2564_v48  ;;  %v2852_v48 = vld [vmem:[%s9980_s8 + $0x38] sm:$0xff] }
 0x6ab   : > { %v2578_v18 = vmul.f32 %v2551_v24, %v8159_v56  ;;  %v2518_v61 = vmul.f32 %v8159_v56, %v2496_v25  ;;  %2896 = vmatpush.msrb.mxu1 %v2852_v48  ;;  %v2845_v48 = vld [vmem:[%s9980_s8] sm:$0xff] }
 0x6ac   : > { %v2602_v62 = vsub.f32 1.5, %v2601_v3 }
 0x6ad   : > { %v6924_v46 = vpop.eup %6923  ;;  %v2589_v11 = vadd.f32 1e-05, %v2578_v18  ;;  %v8258_v45 = vsub.f32 %v8187_v32, %v2518_v61 }
 0x6ae   : > { %v2603_v4 = vmul.f32 %v6922_v34, %v2602_v62  ;;  %v2609_v54 = vmul.f32 %v6924_v46, %v2588_v23  ;;  %vm2615_vm10 = vweird.f32 %v6924_v46 }
 0x6af   : > { %6925 = vrsqrt.f32 %v2589_v11  ;;  %v2540_v36 = vmul.f32 %v8258_v45, %v8258_v45  ;;  %vm2616_vm12 = vmor %vm2614_vm11, %vm2615_vm10  ;;  %vm2624_vm14 = vweird.f32 %v2589_v11 }
 0x6b0   : > { %v2607_v49 = vsel %vm2606_vm9, %v6922_v34, %v2603_v4  ;;  %v2610_v21 = vmul.f32 %v6924_v46, %v2609_v54  ;;  %v2851_v54 = vld [vmem:[%s9980_s8 + $0x30] sm:$0xff] }
 0x6b1   : > { %v2708_v1 = vmul.f32 %v2607_v49, %v8163_v26  ;;  %v2567_v32 = vsel %vm595_vm2, %v2540_v36, 0.0  ;;  %v2850_v36 = vld [vmem:[%s9980_s8 + $0x28] sm:$0xff]  ;;  %2897 = vmatpush.msrb.mxu1 %v2851_v54 }
 0x6b2   : > { %v2611_v44 = vmul.f32 0.5, %v2610_v21  ;;  %v2554_v29 = vpop.xlane.xlu0 %2553  ;;  %2568 = vadd.xlane.f32.xlu2 %v2567_v32  ;;  %v2499_v31 = vpop.xlane.xlu2 %2498  ;;  %v2849_v32 = vld [vmem:[%s9980_s8 + $0x20] sm:$0xff] }
 0x6b3   : > { %v2720_v47 = vmul.f32 %v8261_v16, %v2708_v1  ;;  %v2579_v58 = vmul.f32 %v2554_v29, %v8159_v56  ;;  %v2519_v53 = vmul.f32 %v8159_v56, %v2499_v31  ;;  %2898 = vmatpush.msrb.mxu1 %v2850_v36 }
 0x6b4   : > { %v2612_v6 = vsub.f32 1.5, %v2611_v44 }
 0x6b5   : > { %v6926_v43 = vpop.eup %6925  ;;  %v8274_v52 = vadd.f32 %v8266_v12, %v2720_v47  ;;  %v2590_v59 = vadd.f32 1e-05, %v2579_v58  ;;  %v8277_v26 = vsub.f32 %v8209_v15, %v2519_v53  ;;  %v2848_v58 = vld [vmem:[%s9980_s8 + $0x18] sm:$0xff]  ;;  %2899 = vmatpush.msrb.mxu1 %v2849_v32 }
 0x6b6   : > { %v2613_v30 = vmul.f32 %v6924_v46, %v2612_v6  ;;  %v2619_v5 = vmul.f32 %v6926_v43, %v2589_v11  ;;  %vm2625_vm13 = vweird.f32 %v6926_v43 }
 0x6b7   : > { %6927 = vrsqrt.f32 %v2590_v59  ;;  %6449 = vmatmul.msk.f32.vlgmr.msrb.gmra.mxu0 %vm595_vm2, %v8274_v52  ;;  %v2541_v28 = vmul.f32 %v8277_v26, %v8277_v26  ;;  %vm2626_vm15 = vmor %vm2624_vm14, %vm2625_vm13  ;;  %vm2634_vm1 = vweird.f32 %v2590_v59  ;;  %2900 = vmatpush.msrb.mxu1 %v2848_v58 }
 0x6b8   : > { %v2617_v39 = vsel %vm2616_vm12, %v6924_v46, %v2613_v30  ;;  %v2620_v33 = vmul.f32 %v6926_v43, %v2619_v5 }
 0x6b9   : > { %v2709_v8 = vmul.f32 %v2617_v39, %v8171_v14  ;;  %v2570_v7 = vsel %vm595_vm2, %v2541_v28, 0.0 }
 0x6ba   : > { %v2621_v35 = vmul.f32 0.5, %v2620_v33  ;;  %v2557_v15 = vpop.xlane.xlu1 %2556  ;;  %2571 = vadd.xlane.f32.xlu1 %v2570_v7  ;;  %v2502_v19 = vpop.xlane.xlu0 %2501 }
 0x6bb   : > { %v2580_v9 = vmul.f32 %v2557_v15, %v8159_v56  ;;  %v2520_v38 = vmul.f32 %v8159_v56, %v2502_v19  ;;  %v2721_v13 = vmul.f32 %v8261_v16, %v2709_v8 }
 0x6bc   : > { %v2622_v0 = vsub.f32 1.5, %v2621_v35 }
 0x6bd   : > { %v6928_v63 = vpop.eup %6927  ;;  %v2591_v51 = vadd.f32 1e-05, %v2580_v9  ;;  %v8289_v10 = vsub.f32 %v8222_v50, %v2520_v38  ;;  %v8292_v14 = vadd.f32 %v8266_v12, %v2721_v13 }
 0x6be   : > { %v2623_v40 = vmul.f32 %v6926_v43, %v2622_v0  ;;  %v2629_v34 = vmul.f32 %v6928_v63, %v2590_v59  ;;  %vm2635_vm0 = vweird.f32 %v6928_v63  ;;  %v2847_v59 = vld [vmem:[%s9980_s8 + $0x10] sm:$0xff] }
 0x6bf   : > { %6929 = vrsqrt.f32 %v2591_v51  ;;  %6450 = vmatmul.msk.f32.gmra.mxu0 %vm595_vm2, %v8292_v14  ;;  %v2542_v23 = vmul.f32 %v8289_v10, %v8289_v10  ;;  %vm2636_vm4 = vmor %vm2634_vm1, %vm2635_vm0  ;;  %vm2644_vm7 = vweird.f32 %v2591_v51  ;;  %2901 = vmatpush.msrb.mxu1 %v2847_v59 }
 0x6c0   : > { %v2627_v42 = vsel %vm2626_vm15, %v6926_v43, %v2623_v40  ;;  %v2630_v55 = vmul.f32 %v6928_v63, %v2629_v34 }
 0x6c1   : > { %v2710_v2 = vmul.f32 %v2627_v42, %v8184_v37  ;;  %v2573_v50 = vsel %vm595_vm2, %v2542_v23, 0.0 }
 0x6c2   : > { %v2631_v3 = vmul.f32 0.5, %v2630_v55  ;;  %v2560_v24 = vpop.xlane.xlu2 %2559  ;;  %2574 = vadd.xlane.f32.xlu0 %v2573_v50  ;;  %v2846_v50 = vld [vmem:[%s9980_s8 + $0x8] sm:$0xff] }
 0x6c3   : > { %v2581_v25 = vmul.f32 %v2560_v24, %v8159_v56  ;;  %v2722_v18 = vmul.f32 %v8261_v16, %v2710_v2  ;;  %2902 = vmatpush.msrb.mxu1 %v2846_v50 }
 0x6c4   : > { %v2632_v61 = vsub.f32 1.5, %v2631_v3 }
 0x6c5   : > { %v6930_v62 = vpop.eup %6929  ;;  %v2592_v46 = vadd.f32 1e-05, %v2581_v25  ;;  %v8306_v37 = vadd.f32 %v8266_v12, %v2722_v18  ;;  %2903 = vmatpush.msrb.mxu1 %v2845_v48 }
 0x6c6   : > { %v2633_v11 = vmul.f32 %v6928_v63, %v2632_v61  ;;  %v2639_v4 = vmul.f32 %v6930_v62, %v2591_v51  ;;  %vm2645_vm6 = vweird.f32 %v6930_v62 }
 0x6c7   : > { %6931 = vrsqrt.f32 %v2592_v46  ;;  %6451 = vmatmul.msk.f32.gmra.mxu0 %vm595_vm2, %v8306_v37  ;;  %vm2646_vm8 = vmor %vm2644_vm7, %vm2645_vm6  ;;  %vm2654_vm10 = vweird.f32 %v2592_v46 }
 0x6c8   : > { %v2637_v49 = vsel %vm2636_vm4, %v6928_v63, %v2633_v11  ;;  %v2640_v21 = vmul.f32 %v6930_v62, %v2639_v4  ;;  %vm2854_vm4 = vcmask 523264  }
 0x6c9   : > { %v2711_v1 = vmul.f32 %v2637_v49, %v8206_v41 }
 0x6ca   : > { %v2641_v44 = vmul.f32 0.5, %v2640_v21  ;;  %v2563_v29 = vpop.xlane.xlu1 %2562 }
 0x6cb   : > { %v2582_v31 = vmul.f32 %v2563_v29, %v8159_v56  ;;  %v2723_v47 = vmul.f32 %v8261_v16, %v2711_v1  ;;  %v8366_v29 = vld [vmem:[%s9979_s7] ss:$0 sm:$0xff] }
 0x6cc   : > { %v2642_v53 = vsub.f32 1.5, %v2641_v44 }
 0x6cd   : > { %v6932_v6 = vpop.eup %6931  ;;  %v2593_v41 = vadd.f32 1e-05, %v2582_v31  ;;  %v8326_v43 = vadd.f32 %v8266_v12, %v2723_v47 }
 0x6ce   : > { %v2643_v30 = vmul.f32 %v6930_v62, %v2642_v53  ;;  %v2649_v5 = vmul.f32 %v6932_v6, %v2592_v46  ;;  %vm2655_vm9 = vweird.f32 %v6932_v6 }
 0x6cf   : > { %6933 = vrsqrt.f32 %v2593_v41  ;;  %6452 = vmatmul.msk.f32.gmra.mxu0 %vm595_vm2, %v8326_v43  ;;  %vm2656_vm11 = vmor %vm2654_vm10, %vm2655_vm9  ;;  %vm2664_vm13 = vweird.f32 %v2593_v41 }
 0x6d0   : > { %v2647_v28 = vsel %vm2646_vm8, %v6930_v62, %v2643_v30  ;;  %v2650_v39 = vmul.f32 %v6932_v6, %v2649_v5 }
 0x6d1   : > { %v2712_v33 = vmul.f32 %v2647_v28, %v8219_v22 }
 0x6d2   : > { %v2651_v8 = vmul.f32 0.5, %v2650_v39 }
 0x6d3   : > { %v2724_v7 = vmul.f32 %v8261_v16, %v2712_v33 }
 0x6d4   : > { %v2652_v35 = vsub.f32 1.5, %v2651_v8 }
 0x6d5   : > { %v6934_v15 = vpop.eup %6933  ;;  %v8336_v19 = vadd.f32 %v8266_v12, %v2724_v7 }
 0x6d6   : > { %v2653_v9 = vmul.f32 %v6932_v6, %v2652_v35  ;;  %v2659_v38 = vmul.f32 %v6934_v15, %v2593_v41  ;;  %vm2665_vm12 = vweird.f32 %v6934_v15 }
 0x6d7   : > { %6453 = vmatmul.msk.f32.gmra.mxu0 %vm595_vm2, %v8336_v19  ;;  %vm2666_vm14 = vmor %vm2664_vm13, %vm2665_vm12 }
 0x6d8   : > { %v2657_v13 = vsel %vm2656_vm11, %v6932_v6, %v2653_v9  ;;  %v2660_v0 = vmul.f32 %v6934_v15, %v2659_v38 }
 0x6d9   : > { %v2713_v22 = vmul.f32 %v2657_v13, %v8231_v20 }
 0x6da   : > { %v2661_v63 = vmul.f32 0.5, %v2660_v0 }
 0x6db   : > { %v2725_v51 = vmul.f32 %v8261_v16, %v2713_v22 }
 0x6dc   : > { %v2662_v40 = vsub.f32 1.5, %v2661_v63 }
 0x6dd   : > { %v8343_v34 = vadd.f32 %v8266_v12, %v2725_v51 }
 0x6de   : > { %v2663_v23 = vmul.f32 %v6934_v15, %v2662_v40 }
 0x6df   : > { %6454 = vmatmul.msk.f32.gmra.mxu0 %vm595_vm2, %v8343_v34 }
 0x6e0   : > { %v2667_v42 = vsel %vm2666_vm14, %v6934_v15, %v2663_v23 }
 0x6e1   : > { %v2714_v55 = vmul.f32 %v2667_v42, %v8238_v57 }
 0x6e3   : > { %v2726_v2 = vmul.f32 %v8261_v16, %v2714_v55 }
 0x6e5   : > { %v8350_v20 = vadd.f32 %v8266_v12, %v2726_v2 }
 0x6e7   : > { %6455 = vmatmul.msk.f32.gmra.mxu0 %vm595_vm2, %v8350_v20 }
 0x71d   : > { %v2566_v3 = vpop.xlane.xlu0 %2565 }
 0x71e   : > { %v2583_v57 = vmul.f32 %v2566_v3, %v8159_v56 }
 0x720   : > { %v2594_v24 = vadd.f32 1e-05, %v2583_v57 }
 0x722   : > { %6935 = vrsqrt.f32 %v2594_v24  ;;  %vm2674_vm0 = vweird.f32 %v2594_v24 }
 0x725   : > { %v2569_v25 = vpop.xlane.xlu2 %2568 }
 0x726   : > { %v2584_v18 = vmul.f32 %v2569_v25, %v8159_v56 }
 0x728   : > { %v6936_v61 = vpop.eup %6935  ;;  %v2595_v62 = vadd.f32 1e-05, %v2584_v18 }
 0x729   : > { %v2669_v46 = vmul.f32 %v6936_v61, %v2594_v24  ;;  %vm2675_vm15 = vweird.f32 %v6936_v61 }
 0x72a   : > { %6937 = vrsqrt.f32 %v2595_v62  ;;  %vm2676_vm1 = vmor %vm2674_vm0, %vm2675_vm15  ;;  %vm2684_vm7 = vweird.f32 %v2595_v62 }
 0x72b   : > { %v2670_v11 = vmul.f32 %v6936_v61, %v2669_v46 }
 0x72d   : > { %v2671_v4 = vmul.f32 0.5, %v2670_v11  ;;  %v2572_v54 = vpop.xlane.xlu1 %2571 }
 0x72e   : > { %v2585_v36 = vmul.f32 %v2572_v54, %v8159_v56 }
 0x72f   : > { %v2672_v49 = vsub.f32 1.5, %v2671_v4 }
 0x730   : > { %v6938_v21 = vpop.eup %6937  ;;  %v2596_v1 = vadd.f32 1e-05, %v2585_v36 }
 0x731   : > { %v2673_v32 = vmul.f32 %v6936_v61, %v2672_v49  ;;  %v2679_v44 = vmul.f32 %v6938_v21, %v2595_v62  ;;  %vm2685_vm6 = vweird.f32 %v6938_v21 }
 0x732   : > { %6939 = vrsqrt.f32 %v2596_v1  ;;  %vm2686_vm8 = vmor %vm2684_vm7, %vm2685_vm6  ;;  %vm2694_vm10 = vweird.f32 %v2596_v1 }
 0x733   : > { %v2677_v31 = vsel %vm2676_vm1, %v6936_v61, %v2673_v32  ;;  %v2680_v47 = vmul.f32 %v6938_v21, %v2679_v44 }
 0x734   : > { %v2715_v58 = vmul.f32 %v2677_v31, %v8250_v17  ;;  %v2801_v53 = vpop.f32.mrf.mxu0 }
 0x735   : > { %v2681_v6 = vmul.f32 0.5, %v2680_v47  ;;  %v2802_v41 = vadd.f32 %v8366_v29, %v2801_v53  ;;  %v2575_v59 = vpop.xlane.xlu0 %2574  ;;  %v8412_v53 = vperm.slane %v8112_v27, 5 }
 0x736   : > { %v2586_v30 = vmul.f32 %v2575_v59, %v8159_v56  ;;  %v2727_v5 = vmul.f32 %v8261_v16, %v2715_v58 }
 0x737   : > { %v2682_v28 = vsub.f32 1.5, %v2681_v6  ;;  %v2834_v39 = vmax.f32 %v2802_v41, 0.0 }
 0x738   : > { %v6940_v33 = vpop.eup %6939  ;;  %v2597_v8 = vadd.f32 1e-05, %v2586_v30  ;;  %v8373_v7 = vadd.f32 %v8266_v12, %v2727_v5 }
 0x739   : > { %v2683_v35 = vmul.f32 %v6938_v21, %v2682_v28  ;;  %v2689_v17 = vmul.f32 %v6940_v33, %v2596_v1  ;;  %6460 = vmatmul.msk.f32.vlgmr.msrb.gmra.mxu1 %vm2854_vm4, %v2834_v39  ;;  %vm2695_vm9 = vweird.f32 %v6940_v33 }
 0x73a   : > { %6941 = vrsqrt.f32 %v2597_v8  ;;  %6456 = vmatmul.msk.f32.gmra.mxu0 %vm595_vm2, %v8373_v7  ;;  %vm2696_vm11 = vmor %vm2694_vm10, %vm2695_vm9  ;;  %vm2704_vm13 = vweird.f32 %v2597_v8 }
 0x73b   : > { %v2687_v15 = vsel %vm2686_vm8, %v6938_v21, %v2683_v35  ;;  %v2690_v9 = vmul.f32 %v6940_v33, %v2689_v17 }
 0x73c   : > { %v2716_v38 = vmul.f32 %v2687_v15, %v8258_v45  ;;  %v2804_v13 = vpop.f32.mrf.mxu0 }
 0x73d   : > { %v2691_v0 = vmul.f32 0.5, %v2690_v9  ;;  %v2805_v22 = vadd.f32 %v8366_v29, %v2804_v13 }
 0x73e   : > { %v2728_v63 = vmul.f32 %v8261_v16, %v2716_v38 }
 0x73f   : > { %v2692_v51 = vsub.f32 1.5, %v2691_v0  ;;  %v2835_v40 = vmax.f32 %v2805_v22, 0.0 }
 0x740   : > { %v6942_v23 = vpop.eup %6941  ;;  %v8382_v42 = vadd.f32 %v8266_v12, %v2728_v63 }
 0x741   : > { %v2693_v55 = vmul.f32 %v6940_v33, %v2692_v51  ;;  %v2699_v2 = vmul.f32 %v6942_v23, %v2597_v8  ;;  %6461 = vmatmul.msk.f32.gmra.mxu1 %vm2854_vm4, %v2835_v40  ;;  %vm2705_vm12 = vweird.f32 %v6942_v23 }
 0x742   : > { %6457 = vmatmul.msk.f32.gmra.mxu0 %vm595_vm2, %v8382_v42  ;;  %vm2706_vm14 = vmor %vm2704_vm13, %vm2705_vm12 }
 0x743   : > { %v2697_v45 = vsel %vm2696_vm11, %v6940_v33, %v2693_v55  ;;  %v2700_v50 = vmul.f32 %v6942_v23, %v2699_v2 }
 0x744   : > { %v2717_v48 = vmul.f32 %v2697_v45, %v8277_v26  ;;  %v2807_v3 = vpop.f32.mrf.mxu0 }
 0x745   : > { %v2701_v57 = vmul.f32 0.5, %v2700_v50  ;;  %v2808_v24 = vadd.f32 %v8366_v29, %v2807_v3 }
 0x746   : > { %v2729_v25 = vmul.f32 %v8261_v16, %v2717_v48 }
 0x747   : > { %v2702_v18 = vsub.f32 1.5, %v2701_v57  ;;  %v2836_v61 = vmax.f32 %v2808_v24, 0.0 }
 0x748   : > { %v8391_v62 = vadd.f32 %v8266_v12, %v2729_v25 }
 0x749   : > { %v2703_v46 = vmul.f32 %v6942_v23, %v2702_v18  ;;  %6462 = vmatmul.msk.f32.gmra.mxu1 %vm2854_vm4, %v2836_v61 }
 0x74a   : > { %6458 = vmatmul.msk.f32.gmra.mxu0 %vm595_vm2, %v8391_v62 }
 0x74b   : > { %v2707_v26 = vsel %vm2706_vm14, %v6942_v23, %v2703_v46 }
 0x74c   : > { %v2718_v11 = vmul.f32 %v2707_v26, %v8289_v10  ;;  %v2810_v4 = vpop.f32.mrf.mxu0 }
 0x74d   : > { %v2811_v54 = vadd.f32 %v8366_v29, %v2810_v4 }
 0x74e   : > { %v2730_v36 = vmul.f32 %v8261_v16, %v2718_v11 }
 0x74f   : > { %v2837_v49 = vmax.f32 %v2811_v54, 0.0 }
 0x750   : > { %v8400_v21 = vadd.f32 %v8266_v12, %v2730_v36 }
 0x751   : > { %6463 = vmatmul.msk.f32.gmra.mxu1 %vm2854_vm4, %v2837_v49 }
 0x752   : > { %6459 = vmatmul.msk.f32.gmra.mxu0 %vm595_vm2, %v8400_v21 }
 0x754   : > { %v2813_v1 = vpop.f32.mrf.mxu0 }
 0x755   : > { %v2814_v32 = vadd.f32 %v8366_v29, %v2813_v1 }
 0x757   : > { %v2838_v44 = vmax.f32 %v2814_v32, 0.0 }
 0x759   : > { %6464 = vmatmul.msk.f32.gmra.mxu1 %vm2854_vm4, %v2838_v44 }
 0x75c   : > { %v2816_v10 = vpop.f32.mrf.mxu0 }
 0x75d   : > { %v2817_v31 = vadd.f32 %v8366_v29, %v2816_v10 }
 0x75f   : > { %v2839_v47 = vmax.f32 %v2817_v31, 0.0 }
 0x761   : > { %6465 = vmatmul.msk.f32.gmra.mxu1 %vm2854_vm4, %v2839_v47 }
 0x764   : > { %v2819_v16 = vpop.f32.mrf.mxu0 }
 0x765   : > { %v2820_v12 = vadd.f32 %v8366_v29, %v2819_v16 }
 0x767   : > { %v2840_v58 = vmax.f32 %v2820_v12, 0.0 }
 0x769   : > { %6466 = vmatmul.msk.f32.gmra.mxu1 %vm2854_vm4, %v2840_v58 }
 0x7b6   : > { %v2905_v6 = vpop.f32.mrf.mxu1 }
 0x7b7   : > { %v2906_v41 = vadd.f32 %v2905_v6, %v8412_v53  ;;  %v2822_v59 = vpop.f32.mrf.mxu0 }
 0x7b8   : > { %v2823_v30 = vadd.f32 %v8366_v29, %v2822_v59 }
 0x7b9   : > { %v2938_v5 = vadd.f32 %v2906_v41, %v8274_v52 }
 0x7ba   : > { %v2841_v28 = vmax.f32 %v2823_v30, 0.0 }
 0x7bb   : > { %v2949_v39 = vsel %vm595_vm2, %v2938_v5, 0.0 }
 0x7bc   : > { %2950 = vadd.xlane.f32.xlu2 %v2949_v39  ;;  %6467 = vmatmul.msk.f32.gmra.mxu1 %vm2854_vm4, %v2841_v28 }
 0x7be   : > { %v2908_v33 = vpop.f32.mrf.mxu1 }
 0x7bf   : > { %v2909_v8 = vadd.f32 %v2908_v33, %v8412_v53  ;;  %v2825_v35 = vpop.f32.mrf.mxu0 }
 0x7c0   : > { %v2826_v27 = vadd.f32 %v8366_v29, %v2825_v35 }
 0x7c1   : > { %v2939_v17 = vadd.f32 %v2909_v8, %v8292_v14 }
 0x7c2   : > { %v2842_v15 = vmax.f32 %v2826_v27, 0.0 }
 0x7c3   : > { %v2952_v9 = vsel %vm595_vm2, %v2939_v17, 0.0 }
 0x7c4   : > { %2953 = vadd.xlane.f32.xlu1 %v2952_v9  ;;  %6468 = vmatmul.msk.f32.gmra.mxu1 %vm2854_vm4, %v2842_v15 }
 0x7c6   : > { %v2911_v52 = vpop.f32.mrf.mxu1 }
 0x7c7   : > { %v2912_v38 = vadd.f32 %v2911_v52, %v8412_v53  ;;  %v2828_v13 = vpop.f32.mrf.mxu0 }
 0x7c8   : > { %v2829_v0 = vadd.f32 %v8366_v29, %v2828_v13 }
 0x7c9   : > { %v2940_v22 = vadd.f32 %v2912_v38, %v8306_v37 }
 0x7ca   : > { %v2843_v63 = vmax.f32 %v2829_v0, 0.0 }
 0x7cb   : > { %v2955_v51 = vsel %vm595_vm2, %v2940_v22, 0.0 }
 0x7cc   : > { %2956 = vadd.xlane.f32.xlu0 %v2955_v51  ;;  %6469 = vmatmul.msk.f32.gmra.mxu1 %vm2854_vm4, %v2843_v63 }
 0x7ce   : > { %v2914_v14 = vpop.f32.mrf.mxu1 }
 0x7cf   : > { %v2915_v40 = vadd.f32 %v2914_v14, %v8412_v53  ;;  %v2831_v23 = vpop.f32.mrf.mxu0 }
 0x7d0   : > { %v2832_v55 = vadd.f32 %v8366_v29, %v2831_v23 }
 0x7d1   : > { %v2941_v2 = vadd.f32 %v2915_v40, %v8326_v43 }
 0x7d2   : > { %v2844_v45 = vmax.f32 %v2832_v55, 0.0 }
 0x7d3   : > { %v2958_v50 = vsel %vm595_vm2, %v2941_v2, 0.0 }
 0x7d4   : > { %2959 = vadd.xlane.f32.xlu2 %v2958_v50  ;;  %6470 = vmatmul.msk.f32.gmra.mxu1 %vm2854_vm4, %v2844_v45 }
 0x7d6   : > { %v2917_v37 = vpop.f32.mrf.mxu1 }
 0x7d7   : > { %v2918_v48 = vadd.f32 %v2917_v37, %v8412_v53 }
 0x7d9   : > { %v2942_v3 = vadd.f32 %v2918_v48, %v8336_v19  ;;  %v6475_v48 = vld [vmem:[%s9975_s3 + $0x38] sm:$0xff] }
 0x7da   : > { %3272 = vmatpush.msra.mxu2 %v6475_v48 }
 0x7db   : > { %v2961_v57 = vsel %vm595_vm2, %v2942_v3, 0.0 }
 0x7dc   : > { %2962 = vadd.xlane.f32.xlu1 %v2961_v57  ;;  %v6473_v57 = vld [vmem:[%s9975_s3 + $0x28] sm:$0xff] }
 0x7de   : > { %v2920_v24 = vpop.f32.mrf.mxu1 }
 0x7df   : > { %v2921_v25 = vadd.f32 %v2920_v24, %v8412_v53  ;;  %v6472_v24 = vld [vmem:[%s9975_s3 + $0x20] sm:$0xff] }
 0x7e1   : > { %v2943_v29 = vadd.f32 %v2921_v25, %v8343_v34 }
 0x7e3   : > { %v2964_v43 = vsel %vm595_vm2, %v2943_v29, 0.0 }
 0x7e4   : > { %2965 = vadd.xlane.f32.xlu0 %v2964_v43 }
 0x7e6   : > { %v2923_v18 = vpop.f32.mrf.mxu1 }
 0x7e7   : > { %v2924_v61 = vadd.f32 %v2923_v18, %v8412_v53 }
 0x7e9   : > { %v2944_v46 = vadd.f32 %v2924_v61, %v8350_v20 }
 0x7eb   : > { %v2967_v26 = vsel %vm595_vm2, %v2944_v46, 0.0 }
 0x7ec   : > { %2968 = vadd.xlane.f32.xlu1 %v2967_v26 }
 0x82f   : > { %v2951_v19 = vpop.xlane.xlu2 %2950 }
 0x830   : > { %v2982_v11 = vmul.f32 %v2951_v19, %v8159_v56 }
 0x832   : > { %v8444_v4 = vsub.f32 %v2938_v5, %v2982_v11 }
 0x834   : > { %v3004_v54 = vmul.f32 %v8444_v4, %v8444_v4 }
 0x836   : > { %v3015_v34 = vsel %vm595_vm2, %v3004_v54, 0.0 }
 0x837   : > { %v2954_v36 = vpop.xlane.xlu1 %2953  ;;  %3016 = vadd.xlane.f32.xlu2 %v3015_v34 }
 0x838   : > { %v2983_v49 = vmul.f32 %v2954_v36, %v8159_v56 }
 0x839   : > { %v2926_v1 = vpop.f32.mrf.mxu1 }
 0x83a   : > { %v8450_v32 = vsub.f32 %v2939_v17, %v2983_v49  ;;  %v2927_v20 = vadd.f32 %v2926_v1, %v8412_v53 }
 0x83c   : > { %v3005_v44 = vmul.f32 %v8450_v32, %v8450_v32  ;;  %v8456_v10 = vadd.f32 %v2927_v20, %v8373_v7 }
 0x83e   : > { %v3018_v31 = vsel %vm595_vm2, %v3005_v44, 0.0  ;;  %v2970_v47 = vsel %vm595_vm2, %v8456_v10, 0.0 }
 0x83f   : > { %3019 = vadd.xlane.f32.xlu0 %v3018_v31  ;;  %2971 = vadd.xlane.f32.xlu2 %v2970_v47  ;;  %v2957_v16 = vpop.xlane.xlu0 %2956 }
 0x840   : > { %v2984_v12 = vmul.f32 %v2957_v16, %v8159_v56 }
 0x841   : > { %v2929_v58 = vpop.f32.mrf.mxu1 }
 0x842   : > { %v8462_v6 = vsub.f32 %v2940_v22, %v2984_v12  ;;  %v2930_v41 = vadd.f32 %v2929_v58, %v8412_v53 }
 0x844   : > { %v8466_v59 = vadd.f32 %v2930_v41, %v8382_v42  ;;  %v3006_v7 = vmul.f32 %v8462_v6, %v8462_v6 }
 0x846   : > { %v2973_v30 = vsel %vm595_vm2, %v8466_v59, 0.0  ;;  %v3021_v5 = vsel %vm595_vm2, %v3006_v7, 0.0 }
 0x847   : > { %v2960_v28 = vpop.xlane.xlu2 %2959  ;;  %2974 = vadd.xlane.f32.xlu0 %v2973_v30  ;;  %3022 = vadd.xlane.f32.xlu1 %v3021_v5  ;;  %v7195_v5 = vld [vmem:[%s9981_s9] sm:$0x3f] }
 0x848   : > { %v2985_v39 = vmul.f32 %v2960_v28, %v8159_v56  ;;  %v8538_v28 = vperm.slane %v7195_v5, 3 }
 0x849   : > { %v2932_v33 = vpop.f32.mrf.mxu1 }
 0x84a   : > { %v8474_v8 = vsub.f32 %v2941_v2, %v2985_v39  ;;  %v2933_v35 = vadd.f32 %v2932_v33, %v8412_v53 }
 0x84c   : > { %v3007_v42 = vmul.f32 %v8474_v8, %v8474_v8  ;;  %v8480_v27 = vadd.f32 %v2933_v35, %v8391_v62 }
 0x84e   : > { %v3024_v17 = vsel %vm595_vm2, %v3007_v42, 0.0  ;;  %v2976_v15 = vsel %vm595_vm2, %v8480_v27, 0.0  ;;  %v8542_v42 = vperm.slane %v7195_v5, 4 }
 0x84f   : > { %v2963_v9 = vpop.xlane.xlu1 %2962  ;;  %3025 = vadd.xlane.f32.xlu2 %v3024_v17  ;;  %2977 = vadd.xlane.f32.xlu1 %v2976_v15 }
 0x850   : > { %v2986_v52 = vmul.f32 %v2963_v9, %v8159_v56 }
 0x851   : > { %v2935_v38 = vpop.f32.mrf.mxu1 }
 0x852   : > { %v8486_v13 = vsub.f32 %v2942_v3, %v2986_v52  ;;  %v2936_v0 = vadd.f32 %v2935_v38, %v8412_v53  ;;  %v6474_v3 = vld [vmem:[%s9975_s3 + $0x30] sm:$0xff] }
 0x853   : > { %3273 = vmatpush.msra.mxu2 %v6474_v3 }
 0x854   : > { %v3008_v22 = vmul.f32 %v8486_v13, %v8486_v13  ;;  %v8492_v62 = vadd.f32 %v2936_v0, %v8400_v21 }
 0x855   : > { %3274 = vmatpush.msra.mxu2 %v6473_v57 }
 0x856   : > { %v3027_v63 = vsel %vm595_vm2, %v3008_v22, 0.0  ;;  %v2979_v51 = vsel %vm595_vm2, %v8492_v62, 0.0 }
 0x857   : > { %3028 = vadd.xlane.f32.xlu0 %v3027_v63  ;;  %2980 = vadd.xlane.f32.xlu2 %v2979_v51  ;;  %v2966_v14 = vpop.xlane.xlu0 %2965 }
 0x858   : > { %v2987_v40 = vmul.f32 %v2966_v14, %v8159_v56  ;;  %3275 = vmatpush.msra.mxu2 %v6472_v24 }
 0x85a   : > { %v8498_v23 = vsub.f32 %v2943_v29, %v2987_v40 }
 0x85c   : > { %v3009_v53 = vmul.f32 %v8498_v23, %v8498_v23 }
 0x85e   : > { %v3030_v55 = vsel %vm595_vm2, %v3009_v53, 0.0 }
 0x85f   : > { %v2969_v2 = vpop.xlane.xlu1 %2968  ;;  %3031 = vadd.xlane.f32.xlu1 %v3030_v55 }
 0x860   : > { %v2988_v21 = vmul.f32 %v2969_v2, %v8159_v56 }
 0x862   : > { %v8504_v45 = vsub.f32 %v2944_v46, %v2988_v21 }
 0x864   : > { %v3010_v50 = vmul.f32 %v8504_v45, %v8504_v45 }
 0x866   : > { %v3033_v37 = vsel %vm595_vm2, %v3010_v50, 0.0 }
 0x867   : > { %3034 = vadd.xlane.f32.xlu0 %v3033_v37 }
 0x8aa   : > { %v3017_v25 = vpop.xlane.xlu2 %3016 }
 0x8ab   : > { %v3048_v29 = vmul.f32 %v3017_v25, %v8159_v56 }
 0x8ad   : > { %v3059_v43 = vadd.f32 1e-05, %v3048_v29 }
 0x8af   : > { %6943 = vrsqrt.f32 %v3059_v43  ;;  %vm3076_vm0 = vweird.f32 %v3059_v43 }
 0x8b2   : > { %v2972_v18 = vpop.xlane.xlu2 %2971  ;;  %v3020_v61 = vpop.xlane.xlu0 %3019 }
 0x8b3   : > { %v2989_v46 = vmul.f32 %v2972_v18, %v8159_v56  ;;  %v3049_v26 = vmul.f32 %v3020_v61, %v8159_v56 }
 0x8b5   : > { %v6944_v19 = vpop.eup %6943  ;;  %v8525_v11 = vsub.f32 %v8456_v10, %v2989_v46  ;;  %v3060_v54 = vadd.f32 1e-05, %v3049_v26 }
 0x8b6   : > { %v3071_v34 = vmul.f32 %v6944_v19, %v3059_v43  ;;  %vm3077_vm15 = vweird.f32 %v6944_v19 }
 0x8b7   : > { %6945 = vrsqrt.f32 %v3060_v54  ;;  %v3011_v36 = vmul.f32 %v8525_v11, %v8525_v11  ;;  %vm3078_vm1 = vmor %vm3076_vm0, %vm3077_vm15  ;;  %vm3086_vm7 = vweird.f32 %v3060_v54 }
 0x8b8   : > { %v3072_v49 = vmul.f32 %v6944_v19, %v3071_v34 }
 0x8b9   : > { %v3036_v1 = vsel %vm595_vm2, %v3011_v36, 0.0 }
 0x8ba   : > { %v3073_v20 = vmul.f32 0.5, %v3072_v49  ;;  %3037 = vadd.xlane.f32.xlu2 %v3036_v1  ;;  %v3023_v44 = vpop.xlane.xlu1 %3022  ;;  %v2975_v31 = vpop.xlane.xlu0 %2974 }
 0x8bb   : > { %v3050_v47 = vmul.f32 %v3023_v44, %v8159_v56  ;;  %v2990_v16 = vmul.f32 %v2975_v31, %v8159_v56 }
 0x8bc   : > { %v3074_v12 = vsub.f32 1.5, %v3073_v20 }
 0x8bd   : > { %v6946_v10 = vpop.eup %6945  ;;  %v3061_v58 = vadd.f32 1e-05, %v3050_v47  ;;  %v8533_v41 = vsub.f32 %v8466_v59, %v2990_v16 }
 0x8be   : > { %v3075_v7 = vmul.f32 %v6944_v19, %v3074_v12  ;;  %v3081_v30 = vmul.f32 %v6946_v10, %v3060_v54  ;;  %vm3087_vm6 = vweird.f32 %v6946_v10 }
 0x8bf   : > { %6947 = vrsqrt.f32 %v3061_v58  ;;  %v3012_v39 = vmul.f32 %v8533_v41, %v8533_v41  ;;  %vm3088_vm8 = vmor %vm3086_vm7, %vm3087_vm6  ;;  %vm3096_vm10 = vweird.f32 %v3061_v58 }
 0x8c0   : > { %v3079_v33 = vsel %vm3078_vm1, %v6944_v19, %v3075_v7  ;;  %v3082_v35 = vmul.f32 %v6946_v10, %v3081_v30 }
 0x8c1   : > { %v3180_v59 = vmul.f32 %v3079_v33, %v8444_v4  ;;  %v3039_v17 = vsel %vm595_vm2, %v3012_v39, 0.0 }
 0x8c2   : > { %v3083_v15 = vmul.f32 0.5, %v3082_v35  ;;  %v3026_v9 = vpop.xlane.xlu2 %3025  ;;  %v2978_v52 = vpop.xlane.xlu1 %2977  ;;  %3040 = vadd.xlane.f32.xlu1 %v3039_v17 }
 0x8c3   : > { %v3192_v38 = vmul.f32 %v8538_v28, %v3180_v59  ;;  %v3051_v0 = vmul.f32 %v3026_v9, %v8159_v56  ;;  %v2991_v22 = vmul.f32 %v2978_v52, %v8159_v56 }
 0x8c4   : > { %v3084_v63 = vsub.f32 1.5, %v3083_v15 }
 0x8c5   : > { %v6948_v51 = vpop.eup %6947  ;;  %v8550_v14 = vadd.f32 %v8542_v42, %v3192_v38  ;;  %v3062_v40 = vadd.f32 1e-05, %v3051_v0  ;;  %v8553_v4 = vsub.f32 %v8480_v27, %v2991_v22 }
 0x8c6   : > { %v3085_v53 = vmul.f32 %v6946_v10, %v3084_v63  ;;  %v3091_v55 = vmul.f32 %v6948_v51, %v3061_v58  ;;  %vm3097_vm9 = vweird.f32 %v6948_v51 }
 0x8c7   : > { %6949 = vrsqrt.f32 %v3062_v40  ;;  %6477 = vmatmul.msk.f32.vlgmr.msra.gmra.mxu2 %vm595_vm2, %v8550_v14  ;;  %v3013_v2 = vmul.f32 %v8553_v4, %v8553_v4  ;;  %vm3098_vm11 = vmor %vm3096_vm10, %vm3097_vm9  ;;  %vm3106_vm13 = vweird.f32 %v3062_v40 }
 0x8c8   : > { %v3089_v21 = vsel %vm3088_vm8, %v6946_v10, %v3085_v53  ;;  %v3092_v50 = vmul.f32 %v6948_v51, %v3091_v55 }
 0x8c9   : > { %v3181_v37 = vmul.f32 %v3089_v21, %v8450_v32  ;;  %v3042_v48 = vsel %vm595_vm2, %v3013_v2, 0.0 }
 0x8ca   : > { %v3093_v3 = vmul.f32 0.5, %v3092_v50  ;;  %v2981_v27 = vpop.xlane.xlu2 %2980  ;;  %3043 = vadd.xlane.f32.xlu0 %v3042_v48  ;;  %v3029_v57 = vpop.xlane.xlu0 %3028 }
 0x8cb   : > { %v2992_v24 = vmul.f32 %v2981_v27, %v8159_v56  ;;  %v3052_v25 = vmul.f32 %v3029_v57, %v8159_v56  ;;  %v3193_v29 = vmul.f32 %v8538_v28, %v3181_v37 }
 0x8cc   : > { %v3094_v43 = vsub.f32 1.5, %v3093_v3 }
 0x8cd   : > { %v6950_v18 = vpop.eup %6949  ;;  %v8565_v61 = vsub.f32 %v8492_v62, %v2992_v24  ;;  %v3063_v46 = vadd.f32 1e-05, %v3052_v25  ;;  %v8568_v32 = vadd.f32 %v8542_v42, %v3193_v29 }
 0x8ce   : > { %v3095_v26 = vmul.f32 %v6948_v51, %v3094_v43  ;;  %v3101_v19 = vmul.f32 %v6950_v18, %v3062_v40  ;;  %vm3107_vm12 = vweird.f32 %v6950_v18 }
 0x8cf   : > { %10051 = vst [vmem:[#allocation14_spill] sm:$0xff] %v8568_v32  ;;  %6951 = vrsqrt.f32 %v3063_v46  ;;  %6478 = vmatmul.msk.f32.gmra.mxu2 %vm595_vm2, %v8568_v32  ;;  %v3014_v54 = vmul.f32 %v8565_v61, %v8565_v61  ;;  %vm3108_vm14 = vmor %vm3106_vm13, %vm3107_vm12  ;;  %vm3116_vm0 = vweird.f32 %v3063_v46 }
 0x8d0   : > { %v3099_v34 = vsel %vm3098_vm11, %v6948_v51, %v3095_v26  ;;  %v3102_v36 = vmul.f32 %v6950_v18, %v3101_v19 }
 0x8d1   : > { %v3182_v62 = vmul.f32 %v3099_v34, %v8462_v6  ;;  %v3045_v49 = vsel %vm595_vm2, %v3014_v54, 0.0 }
 0x8d2   : > { %v3103_v1 = vmul.f32 0.5, %v3102_v36  ;;  %3046 = vadd.xlane.f32.xlu2 %v3045_v49  ;;  %v3032_v20 = vpop.xlane.xlu1 %3031 }
 0x8d3   : > { %v3053_v44 = vmul.f32 %v3032_v20, %v8159_v56  ;;  %v3194_v31 = vmul.f32 %v8538_v28, %v3182_v62 }
 0x8d4   : > { %v3104_v47 = vsub.f32 1.5, %v3103_v1 }
 0x8d5   : > { %v6952_v16 = vpop.eup %6951  ;;  %v3064_v12 = vadd.f32 1e-05, %v3053_v44  ;;  %v8579_v10 = vadd.f32 %v8542_v42, %v3194_v31 }
 0x8d6   : > { %v3105_v58 = vmul.f32 %v6950_v18, %v3104_v47  ;;  %v3111_v7 = vmul.f32 %v6952_v16, %v3063_v46  ;;  %vm3117_vm15 = vweird.f32 %v6952_v16 }
 0x8d7   : > { %10052 = vst [vmem:[#allocation15_spill] sm:$0xff] %v8579_v10  ;;  %6953 = vrsqrt.f32 %v3064_v12  ;;  %6479 = vmatmul.msk.f32.gmra.mxu2 %vm595_vm2, %v8579_v10  ;;  %vm3118_vm1 = vmor %vm3116_vm0, %vm3117_vm15  ;;  %vm3126_vm7 = vweird.f32 %v3064_v12 }
 0x8d8   : > { %v3109_v6 = vsel %vm3108_vm14, %v6950_v18, %v3105_v58  ;;  %v3112_v30 = vmul.f32 %v6952_v16, %v3111_v7 }
 0x8d9   : > { %v3183_v5 = vmul.f32 %v3109_v6, %v8474_v8 }
 0x8da   : > { %v3113_v39 = vmul.f32 0.5, %v3112_v30  ;;  %v3035_v33 = vpop.xlane.xlu0 %3034 }
 0x8db   : > { %v3054_v35 = vmul.f32 %v3035_v33, %v8159_v56  ;;  %v3195_v59 = vmul.f32 %v8538_v28, %v3183_v5 }
 0x8dc   : > { %v3114_v17 = vsub.f32 1.5, %v3113_v39 }
 0x8dd   : > { %v6954_v15 = vpop.eup %6953  ;;  %v3065_v9 = vadd.f32 1e-05, %v3054_v35  ;;  %v8587_v52 = vadd.f32 %v8542_v42, %v3195_v59 }
 0x8de   : > { %v3115_v38 = vmul.f32 %v6952_v16, %v3114_v17  ;;  %v3121_v0 = vmul.f32 %v6954_v15, %v3064_v12  ;;  %vm3127_vm6 = vweird.f32 %v6954_v15  ;;  %v8621_v17 = vld [vmem:[%s9976_s4 + $0x1] ss:$0 sm:$0xff] }
 0x8df   : > { %10053 = vst [vmem:[#allocation16_spill] sm:$0xff] %v8587_v52  ;;  %6955 = vrsqrt.f32 %v3065_v9  ;;  %6480 = vmatmul.msk.f32.gmra.mxu2 %vm595_vm2, %v8587_v52  ;;  %vm3128_vm8 = vmor %vm3126_vm7, %vm3127_vm6  ;;  %vm3136_vm10 = vweird.f32 %v3065_v9 }
 0x8e0   : > { %v3119_v8 = vsel %vm3118_vm1, %v6952_v16, %v3115_v38  ;;  %v3122_v22 = vmul.f32 %v6954_v15, %v3121_v0 }
 0x8e1   : > { %v3184_v63 = vmul.f32 %v3119_v8, %v8486_v13 }
 0x8e2   : > { %v3123_v51 = vmul.f32 0.5, %v3122_v22 }
 0x8e3   : > { %v3196_v40 = vmul.f32 %v8538_v28, %v3184_v63 }
 0x8e4   : > { %v3124_v53 = vsub.f32 1.5, %v3123_v51 }
 0x8e5   : > { %v6956_v55 = vpop.eup %6955  ;;  %v8594_v2 = vadd.f32 %v8542_v42, %v3196_v40 }
 0x8e6   : > { %v3125_v21 = vmul.f32 %v6954_v15, %v3124_v53  ;;  %v3131_v50 = vmul.f32 %v6956_v55, %v3065_v9  ;;  %vm3137_vm9 = vweird.f32 %v6956_v55 }
 0x8e7   : > { %10054 = vst [vmem:[#allocation17_spill] sm:$0xff] %v8594_v2  ;;  %6481 = vmatmul.msk.f32.gmra.mxu2 %vm595_vm2, %v8594_v2  ;;  %vm3138_vm11 = vmor %vm3136_vm10, %vm3137_vm9 }
 0x8e8   : > { %v3129_v37 = vsel %vm3128_vm8, %v6954_v15, %v3125_v21  ;;  %v3132_v48 = vmul.f32 %v6956_v55, %v3131_v50 }
 0x8e9   : > { %v3185_v13 = vmul.f32 %v3129_v37, %v8498_v23 }
 0x8ea   : > { %v3133_v3 = vmul.f32 0.5, %v3132_v48 }
 0x8eb   : > { %v3197_v27 = vmul.f32 %v8538_v28, %v3185_v13 }
 0x8ec   : > { %v3134_v57 = vsub.f32 1.5, %v3133_v3 }
 0x8ed   : > { %v8601_v24 = vadd.f32 %v8542_v42, %v3197_v27 }
 0x8ee   : > { %v3135_v25 = vmul.f32 %v6956_v55, %v3134_v57 }
 0x8ef   : > { %10055 = vst [vmem:[#allocation2_spill] sm:$0xff] %v8601_v24  ;;  %6482 = vmatmul.msk.f32.gmra.mxu2 %vm595_vm2, %v8601_v24 }
 0x8f0   : > { %v3139_v29 = vsel %vm3138_vm11, %v6956_v55, %v3135_v25 }
 0x8f1   : > { %v3186_v43 = vmul.f32 %v3139_v29, %v8504_v45 }
 0x8f3   : > { %v3198_v18 = vmul.f32 %v8538_v28, %v3186_v43 }
 0x8f5   : > { %v8608_v23 = vadd.f32 %v8542_v42, %v3198_v18 }
 0x8f7   : > { %10056 = vst [vmem:[#allocation3_spill] sm:$0xff] %v8608_v23  ;;  %6483 = vmatmul.msk.f32.gmra.mxu2 %vm595_vm2, %v8608_v23 }
 0x92d   : > { %v3038_v46 = vpop.xlane.xlu2 %3037 }
 0x92e   : > { %v3055_v26 = vmul.f32 %v3038_v46, %v8159_v56 }
 0x930   : > { %v3066_v19 = vadd.f32 1e-05, %v3055_v26 }
 0x932   : > { %6957 = vrsqrt.f32 %v3066_v19  ;;  %vm3146_vm13 = vweird.f32 %v3066_v19 }
 0x935   : > { %v3041_v54 = vpop.xlane.xlu1 %3040 }
 0x936   : > { %v3056_v34 = vmul.f32 %v3041_v54, %v8159_v56 }
 0x938   : > { %v6958_v36 = vpop.eup %6957  ;;  %v3067_v62 = vadd.f32 1e-05, %v3056_v34 }
 0x939   : > { %v3141_v49 = vmul.f32 %v6958_v36, %v3066_v19  ;;  %vm3147_vm12 = vweird.f32 %v6958_v36 }
 0x93a   : > { %6959 = vrsqrt.f32 %v3067_v62  ;;  %vm3148_vm14 = vmor %vm3146_vm13, %vm3147_vm12  ;;  %vm3156_vm0 = vweird.f32 %v3067_v62 }
 0x93b   : > { %v3142_v45 = vmul.f32 %v6958_v36, %v3141_v49 }
 0x93d   : > { %v3143_v1 = vmul.f32 0.5, %v3142_v45  ;;  %v3044_v20 = vpop.xlane.xlu0 %3043 }
 0x93e   : > { %v3057_v44 = vmul.f32 %v3044_v20, %v8159_v56 }
 0x93f   : > { %v3144_v31 = vsub.f32 1.5, %v3143_v1 }
 0x940   : > { %v6960_v47 = vpop.eup %6959  ;;  %v3068_v16 = vadd.f32 1e-05, %v3057_v44 }
 0x941   : > { %v3145_v12 = vmul.f32 %v6958_v36, %v3144_v31  ;;  %v3151_v58 = vmul.f32 %v6960_v47, %v3067_v62  ;;  %vm3157_vm15 = vweird.f32 %v6960_v47 }
 0x942   : > { %6961 = vrsqrt.f32 %v3068_v16  ;;  %vm3158_vm1 = vmor %vm3156_vm0, %vm3157_vm15  ;;  %vm3166_vm7 = vweird.f32 %v3068_v16 }
 0x943   : > { %v3149_v7 = vsel %vm3148_vm14, %v6958_v36, %v3145_v12  ;;  %v3152_v6 = vmul.f32 %v6960_v47, %v3151_v58 }
 0x944   : > { %v3187_v30 = vmul.f32 %v3149_v7, %v8525_v11 }
 0x945   : > { %v3153_v5 = vmul.f32 0.5, %v3152_v6  ;;  %v3047_v39 = vpop.xlane.xlu2 %3046 }
 0x946   : > { %v3058_v33 = vmul.f32 %v3047_v39, %v8159_v56  ;;  %v3199_v35 = vmul.f32 %v8538_v28, %v3187_v30 }
 0x947   : > { %v3154_v59 = vsub.f32 1.5, %v3153_v5 }
 0x948   : > { %v6962_v15 = vpop.eup %6961  ;;  %v3069_v9 = vadd.f32 1e-05, %v3058_v33  ;;  %v8624_v38 = vadd.f32 %v8542_v42, %v3199_v35 }
 0x949   : > { %v3155_v0 = vmul.f32 %v6960_v47, %v3154_v59  ;;  %v3161_v11 = vmul.f32 %v6962_v15, %v3068_v16  ;;  %vm3167_vm6 = vweird.f32 %v6962_v15 }
 0x94a   : > { %10057 = vst [vmem:[#allocation4_spill] sm:$0xff] %v8624_v38  ;;  %6963 = vrsqrt.f32 %v3069_v9  ;;  %v3277_v8 = vpop.f32.mrf.mxu2  ;;  %6484 = vmatmul.msk.f32.gmra.mxu2 %vm595_vm2, %v8624_v38  ;;  %vm3168_vm8 = vmor %vm3166_vm7, %vm3167_vm6  ;;  %vm3176_vm10 = vweird.f32 %v3069_v9 }
 0x94b   : > { %v3159_v22 = vsel %vm3158_vm1, %v6960_v47, %v3155_v0  ;;  %v3162_v63 = vmul.f32 %v6962_v15, %v3161_v11  ;;  %v3278_v51 = vadd.f32 %v8621_v17, %v3277_v8 }
 0x94c   : > { %v3188_v40 = vmul.f32 %v3159_v22, %v8533_v41 }
 0x94d   : > { %v3163_v53 = vmul.f32 0.5, %v3162_v63  ;;  %3310 = vxpose.xlu1.b32.start [1/11] (short) (narrow) %v3278_v51, 96 }
 0x94e   : > { %v3200_v55 = vmul.f32 %v8538_v28, %v3188_v40 }
 0x94f   : > { %v3164_v21 = vsub.f32 1.5, %v3163_v53 }
 0x950   : > { %v6964_v50 = vpop.eup %6963  ;;  %v8632_v37 = vadd.f32 %v8542_v42, %v3200_v55 }
 0x951   : > { %v3165_v48 = vmul.f32 %v6962_v15, %v3164_v21  ;;  %v3171_v13 = vmul.f32 %v6964_v50, %v3069_v9  ;;  %vm3177_vm9 = vweird.f32 %v6964_v50 }
 0x952   : > { %10058 = vst [vmem:[#allocation5_spill] sm:$0xff] %v8632_v37  ;;  %v3280_v3 = vpop.f32.mrf.mxu2  ;;  %6485 = vmatmul.msk.f32.gmra.mxu2 %vm595_vm2, %v8632_v37  ;;  %vm3178_vm11 = vmor %vm3176_vm10, %vm3177_vm9 }
 0x953   : > { %v3169_v27 = vsel %vm3168_vm8, %v6962_v15, %v3165_v48  ;;  %v3172_v41 = vmul.f32 %v6964_v50, %v3171_v13  ;;  %v3281_v57 = vadd.f32 %v8621_v17, %v3280_v3 }
 0x954   : > { %v3189_v25 = vmul.f32 %v3169_v27, %v8553_v4 }
 0x955   : > { %v3173_v29 = vmul.f32 0.5, %v3172_v41  ;;  %3311 = vxpose.xlu1.b32.cont [2/11] (short) (narrow) %v3281_v57, 96 }
 0x956   : > { %v3201_v43 = vmul.f32 %v8538_v28, %v3189_v25 }
 0x957   : > { %v3174_v18 = vsub.f32 1.5, %v3173_v29 }
 0x958   : > { %v8640_v46 = vadd.f32 %v8542_v42, %v3201_v43 }
 0x959   : > { %v3175_v26 = vmul.f32 %v6964_v50, %v3174_v18 }
 0x95a   : > { %10059 = vst [vmem:[#allocation6_spill] sm:$0xff] %v8640_v46  ;;  %v3283_v19 = vpop.f32.mrf.mxu2  ;;  %6486 = vmatmul.msk.f32.gmra.mxu2 %vm595_vm2, %v8640_v46 }
 0x95b   : > { %v3179_v54 = vsel %vm3178_vm11, %v6964_v50, %v3175_v26  ;;  %v3284_v34 = vadd.f32 %v8621_v17, %v3283_v19 }
 0x95c   : > { %v3190_v4 = vmul.f32 %v3179_v54, %v8565_v61 }
 0x95d   : > { %3312 = vxpose.xlu1.b32.cont [3/11] (short) (narrow) %v3284_v34, 96 }
 0x95e   : > { %v3202_v36 = vmul.f32 %v8538_v28, %v3190_v4 }
 0x960   : > { %v8648_v62 = vadd.f32 %v8542_v42, %v3202_v36 }
 0x962   : > { %10060 = vst [vmem:[#allocation7_spill] sm:$0xff] %v8648_v62  ;;  %v3286_v49 = vpop.f32.mrf.mxu2  ;;  %6487 = vmatmul.msk.f32.gmra.mxu2 %vm595_vm2, %v8648_v62 }
 0x963   : > { %v3287_v45 = vadd.f32 %v8621_v17, %v3286_v49 }
 0x965   : > { %3313 = vxpose.xlu1.b32.cont [4/11] (short) (narrow) %v3287_v45, 96 }
 0x96a   : > { %v3289_v1 = vpop.f32.mrf.mxu2 }
 0x96b   : > { %v3290_v20 = vadd.f32 %v8621_v17, %v3289_v1 }
 0x96d   : > { %3314 = vxpose.xlu1.b32.cont [5/11] (short) (narrow) %v3290_v20, 96 }
 0x972   : > { %v3292_v44 = vpop.f32.mrf.mxu2 }
 0x973   : > { %v3293_v61 = vadd.f32 %v8621_v17, %v3292_v44 }
 0x975   : > { %3315 = vxpose.xlu1.b32.cont [6/11] (short) (narrow) %v3293_v61, 96 }
 0x97a   : > { %v3295_v31 = vpop.f32.mrf.mxu2 }
 0x97b   : > { %v3296_v28 = vadd.f32 %v8621_v17, %v3295_v31 }
 0x97d   : > { %3316 = vxpose.xlu1.b32.cont [7/11] (short) (narrow) %v3296_v28, 96 }
 0x9cd   : > { %v3298_v42 = vpop.f32.mrf.mxu2 }
 0x9ce   : > { %v3299_v47 = vadd.f32 %v8621_v17, %v3298_v42 }
 0x9d0   : > { %3317 = vxpose.xlu1.b32.cont [8/11] (short) (narrow) %v3299_v47, 96 }
 0x9d5   : > { %v3301_v16 = vpop.f32.mrf.mxu2 }
 0x9d6   : > { %v3302_v12 = vadd.f32 %v8621_v17, %v3301_v16 }
 0x9d8   : > { %3318 = vxpose.xlu1.b32.cont [9/11] (short) (narrow) %v3302_v12, 96 }
 0x9dd   : > { %v3304_v58 = vpop.f32.mrf.mxu2 }
 0x9de   : > { %v3305_v7 = vadd.f32 %v8621_v17, %v3304_v58 }
 0x9e0   : > { %3319 = vxpose.xlu1.b32.cont [10/11] (short) (narrow) %v3305_v7, 96 }
 0x9e5   : > { %v3307_v6 = vpop.f32.mrf.mxu2 }
 0x9e6   : > { %v3308_v30 = vadd.f32 %v8621_v17, %v3307_v6 }
 0x9e8   : > { %3320 = vxpose.xlu1.b32.end [11/11] (short) (narrow) %v3308_v30, 96 }
 0xa3c   : > { %v3326_v5 = vpop.trf.xlu1 }
 0xa3d   : > { %3342 = vxpose.xlu2.b32.start.end [1/1] (short) (narrow) %v3326_v5, 88 }
 0xa44   : > { %v3327_v39 = vpop.trf.xlu1 }
 0xa45   : > { %3374 = vxpose.xlu0.b32.start.end [1/1] (short) (narrow) %v3327_v39, 88 }
 0xa4c   : > { %v3328_v33 = vpop.trf.xlu1 }
 0xa54   : > { %v3329_v35 = vpop.trf.xlu1 }
 0xa5c   : > { %v3330_v59 = vpop.trf.xlu1 }
 0xa5d   : > { %3518 = vmatpush.msrb.mxu3 %v3330_v59 }
 0xa64   : > { %v3331_v15 = vpop.trf.xlu1 }
 0xa65   : > { %3601 = vmatpush.msra.mxu0 %v3331_v15 }
 0xa6c   : > { %v3332_v9 = vpop.trf.xlu1 }
 0xa6d   : > { %3684 = vmatpush.msra.mxu1 %v3332_v9 }
 0xa74   : > { %v3333_v11 = vpop.trf.xlu1 }
 0xa75   : > { %3767 = vmatpush.msrb.mxu2 %v3333_v11 }
 0xa95   : > { %3406 = vxpose.xlu2.b32.start.end [1/1] (short) (narrow) %v3328_v33, 88 }
 0xa9d   : > { %3438 = vxpose.xlu0.b32.start.end [1/1] (short) (narrow) %v3329_v35, 88 }
 0xad6   : > { %v3358_v0 = vpop.trf.xlu2 }
 0xad7   : > { %6488 = vmatmul.msk.f32.vlgmr.msrb.gmra.mxu3 %vm839_vm3, %v3358_v0 }
 0xade   : > { %v3359_v17 = vpop.trf.xlu2 }
 0xadf   : > { %6489 = vmatmul.msk.f32.gmra.mxu3 %vm839_vm3, %v3359_v17 }
 0xae6   : > { %v3360_v8 = vpop.trf.xlu2 }
 0xae7   : > { %6490 = vmatmul.msk.f32.gmra.mxu3 %vm839_vm3, %v3360_v8 }
 0xae9   : > { %v3390_v22 = vpop.trf.xlu0 }
 0xaea   : > { %6499 = vmatmul.msk.f32.vlgmr.msra.gmra.mxu0 %vm839_vm3, %v3390_v22 }
 0xaee   : > { %v3361_v63 = vpop.trf.xlu2 }
 0xaef   : > { %6491 = vmatmul.msk.f32.gmra.mxu3 %vm839_vm3, %v3361_v63 }
 0xaf1   : > { %v3391_v51 = vpop.trf.xlu0 }
 0xaf2   : > { %6500 = vmatmul.msk.f32.gmra.mxu0 %vm839_vm3, %v3391_v51 }
 0xaf6   : > { %v3362_v40 = vpop.trf.xlu2 }
 0xaf7   : > { %6492 = vmatmul.msk.f32.gmra.mxu3 %vm839_vm3, %v3362_v40 }
 0xaf9   : > { %v3392_v53 = vpop.trf.xlu0 }
 0xafa   : > { %6501 = vmatmul.msk.f32.gmra.mxu0 %vm839_vm3, %v3392_v53 }
 0xafe   : > { %v3363_v55 = vpop.trf.xlu2 }
 0xaff   : > { %6493 = vmatmul.msk.f32.gmra.mxu3 %vm839_vm3, %v3363_v55 }
 0xb01   : > { %v3393_v21 = vpop.trf.xlu0 }
 0xb02   : > { %6502 = vmatmul.msk.f32.gmra.mxu0 %vm839_vm3, %v3393_v21  ;;  %v3334_v21 = vpop.trf.xlu1 }
 0xb03   : > { %6532 = vmatpush.xpose.msk.msra.mxu3 %vm1260_vm5, %v3334_v21 }
 0xb06   : > { %v3364_v50 = vpop.trf.xlu2 }
 0xb07   : > { %6494 = vmatmul.msk.f32.gmra.mxu3 %vm839_vm3, %v3364_v50 }
 0xb09   : > { %v3394_v48 = vpop.trf.xlu0 }
 0xb0a   : > { %6503 = vmatmul.msk.f32.gmra.mxu0 %vm839_vm3, %v3394_v48  ;;  %v3335_v48 = vpop.trf.xlu1 }
 0xb0b   : > { %6544 = vmatpush.xpose.msk.msrb.mxu0 %vm1260_vm5, %v3335_v48 }
 0xb0e   : > { %v3365_v13 = vpop.trf.xlu2 }
 0xb0f   : > { %6495 = vmatmul.msk.f32.gmra.mxu3 %vm839_vm3, %v3365_v13 }
 0xb11   : > { %v3395_v3 = vpop.trf.xlu0 }
 0xb12   : > { %6504 = vmatmul.msk.f32.gmra.mxu0 %vm839_vm3, %v3395_v3 }
 0xb16   : > { %v3366_v27 = vpop.trf.xlu2 }
 0xb17   : > { %6496 = vmatmul.msk.f32.gmra.mxu3 %vm839_vm3, %v3366_v27 }
 0xb19   : > { %v3396_v41 = vpop.trf.xlu0 }
 0xb1a   : > { %6505 = vmatmul.msk.f32.gmra.mxu0 %vm839_vm3, %v3396_v41 }
 0xb1e   : > { %v3367_v57 = vpop.trf.xlu2 }
 0xb1f   : > { %6497 = vmatmul.msk.f32.gmra.mxu3 %vm839_vm3, %v3367_v57  ;;  %v3336_v57 = vpop.trf.xlu1 }
 0xb20   : > { %6556 = vmatpush.xpose.msk.msrb.mxu1 %vm1260_vm5, %v3336_v57 }
 0xb21   : > { %v3397_v25 = vpop.trf.xlu0 }
 0xb22   : > { %6506 = vmatmul.msk.f32.gmra.mxu0 %vm839_vm3, %v3397_v25 }
 0xb26   : > { %v3368_v29 = vpop.trf.xlu2 }
 0xb27   : > { %6498 = vmatmul.msk.f32.gmra.mxu3 %vm839_vm3, %v3368_v29 }
 0xb29   : > { %v3398_v43 = vpop.trf.xlu0 }
 0xb2a   : > { %6507 = vmatmul.msk.f32.gmra.mxu0 %vm839_vm3, %v3398_v43 }
 0xb2e   : > { %v3422_v18 = vpop.trf.xlu2 }
 0xb2f   : > { %6510 = vmatmul.msk.f32.vlgmr.msra.gmra.mxu1 %vm839_vm3, %v3422_v18 }
 0xb31   : > { %v3399_v26 = vpop.trf.xlu0 }
 0xb32   : > { %6508 = vmatmul.msk.f32.gmra.mxu0 %vm839_vm3, %v3399_v26 }
 0xb36   : > { %v3423_v19 = vpop.trf.xlu2 }
 0xb37   : > { %6511 = vmatmul.msk.f32.gmra.mxu1 %vm839_vm3, %v3423_v19 }
 0xb39   : > { %v3400_v54 = vpop.trf.xlu0 }
 0xb3a   : > { %6509 = vmatmul.msk.f32.gmra.mxu0 %vm839_vm3, %v3400_v54 }
 0xb3e   : > { %v3424_v34 = vpop.trf.xlu2 }
 0xb3f   : > { %6512 = vmatmul.msk.f32.gmra.mxu1 %vm839_vm3, %v3424_v34  ;;  %v3337_v34 = vpop.trf.xlu1 }
 0xb40   : > { %6568 = vmatpush.xpose.msk.msra.mxu2 %vm1260_vm5, %v3337_v34 }
 0xb41   : > { %v3454_v4 = vpop.trf.xlu0 }
 0xb42   : > { %6521 = vmatmul.msk.f32.vlgmr.msrb.gmra.mxu2 %vm839_vm3, %v3454_v4 }
 0xb46   : > { %v3425_v36 = vpop.trf.xlu2 }
 0xb47   : > { %6513 = vmatmul.msk.f32.gmra.mxu1 %vm839_vm3, %v3425_v36 }
 0xb49   : > { %v3455_v49 = vpop.trf.xlu0 }
 0xb4a   : > { %6522 = vmatmul.msk.f32.gmra.mxu2 %vm839_vm3, %v3455_v49 }
 0xb4e   : > { %v3426_v45 = vpop.trf.xlu2 }
 0xb4f   : > { %6514 = vmatmul.msk.f32.gmra.mxu1 %vm839_vm3, %v3426_v45 }
 0xb51   : > { %v3456_v1 = vpop.trf.xlu0 }
 0xb52   : > { %6523 = vmatmul.msk.f32.gmra.mxu2 %vm839_vm3, %v3456_v1 }
 0xb56   : > { %v3427_v16 = vpop.trf.xlu2 }
 0xb57   : > { %6515 = vmatmul.msk.f32.gmra.mxu1 %vm839_vm3, %v3427_v16 }
 0xb59   : > { %v3457_v20 = vpop.trf.xlu0 }
 0xb5a   : > { %v3520_v44 = vpop.f32.mrf.mxu3  ;;  %6524 = vmatmul.msk.f32.gmra.mxu2 %vm839_vm3, %v3457_v20 }
 0xb5b   : > { %v3802_v61 = vmul.f32 0.35355338, %v3520_v44 }
 0xb5d   : > { %v8692_v31 = vadd.f32 %v3802_v61, %v7440_v60 }
 0xb5e   : > { %v3428_v40 = vpop.trf.xlu2 }
 0xb5f   : > { %v3890_v28 = vsel %vm1260_vm5, %v8692_v31, -inf  ;;  %6516 = vmatmul.msk.f32.gmra.mxu1 %vm839_vm3, %v3428_v40 }
 0xb60   : > { %3891 = vmax.xlane.f32.xlu2 %v3890_v28 }
 0xb61   : > { %v3458_v42 = vpop.trf.xlu0 }
 0xb62   : > { %v3523_v47 = vpop.f32.mrf.mxu3  ;;  %6525 = vmatmul.msk.f32.gmra.mxu2 %vm839_vm3, %v3458_v42 }
 0xb63   : > { %v3803_v5 = vmul.f32 0.35355338, %v3523_v47 }
 0xb65   : > { %v8705_v35 = vadd.f32 %v3803_v5, %v7440_v60 }
 0xb66   : > { %v3429_v53 = vpop.trf.xlu2 }
 0xb67   : > { %v3603_v12 = vpop.f32.mrf.mxu0  ;;  %v3893_v0 = vsel %vm1260_vm5, %v8705_v35, -inf  ;;  %6517 = vmatmul.msk.f32.gmra.mxu1 %vm839_vm3, %v3429_v53 }
 0xb68   : > { %v3813_v58 = vmul.f32 0.35355338, %v3603_v12 }
 0xb69   : > { %v3459_v7 = vpop.trf.xlu0 }
 0xb6a   : > { %v3526_v6 = vpop.f32.mrf.mxu3  ;;  %6526 = vmatmul.msk.f32.gmra.mxu2 %vm839_vm3, %v3459_v7  ;;  %v8700_v30 = vadd.f32 %v3813_v58, %v7440_v60 }
 0xb6b   : > { %v3804_v43 = vmul.f32 0.35355338, %v3526_v6 }
 0xb6c   : > { %v3923_v39 = vsel %vm1260_vm5, %v8700_v30, -inf }
 0xb6d   : > { %3924 = vmax.xlane.f32.xlu1 %v3923_v39  ;;  %v8737_v19 = vadd.f32 %v3804_v43, %v7440_v60 }
 0xb6e   : > { %v3430_v55 = vpop.trf.xlu2 }
 0xb6f   : > { %v3606_v33 = vpop.f32.mrf.mxu0  ;;  %6518 = vmatmul.msk.f32.gmra.mxu1 %vm839_vm3, %v3430_v55  ;;  %v3896_v36 = vsel %vm1260_vm5, %v8737_v19, -inf }
 0xb70   : > { %v3814_v9 = vmul.f32 0.35355338, %v3606_v33 }
 0xb71   : > { %v3460_v59 = vpop.trf.xlu0 }
 0xb72   : > { %v8707_v15 = vpop.f32.mrf.mxu3  ;;  %6527 = vmatmul.msk.f32.gmra.mxu2 %vm839_vm3, %v3460_v59  ;;  %v8713_v11 = vadd.f32 %v3814_v9, %v7440_v60 }
 0xb73   : > { %v3805_v33 = vmul.f32 0.35355338, %v8707_v15 }
 0xb74   : > { %v3926_v8 = vsel %vm1260_vm5, %v8713_v11, -inf }
 0xb75   : > { %3894 = vmax.xlane.f32.xlu1 %v3893_v0  ;;  %v8770_v40 = vadd.f32 %v3805_v33, %v7440_v60 }
 0xb76   : > { %v3431_v50 = vpop.trf.xlu2 }
 0xb77   : > { %6519 = vmatmul.msk.f32.gmra.mxu1 %vm839_vm3, %v3431_v50  ;;  %v3609_v27 = vpop.f32.mrf.mxu0 }
 0xb78   : > { %v3815_v4 = vmul.f32 0.35355338, %v3609_v27 }
 0xb79   : > { %v3461_v25 = vpop.trf.xlu0 }
 0xb7a   : > { %v3532_v17 = vpop.f32.mrf.mxu3  ;;  %6528 = vmatmul.msk.f32.gmra.mxu2 %vm839_vm3, %v3461_v25  ;;  %v8743_v45 = vadd.f32 %v3815_v4, %v7440_v60 }
 0xb7b   : > { %v3806_v22 = vmul.f32 0.35355338, %v3532_v17 }
 0xb7c   : > { %v3929_v20 = vsel %vm1260_vm5, %v8743_v45, -inf }
 0xb7d   : > { %3927 = vmax.xlane.f32.xlu1 %v3926_v8  ;;  %v8718_v63 = vadd.f32 %v3806_v22, %v7440_v60 }
 0xb7e   : > { %v3432_v13 = vpop.trf.xlu2 }
 0xb7f   : > { %v3902_v51 = vsel %vm1260_vm5, %v8718_v63, -inf  ;;  %6520 = vmatmul.msk.f32.gmra.mxu1 %vm839_vm3, %v3432_v13  ;;  %v3612_v54 = vpop.f32.mrf.mxu0 }
 0xb80   : > { %3903 = vmax.xlane.f32.xlu2 %v3902_v51  ;;  %v3816_v13 = vmul.f32 0.35355338, %v3612_v54 }
 0xb81   : > { %v3462_v47 = vpop.trf.xlu0 }
 0xb82   : > { %v8747_v61 = vpop.f32.mrf.mxu3  ;;  %6529 = vmatmul.msk.f32.gmra.mxu2 %vm839_vm3, %v3462_v47  ;;  %v8786_v43 = vadd.f32 %v3816_v13, %v7440_v60 }
 0xb87   : > { %v3615_v44 = vpop.f32.mrf.mxu0 }
 0xb88   : > { %v3817_v59 = vmul.f32 0.35355338, %v3615_v44 }
 0xb89   : > { %v3463_v22 = vpop.trf.xlu0 }
 0xb8a   : > { %v8773_v15 = vadd.f32 %v3817_v59, %v7440_v60  ;;  %6530 = vmatmul.msk.f32.gmra.mxu2 %vm839_vm3, %v3463_v22  ;;  %v3538_v55 = vpop.f32.mrf.mxu3  ;;  %v3807_v59 = vmul.f32 0.35355338, %v8747_v61 }
 0xb8b   : > { %v3808_v48 = vmul.f32 0.35355338, %v3538_v55 }
 0xb8c   : > { %v3935_v27 = vsel %vm1260_vm5, %v8773_v15, -inf }
 0xb8f   : > { %v3618_v17 = vpop.f32.mrf.mxu0 }
 0xb90   : > { %v3818_v13 = vmul.f32 0.35355338, %v3618_v17 }
 0xb91   : > { %v3464_v57 = vpop.trf.xlu0 }
 0xb92   : > { %6531 = vmatmul.msk.f32.gmra.mxu2 %vm839_vm3, %v3464_v57 }
 0xbac   : > { %v3686_v3 = vpop.f32.mrf.mxu1 }
 0xbad   : > { %v3824_v41 = vmul.f32 0.35355338, %v3686_v3  ;;  %v3899_v3 = vsel %vm1260_vm5, %v8770_v40, -inf }
 0xbaf   : > { %v8730_v29 = vadd.f32 %v3824_v41, %v7440_v60 }
 0xbb1   : > { %v3956_v18 = vsel %vm1260_vm5, %v8730_v29, -inf }
 0xbb2   : > { %3957 = vmax.xlane.f32.xlu1 %v3956_v18  ;;  %v8789_v18 = vadd.f32 %v3808_v48, %v7440_v60 }
 0xbb4   : > { %v3689_v26 = vpop.f32.mrf.mxu1 }
 0xbb5   : > { %v3825_v1 = vmul.f32 0.35355338, %v3689_v26  ;;  %v3621_v26 = vpop.f32.mrf.mxu0 }
 0xbb6   : > { %v3819_v4 = vmul.f32 0.35355338, %v3621_v26 }
 0xbb7   : > { %v8750_v28 = vadd.f32 %v3825_v1, %v7440_v60 }
 0xbb8   : > { %v8802_v44 = vadd.f32 %v3819_v4, %v7440_v60 }
 0xbb9   : > { %v3959_v7 = vsel %vm1260_vm5, %v8750_v28, -inf }
 0xbba   : > { %3897 = vmax.xlane.f32.xlu1 %v3896_v36  ;;  %v3932_v36 = vsel %vm1260_vm5, %v8786_v43, -inf }
 0xbbc   : > { %v3692_v49 = vpop.f32.mrf.mxu1 }
 0xbbd   : > { %v3826_v5 = vmul.f32 0.35355338, %v3692_v49  ;;  %v3908_v49 = vsel %vm1260_vm5, %v8789_v18, -inf }
 0xbbf   : > { %v8767_v8 = vadd.f32 %v3826_v5, %v7440_v60 }
 0xbc1   : > { %v3962_v21 = vsel %vm1260_vm5, %v8767_v8, -inf }
 0xbc2   : > { %3930 = vmax.xlane.f32.xlu1 %v3929_v20 }
 0xbc4   : > { %v3695_v42 = vpop.f32.mrf.mxu1 }
 0xbc5   : > { %v3827_v16 = vmul.f32 0.35355338, %v3695_v42  ;;  %v3769_v12 = vpop.f32.mrf.mxu2 }
 0xbc6   : > { %v3835_v58 = vmul.f32 0.35355338, %v3769_v12  ;;  %v3941_v12 = vsel %vm1260_vm5, %v8802_v44, -inf }
 0xbc7   : > { %v8756_v6 = vadd.f32 %v3827_v16, %v7440_v60 }
 0xbc8   : > { %v8759_v39 = vadd.f32 %v3835_v58, %v7440_v60 }
 0xbc9   : > { %v3965_v9 = vsel %vm1260_vm5, %v8756_v6, -inf }
 0xbca   : > { %3960 = vmax.xlane.f32.xlu1 %v3959_v7  ;;  %3966 = vmax.xlane.f32.xlu2 %v3965_v9  ;;  %v3989_v0 = vsel %vm1260_vm5, %v8759_v39, -inf }
 0xbcb   : > { %3990 = vmax.xlane.f32.xlu0 %v3989_v0 }
 0xbcc   : > { %v3698_v53 = vpop.f32.mrf.mxu1 }
 0xbcd   : > { %v3772_v51 = vpop.f32.mrf.mxu2  ;;  %v3828_v50 = vmul.f32 0.35355338, %v3698_v53  ;;  %v8816_v53 = vadd.f32 %v3807_v59, %v7440_v60 }
 0xbce   : > { %v3836_v54 = vmul.f32 0.35355338, %v3772_v51 }
 0xbcf   : > { %v8783_v41 = vadd.f32 %v3828_v50, %v7440_v60 }
 0xbd0   : > { %v8799_v1 = vadd.f32 %v3836_v54, %v7440_v60 }
 0xbd1   : > { %v3968_v34 = vsel %vm1260_vm5, %v8783_v41, -inf }
 0xbd2   : > { %3900 = vmax.xlane.f32.xlu1 %v3899_v3  ;;  %3936 = vmax.xlane.f32.xlu2 %v3935_v27  ;;  %v3992_v47 = vsel %vm1260_vm5, %v8799_v1, -inf }
 0xbd3   : > { %3963 = vmax.xlane.f32.xlu0 %v3962_v21  ;;  %v3892_v0 = vpop.xlane.xlu2 %3891 }
 0xbd4   : > { %v4022_v21 = vsub.f32 %v8692_v31, %v3892_v0  ;;  %v8828_v31 = vadd.f32 %v3818_v13, %v7440_v60 }
 0xbd5   : > { %v3775_v25 = vpop.f32.mrf.mxu2 }
 0xbd6   : > { %v3837_v42 = vmul.f32 0.35355338, %v3775_v25  ;;  %v4066_v27 = vmul.f32 1.442695, %v4022_v21  ;;  %v3938_v4 = vsel %vm1260_vm5, %v8828_v31, -inf }
 0xbd8   : > { %v8809_v58 = vadd.f32 %v3837_v42, %v7440_v60  ;;  %v3701_v42 = vpop.f32.mrf.mxu1 }
 0xbda   : > { %3933 = vmax.xlane.f32.xlu1 %v3932_v36  ;;  %3909 = vmax.xlane.f32.xlu2 %v3908_v49  ;;  %v3995_v5 = vsel %vm1260_vm5, %v8809_v58, -inf }
 0xbdb   : > { %3969 = vmax.xlane.f32.xlu0 %v3968_v34 }
 0xbdd   : > { %v3778_v20 = vpop.f32.mrf.mxu2 }
 0xbde   : > { %v3838_v17 = vmul.f32 0.35355338, %v3778_v20 }
 0xbe0   : > { %v3925_v16 = vpop.xlane.xlu1 %3924  ;;  %v8843_v20 = vadd.f32 %v3838_v17, %v7440_v60 }
 0xbe1   : > { %v4033_v9 = vsub.f32 %v8700_v30, %v3925_v16  ;;  %v3905_v30 = vsel %vm1260_vm5, %v8816_v53, -inf }
 0xbe2   : > { %3942 = vmax.xlane.f32.xlu2 %v3941_v12  ;;  %3993 = vmax.xlane.f32.xlu1 %v3992_v47  ;;  %v3998_v12 = vsel %vm1260_vm5, %v8843_v20, -inf }
 0xbe3   : > { %v4088_v22 = vmul.f32 1.442695, %v4033_v9 }
 0xbe5   : > { %v3781_v7 = vpop.f32.mrf.mxu2  ;;  %6965 = vpow2.f32 %v4088_v22 }
 0xbe6   : > { %6967 = vpow2.f32 %v4066_v27  ;;  %v3839_v22 = vmul.f32 0.35355338, %v3781_v7 }
 0xbe8   : > { %v3895_v33 = vpop.xlane.xlu1 %3894  ;;  %v8865_v21 = vadd.f32 %v3839_v22, %v7440_v60 }
 0xbe9   : > { %v4023_v34 = vsub.f32 %v8705_v35, %v3895_v33 }
 0xbea   : > { %3996 = vmax.xlane.f32.xlu1 %v3995_v5  ;;  %v3829_v5 = vmul.f32 0.35355338, %v3701_v42 }
 0xbeb   : > { %v8830_v54 = vpop.eup %6965  ;;  %v4068_v47 = vmul.f32 1.442695, %v4023_v34 }
 0xbec   : > { %v4187_v49 = vsel %vm1260_vm5, %v8830_v54, 0.0  ;;  %v8845_v16 = vpop.eup %6967  ;;  %v8856_v9 = vadd.f32 %v3829_v5, %v7440_v60 }
 0xbed   : > { %v3784_v51 = vpop.f32.mrf.mxu2  ;;  %v4154_v33 = vsel %vm1260_vm5, %v8845_v16, 0.0 }
 0xbee   : > { %v3840_v55 = vmul.f32 0.35355338, %v3784_v51  ;;  %v3971_v51 = vsel %vm1260_vm5, %v8856_v9, -inf }
 0xbf0   : > { %v3928_v50 = vpop.xlane.xlu1 %3927  ;;  %v8820_v48 = vadd.f32 %v3840_v55, %v7440_v60 }
 0xbf1   : > { %v4034_v61 = vsub.f32 %v8713_v11, %v3928_v50  ;;  %v4001_v50 = vsel %vm1260_vm5, %v8865_v21, -inf }
 0xbf2   : > { %3906 = vmax.xlane.f32.xlu1 %v3905_v30  ;;  %v4004_v3 = vsel %vm1260_vm5, %v8820_v48, -inf }
 0xbf3   : > { %4005 = vmax.xlane.f32.xlu2 %v4004_v3  ;;  %v4090_v57 = vmul.f32 1.442695, %v4034_v61 }
 0xbf5   : > { %v3787_v25 = vpop.f32.mrf.mxu2  ;;  %6969 = vpow2.f32 %v4090_v57 }
 0xbf6   : > { %v3841_v26 = vmul.f32 0.35355338, %v3787_v25  ;;  %6971 = vpow2.f32 %v4068_v47 }
 0xbf8   : > { %v8833_v11 = vadd.f32 %v3841_v26, %v7440_v60 }
 0xbfa   : > { %3939 = vmax.xlane.f32.xlu1 %v3938_v4  ;;  %v4007_v36 = vsel %vm1260_vm5, %v8833_v11, -inf  ;;  %v8878_v4 = vpop.xlane.xlu2 %3903 }
 0xbfb   : > { %4008 = vmax.xlane.f32.xlu0 %v4007_v36  ;;  %4188 = vadd.xlane.f32.xlu2 %v4187_v49  ;;  %v8847_v35 = vpop.eup %6969 }
 0xbfc   : > { %v4190_v59 = vsel %vm1260_vm5, %v8847_v35, 0.0  ;;  %v8858_v0 = vpop.eup %6971 }
 0xbfd   : > { %v4157_v55 = vsel %vm1260_vm5, %v8858_v0, 0.0 }
 0xc02   : > { %3999 = vmax.xlane.f32.xlu1 %v3998_v12 }
 0xc03   : > { %4155 = vadd.xlane.f32.xlu0 %v4154_v33  ;;  %4191 = vadd.xlane.f32.xlu2 %v4190_v59 }
 0xc0a   : > { %3972 = vmax.xlane.f32.xlu1 %v3971_v51 }
 0xc0b   : > { %4158 = vadd.xlane.f32.xlu0 %v4157_v55 }
 0xc12   : > { %4002 = vmax.xlane.f32.xlu1 %v4001_v50 }
 0xc25   : > { %v3958_v13 = vpop.xlane.xlu1 %3957 }
 0xc26   : > { %v4044_v61 = vsub.f32 %v8730_v29, %v3958_v13 }
 0xc28   : > { %v4110_v30 = vmul.f32 1.442695, %v4044_v61 }
 0xc2a   : > { %6973 = vpow2.f32 %v4110_v30 }
 0xc2d   : > { %v3898_v7 = vpop.xlane.xlu1 %3897 }
 0xc2e   : > { %v4024_v3 = vsub.f32 %v8737_v19, %v3898_v7 }
 0xc30   : > { %v8871_v27 = vpop.eup %6973  ;;  %v4070_v57 = vmul.f32 1.442695, %v4024_v3 }
 0xc31   : > { %v4220_v25 = vsel %vm1260_vm5, %v8871_v27, 0.0 }
 0xc32   : > { %6975 = vpow2.f32 %v4070_v57  ;;  %4221 = vadd.xlane.f32.xlu1 %v4220_v25 }
 0xc35   : > { %v3931_v26 = vpop.xlane.xlu1 %3930 }
 0xc36   : > { %v4035_v17 = vsub.f32 %v8743_v45, %v3931_v26  ;;  %v3790_v26 = vpop.f32.mrf.mxu2 }
 0xc38   : > { %v8876_v34 = vpop.eup %6975  ;;  %v4092_v29 = vmul.f32 1.442695, %v4035_v17 }
 0xc39   : > { %v4160_v36 = vsel %vm1260_vm5, %v8876_v34, 0.0 }
 0xc3a   : > { %6977 = vpow2.f32 %v4092_v29  ;;  %4161 = vadd.xlane.f32.xlu2 %v4160_v36  ;;  %v3842_v36 = vmul.f32 0.35355338, %v3790_v26 }
 0xc3d   : > { %v3961_v19 = vpop.xlane.xlu1 %3960  ;;  %v8886_v5 = vpop.xlane.xlu2 %3966 }
 0xc3e   : > { %v4045_v49 = vsub.f32 %v8750_v28, %v3961_v19  ;;  %v3991_v42 = vpop.xlane.xlu0 %3990 }
 0xc3f   : > { %v4055_v47 = vsub.f32 %v8759_v39, %v3991_v42 }
 0xc40   : > { %v8884_v12 = vpop.eup %6977  ;;  %v4112_v45 = vmul.f32 1.442695, %v4045_v49 }
 0xc41   : > { %v4132_v33 = vmul.f32 1.442695, %v4055_v47  ;;  %v4193_v59 = vsel %vm1260_vm5, %v8884_v12, 0.0  ;;  %v3624_v47 = vpop.f32.mrf.mxu0 }
 0xc42   : > { %4194 = vadd.xlane.f32.xlu1 %v4193_v59  ;;  %6979 = vpow2.f32 %v4112_v45 }
 0xc43   : > { %6981 = vpow2.f32 %v4132_v33  ;;  %v8914_v33 = vadd.f32 %v3842_v36, %v7440_v60 }
 0xc45   : > { %v3901_v22 = vpop.xlane.xlu1 %3900  ;;  %v8896_v30 = vpop.xlane.xlu2 %3936 }
 0xc46   : > { %v4025_v51 = vsub.f32 %v8770_v40, %v3901_v22  ;;  %v3964_v55 = vpop.xlane.xlu0 %3963  ;;  %v3541_v40 = vpop.f32.mrf.mxu3 }
 0xc47   : > { %v4046_v28 = vsub.f32 %v8767_v8, %v3964_v55  ;;  %v3704_v8 = vpop.f32.mrf.mxu1 }
 0xc48   : > { %v4072_v50 = vmul.f32 1.442695, %v4025_v51  ;;  %v8892_v39 = vpop.eup %6979  ;;  %v3830_v55 = vmul.f32 0.35355338, %v3704_v8 }
 0xc49   : > { %v4114_v13 = vmul.f32 1.442695, %v4046_v28  ;;  %v8894_v61 = vpop.eup %6981  ;;  %v4223_v7 = vsel %vm1260_vm5, %v8892_v39, 0.0  ;;  %v8929_v26 = vpop.f32.mrf.mxu0 }
 0xc4a   : > { %6983 = vpow2.f32 %v4072_v50  ;;  %4224 = vadd.xlane.f32.xlu0 %v4223_v7  ;;  %v4253_v3 = vsel %vm1260_vm5, %v8894_v61, 0.0 }
 0xc4b   : > { %6985 = vpow2.f32 %v4114_v13  ;;  %4254 = vadd.xlane.f32.xlu1 %v4253_v3  ;;  %v4010_v13 = vsel %vm1260_vm5, %v8914_v33, -inf  ;;  %v3793_v3 = vpop.f32.mrf.mxu2 }
 0xc4d   : > { %v3934_v57 = vpop.xlane.xlu1 %3933  ;;  %v8911_v45 = vpop.xlane.xlu2 %3909 }
 0xc4e   : > { %v4036_v25 = vsub.f32 %v8786_v43, %v3934_v57  ;;  %v3544_v59 = vpop.f32.mrf.mxu3  ;;  %v8947_v37 = vpop.xlane.xlu0 %3969 }
 0xc4f   : > { %v3707_v51 = vpop.f32.mrf.mxu1 }
 0xc50   : > { %v4094_v17 = vmul.f32 1.442695, %v4036_v25  ;;  %v8903_v29 = vpop.eup %6983  ;;  %v3831_v7 = vmul.f32 0.35355338, %v3707_v51  ;;  %v8924_v25 = vadd.f32 %v3830_v55, %v7440_v60  ;;  %v3809_v55 = vmul.f32 0.35355338, %v3541_v40 }
 0xc51   : > { %v8905_v19 = vpop.eup %6985  ;;  %v4163_v49 = vsel %vm1260_vm5, %v8903_v29, 0.0 }
 0xc52   : > { %6987 = vpow2.f32 %v4094_v17  ;;  %v4226_v42 = vsel %vm1260_vm5, %v8905_v19, 0.0  ;;  %v8927_v8 = vadd.f32 %v3831_v7, %v7440_v60  ;;  %v8955_v40 = vadd.f32 %v3809_v55, %v7440_v60 }
 0xc53   : > { %4227 = vadd.xlane.f32.xlu2 %v4226_v42  ;;  %4164 = vadd.xlane.f32.xlu1 %v4163_v49  ;;  %v3974_v49 = vsel %vm1260_vm5, %v8924_v25, -inf }
 0xc55   : > { %v3994_v43 = vpop.xlane.xlu1 %3993  ;;  %v8931_v17 = vpop.xlane.xlu2 %3942 }
 0xc56   : > { %v4056_v22 = vsub.f32 %v8799_v1, %v3994_v43  ;;  %v3547_v36 = vpop.f32.mrf.mxu3  ;;  %v4047_v43 = vsub.f32 %v8756_v6, %v8886_v5 }
 0xc57   : > { %v3710_v51 = vpop.f32.mrf.mxu1  ;;  %v3811_v7 = vmul.f32 0.35355338, %v3547_v36  ;;  %v3630_v36 = vpop.f32.mrf.mxu0 }
 0xc58   : > { %v4134_v28 = vmul.f32 1.442695, %v4056_v22  ;;  %v8917_v50 = vpop.eup %6987  ;;  %v3977_v22 = vsel %vm1260_vm5, %v8927_v8, -inf  ;;  %v4116_v62 = vmul.f32 1.442695, %v4047_v43 }
 0xc59   : > { %v4196_v57 = vsel %vm1260_vm5, %v8917_v50, 0.0  ;;  %v3820_v43 = vmul.f32 0.35355338, %v3624_v47  ;;  %v3822_v23 = vmul.f32 0.35355338, %v3630_v36 }
 0xc5a   : > { %6989 = vpow2.f32 %v4134_v28  ;;  %4197 = vadd.xlane.f32.xlu0 %v4196_v57  ;;  %v3810_v28 = vmul.f32 0.35355338, %v3544_v59  ;;  %v8943_v57 = vpop.f32.mrf.mxu2  ;;  %v8958_v59 = vadd.f32 %v3811_v7, %v7440_v60  ;;  %v3832_v10 = vmul.f32 0.35355338, %v3710_v51 }
 0xc5b   : > { %4011 = vmax.xlane.f32.xlu2 %v4010_v13  ;;  %6991 = vpow2.f32 %v4116_v62  ;;  %v8974_v38 = vadd.f32 %v3820_v43, %v7440_v60  ;;  %v8979_v36 = vadd.f32 %v3822_v23, %v7440_v60 }
 0xc5c   : > { %v8952_v5 = vadd.f32 %v3810_v28, %v7440_v60  ;;  %v3917_v55 = vsel %vm1260_vm5, %v8958_v59, -inf }
 0xc5d   : > { %v3997_v1 = vpop.xlane.xlu1 %3996  ;;  %v3950_v43 = vsel %vm1260_vm5, %v8979_v36, -inf }
 0xc5f   : > { %v8967_v28 = vpop.f32.mrf.mxu1 }
 0xc60   : > { %v8935_v42 = vpop.eup %6989 }
 0xc61   : > { %v4256_v13 = vsel %vm1260_vm5, %v8935_v42, 0.0  ;;  %v8976_v24 = vpop.eup %6991 }
 0xc62   : > { %3975 = vmax.xlane.f32.xlu0 %v3974_v49  ;;  %4257 = vadd.xlane.f32.xlu1 %v4256_v13  ;;  %v4057_v49 = vsub.f32 %v8809_v58, %v3997_v1  ;;  %v3911_v13 = vsel %vm1260_vm5, %v8955_v40, -inf  ;;  %v3799_v58 = vpop.f32.mrf.mxu2 }
 0xc63   : > { %3978 = vmax.xlane.f32.xlu2 %v3977_v22  ;;  %v3914_v22 = vsel %vm1260_vm5, %v8952_v5, -inf }
 0xc64   : > { %v4136_v7 = vmul.f32 1.442695, %v4057_v49  ;;  %v4229_v49 = vsel %vm1260_vm5, %v8976_v24, 0.0 }
 0xc65   : > { %v8945_v46 = vpop.xlane.xlu1 %3906 }
 0xc66   : > { %v8949_v6 = vpop.xlane.xlu2 %4005 }
 0xc6a   : > { %3915 = vmax.xlane.f32.xlu0 %v3914_v22  ;;  %3912 = vmax.xlane.f32.xlu1 %v3911_v13  ;;  %v3843_v22 = vmul.f32 0.35355338, %v3793_v3  ;;  %v3845_v13 = vmul.f32 0.35355338, %v3799_v58 }
 0xc6b   : > { %3918 = vmax.xlane.f32.xlu2 %v3917_v55  ;;  %v3944_v55 = vsel %vm1260_vm5, %v8974_v38, -inf }
 0xc6c   : > { %v8991_v3 = vadd.f32 %v3845_v13, %v7440_v60 }
 0xc6d   : > { %v8969_v62 = vpop.xlane.xlu1 %3939 }
 0xc6e   : > { %v8971_v47 = vpop.xlane.xlu0 %4008  ;;  %v4189_v1 = vpop.xlane.xlu2 %4188  ;;  %v4019_v13 = vsel %vm1260_vm5, %v8991_v3, -inf }
 0xc6f   : > { %6993 = vrcp.f32 %v4189_v1  ;;  %v8988_v1 = vadd.f32 %v3843_v22, %v7440_v60 }
 0xc70   : > { %6995 = vpow2.f32 %v4136_v7  ;;  %v3716_v7 = vpop.f32.mrf.mxu1 }
 0xc71   : > { %v4013_v22 = vsel %vm1260_vm5, %v8988_v1, -inf  ;;  %v3834_v32 = vmul.f32 0.35355338, %v3716_v7 }
 0xc72   : > { %4230 = vadd.xlane.f32.xlu0 %v4229_v49  ;;  %3945 = vmax.xlane.f32.xlu1 %v3944_v55 }
 0xc73   : > { %3951 = vmax.xlane.f32.xlu2 %v3950_v43 }
 0xc75   : > { %v6994_v23 = vpop.eup %6993  ;;  %v4000_v2 = vpop.xlane.xlu1 %3999 }
 0xc76   : > { %v4341_v58 = vmul.f32 %v6994_v23, %v8830_v54  ;;  %v4058_v56 = vsub.f32 %v8843_v20, %v4000_v2  ;;  %v4156_v52 = vpop.xlane.xlu0 %4155  ;;  %v4192_v49 = vpop.xlane.xlu2 %4191  ;;  %v4027_v2 = vsub.f32 %v8816_v53, %v8945_v46  ;;  %v9010_v20 = vadd.f32 %v3834_v32, %v7440_v60 }
 0xc77   : > { %v8995_v55 = vpop.eup %6995  ;;  %6997 = vrcp.f32 %v4156_v52  ;;  %v3550_v46 = vpop.f32.mrf.mxu3  ;;  %v4026_v32 = vsub.f32 %v8718_v63, %v8878_v4 }
 0xc78   : > { %v4138_v43 = vmul.f32 1.442695, %v4058_v56  ;;  %6999 = vrcp.f32 %v4192_v49  ;;  %6545 = vmatmul.msk.f32.vlgmr.msrb.gmra.mxu0 %vm1260_vm5, %v4341_v58  ;;  %v4259_v54 = vsel %vm1260_vm5, %v8995_v55, 0.0  ;;  %v9007_v56 = vadd.f32 %v3832_v10, %v7440_v60 }
 0xc79   : > { %v4076_v23 = vmul.f32 1.442695, %v4027_v2  ;;  %v4074_v63 = vmul.f32 1.442695, %v4026_v32  ;;  %v4028_v32 = vsub.f32 %v8789_v18, %v8911_v45  ;;  %v4037_v18 = vsub.f32 %v8773_v15, %v8896_v30 }
 0xc7a   : > { %7001 = vpow2.f32 %v4138_v43  ;;  %4014 = vmax.xlane.f32.xlu1 %v4013_v22  ;;  %4260 = vadd.xlane.f32.xlu0 %v4259_v54  ;;  %v3980_v10 = vsel %vm1260_vm5, %v9007_v56, -inf  ;;  %v3986_v43 = vsel %vm1260_vm5, %v9010_v20, -inf  ;;  %v3812_v22 = vmul.f32 0.35355338, %v3550_v46 }
 0xc7b   : > { %4020 = vmax.xlane.f32.xlu2 %v4019_v13  ;;  %v4038_v13 = vsub.f32 %v8828_v31, %v8969_v62  ;;  %v4048_v31 = vsub.f32 %v8783_v41, %v8947_v37  ;;  %v3833_v41 = vmul.f32 0.35355338, %v8967_v28  ;;  %v4078_v28 = vmul.f32 1.442695, %v4028_v32 }
 0xc7c   : > { %v4039_v15 = vsub.f32 %v8802_v44, %v8931_v17  ;;  %v4060_v44 = vsub.f32 %v8820_v48, %v8949_v6 }
 0xc7d   : > { %v6998_v52 = vpop.eup %6997  ;;  %v4098_v4 = vmul.f32 1.442695, %v4038_v13  ;;  %v4118_v46 = vmul.f32 1.442695, %v4048_v31 }
 0xc7e   : > { %v7000_v51 = vpop.eup %6999  ;;  %v4330_v7 = vmul.f32 %v6998_v52, %v8845_v16  ;;  %v4159_v58 = vpop.xlane.xlu0 %4158  ;;  %v9031_v52 = vadd.f32 %v3812_v22, %v7440_v60  ;;  %v9065_v22 = vadd.f32 %v3833_v41, %v7440_v60 }
 0xc7f   : > { %7003 = vrcp.f32 %v4159_v58  ;;  %v4342_v53 = vmul.f32 %v7000_v51, %v8847_v35  ;;  %v3821_v35 = vmul.f32 0.35355338, %v8929_v26  ;;  %v3844_v26 = vmul.f32 0.35355338, %v8943_v57  ;;  %v3973_v58 = vpop.xlane.xlu1 %3972 }
 0xc80   : > { %v9014_v49 = vpop.eup %7001  ;;  %6533 = vmatmul.msk.f32.vlgmr.msra.gmra.mxu3 %vm1260_vm5, %v4330_v7  ;;  %7005 = vpow2.f32 %v4076_v23  ;;  %v3983_v45 = vsel %vm1260_vm5, %v9065_v22, -inf  ;;  %v4049_v30 = vsub.f32 %v8856_v9, %v3973_v58 }
 0xc81   : > { %6546 = vmatmul.msk.f32.gmra.mxu0 %vm1260_vm5, %v4342_v53  ;;  %v4262_v16 = vsel %vm1260_vm5, %v9014_v49, 0.0  ;;  %v9034_v51 = vadd.f32 %v3821_v35, %v7440_v60  ;;  %7007 = vpow2.f32 %v4074_v63  ;;  %v9049_v57 = vadd.f32 %v3844_v26, %v7440_v60 }
 0xc82   : > { %3981 = vmax.xlane.f32.xlu1 %v3980_v10  ;;  %4263 = vadd.xlane.f32.xlu0 %v4262_v16  ;;  %7009 = vpow2.f32 %v4098_v4  ;;  %v4096_v26 = vmul.f32 1.442695, %v4037_v18 }
 0xc83   : > { %3987 = vmax.xlane.f32.xlu2 %v3986_v43  ;;  %v3947_v62 = vsel %vm1260_vm5, %v9034_v51, -inf  ;;  %v4016_v10 = vsel %vm1260_vm5, %v9049_v57, -inf  ;;  %7011 = vpow2.f32 %v4118_v46  ;;  %v4100_v46 = vmul.f32 1.442695, %v4039_v15 }
 0xc84   : > { %7013 = vpow2.f32 %v4078_v28 }
 0xc85   : > { %v7004_v2 = vpop.eup %7003  ;;  %7015 = vpow2.f32 %v4096_v26 }
 0xc86   : > { %v4331_v54 = vmul.f32 %v7004_v2, %v8858_v0  ;;  %v9036_v7 = vpop.eup %7005  ;;  %v3920_v0 = vsel %vm1260_vm5, %v9031_v52, -inf  ;;  %v3633_v2 = vpop.f32.mrf.mxu0 }
 0xc87   : > { %v4169_v23 = vsel %vm1260_vm5, %v9036_v7, 0.0  ;;  %v9051_v53 = vpop.eup %7007  ;;  %v4003_v35 = vpop.xlane.xlu1 %4002  ;;  %v3823_v4 = vmul.f32 0.35355338, %v3633_v2 }
 0xc88   : > { %6534 = vmatmul.msk.f32.gmra.mxu3 %vm1260_vm5, %v4331_v54  ;;  %v9053_v37 = vpop.eup %7009  ;;  %v4166_v16 = vsel %vm1260_vm5, %v9051_v53, 0.0  ;;  %v4059_v63 = vsub.f32 %v8865_v21, %v4003_v35 }
 0xc89   : > { %v4202_v43 = vsel %vm1260_vm5, %v9053_v37, 0.0  ;;  %v9067_v13 = vpop.eup %7011 }
 0xc8a   : > { %3921 = vmax.xlane.f32.xlu1 %v3920_v0  ;;  %3948 = vmax.xlane.f32.xlu0 %v3947_v62  ;;  %v4232_v54 = vsel %vm1260_vm5, %v9067_v13, 0.0  ;;  %v4140_v31 = vmul.f32 1.442695, %v4059_v63  ;;  %v9077_v0 = vadd.f32 %v3823_v4, %v7440_v60  ;;  %v9079_v62 = vpop.eup %7013  ;;  %v4120_v60 = vmul.f32 1.442695, %v4049_v30 }
 0xc8b   : > { %4170 = vadd.xlane.f32.xlu2 %v4169_v23  ;;  %v4172_v21 = vsel %vm1260_vm5, %v9079_v62, 0.0 }
 0xc8c   : > { %7017 = vpow2.f32 %v4140_v31  ;;  %v3953_v23 = vsel %vm1260_vm5, %v9077_v0, -inf }
 0xc92   : > { %4167 = vadd.xlane.f32.xlu1 %v4166_v16  ;;  %4017 = vmax.xlane.f32.xlu0 %v4016_v10  ;;  %v9088_v10 = vpop.eup %7015  ;;  %v4142_v16 = vmul.f32 1.442695, %v4060_v44 }
 0xc93   : > { %4203 = vadd.xlane.f32.xlu2 %v4202_v43  ;;  %v9090_v32 = vpop.eup %7017  ;;  %v4199_v9 = vsel %vm1260_vm5, %v9088_v10, 0.0 }
 0xc94   : > { %v4265_v17 = vsel %vm1260_vm5, %v9090_v32, 0.0 }
 0xc9a   : > { %4233 = vadd.xlane.f32.xlu1 %v4232_v54  ;;  %3984 = vmax.xlane.f32.xlu0 %v3983_v45 }
 0xca2   : > { %4173 = vadd.xlane.f32.xlu1 %v4172_v21  ;;  %3954 = vmax.xlane.f32.xlu0 %v3953_v23 }
 0xca5   : > { %v4222_v41 = vpop.xlane.xlu1 %4221 }
 0xca6   : > { %7019 = vrcp.f32 %v4222_v41 }
 0xca7   : > { %7021 = vpow2.f32 %v4100_v46 }
 0xca8   : > { %7023 = vpow2.f32 %v4120_v60 }
 0xcaa   : > { %4200 = vadd.xlane.f32.xlu0 %v4199_v9  ;;  %4266 = vadd.xlane.f32.xlu1 %v4265_v17 }
 0xcac   : > { %v7020_v58 = vpop.eup %7019 }
 0xcad   : > { %v4352_v43 = vmul.f32 %v7020_v58, %v8871_v27  ;;  %v4162_v28 = vpop.xlane.xlu2 %4161  ;;  %v9099_v35 = vpop.eup %7021 }
 0xcae   : > { %7025 = vrcp.f32 %v4162_v28  ;;  %v9101_v2 = vpop.eup %7023  ;;  %v4205_v6 = vsel %vm1260_vm5, %v9099_v35, 0.0 }
 0xcaf   : > { %6557 = vmatmul.msk.f32.vlgmr.msrb.gmra.mxu1 %vm1260_vm5, %v4352_v43  ;;  %7027 = vpow2.f32 %v4142_v16  ;;  %v4235_v48 = vsel %vm1260_vm5, %v9101_v2, 0.0 }
 0xcb2   : > { %4236 = vadd.xlane.f32.xlu0 %v4235_v48  ;;  %4206 = vadd.xlane.f32.xlu1 %v4205_v6 }
 0xcb4   : > { %v7026_v18 = vpop.eup %7025 }
 0xcb5   : > { %v4195_v45 = vpop.xlane.xlu1 %4194  ;;  %v4332_v27 = vmul.f32 %v7026_v18, %v8876_v34  ;;  %v9109_v63 = vpop.eup %7027 }
 0xcb6   : > { %7029 = vrcp.f32 %v4195_v45  ;;  %v4268_v4 = vsel %vm1260_vm5, %v9109_v63, 0.0 }
 0xcb7   : > { %6535 = vmatmul.msk.f32.gmra.mxu3 %vm1260_vm5, %v4332_v27 }
 0xcba   : > { %4269 = vadd.xlane.f32.xlu0 %v4268_v4 }
 0xcbc   : > { %v7030_v54 = vpop.eup %7029 }
 0xcbd   : > { %v4343_v26 = vmul.f32 %v7030_v54, %v8884_v12  ;;  %v4225_v31 = vpop.xlane.xlu0 %4224 }
 0xcbe   : > { %7031 = vrcp.f32 %v4225_v31  ;;  %v4255_v15 = vpop.xlane.xlu1 %4254 }
 0xcbf   : > { %6547 = vmatmul.msk.f32.gmra.mxu0 %vm1260_vm5, %v4343_v26  ;;  %7033 = vrcp.f32 %v4255_v15 }
 0xcc4   : > { %v7032_v30 = vpop.eup %7031 }
 0xcc5   : > { %v7034_v34 = vpop.eup %7033  ;;  %v4353_v21 = vmul.f32 %v7032_v30, %v8892_v39 }
 0xcc6   : > { %v4363_v23 = vmul.f32 %v7034_v34, %v8894_v61  ;;  %v4228_v46 = vpop.xlane.xlu2 %4227  ;;  %v4165_v60 = vpop.xlane.xlu1 %4164 }
 0xcc7   : > { %7035 = vrcp.f32 %v4228_v46  ;;  %6558 = vmatmul.msk.f32.gmra.mxu1 %vm1260_vm5, %v4353_v21 }
 0xcc8   : > { %7037 = vrcp.f32 %v4165_v60  ;;  %6569 = vmatmul.msk.f32.vlgmr.msra.gmra.mxu2 %vm1260_vm5, %v4363_v23 }
 0xccd   : > { %v7036_v12 = vpop.eup %7035  ;;  %v4198_v41 = vpop.xlane.xlu0 %4197 }
 0xcce   : > { %v7038_v44 = vpop.eup %7037  ;;  %7039 = vrcp.f32 %v4198_v41  ;;  %v4012_v9 = vpop.xlane.xlu2 %4011  ;;  %v4354_v17 = vmul.f32 %v7036_v12, %v8905_v19 }
 0xccf   : > { %v4333_v58 = vmul.f32 %v7038_v44, %v8903_v29  ;;  %v4061_v29 = vsub.f32 %v8833_v11, %v8971_v47  ;;  %v4062_v18 = vsub.f32 %v8914_v33, %v4012_v9 }
 0xcd0   : > { %6559 = vmatmul.msk.f32.gmra.mxu1 %vm1260_vm5, %v4354_v17 }
 0xcd1   : > { %6536 = vmatmul.msk.f32.gmra.mxu3 %vm1260_vm5, %v4333_v58  ;;  %v4144_v4 = vmul.f32 1.442695, %v4061_v29 }
 0xcd4   : > { %v7040_v39 = vpop.eup %7039 }
 0xcd5   : > { %v3976_v61 = vpop.xlane.xlu0 %3975  ;;  %v4258_v16 = vpop.xlane.xlu1 %4257  ;;  %v4344_v43 = vmul.f32 %v7040_v39, %v8917_v50  ;;  %v4146_v50 = vmul.f32 1.442695, %v4062_v18 }
 0xcd6   : > { %v4050_v28 = vsub.f32 %v8924_v25, %v3976_v61  ;;  %7041 = vrcp.f32 %v4258_v16  ;;  %v3979_v48 = vpop.xlane.xlu2 %3978 }
 0xcd7   : > { %v4051_v6 = vsub.f32 %v8927_v8, %v3979_v48  ;;  %6548 = vmatmul.msk.f32.gmra.mxu0 %vm1260_vm5, %v4344_v43 }
 0xcd8   : > { %v4122_v19 = vmul.f32 1.442695, %v4050_v28 }
 0xcd9   : > { %v4124_v45 = vmul.f32 1.442695, %v4051_v6 }
 0xcda   : > { %7043 = vpow2.f32 %v4122_v19 }
 0xcdb   : > { %7045 = vpow2.f32 %v4124_v45 }
 0xcdc   : > { %v7042_v27 = vpop.eup %7041  ;;  %7047 = vpow2.f32 %v4144_v4 }
 0xcdd   : > { %v3916_v54 = vpop.xlane.xlu0 %3915  ;;  %v3913_v25 = vpop.xlane.xlu1 %3912  ;;  %v4364_v26 = vmul.f32 %v7042_v27, %v8935_v42  ;;  %7049 = vpow2.f32 %v4146_v50 }
 0xcde   : > { %v4029_v8 = vsub.f32 %v8955_v40, %v3913_v25  ;;  %v3919_v31 = vpop.xlane.xlu2 %3918  ;;  %v4030_v11 = vsub.f32 %v8952_v5, %v3916_v54 }
 0xcdf   : > { %6570 = vmatmul.msk.f32.gmra.mxu2 %vm1260_vm5, %v4364_v26  ;;  %v4031_v30 = vsub.f32 %v8958_v59, %v3919_v31 }
 0xce0   : > { %v9134_v15 = vpop.eup %7043  ;;  %v4080_v33 = vmul.f32 1.442695, %v4029_v8  ;;  %v4082_v40 = vmul.f32 1.442695, %v4030_v11 }
 0xce1   : > { %v9137_v47 = vpop.eup %7045  ;;  %v4238_v34 = vsel %vm1260_vm5, %v9134_v15, 0.0  ;;  %v4084_v21 = vmul.f32 1.442695, %v4031_v30 }
 0xce2   : > { %4239 = vadd.xlane.f32.xlu2 %v4238_v34  ;;  %v4241_v42 = vsel %vm1260_vm5, %v9137_v47, 0.0  ;;  %7051 = vpow2.f32 %v4080_v33  ;;  %v9144_v5 = vpop.eup %7047 }
 0xce3   : > { %4242 = vadd.xlane.f32.xlu1 %v4241_v42  ;;  %v9147_v59 = vpop.eup %7049  ;;  %v4271_v17 = vsel %vm1260_vm5, %v9144_v5, 0.0 }
 0xce5   : > { %v4231_v23 = vpop.xlane.xlu0 %4230  ;;  %v3946_v46 = vpop.xlane.xlu1 %3945 }
 0xce6   : > { %7053 = vrcp.f32 %v4231_v23  ;;  %v4040_v60 = vsub.f32 %v8974_v38, %v3946_v46  ;;  %v3952_v12 = vpop.xlane.xlu2 %3951  ;;  %v4274_v38 = vsel %vm1260_vm5, %v9147_v59, 0.0 }
 0xce7   : > { %7055 = vpow2.f32 %v4082_v40  ;;  %v4042_v9 = vsub.f32 %v8979_v36, %v3952_v12 }
 0xce8   : > { %v4102_v41 = vmul.f32 1.442695, %v4040_v60  ;;  %v9149_v44 = vpop.eup %7051  ;;  %7057 = vpow2.f32 %v4084_v21 }
 0xce9   : > { %v4175_v58 = vsel %vm1260_vm5, %v9149_v44, 0.0  ;;  %v4106_v61 = vmul.f32 1.442695, %v4042_v9 }
 0xcea   : > { %7059 = vpow2.f32 %v4102_v41  ;;  %4272 = vadd.xlane.f32.xlu2 %v4271_v17  ;;  %4176 = vadd.xlane.f32.xlu0 %v4175_v58 }
 0xceb   : > { %4275 = vadd.xlane.f32.xlu1 %v4274_v38 }
 0xcec   : > { %v7054_v39 = vpop.eup %7053 }
 0xced   : > { %v4261_v16 = vpop.xlane.xlu0 %4260  ;;  %v4015_v43 = vpop.xlane.xlu1 %4014  ;;  %v4355_v28 = vmul.f32 %v7054_v39, %v8976_v24 }
 0xcee   : > { %v9159_v36 = vpop.eup %7055  ;;  %7061 = vrcp.f32 %v4261_v16  ;;  %v4063_v48 = vsub.f32 %v8988_v1, %v4015_v43  ;;  %v4021_v6 = vpop.xlane.xlu2 %4020 }
 0xcef   : > { %v9162_v29 = vpop.eup %7057  ;;  %6560 = vmatmul.msk.f32.gmra.mxu1 %vm1260_vm5, %v4355_v28  ;;  %7063 = vpow2.f32 %v4106_v61  ;;  %v4065_v45 = vsub.f32 %v8991_v3, %v4021_v6  ;;  %v4178_v27 = vsel %vm1260_vm5, %v9159_v36, 0.0 }
 0xcf0   : > { %v9165_v19 = vpop.eup %7059  ;;  %v4148_v18 = vmul.f32 1.442695, %v4063_v48  ;;  %v4181_v1 = vsel %vm1260_vm5, %v9162_v29, 0.0 }
 0xcf1   : > { %v4208_v24 = vsel %vm1260_vm5, %v9165_v19, 0.0  ;;  %v4152_v50 = vmul.f32 1.442695, %v4065_v45 }
 0xcf2   : > { %7065 = vpow2.f32 %v4148_v18  ;;  %4179 = vadd.xlane.f32.xlu2 %v4178_v27  ;;  %4209 = vadd.xlane.f32.xlu0 %v4208_v24 }
 0xcf3   : > { %4182 = vadd.xlane.f32.xlu1 %v4181_v1 }
 0xcf4   : > { %v7062_v4 = vpop.eup %7061 }
 0xcf5   : > { %v4264_v54 = vpop.xlane.xlu0 %4263  ;;  %v3982_v25 = vpop.xlane.xlu1 %3981  ;;  %v4365_v26 = vmul.f32 %v7062_v4, %v8995_v55 }
 0xcf6   : > { %7067 = vrcp.f32 %v4264_v54  ;;  %v4052_v3 = vsub.f32 %v9007_v56, %v3982_v25  ;;  %v9176_v8 = vpop.eup %7063  ;;  %v3988_v60 = vpop.xlane.xlu2 %3987 }
 0xcf7   : > { %6571 = vmatmul.msk.f32.gmra.mxu2 %vm1260_vm5, %v4365_v26  ;;  %7069 = vpow2.f32 %v4152_v50  ;;  %v4214_v30 = vsel %vm1260_vm5, %v9176_v8, 0.0  ;;  %v4054_v27 = vsub.f32 %v9010_v20, %v3988_v60 }
 0xcf8   : > { %v9179_v31 = vpop.eup %7065  ;;  %v4126_v11 = vmul.f32 1.442695, %v4052_v3 }
 0xcf9   : > { %v4277_v33 = vsel %vm1260_vm5, %v9179_v31, 0.0  ;;  %v4130_v50 = vmul.f32 1.442695, %v4054_v27 }
 0xcfa   : > { %7071 = vpow2.f32 %v4126_v11  ;;  %4278 = vadd.xlane.f32.xlu0 %v4277_v33 }
 0xcfb   : > { %4215 = vadd.xlane.f32.xlu1 %v4214_v30 }
 0xcfc   : > { %v7068_v55 = vpop.eup %7067 }
 0xcfd   : > { %v3949_v34 = vpop.xlane.xlu0 %3948  ;;  %v4366_v56 = vmul.f32 %v7068_v55, %v9014_v49  ;;  %v3922_v40 = vpop.xlane.xlu1 %3921 }
 0xcfe   : > { %v4041_v42 = vsub.f32 %v9034_v51, %v3949_v34  ;;  %v9187_v21 = vpop.eup %7069  ;;  %v4032_v23 = vsub.f32 %v9031_v52, %v3922_v40  ;;  %v4171_v16 = vpop.xlane.xlu2 %4170 }
 0xcff   : > { %6572 = vmatmul.msk.f32.gmra.mxu2 %vm1260_vm5, %v4366_v56  ;;  %v4283_v49 = vsel %vm1260_vm5, %v9187_v21, 0.0 }
 0xd00   : > { %v9191_v46 = vpop.eup %7071  ;;  %v4104_v12 = vmul.f32 1.442695, %v4041_v42  ;;  %v4086_v41 = vmul.f32 1.442695, %v4032_v23 }
 0xd01   : > { %v4244_v9 = vsel %vm1260_vm5, %v9191_v46, 0.0 }
 0xd02   : > { %7073 = vpow2.f32 %v4104_v12  ;;  %4245 = vadd.xlane.f32.xlu0 %v4244_v9 }
 0xd03   : > { %7075 = vpow2.f32 %v4086_v41  ;;  %4284 = vadd.xlane.f32.xlu1 %v4283_v49 }
 0xd05   : > { %v4018_v51 = vpop.xlane.xlu0 %4017  ;;  %v4168_v17 = vpop.xlane.xlu1 %4167 }
 0xd06   : > { %v4064_v52 = vsub.f32 %v9049_v57, %v4018_v51  ;;  %7077 = vrcp.f32 %v4168_v17  ;;  %v4204_v56 = vpop.xlane.xlu2 %4203 }
 0xd08   : > { %v9198_v58 = vpop.eup %7073  ;;  %v4150_v38 = vmul.f32 1.442695, %v4064_v52 }
 0xd09   : > { %v9200_v39 = vpop.eup %7075  ;;  %v4211_v61 = vsel %vm1260_vm5, %v9198_v58, 0.0 }
 0xd0a   : > { %7079 = vpow2.f32 %v4150_v38  ;;  %4212 = vadd.xlane.f32.xlu2 %v4211_v61  ;;  %v4184_v43 = vsel %vm1260_vm5, %v9200_v39, 0.0 }
 0xd0b   : > { %4185 = vadd.xlane.f32.xlu0 %v4184_v43  ;;  %7081 = vrcp.f32 %v4171_v16  ;;  %v6582_v16 = vld [vmem:[%s9977_s5 + $0x30] sm:$0xff] }
 0xd0c   : > { %v7078_v28 = vpop.eup %7077  ;;  %4937 = vmatpush.msra.mxu1 %v6582_v16 }
 0xd0d   : > { %v3985_v57 = vpop.xlane.xlu0 %3984  ;;  %v4234_v6 = vpop.xlane.xlu1 %4233  ;;  %v4334_v18 = vmul.f32 %v7078_v28, %v9051_v53 }
 0xd0e   : > { %v4053_v48 = vsub.f32 %v9065_v22, %v3985_v57  ;;  %7083 = vrcp.f32 %v4234_v6 }
 0xd0f   : > { %6537 = vmatmul.msk.f32.gmra.mxu3 %vm1260_vm5, %v4334_v18 }
 0xd10   : > { %v9208_v45 = vpop.eup %7079  ;;  %v4128_v24 = vmul.f32 1.442695, %v4053_v48 }
 0xd11   : > { %v4280_v1 = vsel %vm1260_vm5, %v9208_v45, 0.0  ;;  %v7082_v4 = vpop.eup %7081 }
 0xd12   : > { %7085 = vpow2.f32 %v4128_v24  ;;  %4281 = vadd.xlane.f32.xlu2 %v4280_v1  ;;  %v4335_v26 = vmul.f32 %v7082_v4, %v9036_v7 }
 0xd14   : > { %v7084_v54 = vpop.eup %7083 }
 0xd15   : > { %v3955_v22 = vpop.xlane.xlu0 %3954  ;;  %v4174_v53 = vpop.xlane.xlu1 %4173  ;;  %v4356_v3 = vmul.f32 %v7084_v54, %v9067_v13 }
 0xd16   : > { %v4043_v25 = vsub.f32 %v9077_v0, %v3955_v22  ;;  %7087 = vrcp.f32 %v4174_v53 }
 0xd17   : > { %7089 = vpow2.f32 %v4130_v50  ;;  %6538 = vmatmul.msk.f32.gmra.mxu3 %vm1260_vm5, %v4335_v26  ;;  %6561 = vmatmul.msk.f32.gmra.mxu1 %vm1260_vm5, %v4356_v3 }
 0xd18   : > { %v9217_v20 = vpop.eup %7085  ;;  %v4108_v11 = vmul.f32 1.442695, %v4043_v25 }
 0xd19   : > { %v4247_v33 = vsel %vm1260_vm5, %v9217_v20, 0.0 }
 0xd1a   : > { %7091 = vpow2.f32 %v4108_v11  ;;  %4248 = vadd.xlane.f32.xlu2 %v4247_v33 }
 0xd1c   : > { %v7088_v0 = vpop.eup %7087 }
 0xd1d   : > { %v4201_v30 = vpop.xlane.xlu0 %4200  ;;  %v9223_v55 = vpop.eup %7089  ;;  %v4336_v13 = vmul.f32 %v7088_v0, %v9079_v62  ;;  %v6581_v62 = vld [vmem:[%s9977_s5 + $0x28] sm:$0xff] }
 0xd1e   : > { %7093 = vrcp.f32 %v4201_v30  ;;  %v4267_v7 = vpop.xlane.xlu1 %4266  ;;  %v4250_v42 = vsel %vm1260_vm5, %v9223_v55, 0.0  ;;  %4771 = vmatpush.msrb.mxu3 %v6581_v62 }
 0xd1f   : > { %7095 = vrcp.f32 %v4267_v7  ;;  %6539 = vmatmul.msk.f32.gmra.mxu3 %vm1260_vm5, %v4336_v13 }
 0xd20   : > { %v9226_v34 = vpop.eup %7091  ;;  %7097 = vrcp.f32 %v4204_v56 }
 0xd21   : > { %v4217_v40 = vsel %vm1260_vm5, %v9226_v34, 0.0 }
 0xd22   : > { %4251 = vadd.xlane.f32.xlu2 %v4250_v42  ;;  %4218 = vadd.xlane.f32.xlu0 %v4217_v40 }
 0xd24   : > { %v7094_v23 = vpop.eup %7093 }
 0xd25   : > { %v7096_v60 = vpop.eup %7095  ;;  %v4237_v12 = vpop.xlane.xlu0 %4236  ;;  %v4345_v41 = vmul.f32 %v7094_v23, %v9088_v10  ;;  %v6583_v10 = vld [vmem:[%s9977_s5 + $0x38] sm:$0xff] }
 0xd26   : > { %7099 = vrcp.f32 %v4237_v12  ;;  %v4367_v9 = vmul.f32 %v7096_v60, %v9090_v32  ;;  %v4207_v49 = vpop.xlane.xlu1 %4206  ;;  %v7098_v51 = vpop.eup %7097  ;;  %v6580_v32 = vld [vmem:[%s9977_s5 + $0x20] sm:$0xff]  ;;  %5031 = vmatpush.msrb.mxu2 %v6583_v10 }
 0xd27   : > { %6549 = vmatmul.msk.f32.gmra.mxu0 %vm1260_vm5, %v4345_v41  ;;  %7101 = vrcp.f32 %v4207_v49  ;;  %v4346_v38 = vmul.f32 %v7098_v51, %v9053_v37  ;;  %v4513_v12 = vpop.f32.mrf.mxu0 }
 0xd28   : > { %6573 = vmatmul.msk.f32.gmra.mxu2 %vm1260_vm5, %v4367_v9  ;;  %4854 = vmatpush.msra.mxu0 %v6580_v32 }
 0xd2c   : > { %v7100_v52 = vpop.eup %7099 }
 0xd2d   : > { %v4270_v17 = vpop.xlane.xlu0 %4269  ;;  %v4357_v61 = vmul.f32 %v7100_v52, %v9101_v2  ;;  %v7102_v37 = vpop.eup %7101 }
 0xd2e   : > { %7103 = vrcp.f32 %v4270_v17  ;;  %v4347_v43 = vmul.f32 %v7102_v37, %v9099_v35 }
 0xd2f   : > { %6550 = vmatmul.msk.f32.gmra.mxu0 %vm1260_vm5, %v4346_v38  ;;  %6562 = vmatmul.msk.f32.gmra.mxu1 %vm1260_vm5, %v4357_v61 }
 0xd34   : > { %v7104_v2 = vpop.eup %7103 }
 0xd35   : > { %v4368_v28 = vmul.f32 %v7104_v2, %v9109_v63 }
 0xd37   : > { %6551 = vmatmul.msk.f32.gmra.mxu0 %vm1260_vm5, %v4347_v43  ;;  %6574 = vmatmul.msk.f32.gmra.mxu2 %vm1260_vm5, %v4368_v28  ;;  %v4599_v28 = vpop.f32.mrf.mxu1 }
 0xd4b   : > { %v4685_v16 = vpop.f32.mrf.mxu2 }
 0xd55   : > { %v4240_v57 = vpop.xlane.xlu2 %4239 }
 0xd56   : > { %7105 = vrcp.f32 %v4240_v57  ;;  %v4243_v48 = vpop.xlane.xlu1 %4242 }
 0xd57   : > { %7107 = vrcp.f32 %v4243_v48  ;;  %v4602_v48 = vpop.f32.mrf.mxu1 }
 0xd5c   : > { %v7106_v6 = vpop.eup %7105 }
 0xd5d   : > { %v4273_v18 = vpop.xlane.xlu2 %4272  ;;  %v4358_v27 = vmul.f32 %v7106_v6, %v9134_v15  ;;  %v4177_v24 = vpop.xlane.xlu0 %4176 }
 0xd5e   : > { %7109 = vrcp.f32 %v4273_v18  ;;  %v4276_v35 = vpop.xlane.xlu1 %4275  ;;  %v7108_v1 = vpop.eup %7107 }
 0xd5f   : > { %7111 = vrcp.f32 %v4177_v24  ;;  %6563 = vmatmul.msk.f32.gmra.mxu1 %vm1260_vm5, %v4358_v27  ;;  %v4359_v54 = vmul.f32 %v7108_v1, %v9137_v47  ;;  %v4605_v24 = vpop.f32.mrf.mxu1 }
 0xd60   : > { %7113 = vrcp.f32 %v4276_v35 }
 0xd62   : > { %v4688_v57 = vpop.f32.mrf.mxu2 }
 0xd64   : > { %v7110_v63 = vpop.eup %7109 }
 0xd65   : > { %v7112_v4 = vpop.eup %7111  ;;  %v4180_v50 = vpop.xlane.xlu2 %4179  ;;  %v4369_v22 = vmul.f32 %v7110_v63, %v9144_v5 }
 0xd66   : > { %7115 = vrcp.f32 %v4180_v50  ;;  %v4210_v25 = vpop.xlane.xlu0 %4209  ;;  %v4337_v53 = vmul.f32 %v7112_v4, %v9149_v44  ;;  %v7114_v15 = vpop.eup %7113 }
 0xd67   : > { %7117 = vrcp.f32 %v4210_v25  ;;  %6564 = vmatmul.msk.f32.gmra.mxu1 %vm1260_vm5, %v4359_v54  ;;  %6575 = vmatmul.msk.f32.gmra.mxu2 %vm1260_vm5, %v4369_v22  ;;  %v4183_v26 = vpop.xlane.xlu1 %4182  ;;  %v4370_v5 = vmul.f32 %v7114_v15, %v9147_v59 }
 0xd68   : > { %6540 = vmatmul.msk.f32.gmra.mxu3 %vm1260_vm5, %v4337_v53  ;;  %7119 = vrcp.f32 %v4183_v26 }
 0xd6c   : > { %v7116_v3 = vpop.eup %7115  ;;  %v4608_v63 = vpop.f32.mrf.mxu1 }
 0xd6d   : > { %v7118_v11 = vpop.eup %7117  ;;  %v4338_v47 = vmul.f32 %v7116_v3, %v9159_v36 }
 0xd6e   : > { %v4279_v33 = vpop.xlane.xlu0 %4278  ;;  %v4348_v0 = vmul.f32 %v7118_v11, %v9165_v19  ;;  %v7120_v44 = vpop.eup %7119 }
 0xd6f   : > { %7121 = vrcp.f32 %v4279_v33  ;;  %6576 = vmatmul.msk.f32.gmra.mxu2 %vm1260_vm5, %v4370_v5  ;;  %v4339_v13 = vmul.f32 %v7120_v44, %v9162_v29  ;;  %v4216_v40 = vpop.xlane.xlu1 %4215 }
 0xd70   : > { %6541 = vmatmul.msk.f32.gmra.mxu3 %vm1260_vm5, %v4338_v47  ;;  %6552 = vmatmul.msk.f32.gmra.mxu0 %vm1260_vm5, %v4348_v0 }
 0xd75   : > { %v7122_v30 = vpop.eup %7121 }
 0xd76   : > { %v4246_v7 = vpop.xlane.xlu0 %4245  ;;  %v4371_v56 = vmul.f32 %v7122_v30, %v9179_v31 }
 0xd77   : > { %7123 = vrcp.f32 %v4246_v7  ;;  %v4285_v41 = vpop.xlane.xlu1 %4284 }
 0xd78   : > { %6542 = vmatmul.msk.f32.gmra.mxu3 %vm1260_vm5, %v4339_v13  ;;  %6577 = vmatmul.msk.f32.gmra.mxu2 %vm1260_vm5, %v4371_v56 }
 0xd7a   : > { %v4691_v6 = vpop.f32.mrf.mxu2 }
 0xd7d   : > { %v7124_v59 = vpop.eup %7123  ;;  %v4213_v36 = vpop.xlane.xlu2 %4212 }
 0xd7e   : > { %7125 = vrcp.f32 %v4213_v36  ;;  %v4186_v19 = vpop.xlane.xlu0 %4185  ;;  %v4360_v42 = vmul.f32 %v7124_v59, %v9191_v46 }
 0xd7f   : > { %7127 = vrcp.f32 %v4186_v19 }
 0xd80   : > { %6565 = vmatmul.msk.f32.gmra.mxu1 %vm1260_vm5, %v4360_v42  ;;  %7129 = vrcp.f32 %v4216_v40 }
 0xd82   : > { %v4694_v35 = vpop.f32.mrf.mxu2 }
 0xd84   : > { %v7126_v23 = vpop.eup %7125 }
 0xd85   : > { %v7128_v29 = vpop.eup %7127  ;;  %v4282_v62 = vpop.xlane.xlu2 %4281  ;;  %v4349_v31 = vmul.f32 %v7126_v23, %v9198_v58 }
 0xd86   : > { %7131 = vrcp.f32 %v4282_v62  ;;  %v4340_v60 = vmul.f32 %v7128_v29, %v9200_v39  ;;  %v7130_v46 = vpop.eup %7129  ;;  %v4516_v39 = vpop.f32.mrf.mxu0 }
 0xd87   : > { %6553 = vmatmul.msk.f32.gmra.mxu0 %vm1260_vm5, %v4349_v31  ;;  %7133 = vrcp.f32 %v4285_v41  ;;  %v4350_v51 = vmul.f32 %v7130_v46, %v9176_v8  ;;  %v9340_v41 = vld [vmem:[%s9981_s9 + $0x8] sm:$0x3f] }
 0xd88   : > { %6543 = vmatmul.msk.f32.gmra.mxu3 %vm1260_vm5, %v4340_v60 }
 0xd8c   : > { %v7132_v9 = vpop.eup %7131 }
 0xd8d   : > { %v4249_v49 = vpop.xlane.xlu2 %4248  ;;  %v4372_v52 = vmul.f32 %v7132_v9, %v9208_v45  ;;  %v7134_v58 = vpop.eup %7133 }
 0xd8e   : > { %7135 = vrcp.f32 %v4249_v49  ;;  %v4373_v10 = vmul.f32 %v7134_v58, %v9187_v21  ;;  %v4519_v8 = vpop.f32.mrf.mxu0  ;;  %v4427_v21 = vpop.f32.mrf.mxu3  ;;  %v9343_v49 = vperm.slane %v9340_v41, 0 }
 0xd8f   : > { %6554 = vmatmul.msk.f32.gmra.mxu0 %vm1260_vm5, %v4350_v51  ;;  %6578 = vmatmul.msk.f32.gmra.mxu2 %vm1260_vm5, %v4372_v52 }
 0xd90   : > { %6584 = vmatmul.msk.f32.vlgmr.msrb.gmra.mxu3 %vm839_vm3, %v4513_v12 }
 0xd94   : > { %v7136_v17 = vpop.eup %7135  ;;  %v4611_v22 = vpop.f32.mrf.mxu1 }
 0xd95   : > { %v4252_v38 = vpop.xlane.xlu2 %4251  ;;  %v4361_v61 = vmul.f32 %v7136_v17, %v9217_v20  ;;  %v4219_v32 = vpop.xlane.xlu0 %4218 }
 0xd96   : > { %7137 = vrcp.f32 %v4252_v38  ;;  %v4522_v20 = vpop.f32.mrf.mxu0 }
 0xd97   : > { %7139 = vrcp.f32 %v4219_v32  ;;  %6566 = vmatmul.msk.f32.gmra.mxu1 %vm1260_vm5, %v4361_v61  ;;  %6579 = vmatmul.msk.f32.gmra.mxu2 %vm1260_vm5, %v4373_v10 }
 0xd98   : > { %6585 = vmatmul.msk.f32.gmra.mxu3 %vm839_vm3, %v4516_v39 }
 0xd9c   : > { %v7138_v45 = vpop.eup %7137 }
 0xd9d   : > { %v7140_v37 = vpop.eup %7139  ;;  %v4362_v2 = vmul.f32 %v7138_v45, %v9223_v55  ;;  %v4430_v55 = vpop.f32.mrf.mxu3 }
 0xd9e   : > { %v4351_v43 = vmul.f32 %v7140_v37, %v9226_v34 }
 0xd9f   : > { %6567 = vmatmul.msk.f32.gmra.mxu1 %vm1260_vm5, %v4362_v2  ;;  %6617 = vmatmul.msk.f32.vlgmr.msrb.gmra.mxu2 %vm839_vm3, %v4685_v16 }
 0xda0   : > { %6555 = vmatmul.msk.f32.gmra.mxu0 %vm1260_vm5, %v4351_v43  ;;  %6586 = vmatmul.msk.f32.gmra.mxu3 %vm839_vm3, %v4519_v8 }
 0xda4   : > { %v4525_v34 = vpop.f32.mrf.mxu0 }
 0xda5   : > { %v4433_v18 = vpop.f32.mrf.mxu3 }
 0xda7   : > { %6606 = vmatmul.msk.f32.vlgmr.msra.gmra.mxu1 %vm839_vm3, %v4599_v28  ;;  %6618 = vmatmul.msk.f32.gmra.mxu2 %vm839_vm3, %v4688_v57 }
 0xda8   : > { %6587 = vmatmul.msk.f32.gmra.mxu3 %vm839_vm3, %v4522_v20  ;;  %6595 = vmatmul.msk.f32.vlgmr.msra.gmra.mxu0 %vm839_vm3, %v4427_v21  ;;  %v10061_v20 = vld [vmem:[#allocation14_spill] sm:$0xff] }
 0xdab   : > { %v4697_v4 = vpop.f32.mrf.mxu2 }
 0xdac   : > { %v4528_v27 = vpop.f32.mrf.mxu0  ;;  %v4614_v15 = vpop.f32.mrf.mxu1 }
 0xdad   : > { %v4436_v1 = vpop.f32.mrf.mxu3 }
 0xdaf   : > { %6607 = vmatmul.msk.f32.gmra.mxu1 %vm839_vm3, %v4602_v48  ;;  %6619 = vmatmul.msk.f32.gmra.mxu2 %vm839_vm3, %v4691_v6 }
 0xdb0   : > { %6588 = vmatmul.msk.f32.gmra.mxu3 %vm839_vm3, %v4525_v34  ;;  %6596 = vmatmul.msk.f32.gmra.mxu0 %vm839_vm3, %v4430_v55 }
 0xdb4   : > { %v4531_v50 = vpop.f32.mrf.mxu0 }
 0xdb5   : > { %v4439_v54 = vpop.f32.mrf.mxu3 }
 0xdb7   : > { %6608 = vmatmul.msk.f32.gmra.mxu1 %vm839_vm3, %v4605_v24  ;;  %6620 = vmatmul.msk.f32.gmra.mxu2 %vm839_vm3, %v4694_v35  ;;  %v10062_v24 = vld [vmem:[#allocation15_spill] sm:$0xff] }
 0xdb8   : > { %6589 = vmatmul.msk.f32.gmra.mxu3 %vm839_vm3, %v4528_v27  ;;  %6597 = vmatmul.msk.f32.gmra.mxu0 %vm839_vm3, %v4433_v18 }
 0xdba   : > { %v4700_v25 = vpop.f32.mrf.mxu2 }
 0xdbd   : > { %v4442_v53 = vpop.f32.mrf.mxu3 }
 0xdbf   : > { %6609 = vmatmul.msk.f32.gmra.mxu1 %vm839_vm3, %v4608_v63  ;;  %6621 = vmatmul.msk.f32.gmra.mxu2 %vm839_vm3, %v4697_v4 }
 0xdc0   : > { %6590 = vmatmul.msk.f32.gmra.mxu3 %vm839_vm3, %v4531_v50  ;;  %6598 = vmatmul.msk.f32.gmra.mxu0 %vm839_vm3, %v4436_v1 }
 0xdc5   : > { %v4445_v26 = vpop.f32.mrf.mxu3 }
 0xdc7   : > { %6610 = vmatmul.msk.f32.gmra.mxu1 %vm839_vm3, %v4611_v22  ;;  %6622 = vmatmul.msk.f32.gmra.mxu2 %vm839_vm3, %v4700_v25  ;;  %v10063_v25 = vld [vmem:[#allocation16_spill] sm:$0xff] }
 0xdc8   : > { %6599 = vmatmul.msk.f32.gmra.mxu0 %vm839_vm3, %v4439_v54 }
 0xdcf   : > { %6611 = vmatmul.msk.f32.gmra.mxu1 %vm839_vm3, %v4614_v15 }
 0xdd0   : > { %6600 = vmatmul.msk.f32.gmra.mxu0 %vm839_vm3, %v4442_v53 }
 0xdd8   : > { %6601 = vmatmul.msk.f32.gmra.mxu0 %vm839_vm3, %v4445_v26 }
 0xddc   : > { %v4617_v3 = vpop.f32.mrf.mxu1 }
 0xddd   : > { %6612 = vmatmul.msk.f32.gmra.mxu1 %vm839_vm3, %v4617_v3 }
 0xde4   : > { %v4620_v11 = vpop.f32.mrf.mxu1 }
 0xde5   : > { %6613 = vmatmul.msk.f32.gmra.mxu1 %vm839_vm3, %v4620_v11 }
 0xdea   : > { %v4703_v47 = vpop.f32.mrf.mxu2 }
 0xdeb   : > { %v4448_v5 = vpop.f32.mrf.mxu3  ;;  %6623 = vmatmul.msk.f32.gmra.mxu2 %vm839_vm3, %v4703_v47 }
 0xdec   : > { %6602 = vmatmul.msk.f32.gmra.mxu0 %vm839_vm3, %v4448_v5 }
 0xded   : > { %v4534_v33 = vpop.f32.mrf.mxu0 }
 0xdee   : > { %6591 = vmatmul.msk.f32.gmra.mxu3 %vm839_vm3, %v4534_v33 }
 0xdf2   : > { %v4706_v0 = vpop.f32.mrf.mxu2 }
 0xdf3   : > { %v4451_v44 = vpop.f32.mrf.mxu3  ;;  %6624 = vmatmul.msk.f32.gmra.mxu2 %vm839_vm3, %v4706_v0 }
 0xdf4   : > { %6603 = vmatmul.msk.f32.gmra.mxu0 %vm839_vm3, %v4451_v44 }
 0xdfb   : > { %v4454_v30 = vpop.f32.mrf.mxu3  ;;  %v4709_v7 = vpop.f32.mrf.mxu2 }
 0xdfc   : > { %6604 = vmatmul.msk.f32.gmra.mxu0 %vm839_vm3, %v4454_v30  ;;  %6625 = vmatmul.msk.f32.gmra.mxu2 %vm839_vm3, %v4709_v7 }
 0xdfd   : > { %v4623_v13 = vpop.f32.mrf.mxu1 }
 0xdfe   : > { %6614 = vmatmul.msk.f32.gmra.mxu1 %vm839_vm3, %v4623_v13 }
 0xe04   : > { %v4537_v56 = vpop.f32.mrf.mxu0 }
 0xe05   : > { %6592 = vmatmul.msk.f32.gmra.mxu3 %vm839_vm3, %v4537_v56 }
 0xe0b   : > { %v4457_v59 = vpop.f32.mrf.mxu3 }
 0xe0c   : > { %6605 = vmatmul.msk.f32.gmra.mxu0 %vm839_vm3, %v4457_v59  ;;  %v4540_v36 = vpop.f32.mrf.mxu0 }
 0xe0d   : > { %6593 = vmatmul.msk.f32.gmra.mxu3 %vm839_vm3, %v4540_v36 }
 0xe12   : > { %v4712_v19 = vpop.f32.mrf.mxu2 }
 0xe13   : > { %6626 = vmatmul.msk.f32.gmra.mxu2 %vm839_vm3, %v4712_v19  ;;  %v4773_v62 = vpop.f32.mrf.mxu3 }
 0xe14   : > { %v4626_v42 = vpop.f32.mrf.mxu1 }
 0xe15   : > { %6615 = vmatmul.msk.f32.gmra.mxu1 %vm839_vm3, %v4626_v42  ;;  %v10064_v42 = vld [vmem:[#allocation18_spill] sm:$0xff] }
 0xe1a   : > { %v4715_v40 = vpop.f32.mrf.mxu2 }
 0xe1b   : > { %6627 = vmatmul.msk.f32.gmra.mxu2 %vm839_vm3, %v4715_v40  ;;  %v4776_v51 = vpop.f32.mrf.mxu3 }
 0xe1c   : > { %v4629_v23 = vpop.f32.mrf.mxu1 }
 0xe1d   : > { %v4543_v29 = vpop.f32.mrf.mxu0  ;;  %6616 = vmatmul.msk.f32.gmra.mxu1 %vm839_vm3, %v4629_v23 }
 0xe1e   : > { %6594 = vmatmul.msk.f32.gmra.mxu3 %vm839_vm3, %v4543_v29 }
 0xe22   : > { %v5033_v31 = vpop.f32.mrf.mxu2 }
 0xe23   : > { %v4779_v16 = vpop.f32.mrf.mxu3 }
 0xe24   : > { %v4939_v60 = vpop.f32.mrf.mxu1 }
 0xe25   : > { %v4856_v12 = vpop.f32.mrf.mxu0 }
 0xe26   : > { %v4857_v46 = vadd.f32 %v4856_v12, %v4773_v62 }
 0xe28   : > { %v4972_v9 = vadd.f32 %v4939_v60, %v4857_v46 }
 0xe2a   : > { %v5066_v52 = vadd.f32 %v5033_v31, %v4972_v9  ;;  %v5036_v17 = vpop.f32.mrf.mxu2 }
 0xe2b   : > { %v4782_v6 = vpop.f32.mrf.mxu3 }
 0xe2c   : > { %v4942_v58 = vpop.f32.mrf.mxu1  ;;  %v5078_v39 = vadd.f32 %v9343_v49, %v5066_v52 }
 0xe2d   : > { %v4859_v38 = vpop.f32.mrf.mxu0 }
 0xe2e   : > { %v4860_v61 = vadd.f32 %v4859_v38, %v4776_v51  ;;  %v5089_v10 = vadd.f32 %v5078_v39, %v8550_v14 }
 0xe30   : > { %v4973_v32 = vadd.f32 %v4942_v58, %v4860_v61  ;;  %v5100_v8 = vsel %vm595_vm2, %v5089_v10, 0.0 }
 0xe31   : > { %5101 = vadd.xlane.f32.xlu1 %v5100_v8 }
 0xe32   : > { %v5067_v45 = vadd.f32 %v5036_v17, %v4973_v32  ;;  %v5039_v57 = vpop.f32.mrf.mxu2 }
 0xe33   : > { %v4785_v26 = vpop.f32.mrf.mxu3 }
 0xe34   : > { %v5079_v37 = vadd.f32 %v9343_v49, %v5067_v45  ;;  %v4945_v43 = vpop.f32.mrf.mxu1 }
 0xe35   : > { %v4862_v2 = vpop.f32.mrf.mxu0 }
 0xe36   : > { %v4863_v21 = vadd.f32 %v4862_v2, %v4779_v16  ;;  %v5090_v28 = vadd.f32 %v5079_v37, %v10061_v20  ;;  %v6630_v20 = vld [vmem:[%s9978_s6 + $0x30] sm:$0xff] }
 0xe38   : > { %v4974_v55 = vadd.f32 %v4945_v43, %v4863_v21  ;;  %v5103_v34 = vsel %vm595_vm2, %v5090_v28, 0.0  ;;  %v6631_v21 = vld [vmem:[%s9978_s6 + $0x38] sm:$0xff] }
 0xe39   : > { %5104 = vadd.xlane.f32.xlu0 %v5103_v34  ;;  %5421 = vmatpush.msra.mxu3 %v6631_v21 }
 0xe3a   : > { %v5068_v48 = vadd.f32 %v5039_v57, %v4974_v55  ;;  %v5042_v50 = vpop.f32.mrf.mxu2 }
 0xe3b   : > { %v4788_v5 = vpop.f32.mrf.mxu3  ;;  %5422 = vmatpush.msra.mxu3 %v6630_v20 }
 0xe3c   : > { %v5080_v14 = vadd.f32 %v9343_v49, %v5068_v48  ;;  %v4948_v1 = vpop.f32.mrf.mxu1  ;;  %v6629_v48 = vld [vmem:[%s9978_s6 + $0x28] sm:$0xff] }
 0xe3d   : > { %v4865_v18 = vpop.f32.mrf.mxu0  ;;  %5423 = vmatpush.msra.mxu3 %v6629_v48 }
 0xe3e   : > { %v4866_v27 = vadd.f32 %v4865_v18, %v4782_v6  ;;  %v5091_v35 = vadd.f32 %v5080_v14, %v10062_v24  ;;  %v10065_v18 = vld [vmem:[#allocation17_spill] sm:$0xff] }
 0xe40   : > { %v4975_v63 = vadd.f32 %v4948_v1, %v4866_v27  ;;  %v5106_v4 = vsel %vm595_vm2, %v5091_v35, 0.0 }
 0xe41   : > { %5107 = vadd.xlane.f32.xlu2 %v5106_v4 }
 0xe42   : > { %v5069_v54 = vadd.f32 %v5042_v50, %v4975_v63  ;;  %v5045_v47 = vpop.f32.mrf.mxu2 }
 0xe43   : > { %v4791_v30 = vpop.f32.mrf.mxu3 }
 0xe44   : > { %v5081_v22 = vadd.f32 %v9343_v49, %v5069_v54  ;;  %v4951_v11 = vpop.f32.mrf.mxu1 }
 0xe45   : > { %v4868_v3 = vpop.f32.mrf.mxu0 }
 0xe46   : > { %v9356_v53 = vadd.f32 %v5081_v22, %v10063_v25  ;;  %v4869_v23 = vadd.f32 %v4868_v3, %v4785_v26 }
 0xe48   : > { %v5109_v15 = vsel %vm595_vm2, %v9356_v53, 0.0  ;;  %v4976_v46 = vadd.f32 %v4951_v11, %v4869_v23 }
 0xe49   : > { %5110 = vadd.xlane.f32.xlu1 %v5109_v15 }
 0xe4a   : > { %v5048_v44 = vpop.f32.mrf.mxu2  ;;  %v5070_v17 = vadd.f32 %v5045_v47, %v4976_v46 }
 0xe4c   : > { %v4954_v0 = vpop.f32.mrf.mxu1  ;;  %v5082_v45 = vadd.f32 %v9343_v49, %v5070_v17  ;;  %v10069_v17 = vld [vmem:[#allocation5_spill] sm:$0xff] }
 0xe4d   : > { %v4871_v33 = vpop.f32.mrf.mxu0 }
 0xe4e   : > { %v4872_v39 = vadd.f32 %v4871_v33, %v4788_v5  ;;  %v9386_v27 = vadd.f32 %v5082_v45, %v10065_v18  ;;  %v10066_v33 = vld [vmem:[#allocation2_spill] sm:$0xff] }
 0xe50   : > { %v4977_v32 = vadd.f32 %v4954_v0, %v4872_v39 }
 0xe52   : > { %v5071_v57 = vadd.f32 %v5048_v44, %v4977_v32 }
 0xe54   : > { %v5083_v4 = vadd.f32 %v9343_v49, %v5071_v57 }
 0xe55   : > { %v4874_v7 = vpop.f32.mrf.mxu0 }
 0xe56   : > { %v4875_v50 = vadd.f32 %v4874_v7, %v4791_v30  ;;  %v9397_v0 = vadd.f32 %v5083_v4, %v10066_v33  ;;  %v6651_v33 = vld [vmem:[%s9980_s8 + $0x78] sm:$0xff] }
 0xe57   : > { %5521 = vmatpush.msrb.mxu0 %v6651_v33 }
 0xe5a   : > { %v4957_v13 = vpop.f32.mrf.mxu1 }
 0xe5b   : > { %v4978_v11 = vadd.f32 %v4957_v13, %v4875_v50 }
 0xe62   : > { %v4960_v62 = vpop.f32.mrf.mxu1 }
 0xe69   : > { %v4877_v59 = vpop.f32.mrf.mxu0 }
 0xe6e   : > { %v5051_v56 = vpop.f32.mrf.mxu2 }
 0xe6f   : > { %v5072_v44 = vadd.f32 %v5051_v56, %v4978_v11 }
 0xe71   : > { %v4794_v36 = vpop.f32.mrf.mxu3  ;;  %v4880_v51 = vpop.f32.mrf.mxu0 }
 0xe72   : > { %v4878_v8 = vadd.f32 %v4877_v59, %v4794_v36  ;;  %v10067_v36 = vld [vmem:[#allocation4_spill] sm:$0xff] }
 0xe74   : > { %v4979_v55 = vadd.f32 %v4960_v62, %v4878_v8  ;;  %v5115_v62 = vsel %vm595_vm2, %v9397_v0, 0.0 }
 0xe76   : > { %v5054_v31 = vpop.f32.mrf.mxu2 }
 0xe77   : > { %v5073_v24 = vadd.f32 %v5054_v31, %v4979_v55  ;;  %v5084_v31 = vadd.f32 %v9343_v49, %v5072_v44 }
 0xe79   : > { %v4883_v34 = vpop.f32.mrf.mxu0  ;;  %v5085_v15 = vadd.f32 %v9343_v49, %v5073_v24 }
 0xe7b   : > { %v4963_v61 = vpop.f32.mrf.mxu1 }
 0xe7f   : > { %v5057_v16 = vpop.f32.mrf.mxu2 }
 0xe88   : > { %v4797_v12 = vpop.f32.mrf.mxu3 }
 0xe89   : > { %v4881_v14 = vadd.f32 %v4880_v51, %v4797_v12  ;;  %v4886_v5 = vpop.f32.mrf.mxu0 }
 0xe8b   : > { %v4980_v54 = vadd.f32 %v4963_v61, %v4881_v14 }
 0xe8d   : > { %v5074_v30 = vadd.f32 %v5057_v16, %v4980_v54  ;;  %v10070_v16 = vld [vmem:[#allocation6_spill] sm:$0xff] }
 0xe8f   : > { %v5086_v12 = vadd.f32 %v9343_v49, %v5074_v30 }
 0xe90   : > { %v4800_v2 = vpop.f32.mrf.mxu3 }
 0xe91   : > { %v9418_v61 = vadd.f32 %v5086_v12, %v10069_v17 }
 0xe92   : > { %v4966_v1 = vpop.f32.mrf.mxu1 }
 0xe93   : > { %v5124_v8 = vsel %vm595_vm2, %v9418_v61, 0.0 }
 0xe96   : > { %v5060_v22 = vpop.f32.mrf.mxu2 }
 0xe9a   : > { %v4969_v13 = vpop.f32.mrf.mxu1 }
 0xea1   : > { %v4803_v26 = vpop.f32.mrf.mxu3 }
 0xea2   : > { %v4887_v7 = vadd.f32 %v4886_v5, %v4803_v26 }
 0xea4   : > { %v5102_v19 = vpop.xlane.xlu1 %5101 }
 0xea5   : > { %v5133_v40 = vmul.f32 %v5102_v19, %v10064_v42  ;;  %v9403_v19 = vadd.f32 %v5085_v15, %v10067_v36 }
 0xea7   : > { %v9361_v29 = vsub.f32 %v5089_v10, %v5133_v40  ;;  %v4884_v40 = vadd.f32 %v4883_v34, %v4800_v2  ;;  %v10071_v2 = vld [vmem:[#allocation7_spill] sm:$0xff] }
 0xea9   : > { %v5155_v60 = vmul.f32 %v9361_v29, %v9361_v29  ;;  %v4981_v46 = vadd.f32 %v4966_v1, %v4884_v40 }
 0xeab   : > { %v5166_v9 = vsel %vm595_vm2, %v5155_v60, 0.0  ;;  %v4982_v60 = vadd.f32 %v4969_v13, %v4887_v7  ;;  %v5075_v51 = vadd.f32 %v5060_v22, %v4981_v46  ;;  %v9461_v7 = vperm.slane %v9340_v41, 2 }
 0xeac   : > { %5167 = vadd.xlane.f32.xlu0 %v5166_v9  ;;  %v5105_v52 = vpop.xlane.xlu0 %5104  ;;  %v5063_v9 = vpop.f32.mrf.mxu2 }
 0xead   : > { %v5134_v58 = vmul.f32 %v5105_v52, %v10064_v42  ;;  %v5076_v52 = vadd.f32 %v5063_v9, %v4982_v60 }
 0xeaf   : > { %v9367_v38 = vsub.f32 %v5090_v28, %v5134_v58  ;;  %v10068_v58 = vld [vmem:[#allocation3_spill] sm:$0xff]  ;;  %v5088_v45 = vadd.f32 %v9343_v49, %v5076_v52 }
 0xeb0   : > { %v9415_v39 = vadd.f32 %v5084_v31, %v10068_v58 }
 0xeb1   : > { %v5156_v10 = vmul.f32 %v9367_v38, %v9367_v38 }
 0xeb2   : > { %v5118_v32 = vsel %vm595_vm2, %v9415_v39, 0.0 }
 0xeb3   : > { %v5169_v37 = vsel %vm595_vm2, %v5156_v10, 0.0  ;;  %v5087_v10 = vadd.f32 %v9343_v49, %v5075_v51  ;;  %v6628_v49 = vld [vmem:[%s9978_s6 + $0x20] sm:$0xff] }
 0xeb4   : > { %5170 = vadd.xlane.f32.xlu2 %v5169_v37  ;;  %v5108_v43 = vpop.xlane.xlu2 %5107  ;;  %5424 = vmatpush.msra.mxu3 %v6628_v49 }
 0xeb5   : > { %v5135_v28 = vmul.f32 %v5108_v43, %v10064_v42  ;;  %v9427_v37 = vadd.f32 %v5087_v10, %v10070_v16  ;;  %v9430_v43 = vadd.f32 %v5088_v45, %v10071_v2  ;;  %v6647_v10 = vld [vmem:[%s9980_s8 + $0x58] sm:$0xff]  ;;  %v6646_v16 = vld [vmem:[%s9980_s8 + $0x50] sm:$0xff] }
 0xeb7   : > { %v9383_v6 = vsub.f32 %v5091_v35, %v5135_v28  ;;  %v5112_v35 = vsel %vm595_vm2, %v9386_v27, 0.0  ;;  %v5127_v21 = vsel %vm595_vm2, %v9427_v37, 0.0  ;;  %v5130_v20 = vsel %vm595_vm2, %v9430_v43, 0.0 }
 0xeb9   : > { %v5157_v63 = vmul.f32 %v9383_v6, %v9383_v6 }
 0xebb   : > { %v5172_v25 = vsel %vm595_vm2, %v5157_v63, 0.0 }
 0xebc   : > { %5173 = vadd.xlane.f32.xlu1 %v5172_v25  ;;  %v5111_v3 = vpop.xlane.xlu1 %5110  ;;  %5113 = vadd.xlane.f32.xlu2 %v5112_v35 }
 0xebd   : > { %v5136_v47 = vmul.f32 %v5111_v3, %v10064_v42 }
 0xebf   : > { %v9400_v59 = vsub.f32 %v9356_v53, %v5136_v47  ;;  %v5121_v53 = vsel %vm595_vm2, %v9403_v19, 0.0  ;;  %v9449_v47 = vperm.slane %v9340_v41, 1 }
 0xec1   : > { %v5158_v23 = vmul.f32 %v9400_v59, %v9400_v59 }
 0xec3   : > { %v5175_v56 = vsel %vm595_vm2, %v5158_v23, 0.0  ;;  %v6649_v23 = vld [vmem:[%s9980_s8 + $0x68] sm:$0xff] }
 0xec4   : > { %5176 = vadd.xlane.f32.xlu0 %v5175_v56  ;;  %5116 = vadd.xlane.f32.xlu1 %v5115_v62 }
 0xec5   : > { %5122 = vadd.xlane.f32.xlu2 %v5121_v53 }
 0xecc   : > { %5119 = vadd.xlane.f32.xlu0 %v5118_v32  ;;  %5125 = vadd.xlane.f32.xlu1 %v5124_v8 }
 0xed4   : > { %5128 = vadd.xlane.f32.xlu0 %v5127_v21  ;;  %5131 = vadd.xlane.f32.xlu1 %v5130_v20 }
 0xf1f   : > { %v5168_v28 = vpop.xlane.xlu0 %5167 }
 0xf20   : > { %v5199_v57 = vmul.f32 %v5168_v28, %v10064_v42 }
 0xf22   : > { %v5210_v55 = vadd.f32 1e-05, %v5199_v57 }
 0xf24   : > { %7141 = vrsqrt.f32 %v5210_v55  ;;  %vm5227_vm5 = vweird.f32 %v5210_v55 }
 0xf27   : > { %v5171_v34 = vpop.xlane.xlu2 %5170 }
 0xf28   : > { %v5200_v48 = vmul.f32 %v5171_v34, %v10064_v42 }
 0xf2a   : > { %v7142_v14 = vpop.eup %7141  ;;  %v5211_v18 = vadd.f32 1e-05, %v5200_v48 }
 0xf2b   : > { %v5222_v24 = vmul.f32 %v7142_v14, %v5210_v55  ;;  %vm5228_vm3 = vweird.f32 %v7142_v14 }
 0xf2c   : > { %7143 = vrsqrt.f32 %v5211_v18  ;;  %vm5229_vm12 = vmor %vm5227_vm5, %vm5228_vm3  ;;  %vm5237_vm14 = vweird.f32 %v5211_v18 }
 0xf2d   : > { %v5223_v1 = vmul.f32 %v7142_v14, %v5222_v24 }
 0xf2f   : > { %v5224_v63 = vmul.f32 0.5, %v5223_v1  ;;  %v5174_v4 = vpop.xlane.xlu1 %5173  ;;  %v5114_v50 = vpop.xlane.xlu2 %5113 }
 0xf30   : > { %v5201_v54 = vmul.f32 %v5174_v4, %v10064_v42  ;;  %v5137_v22 = vmul.f32 %v5114_v50, %v10064_v42 }
 0xf31   : > { %v5225_v25 = vsub.f32 1.5, %v5224_v63 }
 0xf32   : > { %v7144_v35 = vpop.eup %7143  ;;  %v9443_v15 = vadd.f32 1e-05, %v5201_v54  ;;  %v9446_v26 = vsub.f32 %v9386_v27, %v5137_v22  ;;  %v6650_v27 = vld [vmem:[%s9980_s8 + $0x70] sm:$0xff] }
 0xf33   : > { %v5226_v3 = vmul.f32 %v7142_v14, %v5225_v25  ;;  %v5232_v11 = vmul.f32 %v7144_v35, %v5211_v18  ;;  %5522 = vmatpush.msrb.mxu0 %v6650_v27  ;;  %vm5238_vm13 = vweird.f32 %v7144_v35 }
 0xf34   : > { %7145 = vrsqrt.f32 %v9443_v15  ;;  %v5159_v5 = vmul.f32 %v9446_v26, %v9446_v26  ;;  %vm5239_vm15 = vmor %vm5237_vm14, %vm5238_vm13  ;;  %vm5247_vm1 = vweird.f32 %v9443_v15 }
 0xf35   : > { %v5230_v44 = vsel %vm5229_vm12, %v7142_v14, %v5226_v3  ;;  %v5233_v30 = vmul.f32 %v7144_v35, %v5232_v11  ;;  %5523 = vmatpush.msrb.mxu0 %v6649_v23 }
 0xf36   : > { %v5331_v36 = vmul.f32 %v5230_v44, %v9361_v29  ;;  %v5178_v40 = vsel %vm595_vm2, %v5159_v5, 0.0  ;;  %v6648_v29 = vld [vmem:[%s9980_s8 + $0x60] sm:$0xff] }
 0xf37   : > { %v5234_v13 = vmul.f32 0.5, %v5233_v30  ;;  %v5177_v62 = vpop.xlane.xlu0 %5176  ;;  %v5117_v31 = vpop.xlane.xlu1 %5116  ;;  %5179 = vadd.xlane.f32.xlu2 %v5178_v40  ;;  %5524 = vmatpush.msrb.mxu0 %v6648_v29  ;;  %v6645_v29 = vld [vmem:[%s9980_s8 + $0x48] sm:$0xff] }
 0xf38   : > { %v5343_v60 = vmul.f32 %v9449_v47, %v5331_v36  ;;  %v5202_v56 = vmul.f32 %v5177_v62, %v10064_v42  ;;  %v5138_v12 = vmul.f32 %v5117_v31, %v10064_v42  ;;  %v5123_v53 = vpop.xlane.xlu2 %5122 }
 0xf39   : > { %v5235_v46 = vsub.f32 1.5, %v5234_v13  ;;  %v5140_v9 = vmul.f32 %v5123_v53, %v10064_v42  ;;  %5525 = vmatpush.msrb.mxu0 %v6647_v10 }
 0xf3a   : > { %v7146_v51 = vpop.eup %7145  ;;  %v9476_v52 = vadd.f32 %v9461_v7, %v5343_v60  ;;  %v5213_v58 = vadd.f32 1e-05, %v5202_v56  ;;  %v9479_v17 = vsub.f32 %v9397_v0, %v5138_v12 }
 0xf3b   : > { %v5236_v32 = vmul.f32 %v7144_v35, %v5235_v46  ;;  %v5242_v8 = vmul.f32 %v7146_v51, %v9443_v15  ;;  %v9486_v45 = vsub.f32 %v9403_v19, %v5140_v9  ;;  %5526 = vmatpush.msrb.mxu0 %v6646_v16  ;;  %vm5248_vm0 = vweird.f32 %v7146_v51 }
 0xf3c   : > { %7147 = vrsqrt.f32 %v5213_v58  ;;  %6633 = vmatmul.msk.f32.vlgmr.msra.gmra.mxu3 %vm595_vm2, %v9476_v52  ;;  %v5160_v0 = vmul.f32 %v9479_v17, %v9479_v17  ;;  %vm5249_vm6 = vmor %vm5247_vm1, %vm5248_vm0  ;;  %vm5257_vm8 = vweird.f32 %v5213_v58 }
 0xf3d   : > { %v5240_v2 = vsel %vm5239_vm15, %v7144_v35, %v5236_v32  ;;  %v5243_v21 = vmul.f32 %v7146_v51, %v5242_v8  ;;  %v5162_v20 = vmul.f32 %v9486_v45, %v9486_v45  ;;  %5527 = vmatpush.msrb.mxu0 %v6645_v29 }
 0xf3e   : > { %v5332_v19 = vmul.f32 %v5240_v2, %v9367_v38  ;;  %v5181_v49 = vsel %vm595_vm2, %v5160_v0, 0.0 }
 0xf3f   : > { %v5244_v28 = vmul.f32 0.5, %v5243_v21  ;;  %v5120_v57 = vpop.xlane.xlu0 %5119  ;;  %v5126_v55 = vpop.xlane.xlu1 %5125  ;;  %5182 = vadd.xlane.f32.xlu0 %v5181_v49  ;;  %v5187_v34 = vsel %vm595_vm2, %v5162_v20, 0.0 }
 0xf40   : > { %v5139_v48 = vmul.f32 %v5120_v57, %v10064_v42  ;;  %v5141_v14 = vmul.f32 %v5126_v55, %v10064_v42  ;;  %5188 = vadd.xlane.f32.xlu1 %v5187_v34  ;;  %v5344_v18 = vmul.f32 %v9449_v47, %v5332_v19 }
 0xf41   : > { %v5245_v24 = vsub.f32 1.5, %v5244_v28 }
 0xf42   : > { %v7148_v1 = vpop.eup %7147  ;;  %v9504_v38 = vsub.f32 %v9415_v39, %v5139_v48  ;;  %v9507_v63 = vsub.f32 %v9418_v61, %v5141_v14  ;;  %v9510_v4 = vadd.f32 %v9461_v7, %v5344_v18 }
 0xf43   : > { %v5246_v50 = vmul.f32 %v7146_v51, %v5245_v24  ;;  %v5252_v54 = vmul.f32 %v7148_v1, %v5213_v58  ;;  %vm5258_vm7 = vweird.f32 %v7148_v1  ;;  %v9568_v24 = vld [vmem:[%s9979_s7 + $0x1] ss:$0 sm:$0xff] }
 0xf44   : > { %6634 = vmatmul.msk.f32.gmra.mxu3 %vm595_vm2, %v9510_v4  ;;  %v5161_v22 = vmul.f32 %v9504_v38, %v9504_v38  ;;  %v5163_v39 = vmul.f32 %v9507_v63, %v9507_v63  ;;  %vm5259_vm9 = vmor %vm5257_vm8, %vm5258_vm7 }
 0xf45   : > { %v5250_v25 = vsel %vm5249_vm6, %v7146_v51, %v5246_v50  ;;  %v5253_v61 = vmul.f32 %v7148_v1, %v5252_v54 }
 0xf46   : > { %v5333_v35 = vmul.f32 %v5250_v25, %v9383_v6  ;;  %v5184_v3 = vsel %vm595_vm2, %v5161_v22, 0.0  ;;  %v5190_v11 = vsel %vm595_vm2, %v5163_v39, 0.0 }
 0xf47   : > { %v5254_v15 = vmul.f32 0.5, %v5253_v61  ;;  %5185 = vadd.xlane.f32.xlu2 %v5184_v3  ;;  %5191 = vadd.xlane.f32.xlu0 %v5190_v11  ;;  %v5129_v5 = vpop.xlane.xlu0 %5128  ;;  %v5132_v33 = vpop.xlane.xlu1 %5131 }
 0xf48   : > { %v5142_v27 = vmul.f32 %v5129_v5, %v10064_v42  ;;  %v5143_v44 = vmul.f32 %v5132_v33, %v10064_v42  ;;  %v5345_v30 = vmul.f32 %v9449_v47, %v5333_v35 }
 0xf49   : > { %v5255_v36 = vsub.f32 1.5, %v5254_v15 }
 0xf4a   : > { %v9526_v40 = vsub.f32 %v9427_v37, %v5142_v27  ;;  %v9529_v6 = vsub.f32 %v9430_v43, %v5143_v44  ;;  %v9532_v23 = vadd.f32 %v9461_v7, %v5345_v30 }
 0xf4b   : > { %v5256_v13 = vmul.f32 %v7148_v1, %v5255_v36 }
 0xf4c   : > { %6635 = vmatmul.msk.f32.gmra.mxu3 %vm595_vm2, %v9532_v23  ;;  %v5164_v62 = vmul.f32 %v9526_v40, %v9526_v40  ;;  %v5165_v31 = vmul.f32 %v9529_v6, %v9529_v6 }
 0xf4d   : > { %v5260_v37 = vsel %vm5259_vm9, %v7148_v1, %v5256_v13 }
 0xf4e   : > { %v5334_v60 = vmul.f32 %v5260_v37, %v9400_v59  ;;  %v5193_v43 = vsel %vm595_vm2, %v5164_v62, 0.0  ;;  %v5196_v56 = vsel %vm595_vm2, %v5165_v31, 0.0  ;;  %v6644_v59 = vld [vmem:[%s9980_s8 + $0x40] sm:$0xff] }
 0xf4f   : > { %5194 = vadd.xlane.f32.xlu2 %v5193_v43  ;;  %5197 = vadd.xlane.f32.xlu0 %v5196_v56 }
 0xf50   : > { %v5346_v12 = vmul.f32 %v9449_v47, %v5334_v60  ;;  %5528 = vmatpush.msrb.mxu0 %v6644_v59 }
 0xf52   : > { %v9545_v53 = vadd.f32 %v9461_v7, %v5346_v12 }
 0xf54   : > { %6636 = vmatmul.msk.f32.gmra.mxu3 %vm595_vm2, %v9545_v53 }
 0xfaa   : > { %v5180_v46 = vpop.xlane.xlu2 %5179 }
 0xfab   : > { %v5203_v9 = vmul.f32 %v5180_v46, %v10064_v42 }
 0xfad   : > { %v5214_v51 = vadd.f32 1e-05, %v5203_v9 }
 0xfaf   : > { %7149 = vrsqrt.f32 %v5214_v51  ;;  %vm5267_vm11 = vweird.f32 %v5214_v51 }
 0xfb2   : > { %v5183_v58 = vpop.xlane.xlu0 %5182 }
 0xfb3   : > { %v5204_v10 = vmul.f32 %v5183_v58, %v10064_v42  ;;  %v5189_v32 = vpop.xlane.xlu1 %5188 }
 0xfb4   : > { %v5206_v8 = vmul.f32 %v5189_v32, %v10064_v42 }
 0xfb5   : > { %v7150_v0 = vpop.eup %7149  ;;  %v5215_v16 = vadd.f32 1e-05, %v5204_v10 }
 0xfb6   : > { %v5262_v2 = vmul.f32 %v7150_v0, %v5214_v51  ;;  %v9558_v21 = vadd.f32 1e-05, %v5206_v8  ;;  %vm5268_vm10 = vweird.f32 %v7150_v0 }
 0xfb7   : > { %7151 = vrsqrt.f32 %v5215_v16  ;;  %vm5269_vm3 = vmor %vm5267_vm11, %vm5268_vm10  ;;  %vm5277_vm12 = vweird.f32 %v5215_v16 }
 0xfb8   : > { %v5263_v20 = vmul.f32 %v7150_v0, %v5262_v2  ;;  %7153 = vrsqrt.f32 %v9558_v21  ;;  %vm5297_vm6 = vweird.f32 %v9558_v21 }
 0xfba   : > { %v5264_v19 = vmul.f32 0.5, %v5263_v20  ;;  %v5186_v49 = vpop.xlane.xlu2 %5185  ;;  %v5192_v28 = vpop.xlane.xlu0 %5191 }
 0xfbb   : > { %v5205_v57 = vmul.f32 %v5186_v49, %v10064_v42  ;;  %v5207_v55 = vmul.f32 %v5192_v28, %v10064_v42 }
 0xfbc   : > { %v5265_v34 = vsub.f32 1.5, %v5264_v19 }
 0xfbd   : > { %v7152_v48 = vpop.eup %7151  ;;  %v5216_v14 = vadd.f32 1e-05, %v5205_v57  ;;  %v9563_v18 = vadd.f32 1e-05, %v5207_v55 }
 0xfbe   : > { %v9570_v1 = vpop.eup %7153  ;;  %v5266_v50 = vmul.f32 %v7150_v0, %v5265_v34  ;;  %v5272_v54 = vmul.f32 %v7152_v48, %v5215_v16  ;;  %vm5278_vm5 = vweird.f32 %v7152_v48 }
 0xfbf   : > { %v5292_v22 = vmul.f32 %v9570_v1, %v9558_v21  ;;  %7155 = vrsqrt.f32 %v5216_v14  ;;  %v5426_v39 = vpop.f32.mrf.mxu3  ;;  %vm5279_vm13 = vmor %vm5277_vm12, %vm5278_vm5  ;;  %vm5287_vm15 = vweird.f32 %v5216_v14  ;;  %vm5298_vm0 = vweird.f32 %v9570_v1 }
 0xfc0   : > { %v5270_v25 = vsel %vm5269_vm3, %v7150_v0, %v5266_v50  ;;  %v5273_v61 = vmul.f32 %v7152_v48, %v5272_v54  ;;  %7157 = vrsqrt.f32 %v9563_v18  ;;  %v5427_v3 = vadd.f32 %v9568_v24, %v5426_v39  ;;  %vm5299_vm7 = vmor %vm5297_vm6, %vm5298_vm0 }
 0xfc1   : > { %v5335_v35 = vmul.f32 %v5270_v25, %v9446_v26  ;;  %v5293_v5 = vmul.f32 %v9570_v1, %v5292_v22  ;;  %vm5307_vm9 = vweird.f32 %v9563_v18 }
 0xfc2   : > { %v5274_v11 = vmul.f32 0.5, %v5273_v61  ;;  %v5195_v15 = vpop.xlane.xlu2 %5194  ;;  %v5459_v33 = vmax.f32 %v5427_v3, 0.0  ;;  %v5198_v44 = vpop.xlane.xlu0 %5197 }
 0xfc3   : > { %v5208_v27 = vmul.f32 %v5195_v15, %v10064_v42  ;;  %v5347_v36 = vmul.f32 %v9449_v47, %v5335_v35  ;;  %v5209_v60 = vmul.f32 %v5198_v44, %v10064_v42  ;;  %v5294_v56 = vmul.f32 0.5, %v5293_v5 }
 0xfc4   : > { %v5275_v30 = vsub.f32 1.5, %v5274_v11  ;;  %6652 = vmatmul.msk.f32.vlgmr.msrb.gmra.mxu0 %vm2854_vm4, %v5459_v33 }
 0xfc5   : > { %v7156_v13 = vpop.eup %7155  ;;  %v9580_v62 = vadd.f32 1e-05, %v5208_v27  ;;  %v5359_v43 = vadd.f32 %v9461_v7, %v5347_v36  ;;  %v9592_v58 = vadd.f32 1e-05, %v5209_v60  ;;  %v5295_v32 = vsub.f32 1.5, %v5294_v56 }
 0xfc6   : > { %v9583_v26 = vpop.eup %7157  ;;  %v5276_v31 = vmul.f32 %v7152_v48, %v5275_v30  ;;  %v5282_v37 = vmul.f32 %v7156_v13, %v5216_v14  ;;  %vm5288_vm14 = vweird.f32 %v7156_v13 }
 0xfc7   : > { %v5302_v12 = vmul.f32 %v9583_v26, %v9563_v18  ;;  %7159 = vrsqrt.f32 %v9580_v62  ;;  %v5429_v29 = vpop.f32.mrf.mxu3  ;;  %6637 = vmatmul.msk.f32.gmra.mxu3 %vm595_vm2, %v5359_v43  ;;  %vm5289_vm1 = vmor %vm5287_vm15, %vm5288_vm14  ;;  %vm5308_vm8 = vweird.f32 %v9583_v26  ;;  %vm5317_vm3 = vweird.f32 %v9580_v62 }
 0xfc8   : > { %v5280_v59 = vsel %vm5279_vm13, %v7152_v48, %v5276_v31  ;;  %v5283_v46 = vmul.f32 %v7156_v13, %v5282_v37  ;;  %v5430_v10 = vadd.f32 %v9568_v24, %v5429_v29  ;;  %7161 = vrsqrt.f32 %v9592_v58  ;;  %vm5309_vm10 = vmor %vm5307_vm9, %vm5308_vm8 }
 0xfc9   : > { %v5336_v9 = vmul.f32 %v5280_v59, %v9479_v17  ;;  %v5303_v8 = vmul.f32 %v9583_v26, %v5302_v12  ;;  %v5296_v17 = vmul.f32 %v9570_v1, %v5295_v32  ;;  %vm5327_vm13 = vweird.f32 %v9592_v58 }
 0xfca   : > { %v5284_v51 = vmul.f32 0.5, %v5283_v46  ;;  %v5460_v2 = vmax.f32 %v5430_v10, 0.0  ;;  %v5479_v46 = vperm.slane %v9340_v41, 5 }
 0xfcb   : > { %v5348_v0 = vmul.f32 %v9449_v47, %v5336_v9  ;;  %v5304_v28 = vmul.f32 0.5, %v5303_v8  ;;  %v5300_v54 = vsel %vm5299_vm7, %v9570_v1, %v5296_v17 }
 0xfcc   : > { %v5285_v16 = vsub.f32 1.5, %v5284_v51  ;;  %6653 = vmatmul.msk.f32.gmra.mxu0 %vm2854_vm4, %v5460_v2  ;;  %v5338_v3 = vmul.f32 %v5300_v54, %v9486_v45 }
 0xfcd   : > { %v7160_v20 = vpop.eup %7159  ;;  %v5360_v19 = vadd.f32 %v9461_v7, %v5348_v0  ;;  %v5305_v22 = vsub.f32 1.5, %v5304_v28 }
 0xfce   : > { %v5286_v49 = vmul.f32 %v7156_v13, %v5285_v16  ;;  %v5312_v57 = vmul.f32 %v7160_v20, %v9580_v62  ;;  %v7162_v61 = vpop.eup %7161  ;;  %v5350_v45 = vmul.f32 %v9449_v47, %v5338_v3  ;;  %vm5318_vm11 = vweird.f32 %v7160_v20 }
 0xfcf   : > { %v5432_v55 = vpop.f32.mrf.mxu3  ;;  %6638 = vmatmul.msk.f32.gmra.mxu3 %vm595_vm2, %v5360_v19  ;;  %v5306_v11 = vmul.f32 %v9583_v26, %v5305_v22  ;;  %v5322_v21 = vmul.f32 %v7162_v61, %v9592_v58  ;;  %vm5319_vm5 = vmor %vm5317_vm3, %vm5318_vm11  ;;  %vm5328_vm12 = vweird.f32 %v7162_v61 }
 0xfd0   : > { %v5290_v34 = vsel %vm5289_vm1, %v7156_v13, %v5286_v49  ;;  %v5433_v48 = vadd.f32 %v9568_v24, %v5432_v55  ;;  %v5313_v39 = vmul.f32 %v7160_v20, %v5312_v57  ;;  %v5362_v36 = vadd.f32 %v9461_v7, %v5350_v45  ;;  %vm5329_vm14 = vmor %vm5327_vm13, %vm5328_vm12 }
 0xfd1   : > { %v5337_v14 = vmul.f32 %v5290_v34, %v9504_v38  ;;  %v5310_v33 = vsel %vm5309_vm10, %v9583_v26, %v5306_v11  ;;  %v5323_v44 = vmul.f32 %v7162_v61, %v5322_v21 }
 0xfd2   : > { %v5461_v50 = vmax.f32 %v5433_v48, 0.0  ;;  %v5314_v38 = vmul.f32 0.5, %v5313_v39  ;;  %v5339_v30 = vmul.f32 %v5310_v33, %v9507_v63 }
 0xfd3   : > { %v5349_v25 = vmul.f32 %v9449_v47, %v5337_v14  ;;  %v5324_v31 = vmul.f32 0.5, %v5323_v44 }
 0xfd4   : > { %6654 = vmatmul.msk.f32.gmra.mxu0 %vm2854_vm4, %v5461_v50  ;;  %v5315_v27 = vsub.f32 1.5, %v5314_v38  ;;  %v5351_v18 = vmul.f32 %v9449_v47, %v5339_v30 }
 0xfd5   : > { %v5361_v35 = vadd.f32 %v9461_v7, %v5349_v25  ;;  %v5325_v26 = vsub.f32 1.5, %v5324_v31 }
 0xfd6   : > { %v5316_v13 = vmul.f32 %v7160_v20, %v5315_v27  ;;  %v5363_v63 = vadd.f32 %v9461_v7, %v5351_v18 }
 0xfd7   : > { %v5435_v15 = vpop.f32.mrf.mxu3  ;;  %6639 = vmatmul.msk.f32.gmra.mxu3 %vm595_vm2, %v5361_v35  ;;  %v5326_v43 = vmul.f32 %v7162_v61, %v5325_v26 }
 0xfd8   : > { %v5436_v1 = vadd.f32 %v9568_v24, %v5435_v15  ;;  %v5320_v37 = vsel %vm5319_vm5, %v7160_v20, %v5316_v13 }
 0xfd9   : > { %v5340_v60 = vmul.f32 %v5320_v37, %v9526_v40  ;;  %v5330_v12 = vsel %vm5329_vm14, %v7162_v61, %v5326_v43  ;;  %v5696_v43 = vld [vmem:[%s9982_s10 + $0x18] sm:$0xff] }
 0xfda   : > { %v5462_v5 = vmax.f32 %v5436_v1, 0.0  ;;  %v5341_v62 = vmul.f32 %v5330_v12, %v9529_v6  ;;  %5721 = vmatpush.msrb.mxu1 %v5696_v43 }
 0xfdb   : > { %v5352_v56 = vmul.f32 %v9449_v47, %v5340_v60 }
 0xfdc   : > { %6655 = vmatmul.msk.f32.gmra.mxu0 %vm2854_vm4, %v5462_v5  ;;  %v5353_v40 = vmul.f32 %v9449_v47, %v5341_v62 }
 0xfdd   : > { %v5364_v29 = vadd.f32 %v9461_v7, %v5352_v56  ;;  %v5695_v56 = vld [vmem:[%s9982_s10 + $0x10] sm:$0xff] }
 0xfde   : > { %v5365_v59 = vadd.f32 %v9461_v7, %v5353_v40  ;;  %5722 = vmatpush.msrb.mxu1 %v5695_v56 }
 0xfdf   : > { %6640 = vmatmul.msk.f32.gmra.mxu3 %vm595_vm2, %v5362_v36 }
 0xfe7   : > { %6641 = vmatmul.msk.f32.gmra.mxu3 %vm595_vm2, %v5363_v63 }
 0xfef   : > { %6642 = vmatmul.msk.f32.gmra.mxu3 %vm595_vm2, %v5364_v29 }
 0xff7   : > { %6643 = vmatmul.msk.f32.gmra.mxu3 %vm595_vm2, %v5365_v59 }
0x1041   : > { %v5530_v9 = vpop.f32.mrf.mxu0 }
0x1042   : > { %v5531_v51 = vadd.f32 %v5530_v9, %v5479_v46 }
0x1044   : > { %v5556_v58 = vadd.f32 %v5531_v51, %v9476_v52 }
0x1046   : > { %v5560_v10 = vsel %vm595_vm2, %v5556_v58, 0.0 }
0x1047   : > { %5561 = vadd.xlane.f32.xlu2 %v5560_v10  ;;  %v5694_v10 = vld [vmem:[%s9982_s10 + $0x8] sm:$0xff] }
0x1048   : > { %5723 = vmatpush.msrb.mxu1 %v5694_v10 }
0x1049   : > { %v5533_v6 = vpop.f32.mrf.mxu0 }
0x104a   : > { %v5438_v32 = vpop.f32.mrf.mxu3  ;;  %v5534_v34 = vadd.f32 %v5533_v6, %v5479_v46 }
0x104b   : > { %v5439_v8 = vadd.f32 %v9568_v24, %v5438_v32 }
0x104c   : > { %v5557_v14 = vadd.f32 %v5534_v34, %v9510_v4  ;;  %v6693_v34 = vld [vmem:[%s9982_s10 + $0x90] sm:$0xff] }
0x104d   : > { %v5463_v0 = vmax.f32 %v5439_v8, 0.0 }
0x104e   : > { %v5563_v22 = vsel %vm595_vm2, %v5557_v14, 0.0 }
0x104f   : > { %6656 = vmatmul.msk.f32.gmra.mxu0 %vm2854_vm4, %v5463_v0 }
0x1051   : > { %v5536_v47 = vpop.f32.mrf.mxu0 }
0x1052   : > { %v5441_v7 = vpop.f32.mrf.mxu3  ;;  %v5537_v16 = vadd.f32 %v5536_v47, %v5479_v46 }
0x1053   : > { %v5442_v2 = vadd.f32 %v9568_v24, %v5441_v7  ;;  %v6686_v7 = vld [vmem:[%s9982_s10 + $0x58] sm:$0xff] }
0x1054   : > { %v5558_v41 = vadd.f32 %v5537_v16, %v9532_v23  ;;  %5876 = vmatpush.msra.mxu2 %v6686_v7  ;;  %v6685_v16 = vld [vmem:[%s9982_s10 + $0x50] sm:$0xff] }
0x1055   : > { %v5464_v20 = vmax.f32 %v5442_v2, 0.0 }
0x1056   : > { %v5566_v52 = vsel %vm595_vm2, %v5558_v41, 0.0  ;;  %5877 = vmatpush.msra.mxu2 %v6685_v16 }
0x1057   : > { %6657 = vmatmul.msk.f32.gmra.mxu0 %vm2854_vm4, %v5464_v20  ;;  %5567 = vadd.xlane.f32.xlu0 %v5566_v52  ;;  %v5693_v52 = vld [vmem:[%s9982_s10] sm:$0xff] }
0x1058   : > { %5724 = vmatpush.msrb.mxu1 %v5693_v52 }
0x1059   : > { %v5539_v19 = vpop.f32.mrf.mxu0 }
0x105a   : > { %v5444_v49 = vpop.f32.mrf.mxu3  ;;  %v5540_v17 = vadd.f32 %v5539_v19, %v5479_v46  ;;  %v6683_v19 = vld [vmem:[%s9982_s10 + $0x40] sm:$0xff] }
0x105b   : > { %v5445_v28 = vadd.f32 %v9568_v24, %v5444_v49 }
0x105c   : > { %v5559_v57 = vadd.f32 %v5540_v17, %v9545_v53  ;;  %v6694_v17 = vld [vmem:[%s9982_s10 + $0x98] sm:$0xff] }
0x105d   : > { %v5465_v55 = vmax.f32 %v5445_v28, 0.0  ;;  %v6702_v28 = vld [vmem:[%s9982_s10 + $0xb8] sm:$0xff]  ;;  %5935 = vmatpush.msrb.mxu3 %v6694_v17 }
0x105e   : > { %v5569_v48 = vsel %vm595_vm2, %v5559_v57, 0.0  ;;  %5994 = vmatpush.msra.mxu0 %v6702_v28 }
0x105f   : > { %6658 = vmatmul.msk.f32.gmra.mxu0 %vm2854_vm4, %v5465_v55  ;;  %5570 = vadd.xlane.f32.xlu1 %v5569_v48  ;;  %v6701_v48 = vld [vmem:[%s9982_s10 + $0xb0] sm:$0xff] }
0x1060   : > { %5936 = vmatpush.msrb.mxu3 %v6693_v34  ;;  %5995 = vmatpush.msra.mxu0 %v6701_v48 }
0x1062   : > { %v5447_v23 = vpop.f32.mrf.mxu3 }
0x1063   : > { %v5448_v50 = vadd.f32 %v9568_v24, %v5447_v23  ;;  %v6666_v23 = vld [vmem:[%s9982_s10 + $0x78] sm:$0xff] }
0x1064   : > { %5762 = vmatpush.msra.mxu1 %v6666_v23 }
0x1065   : > { %v5466_v54 = vmax.f32 %v5448_v50, 0.0  ;;  %v6700_v50 = vld [vmem:[%s9982_s10 + $0xa8] sm:$0xff] }
0x1066   : > { %5996 = vmatpush.msra.mxu0 %v6700_v50  ;;  %v6678_v50 = vld [vmem:[%s9982_s10 + $0x38] sm:$0xff] }
0x1067   : > { %6659 = vmatmul.msk.f32.gmra.mxu0 %vm2854_vm4, %v5466_v54  ;;  %5564 = vadd.xlane.f32.xlu1 %v5563_v22  ;;  %v6691_v54 = vld [vmem:[%s9982_s10 + $0x80] sm:$0xff] }
0x1068   : > { %v6699_v22 = vld [vmem:[%s9982_s10 + $0xa0] sm:$0xff] }
0x1069   : > { %5997 = vmatpush.msra.mxu0 %v6699_v22 }
0x106a   : > { %v5450_v39 = vpop.f32.mrf.mxu3 }
0x106b   : > { %v5451_v53 = vadd.f32 %v9568_v24, %v5450_v39 }
0x106d   : > { %v5467_v25 = vmax.f32 %v5451_v53, 0.0 }
0x106f   : > { %6660 = vmatmul.msk.f32.gmra.mxu0 %vm2854_vm4, %v5467_v25 }
0x1072   : > { %v5453_v61 = vpop.f32.mrf.mxu3 }
0x1073   : > { %v5454_v35 = vadd.f32 %v9568_v24, %v5453_v61 }
0x1075   : > { %v5468_v3 = vmax.f32 %v5454_v35, 0.0 }
0x1077   : > { %6661 = vmatmul.msk.f32.gmra.mxu0 %vm2854_vm4, %v5468_v3 }
0x107a   : > { %v5456_v4 = vpop.f32.mrf.mxu3 }
0x107b   : > { %v5457_v11 = vadd.f32 %v9568_v24, %v5456_v4  ;;  %v6665_v4 = vld [vmem:[%s9982_s10 + $0x70] sm:$0xff] }
0x107c   : > { %5763 = vmatpush.msra.mxu1 %v6665_v4 }
0x107d   : > { %v5469_v38 = vmax.f32 %v5457_v11, 0.0 }
0x107f   : > { %6662 = vmatmul.msk.f32.gmra.mxu0 %vm2854_vm4, %v5469_v38 }
0x10ba   : > { %v5562_v21 = vpop.xlane.xlu2 %5561 }
0x10bb   : > { %v5572_v15 = vmul.f32 %v5562_v21, %v10064_v42 }
0x10bd   : > { %v9661_v1 = vsub.f32 %v5556_v58, %v5572_v15 }
0x10bf   : > { %v5580_v5 = vmul.f32 %v9661_v1, %v9661_v1 }
0x10c1   : > { %v5584_v45 = vsel %vm595_vm2, %v5580_v5, 0.0 }
0x10c2   : > { %5585 = vadd.xlane.f32.xlu1 %v5584_v45 }
0x10ca   : > { %v5568_v27 = vpop.xlane.xlu0 %5567 }
0x10cb   : > { %v5574_v36 = vmul.f32 %v5568_v27, %v10064_v42 }
0x10cc   : > { %v5542_v33 = vpop.f32.mrf.mxu0 }
0x10cd   : > { %v9672_v18 = vsub.f32 %v5558_v41, %v5574_v36  ;;  %v6684_v41 = vld [vmem:[%s9982_s10 + $0x48] sm:$0xff] }
0x10ce   : > { %5878 = vmatpush.msra.mxu2 %v6684_v41 }
0x10cf   : > { %v5582_v62 = vmul.f32 %v9672_v18, %v9672_v18 }
0x10d0   : > { %5879 = vmatpush.msra.mxu2 %v6683_v19 }
0x10d1   : > { %v5590_v40 = vsel %vm595_vm2, %v5582_v62, 0.0 }
0x10d2   : > { %v5571_v44 = vpop.xlane.xlu1 %5570 }
0x10d3   : > { %v5575_v30 = vmul.f32 %v5571_v44, %v10064_v42 }
0x10d4   : > { %v5544_v24 = vpop.f32.mrf.mxu0 }
0x10d5   : > { %v9668_v13 = vsub.f32 %v5559_v57, %v5575_v30  ;;  %v10072_v30 = vlaneseq }
0x10d7   : > { %v5583_v31 = vmul.f32 %v9668_v13, %v9668_v13  ;;  %v9747_v24 = vshrl.u32 %v10072_v30, 7 }
0x10d9   : > { %v5593_v37 = vsel %vm595_vm2, %v5583_v31, 0.0  ;;  %v6664_v31 = vld [vmem:[%s9982_s10 + $0x68] sm:$0xff]  ;;  %vm5688_vm11 = vcmp.lt.s32.totalorder %v9747_v24, 3  ;;  %vm5842_vm5 = vcmp.lt.s32.totalorder %v9747_v24, 1  ;;  %vm5783_vm12 = vcmp.lt.s32.totalorder %v9747_v24, 2 }
0x10da   : > { %5594 = vadd.xlane.f32.xlu2 %v5593_v37  ;;  %v5565_v26 = vpop.xlane.xlu1 %5564  ;;  %5764 = vmatpush.msra.mxu1 %v6664_v31 }
0x10db   : > { %v5573_v60 = vmul.f32 %v5565_v26, %v10064_v42 }
0x10dc   : > { %v5546_v63 = vpop.f32.mrf.mxu0 }
0x10dd   : > { %v9682_v12 = vsub.f32 %v5557_v14, %v5573_v60  ;;  %v6692_v14 = vld [vmem:[%s9982_s10 + $0x88] sm:$0xff] }
0x10de   : > { %5937 = vmatpush.msrb.mxu3 %v6692_v14 }
0x10df   : > { %v5581_v29 = vmul.f32 %v9682_v12, %v9682_v12 }
0x10e0   : > { %5938 = vmatpush.msrb.mxu3 %v6691_v54 }
0x10e1   : > { %v5587_v59 = vsel %vm595_vm2, %v5581_v29, 0.0 }
0x10e2   : > { %5591 = vadd.xlane.f32.xlu2 %v5590_v40  ;;  %5588 = vadd.xlane.f32.xlu0 %v5587_v59 }
0x10e4   : > { %v5548_v46 = vpop.f32.mrf.mxu0 }
0x10ec   : > { %v5550_v9 = vpop.f32.mrf.mxu0 }
0x10f4   : > { %v5552_v51 = vpop.f32.mrf.mxu0 }
0x10fc   : > { %v5554_v58 = vpop.f32.mrf.mxu0 }
0x1135   : > { %v5586_v6 = vpop.xlane.xlu1 %5585 }
0x1136   : > { %v5596_v32 = vmul.f32 %v5586_v6, %v10064_v42 }
0x1138   : > { %v5600_v8 = vadd.f32 1e-05, %v5596_v32  ;;  %v6663_v32 = vld [vmem:[%s9982_s10 + $0x60] sm:$0xff] }
0x1139   : > { %5765 = vmatpush.msra.mxu1 %v6663_v32 }
0x113a   : > { %7163 = vrsqrt.f32 %v5600_v8  ;;  %vm5610_vm15 = vweird.f32 %v5600_v8 }
0x1140   : > { %v7164_v0 = vpop.eup %7163 }
0x1141   : > { %v5605_v47 = vmul.f32 %v7164_v0, %v5600_v8  ;;  %vm5611_vm4 = vweird.f32 %v7164_v0 }
0x1142   : > { %vm5612_vm0 = vmor %vm5610_vm15, %vm5611_vm4  ;;  %vm6019_vm15 = vcmp.lt.s32.totalorder %v9747_v24, 5 }
0x1143   : > { %v5606_v2 = vmul.f32 %v7164_v0, %v5605_v47 }
0x1145   : > { %v5607_v57 = vmul.f32 0.5, %v5606_v2 }
0x1147   : > { %v5608_v39 = vsub.f32 1.5, %v5607_v57 }
0x1149   : > { %v5609_v3 = vmul.f32 %v7164_v0, %v5608_v39 }
0x114b   : > { %v5613_v5 = vsel %vm5612_vm0, %v7164_v0, %v5609_v3  ;;  %vm5901_vm0 = vcmp.lt.s32.totalorder %v9747_v24, 7 }
0x114c   : > { %v5644_v44 = vmul.f32 %v5613_v5, %v9661_v1  ;;  %v5662_v1 = vadd.s32 24, %v9747_v24 }
0x114d   : > { %v5595_v20 = vpop.xlane.xlu2 %5594 }
0x114e   : > { %v5599_v49 = vmul.f32 %v5595_v20, %v10064_v42  ;;  %vm5666_vm8 = vcmp.lt.s32.totalorder %v5662_v1, 29 }
0x1150   : > { %v5603_v55 = vadd.f32 1e-05, %v5599_v49 }
0x1152   : > { %7165 = vrsqrt.f32 %v5603_v55  ;;  %vm5640_vm6 = vweird.f32 %v5603_v55 }
0x1155   : > { %v5592_v53 = vpop.xlane.xlu2 %5591  ;;  %v5589_v25 = vpop.xlane.xlu0 %5588 }
0x1156   : > { %v5598_v61 = vmul.f32 %v5592_v53, %v10064_v42  ;;  %v5597_v35 = vmul.f32 %v5589_v25, %v10064_v42  ;;  %v7196_v42 = vld [vmem:[%s9981_s9 + $0x8] sm:$0x3f] }
0x1157   : > { %v5648_v27 = vperm.slane %v7196_v42, 3  ;;  %v5653_v43 = vperm.slane %v7196_v42, 4 }
0x1158   : > { %v7166_v11 = vpop.eup %7165  ;;  %v5602_v38 = vadd.f32 1e-05, %v5598_v61  ;;  %v5601_v21 = vadd.f32 1e-05, %v5597_v35 }
0x1159   : > { %v5635_v15 = vmul.f32 %v7166_v11, %v5603_v55  ;;  %vm5641_vm1 = vweird.f32 %v7166_v11  ;;  %v5649_v56 = vmul.f32 %v5648_v27, %v5644_v44 }
0x115a   : > { %7167 = vrsqrt.f32 %v5602_v38  ;;  %vm5642_vm7 = vmor %vm5640_vm6, %vm5641_vm1  ;;  %vm5630_vm3 = vweird.f32 %v5602_v38  ;;  %vm5620_vm14 = vweird.f32 %v5601_v21  ;;  %vm5960_vm1 = vcmp.lt.s32.totalorder %v9747_v24, 6  ;;  %v6709_v24 = vld [vmem:[%s9982_s10 + $0xd0] sm:$0xff] }
0x115b   : > { %v5636_v45 = vmul.f32 %v7166_v11, %v5635_v15  ;;  %7169 = vrsqrt.f32 %v5601_v21  ;;  %v9754_v51 = vadd.f32 %v5653_v43, %v5649_v56 }
0x115d   : > { %v5637_v33 = vmul.f32 0.5, %v5636_v45  ;;  %v5684_v16 = vrot.slane %v9754_v51, 5  ;;  %v5838_v20 = vrot.slane %v9754_v51, 7  ;;  %v5779_v17 = vrot.slane %v9754_v51, 6  ;;  %v6677_v45 = vld [vmem:[%s9982_s10 + $0x30] sm:$0xff] }
0x115e   : > { %v6015_v48 = vrot.slane %v9754_v51, 3  ;;  %v5897_v53 = vrot.slane %v9754_v51, 1  ;;  %v5956_v25 = vrot.slane %v9754_v51, 2 }
0x115f   : > { %v5638_v36 = vsub.f32 1.5, %v5637_v33 }
0x1160   : > { %v7168_v37 = vpop.eup %7167 }
0x1161   : > { %v7170_v26 = vpop.eup %7169  ;;  %v5639_v60 = vmul.f32 %v7166_v11, %v5638_v36  ;;  %v5625_v63 = vmul.f32 %v7168_v37, %v5602_v38  ;;  %vm5631_vm9 = vweird.f32 %v7168_v37 }
0x1162   : > { %v5615_v62 = vmul.f32 %v7170_v26, %v5601_v21  ;;  %vm5621_vm10 = vweird.f32 %v7170_v26  ;;  %vm5632_vm13 = vmor %vm5630_vm3, %vm5631_vm9 }
0x1163   : > { %v5643_v29 = vsel %vm5642_vm7, %v7166_v11, %v5639_v60  ;;  %v5626_v40 = vmul.f32 %v7168_v37, %v5625_v63  ;;  %vm5622_vm4 = vmor %vm5620_vm14, %vm5621_vm10 }
0x1164   : > { %v5647_v59 = vmul.f32 %v5643_v29, %v9668_v13  ;;  %v5616_v46 = vmul.f32 %v7170_v26, %v5615_v62 }
0x1165   : > { %v5627_v9 = vmul.f32 0.5, %v5626_v40 }
0x1166   : > { %v5652_v58 = vmul.f32 %v5648_v27, %v5647_v59  ;;  %v5617_v10 = vmul.f32 0.5, %v5616_v46  ;;  %v6676_v59 = vld [vmem:[%s9982_s10 + $0x28] sm:$0xff] }
0x1167   : > { %v5628_v6 = vsub.f32 1.5, %v5627_v9 }
0x1168   : > { %v5657_v8 = vadd.f32 %v5653_v43, %v5652_v58  ;;  %v5618_v0 = vsub.f32 1.5, %v5617_v10 }
0x1169   : > { %v5629_v13 = vmul.f32 %v7168_v37, %v5628_v6 }
0x116a   : > { %v9762_v47 = vsel %vm5666_vm8, %v5657_v8, 0.0  ;;  %v5619_v7 = vmul.f32 %v7170_v26, %v5618_v0  ;;  %v6675_v8 = vld [vmem:[%s9982_s10 + $0x20] sm:$0xff] }
0x116b   : > { %v5633_v2 = vsel %vm5632_vm13, %v7168_v37, %v5629_v13  ;;  %v5687_v41 = vrot.slane %v9762_v47, 5  ;;  %v5841_v52 = vrot.slane %v9762_v47, 7  ;;  %v5782_v28 = vrot.slane %v9762_v47, 6 }
0x116c   : > { %v5646_v19 = vmul.f32 %v5633_v2, %v9672_v18  ;;  %v5623_v49 = vsel %vm5622_vm4, %v7170_v26, %v5619_v7  ;;  %v6018_v23 = vrot.slane %v9762_v47, 3  ;;  %v5900_v46 = vrot.slane %v9762_v47, 1  ;;  %v6710_v7 = vld [vmem:[%s9982_s10 + $0xd8] sm:$0xff] }
0x116d   : > { %v5645_v57 = vmul.f32 %v5623_v49, %v9682_v12  ;;  %v5692_v55 = vsel %vm5688_vm11, %v5687_v41, %v5684_v16  ;;  %v5846_v34 = vsel %vm5842_vm5, %v5841_v52, %v5838_v20  ;;  %v9785_v12 = vsel %vm5783_vm12, %v5782_v28, %v5779_v17  ;;  %v6092_v49 = vld [vmem:[%s9984_s12 + $0x18] sm:$0xff] }
0x116e   : > { %v5651_v18 = vmul.f32 %v5648_v27, %v5646_v19  ;;  %6667 = vmatmul.msk.f32.vlgmr.msrb.gmra.mxu1 %vm595_vm2, %v5692_v55  ;;  %6687 = vmatmul.msk.f32.vlgmr.msra.gmra.mxu2 %vm595_vm2, %v5846_v34  ;;  %v9794_v54 = vsel %vm6019_vm15, %v6018_v23, %v6015_v48  ;;  %v5959_v9 = vrot.slane %v9762_v47, 2  ;;  %v5905_v0 = vsel %vm5901_vm0, %v5900_v46, %v5897_v53  ;;  %v6090_v55 = vld [vmem:[%s9984_s12 + $0x8] sm:$0xff] }
0x116f   : > { %v5650_v14 = vmul.f32 %v5648_v27, %v5645_v57  ;;  %5817 = vmatpush.msrb.mxu1 %v6678_v50  ;;  %6121 = vmatpush.msrb.mxu2 %v6092_v49 }
0x1170   : > { %v9798_v39 = vadd.f32 %v5653_v43, %v5651_v18  ;;  %v5964_v13 = vsel %vm5960_vm1, %v5959_v9, %v5956_v25  ;;  %v6089_v18 = vld [vmem:[%s9984_s12] sm:$0xff] }
0x1171   : > { %v9796_v22 = vadd.f32 %v5653_v43, %v5650_v14  ;;  %5818 = vmatpush.msrb.mxu1 %v6677_v45 }
0x1172   : > { %v5781_v33 = vrot.slane %v9798_v39, 6  ;;  %v6017_v27 = vrot.slane %v9798_v39, 3  ;;  %v5899_v44 = vrot.slane %v9798_v39, 1  ;;  %v5958_v30 = vrot.slane %v9798_v39, 2 }
0x1173   : > { %v5898_v61 = vrot.slane %v9796_v22, 1  ;;  %v5957_v35 = vrot.slane %v9796_v22, 2  ;;  %v5685_v3 = vrot.slane %v9796_v22, 5  ;;  %v5839_v4 = vrot.slane %v9796_v22, 7  ;;  %5819 = vmatpush.msrb.mxu1 %v6676_v59 }
0x1174   : > { %v5780_v5 = vrot.slane %v9796_v22, 6  ;;  %v6016_v42 = vrot.slane %v9796_v22, 3  ;;  %v5784_v37 = vsel %vm5783_vm12, %v5781_v33, %v5782_v28  ;;  %v5686_v63 = vrot.slane %v9798_v39, 5  ;;  %v6091_v28 = vld [vmem:[%s9984_s12 + $0x10] sm:$0xff] }
0x1175   : > { %v5904_v11 = vsel %vm5901_vm0, %v5897_v53, %v5898_v61  ;;  %v5963_v38 = vsel %vm5960_vm1, %v5956_v25, %v5957_v35  ;;  %v5691_v21 = vsel %vm5688_vm11, %v5684_v16, %v5685_v3  ;;  %v5845_v15 = vsel %vm5842_vm5, %v5838_v20, %v5839_v4  ;;  %5820 = vmatpush.msrb.mxu1 %v6675_v8  ;;  %v6707_v16 = vld [vmem:[%s9982_s10 + $0xc0] sm:$0xff] }
0x1176   : > { %6695 = vmatmul.msk.f32.vlgmr.msrb.gmra.mxu3 %vm595_vm2, %v5904_v11  ;;  %6703 = vmatmul.msk.f32.vlgmr.msra.gmra.mxu0 %vm595_vm2, %v5963_v38  ;;  %v5786_v36 = vsel %vm5783_vm12, %v5779_v17, %v5780_v5  ;;  %v5785_v31 = vsel %vm5783_vm12, %v5780_v5, %v5781_v33  ;;  %v6022_v26 = vsel %vm6019_vm15, %v6015_v48, %v6016_v42  ;;  %v5840_v43 = vrot.slane %v9798_v39, 7 }
0x1177   : > { %6668 = vmatmul.msk.f32.gmra.mxu1 %vm595_vm2, %v5691_v21  ;;  %6688 = vmatmul.msk.f32.gmra.mxu2 %vm595_vm2, %v5845_v15  ;;  %v6021_v60 = vsel %vm6019_vm15, %v6016_v42, %v6017_v27  ;;  %v6020_v56 = vsel %vm6019_vm15, %v6017_v27, %v6018_v23  ;;  %v5903_v62 = vsel %vm5901_vm0, %v5898_v61, %v5899_v44 }
0x1178   : > { %v5962_v1 = vsel %vm5960_vm1, %v5957_v35, %v5958_v30  ;;  %v5690_v29 = vsel %vm5688_vm11, %v5685_v3, %v5686_v63  ;;  %v5844_v40 = vsel %vm5842_vm5, %v5839_v4, %v5840_v43  ;;  %v5902_v58 = vsel %vm5901_vm0, %v5899_v44, %v5900_v46  ;;  %6122 = vmatpush.msrb.mxu2 %v6091_v28  ;;  %v6074_v4 = vld [vmem:[%s9983_s11] sm:$0x3] }
0x1179   : > { %v5961_v10 = vsel %vm5960_vm1, %v5958_v30, %v5959_v9  ;;  %v5689_v6 = vsel %vm5688_vm11, %v5686_v63, %v5687_v41  ;;  %v5843_v32 = vsel %vm5842_vm5, %v5840_v43, %v5841_v52  ;;  %v6075_v15 = vperm.slane %v6074_v4, 0 }
0x117a   : > { %6123 = vmatpush.msrb.mxu2 %v6090_v55  ;;  %v6080_v42 = vperm.slane %v6074_v4, 1 }
0x117c   : > { %6124 = vmatpush.msrb.mxu2 %v6089_v18 }
0x117e   : > { %6696 = vmatmul.msk.f32.gmra.mxu3 %vm595_vm2, %v5903_v62  ;;  %6704 = vmatmul.msk.f32.gmra.mxu0 %vm595_vm2, %v5962_v1 }
0x117f   : > { %6669 = vmatmul.msk.f32.gmra.mxu1 %vm595_vm2, %v5690_v29  ;;  %6689 = vmatmul.msk.f32.gmra.mxu2 %vm595_vm2, %v5844_v40 }
0x1186   : > { %6697 = vmatmul.msk.f32.gmra.mxu3 %vm595_vm2, %v5902_v58  ;;  %6705 = vmatmul.msk.f32.gmra.mxu0 %vm595_vm2, %v5961_v10 }
0x1187   : > { %6670 = vmatmul.msk.f32.gmra.mxu1 %vm595_vm2, %v5689_v6  ;;  %6690 = vmatmul.msk.f32.gmra.mxu2 %vm595_vm2, %v5843_v32 }
0x118e   : > { %6698 = vmatmul.msk.f32.gmra.mxu3 %vm595_vm2, %v5905_v0  ;;  %6706 = vmatmul.msk.f32.gmra.mxu0 %vm595_vm2, %v5964_v13 }
0x118f   : > { %6671 = vmatmul.msk.f32.vlgmr.msra.gmra.mxu1 %vm595_vm2, %v9754_v51  ;;  %v6708_v51 = vld [vmem:[%s9982_s10 + $0xc8] sm:$0xff] }
0x1190   : > { %6053 = vmatpush.msra.mxu1 %v6710_v7 }
0x1192   : > { %6054 = vmatpush.msra.mxu1 %v6709_v24 }
0x1194   : > { %6055 = vmatpush.msra.mxu1 %v6708_v51 }
0x1196   : > { %6056 = vmatpush.msra.mxu1 %v6707_v16 }
0x1197   : > { %6672 = vmatmul.msk.f32.gmra.mxu1 %vm595_vm2, %v9796_v22 }
0x119f   : > { %6673 = vmatmul.msk.f32.gmra.mxu1 %vm595_vm2, %v9798_v39 }
0x11a7   : > { %6674 = vmatmul.msk.f32.gmra.mxu1 %vm595_vm2, %v9762_v47 }
0x11af   : > { %6679 = vmatmul.msk.f32.vlgmr.msrb.gmra.mxu1 %vm595_vm2, %v9785_v12 }
0x11b7   : > { %6680 = vmatmul.msk.f32.gmra.mxu1 %vm595_vm2, %v5786_v36 }
0x11bf   : > { %6681 = vmatmul.msk.f32.gmra.mxu1 %vm595_vm2, %v5785_v31 }
0x11c7   : > { %6682 = vmatmul.msk.f32.gmra.mxu1 %vm595_vm2, %v5784_v37 }
0x11cf   : > { %6711 = vmatmul.msk.f32.vlgmr.msra.gmra.mxu1 %vm595_vm2, %v6022_v26 }
0x11d7   : > { %6712 = vmatmul.msk.f32.gmra.mxu1 %vm595_vm2, %v6021_v60 }
0x11df   : > { %6713 = vmatmul.msk.f32.gmra.mxu1 %vm595_vm2, %v6020_v56 }
0x11e7   : > { %6714 = vmatmul.msk.f32.gmra.mxu1 %vm595_vm2, %v9794_v54 }
0x11eb   : > { %v5726_v47 = vpop.f32.mrf.mxu1 }
0x11f1   : > { %v5881_v48 = vpop.f32.mrf.mxu2 }
0x11f3   : > { %v5999_v39 = vpop.f32.mrf.mxu0 }
0x11f4   : > { %v5729_v2 = vpop.f32.mrf.mxu1 }
0x11f9   : > { %v5940_v54 = vpop.f32.mrf.mxu3 }
0x11fa   : > { %v5884_v61 = vpop.f32.mrf.mxu2 }
0x11fb   : > { %v6002_v27 = vpop.f32.mrf.mxu0 }
0x11fc   : > { %v5732_v41 = vpop.f32.mrf.mxu1 }
0x1201   : > { %v5943_v11 = vpop.f32.mrf.mxu3 }
0x1202   : > { %v5887_v31 = vpop.f32.mrf.mxu2 }
0x1203   : > { %v6005_v59 = vpop.f32.mrf.mxu0 }
0x1204   : > { %v5735_v20 = vpop.f32.mrf.mxu1 }
0x1209   : > { %v5946_v63 = vpop.f32.mrf.mxu3 }
0x120a   : > { %v5890_v58 = vpop.f32.mrf.mxu2 }
0x120b   : > { %v6008_v16 = vpop.f32.mrf.mxu0 }
0x120c   : > { %v5767_v52 = vpop.f32.mrf.mxu1 }
0x120d   : > { %v5768_v14 = vadd.f32 %v5767_v52, %v5726_v47 }
0x1211   : > { %v5949_v0 = vpop.f32.mrf.mxu3 }
0x1214   : > { %v5770_v19 = vpop.f32.mrf.mxu1 }
0x1215   : > { %v5771_v25 = vadd.f32 %v5770_v19, %v5729_v2 }
0x121c   : > { %v5773_v17 = vpop.f32.mrf.mxu1 }
0x121d   : > { %v5774_v45 = vadd.f32 %v5773_v17, %v5732_v41  ;;  %v6742_v17 = vld [vmem:[%s9985_s13] ss:$0 sm:$0xff] }
0x1224   : > { %v5776_v57 = vpop.f32.mrf.mxu1 }
0x1225   : > { %v5777_v56 = vadd.f32 %v5776_v57, %v5735_v20 }
0x122c   : > { %v5822_v34 = vpop.f32.mrf.mxu1 }
0x122d   : > { %v5834_v50 = vadd.f32 %v5822_v34, %v5768_v14 }
0x122f   : > { %v5893_v22 = vadd.f32 %v5881_v48, %v5834_v50 }
0x1231   : > { %v5952_v3 = vadd.f32 %v5940_v54, %v5893_v22 }
0x1233   : > { %v6011_v21 = vadd.f32 %v5999_v39, %v5952_v3 }
0x1234   : > { %v5825_v12 = vpop.f32.mrf.mxu1 }
0x1235   : > { %v5835_v35 = vadd.f32 %v5825_v12, %v5771_v25 }
0x1237   : > { %v5894_v38 = vadd.f32 %v5884_v61, %v5835_v35  ;;  %v10073_v35 = vld [vmem:[#allocation13_spill] sm:$0xff] }
0x1238   : > { %vm6139_vm6 = vcmp.lt.s32.totalorder %v10073_v35, 11 }
0x1239   : > { %v5953_v36 = vadd.f32 %v5943_v11, %v5894_v38 }
0x123b   : > { %v6012_v60 = vadd.f32 %v6002_v27, %v5953_v36 }
0x123c   : > { %v5828_v23 = vpop.f32.mrf.mxu1 }
0x123d   : > { %v5836_v44 = vadd.f32 %v5828_v23, %v5774_v45 }
0x123f   : > { %v5895_v26 = vadd.f32 %v5887_v31, %v5836_v44 }
0x1241   : > { %v5954_v40 = vadd.f32 %v5946_v63, %v5895_v26 }
0x1243   : > { %v6013_v6 = vadd.f32 %v6005_v59, %v5954_v40 }
0x1244   : > { %v5831_v53 = vpop.f32.mrf.mxu1 }
0x1245   : > { %v5837_v1 = vadd.f32 %v5831_v53, %v5777_v56 }
0x1247   : > { %v5896_v10 = vadd.f32 %v5890_v58, %v5837_v1 }
0x1249   : > { %v5955_v7 = vadd.f32 %v5949_v0, %v5896_v10 }
0x124b   : > { %v6014_v47 = vadd.f32 %v6008_v16, %v5955_v7 }
0x124c   : > { %v6058_v5 = vpop.f32.mrf.mxu1 }
0x124d   : > { %v6070_v33 = vadd.f32 %v6058_v5, %v6011_v21 }
0x124f   : > { %v6076_v30 = vmul.f32 %v6075_v15, %v6070_v33 }
0x1251   : > { %v6081_v37 = vadd.f32 %v6080_v42, %v6076_v30 }
0x1253   : > { %7171 = vtanh.f32 %v6081_v37 }
0x1254   : > { %v6061_v43 = vpop.f32.mrf.mxu1 }
0x1255   : > { %v6071_v62 = vadd.f32 %v6061_v43, %v6012_v60 }
0x1257   : > { %v6077_v29 = vmul.f32 %v6075_v15, %v6071_v62 }
0x1259   : > { %v7172_v46 = vpop.eup %7171  ;;  %v6082_v9 = vadd.f32 %v6080_v42, %v6077_v29 }
0x125a   : > { %6715 = vmatmul.msk.f32.vlgmr.msrb.gmra.mxu2 %vm595_vm2, %v7172_v46 }
0x125b   : > { %7173 = vtanh.f32 %v6082_v9 }
0x125c   : > { %v6064_v32 = vpop.f32.mrf.mxu1 }
0x125d   : > { %v6072_v8 = vadd.f32 %v6064_v32, %v6013_v6 }
0x125f   : > { %v6078_v13 = vmul.f32 %v6075_v15, %v6072_v8 }
0x1261   : > { %v7174_v24 = vpop.eup %7173  ;;  %v6083_v51 = vadd.f32 %v6080_v42, %v6078_v13 }
0x1262   : > { %6716 = vmatmul.msk.f32.gmra.mxu2 %vm595_vm2, %v7174_v24 }
0x1263   : > { %7175 = vtanh.f32 %v6083_v51 }
0x1264   : > { %v6067_v2 = vpop.f32.mrf.mxu1 }
0x1265   : > { %v6073_v41 = vadd.f32 %v6067_v2, %v6014_v47 }
0x1267   : > { %v6079_v20 = vmul.f32 %v6075_v15, %v6073_v41 }
0x1269   : > { %v7176_v52 = vpop.eup %7175  ;;  %v6084_v19 = vadd.f32 %v6080_v42, %v6079_v20 }
0x126a   : > { %6717 = vmatmul.msk.f32.gmra.mxu2 %vm595_vm2, %v7176_v52 }
0x126b   : > { %7177 = vtanh.f32 %v6084_v19 }
0x1271   : > { %v7178_v49 = vpop.eup %7177 }
0x1272   : > { %6718 = vmatmul.msk.f32.gmra.mxu2 %vm595_vm2, %v7178_v49  ;;  %vm6138_vm2 = vcmp.ge.s32.totalorder %v10073_v35, 9 }
0x1273   : > { %vm9945_vm8 = vmand %vm6138_vm2, %vm6139_vm6 }
0x12dd   : > { %v6126_v28 = vpop.f32.mrf.mxu2 }
0x12de   : > { %v6127_v57 = vadd.f32 %v6742_v17, %v6126_v28 }
0x12e0   : > { %v6719_v55 = vmul.f32 -1.442695, %v6127_v57 }
0x12e2   : > { %7179 = vpow2.f32 %v6719_v55 }
0x12e5   : > { %v6129_v34 = vpop.f32.mrf.mxu2 }
0x12e6   : > { %v6130_v18 = vadd.f32 %v6742_v17, %v6129_v34 }
0x12e8   : > { %v7180_v12 = vpop.eup %7179  ;;  %v6720_v48 = vmul.f32 -1.442695, %v6130_v18 }
0x12e9   : > { %v6153_v23 = vadd.f32 1.0, %v7180_v12 }
0x12ea   : > { %7181 = vpow2.f32 %v6720_v48 }
0x12eb   : > { %7183 = vrcp.f32 %v6153_v23  ;;  %v6168_v3 = vand.u32 2147483648, %v6153_v23  ;;  %v6166_v38 = vand.u32 2147483647, %v6153_v23  ;;  %vm6162_vm9 = vweird.f32 %v6153_v23 }
0x12ed   : > { %v6132_v14 = vpop.f32.mrf.mxu2  ;;  %v6169_v27 = vor.u32 1.1754944e-38, %v6168_v3  ;;  %vm6167_vm11 = vcmp.eq.f32.partialorder %v6166_v38, 8.507059e+37 }
0x12ee   : > { %v9937_v50 = vadd.f32 %v6742_v17, %v6132_v14 }
0x12f0   : > { %v7182_v54 = vpop.eup %7181  ;;  %v6721_v22 = vmul.f32 -1.442695, %v9937_v50 }
0x12f1   : > { %v7184_v39 = vpop.eup %7183  ;;  %v6154_v53 = vadd.f32 1.0, %v7182_v54 }
0x12f2   : > { %v6158_v25 = vmul.f32 %v7184_v39, %v6153_v23  ;;  %7185 = vpow2.f32 %v6721_v22  ;;  %vm6163_vm7 = vweird.f32 %v7184_v39 }
0x12f3   : > { %7187 = vrcp.f32 %v6154_v53  ;;  %vm6164_vm10 = vmor %vm6162_vm9, %vm6163_vm7  ;;  %v6183_v60 = vand.u32 2147483648, %v6154_v53  ;;  %v6181_v43 = vand.u32 2147483647, %v6154_v53  ;;  %vm6177_vm5 = vweird.f32 %v6154_v53 }
0x12f4   : > { %v6159_v61 = vsub.f32 1.0, %v6158_v25 }
0x12f5   : > { %v6135_v4 = vpop.f32.mrf.mxu2  ;;  %v6184_v29 = vor.u32 1.1754944e-38, %v6183_v60  ;;  %vm6182_vm13 = vcmp.eq.f32.partialorder %v6181_v43, 8.507059e+37 }
0x12f6   : > { %v6160_v11 = vmul.f32 %v7184_v39, %v6159_v61  ;;  %v9942_v21 = vadd.f32 %v6742_v17, %v6135_v4 }
0x12f8   : > { %v7186_v15 = vpop.eup %7185  ;;  %v6161_v45 = vadd.f32 %v7184_v39, %v6160_v11  ;;  %v6722_v33 = vmul.f32 -1.442695, %v9942_v21 }
0x12f9   : > { %v7188_v42 = vpop.eup %7187  ;;  %v6155_v44 = vadd.f32 1.0, %v7186_v15 }
0x12fa   : > { %v6165_v30 = vsel %vm6164_vm10, %v7184_v39, %v6161_v45  ;;  %v6173_v36 = vmul.f32 %v7188_v42, %v6154_v53  ;;  %7189 = vpow2.f32 %v6722_v33  ;;  %vm6178_vm3 = vweird.f32 %v7188_v42 }
0x12fb   : > { %v6170_v31 = vsel %vm6167_vm11, %v6169_v27, %v6165_v30  ;;  %7191 = vrcp.f32 %v6155_v44  ;;  %vm6179_vm12 = vmor %vm6177_vm5, %vm6178_vm3  ;;  %v6198_v6 = vand.u32 2147483648, %v6155_v44  ;;  %v6196_v8 = vand.u32 2147483647, %v6155_v44 }
0x12fc   : > { %v6219_v37 = vsel %vm9945_vm8, %v6170_v31, %v6127_v57  ;;  %v6174_v26 = vsub.f32 1.0, %v6173_v36  ;;  %vm6192_vm4 = vweird.f32 %v6155_v44 }
0x12fd   : > { %6223 = vst [vmem:[%s9953_s20] sm:$0xff] %v6219_v37  ;;  %v6199_v7 = vor.u32 1.1754944e-38, %v6198_v6  ;;  %vm6197_vm0 = vcmp.eq.f32.partialorder %v6196_v8, 8.507059e+37 }
0x12fe   : > { %v6175_v63 = vmul.f32 %v7188_v42, %v6174_v26 }
0x1300   : > { %v7190_v56 = vpop.eup %7189  ;;  %v6176_v62 = vadd.f32 %v7188_v42, %v6175_v63 }
0x1301   : > { %v7192_v1 = vpop.eup %7191  ;;  %v6156_v40 = vadd.f32 1.0, %v7190_v56 }
0x1302   : > { %v6180_v59 = vsel %vm6179_vm12, %v7188_v42, %v6176_v62  ;;  %v6188_v46 = vmul.f32 %v7192_v1, %v6155_v44  ;;  %vm6193_vm14 = vweird.f32 %v7192_v1 }
0x1303   : > { %v6185_v9 = vsel %vm6182_vm13, %v6184_v29, %v6180_v59  ;;  %7193 = vrcp.f32 %v6156_v40  ;;  %vm6194_vm15 = vmor %vm6192_vm4, %vm6193_vm14  ;;  %v6213_v41 = vand.u32 2147483648, %v6156_v40  ;;  %v6211_v52 = vand.u32 2147483647, %v6156_v40 }
0x1304   : > { %v6220_v58 = vsel %vm9945_vm8, %v6185_v9, %v6130_v18  ;;  %v6189_v10 = vsub.f32 1.0, %v6188_v46  ;;  %vm6207_vm2 = vweird.f32 %v6156_v40 }
0x1305   : > { %6224 = vst [vmem:[%s9953_s20 + $0x8] sm:$0xff] %v6220_v58  ;;  %v6214_v49 = vor.u32 1.1754944e-38, %v6213_v41  ;;  %vm6212_vm7 = vcmp.eq.f32.partialorder %v6211_v52, 8.507059e+37 }
0x1306   : > { %v6190_v32 = vmul.f32 %v7192_v1, %v6189_v10 }
0x1308   : > { %v6191_v0 = vadd.f32 %v7192_v1, %v6190_v32 }
0x1309   : > { %v7194_v13 = vpop.eup %7193 }
0x130a   : > { %v6195_v24 = vsel %vm6194_vm15, %v7192_v1, %v6191_v0  ;;  %v6203_v51 = vmul.f32 %v7194_v13, %v6156_v40  ;;  %vm6208_vm1 = vweird.f32 %v7194_v13 }
0x130b   : > { %v6200_v16 = vsel %vm6197_vm0, %v6199_v7, %v6195_v24  ;;  %vm6209_vm6 = vmor %vm6207_vm2, %vm6208_vm1 }
0x130c   : > { %v6221_v47 = vsel %vm9945_vm8, %v6200_v16, %v9937_v50  ;;  %v6204_v2 = vsub.f32 1.0, %v6203_v51 }
0x130d   : > { %6225 = vst [vmem:[%s9953_s20 + $0x10] sm:$0xff] %v6221_v47 }
0x130e   : > { %v6205_v20 = vmul.f32 %v7194_v13, %v6204_v2 }
0x1310   : > { %v6206_v19 = vadd.f32 %v7194_v13, %v6205_v20 }
0x1312   : > { %v6210_v17 = vsel %vm6209_vm6, %v7194_v13, %v6206_v19 }
0x1313   : > { %v6215_v28 = vsel %vm6212_vm7, %v6214_v49, %v6210_v17 }
0x1314   : > { %v6222_v57 = vsel %vm9945_vm8, %v6215_v28, %v9942_v21 }
0x1315   : > { %6226 = vst [vmem:[%s9953_s20 + $0x18] sm:$0xff] %v6222_v57 }
0x1316 PF: > { %s24_s29 = sadd.s32 1, %s7203_s29  }
0x1317   : > { %p21_p4 = scmp.ge.s32.totalorder %s24_s29, 4  }
0x1319   :  { %23 = sbr.rel (!%p21_p4) target bundleno = 1 (0x1), region = 119 }

</bundles_post_ra>
